<compile_context>
chip_gen: v5e
topology: v5e:2x2
jax: 0.10.0
libtpu: 0.0.40
codegen_flags: <defaults>
</compile_context>

<pallas_src>
import jax
import jax.numpy as jnp
from jax import lax
from jax.experimental import pallas as pl
from jax.experimental.pallas import tpu as pltpu

HIDDEN = 768
EPS = 1e-12


def _fused_kernel(x_ref, res_ref, w_ref, p_ref, o_ref):
    # Linear on the MXU: bf16 operands (cast at the call boundary), f32 accumulation.
    y = jnp.dot(x_ref[...], w_ref[...], preferred_element_type=jnp.float32)

    params = p_ref[...]          # (3, H) f32, rows = [bias, gamma, beta]
    bias = params[0:1, :]
    gamma = params[1:2, :]
    beta = params[2:3, :]

    # Dropout(p=0.1) in eval mode == identity.
    # TODO(synk): training-mode dropout (random mask + 1/(1-p) scale) not implemented.
    # Bias folded into the residual add: one VPU pass instead of two.
    z = res_ref[...] + y + bias

    # LayerNorm over the last dim, two-pass (numerically robust), all f32.
    h = z.shape[-1]
    mean = jnp.sum(z, axis=-1, keepdims=True) * (1.0 / h)
    zc = z - mean
    var = jnp.sum(zc * zc, axis=-1, keepdims=True) * (1.0 / h)
    inv = lax.rsqrt(var + EPS)   # lands on the EUP slot

    o_ref[...] = (zc * inv * gamma + beta).astype(o_ref.dtype)


def _pick_tm(rows: int) -> int:
    """Row-tile choice: VMEM-aware and pipelining-aware.

    v5e / v6e (single TC): want >= 3 grid steps so input-DMA / compute / writeback
    overlap; cap tm at 512 so double-buffered f32 tiles stay inside scoped VMEM.
    v7x (2 TCs, 64 MiB VMEM): want >= 4 grid steps and an even grid so each
    TensorCore gets >= 2 pipelined steps; tighter cap of 256.
    """
    try:
        kind = jax.devices()[0].device_kind.lower()
    except Exception:  # pragma: no cover - defensive
        kind = ""
    is_v7 = "v7" in kind
    cap = 256 if is_v7 else 512
    min_steps = 4 if is_v7 else 3

    best = None
    for tm in range(8, min(rows, cap) + 1, 8):
        if rows % tm:
            continue
        steps = rows // tm
        if steps < min_steps:
            continue
        if is_v7 and steps % 2:
            continue
        best = tm  # keep the largest qualifying tile
    if best is not None:
        return best
    # Fallback for small/awkward row counts: largest 8-multiple divisor <= cap,
    # else the full row count (single step).
    for tm in range(min(rows, cap) - min(rows, cap) % 8, 7, -8):
        if rows % tm == 0:
            return tm
    return rows


def linear_dropout_add_layernorm(x205, x177, w_t, b, gamma, beta, *, tm=None):
    """x205, x177: (B, S, H).  w_t: (H, H) laid out (in, out) so y = x @ w_t + b."""
    B, S, H = x205.shape
    assert H == HIDDEN
    rows = B * S
    if tm is None:
        tm = _pick_tm(rows)
    assert rows % tm == 0, "row count must be divisible by tile size"

    # x205 is only an MXU operand -> ship it bf16 (halves its DMA bytes).
    x2 = x205.reshape(rows, H).astype(jnp.bfloat16)
    # Residual stays f32 (feeds the LayerNorm directly).
    r2 = x177.reshape(rows, H).astype(jnp.float32)
    # Weight in bf16: halves the resident weight DMA and hits the bf16 MXU path.
    w_bf = w_t.astype(jnp.bfloat16)
    # Pack bias / gamma / beta into one aligned operand -> one DMA, one BlockSpec.
    params = jnp.stack([b, gamma, beta]).astype(jnp.float32)  # (3, H)

    out = pl.pallas_call(
        _fused_kernel,
        out_shape=jax.ShapeDtypeStruct((rows, H), jnp.float32),
        grid_spec=pltpu.PrefetchScalarGridSpec(
            num_scalar_prefetch=0,
            grid=(rows // tm,),
            in_specs=[
                pl.BlockSpec((tm, H), lambda i: (i, 0)),  # x205 rows (bf16)
                pl.BlockSpec((tm, H), lambda i: (i, 0)),  # x177 rows (residual, f32)
                pl.BlockSpec((H, H), lambda i: (0, 0)),   # weight, grid-resident (bf16)
                pl.BlockSpec((3, H), lambda i: (0, 0)),   # packed bias/gamma/beta
            ],
            out_specs=pl.BlockSpec((tm, H), lambda i: (i, 0)),
        ),
        compiler_params=pltpu.CompilerParams(
            # Row tiles are independent -> shard across TensorCores on v7x.
            dimension_semantics=("parallel",),
        ),
    )(x2, r2, w_bf, params)
    return out.reshape(B, S, H)


def reference_f32(x205, x177, w_t, b, gamma, beta):
    y = jnp.einsum("bsh,hk->bsk", x205, w_t) + b
    z = x177 + y
    mean = jnp.mean(z, axis=-1, keepdims=True)
    var = jnp.mean((z - mean) ** 2, axis=-1, keepdims=True)
    return (z - mean) / jnp.sqrt(var + EPS) * gamma + beta


def reference_bf16_matmul(x205, x177, w_t, b, gamma, beta):
    y = jnp.einsum(
        "bsh,hk->bsk",
        x205.astype(jnp.bfloat16),
        w_t.astype(jnp.bfloat16),
        preferred_element_type=jnp.float32,
    ) + b
    z = x177 + y
    mean = jnp.mean(z, axis=-1, keepdims=True)
    var = jnp.mean((z - mean) ** 2, axis=-1, keepdims=True)
    return (z - mean) / jnp.sqrt(var + EPS) * gamma + beta


if __name__ == "__main__":
    key = jax.random.PRNGKey(0)
    k1, k2, k3, k4, k5, k6 = jax.random.split(key, 6)

    B, S, H = 1, 384, HIDDEN  # shapes implied by the module
    x205 = jax.random.normal(k1, (B, S, H), dtype=jnp.float32)
    x177 = jax.random.normal(k2, (B, S, H), dtype=jnp.float32)

    # Deterministic parameter init (Linear weight stored as (in, out) = W.T)
    w_t = jax.random.normal(k3, (H, H), dtype=jnp.float32) * (1.0 / jnp.sqrt(H))
    b = jax.random.normal(k4, (H,), dtype=jnp.float32) * 0.02
    gamma = 1.0 + jax.random.normal(k5, (H,), dtype=jnp.float32) * 0.02
    beta = jax.random.normal(k6, (H,), dtype=jnp.float32) * 0.02

    out = linear_dropout_add_layernorm(x205, x177, w_t, b, gamma, beta)
    out = jax.block_until_ready(out)
    assert out.shape == (B, S, H)
    assert bool(jnp.all(jnp.isfinite(out)))

    # Tight check vs a reference using the same bf16-matmul precision.
    ref_bf = reference_bf16_matmul(x205, x177, w_t, b, gamma, beta)
    assert jnp.allclose(out, ref_bf, atol=2e-3, rtol=2e-3), "mismatch vs bf16 reference"

    # Looser check vs the full-f32 module semantics (bf16 MXU rounding ~1e-2).
    ref32 = reference_f32(x205, x177, w_t, b, gamma, beta)
    assert jnp.allclose(out, ref32, atol=3e-2, rtol=3e-2), "mismatch vs f32 reference"

    print("KERNEL_OK")
</pallas_src>

<mosaic_0001>
module attributes {stable_mosaic.version = 11 : i64} {
  func.func @_fused_kernel(%arg0: i32, %arg1: memref<128x768xbf16, #tpu.memory_space<vmem>>, %arg2: memref<128x768xf32, #tpu.memory_space<vmem>>, %arg3: memref<768x768xbf16, #tpu.memory_space<vmem>>, %arg4: memref<3x768xf32, #tpu.memory_space<vmem>>, %arg5: memref<128x768xf32, #tpu.memory_space<vmem>>) attributes {dimension_semantics = [#tpu.dimension_semantics<parallel>], iteration_bounds = array<i64: 3>, scalar_prefetch = 0 : i64, scratch_operands = 0 : i64, tpu.core_type = #tpu.core_type<tc>, window_params = [{transform_indices = @transform_0, window_bounds = array<i64: 128, 768>}, {transform_indices = @transform_1, window_bounds = array<i64: 128, 768>}, {pipeline_mode = #tpu.pipeline_mode<synchronous>, transform_indices = @transform_2, window_bounds = array<i64: 768, 768>}, {pipeline_mode = #tpu.pipeline_mode<synchronous>, transform_indices = @transform_3, window_bounds = array<i64: 3, 768>}, {transform_indices = @transform_4, window_bounds = array<i64: 128, 768>}]} {
    %c0 = arith.constant 0 : index
    %c0_0 = arith.constant 0 : index
    %0 = vector.load %arg1[%c0, %c0_0] : memref<128x768xbf16, #tpu.memory_space<vmem>>, vector<128x768xbf16>
    %c0_1 = arith.constant 0 : index
    %c0_2 = arith.constant 0 : index
    %1 = vector.load %arg3[%c0_1, %c0_2] : memref<768x768xbf16, #tpu.memory_space<vmem>>, vector<768x768xbf16>
    %cst = arith.constant dense<0.000000e+00> : vector<128x768xf32>
    %2 = tpu.matmul %0, %1, %cst {dimension_numbers = #tpu.dot_dimension_numbers<[1], [0], [0], [1], [0, 0, 1, 1], [], []>} : vector<128x768xbf16>, vector<768x768xbf16>, vector<128x768xf32> -> vector<128x768xf32>
    %c0_3 = arith.constant 0 : index
    %c0_4 = arith.constant 0 : index
    %3 = vector.load %arg4[%c0_3, %c0_4] : memref<3x768xf32, #tpu.memory_space<vmem>>, vector<3x768xf32>
    %4 = vector.extract_strided_slice %3 {offsets = [0, 0], sizes = [1, 768], strides = [1, 1]} : vector<3x768xf32> to vector<1x768xf32>
    %5 = vector.extract_strided_slice %3 {offsets = [1, 0], sizes = [1, 768], strides = [1, 1]} : vector<3x768xf32> to vector<1x768xf32>
    %6 = vector.extract_strided_slice %3 {offsets = [2, 0], sizes = [1, 768], strides = [1, 1]} : vector<3x768xf32> to vector<1x768xf32>
    %c0_5 = arith.constant 0 : index
    %c0_6 = arith.constant 0 : index
    %7 = vector.load %arg2[%c0_5, %c0_6] : memref<128x768xf32, #tpu.memory_space<vmem>>, vector<128x768xf32>
    %8 = arith.addf %7, %2 : vector<128x768xf32>
    %9 = vector.broadcast %4 : vector<1x768xf32> to vector<128x768xf32>
    %10 = arith.addf %8, %9 : vector<128x768xf32>
    %cst_7 = arith.constant dense<0.000000e+00> : vector<128xf32>
    %11 = vector.multi_reduction <add>, %10, %cst_7 [1] : vector<128x768xf32> to vector<128xf32>
    %12 = vector.shape_cast %11 : vector<128xf32> to vector<128x1xf32>
    %cst_8 = arith.constant 0.00130208337 : f32
    %13 = vector.broadcast %cst_8 : f32 to vector<128x1xf32>
    %14 = arith.mulf %12, %13 : vector<128x1xf32>
    %15 = vector.broadcast %14 : vector<128x1xf32> to vector<128x768xf32>
    %16 = arith.subf %10, %15 : vector<128x768xf32>
    %17 = arith.mulf %16, %16 : vector<128x768xf32>
    %cst_9 = arith.constant dense<0.000000e+00> : vector<128xf32>
    %18 = vector.multi_reduction <add>, %17, %cst_9 [1] : vector<128x768xf32> to vector<128xf32>
    %19 = vector.shape_cast %18 : vector<128xf32> to vector<128x1xf32>
    %cst_10 = arith.constant 0.00130208337 : f32
    %20 = vector.broadcast %cst_10 : f32 to vector<128x1xf32>
    %21 = arith.mulf %19, %20 : vector<128x1xf32>
    %cst_11 = arith.constant 9.99999996E-13 : f32
    %22 = vector.broadcast %cst_11 : f32 to vector<128x1xf32>
    %23 = arith.addf %21, %22 : vector<128x1xf32>
    %24 = math.rsqrt %23 : vector<128x1xf32>
    %25 = vector.broadcast %24 : vector<128x1xf32> to vector<128x768xf32>
    %26 = arith.mulf %16, %25 : vector<128x768xf32>
    %27 = vector.broadcast %5 : vector<1x768xf32> to vector<128x768xf32>
    %28 = arith.mulf %26, %27 : vector<128x768xf32>
    %29 = vector.broadcast %6 : vector<1x768xf32> to vector<128x768xf32>
    %30 = arith.addf %28, %29 : vector<128x768xf32>
    %c0_12 = arith.constant 0 : index
    %c0_13 = arith.constant 0 : index
    %31 = vector.load %arg5[%c0_12, %c0_13] : memref<128x768xf32, #tpu.memory_space<vmem>>, vector<128x768xf32>
    tpu.vector_store %arg5[%c0_12, %c0_13], %30 {strides = array<i32>} : memref<128x768xf32, #tpu.memory_space<vmem>>, vector<128x768xf32>,
    return
  }
  func.func @transform_0(%arg0: i32) -> (i32, i32) {
    %c0_i32 = arith.constant 0 : i32
    %c0_i32_0 = arith.constant 0 : i32
    return %arg0, %c0_i32 : i32, i32
  }
  func.func @transform_1(%arg0: i32) -> (i32, i32) {
    %c0_i32 = arith.constant 0 : i32
    %c0_i32_0 = arith.constant 0 : i32
    return %arg0, %c0_i32 : i32, i32
  }
  func.func @transform_2(%arg0: i32) -> (i32, i32) {
    %c0_i32 = arith.constant 0 : i32
    %c0_i32_0 = arith.constant 0 : i32
    %c0_i32_1 = arith.constant 0 : i32
    return %c0_i32, %c0_i32_0 : i32, i32
  }
  func.func @transform_3(%arg0: i32) -> (i32, i32) {
    %c0_i32 = arith.constant 0 : i32
    %c0_i32_0 = arith.constant 0 : i32
    %c0_i32_1 = arith.constant 0 : i32
    return %c0_i32, %c0_i32_0 : i32, i32
  }
  func.func @transform_4(%arg0: i32) -> (i32, i32) {
    %c0_i32 = arith.constant 0 : i32
    %c0_i32_0 = arith.constant 0 : i32
    return %arg0, %c0_i32 : i32, i32
  }
}

</mosaic_0001>

<bundles_post_ra>
// kernel: tpu_custom_call.1
= control target key start
LH: loop header
LB: loop body
LE: loop exit
PB: predicated region body
PF: predicated region fallthrough
CT: control target
= control target key end

     0   :  { %s10312_s0 = inlined_call_operand.hbm [shape: bf16[384,768], index: 0, kind: input, shape index: {}]   ;;  %s10313_s1 = inlined_call_operand.hbm [shape: f32[384,768], index: 1, kind: input, shape index: {}]   ;;  %s10314_s2 = inlined_call_operand.hbm [shape: bf16[768,768], index: 2, kind: input, shape index: {}]   ;;  %s10315_s3 = inlined_call_operand.hbm [shape: f32[3,768], index: 3, kind: input, shape index: {}]   ;;  %s10316_s4 = inlined_call_operand.hbm [shape: f32[384,768], index: 4, kind: output, shape index: {}]  }
   0x1   :  { %10508 = sst [smem:[#allocation88_spill]] %s10312_s0 }
   0x2   :  { %10509 = sst [smem:[#allocation89_spill]] %s10314_s2 }
   0x3   :  { %10510 = sst [smem:[#allocation90_spill]] %s10315_s3 }
   0x4   :  { %9 = vsyncpa [#allocation3], 0 }
   0x5   :  { %11 = vsyncpa [#allocation3 + $0x1], 0 }
   0x6   :  { %12 = vsyncpa [#allocation6], 0 }
   0x7   :  { %14 = vsyncpa [#allocation6 + $0x1], 0 }
   0x8   :  { %15 = vsyncpa [#allocation9], 0 }
   0x9   :  { %16 = vsyncpa [#allocation4], 0 }
   0xa   :  { %18 = vsyncpa [#allocation4 + $0x1], 0  ;;  %s7616_s15 = smov 0   ;;  %s7618_s16 = smov 0  }
   0xb   :  { %s7620_s17 = smov 0   ;;  %s7622_s18 = smov 0  }
   0xc LB: > { %s7637_s19 = sadd.s32 4294967295, %s7581_s18   ;;  %s5564_s20 = sadd.s32 4294967294, %s7581_s18   ;;  %s7581_s18 = sphi %s7622_s18, %s10963_s18   ;;  %s7577_s17 = sphi %s7620_s17, %s10962_s17   ;;  %s7573_s16 = sphi %s7618_s16, %s10961_s16   ;;  %s7569_s15 = sphi %s7616_s15, %s10960_s15  }
   0xd   : > { %p44_p0 = scmp.ne.s32.totalorder %s7573_s16, %s7569_s15  ;;  %p45_p1 = scmp.eq.s32.totalorder %s7637_s19, 0 }
   0xe   : > { %p136_p2 = scmp.eq.s32.totalorder %s7637_s19, 2  ;;  %p142_p3 = scmp.eq.s32.totalorder %s5564_s20, 2 }
   0xf   : > { %p7646_p4 = por %p45_p1, %p44_p0  ;;  %p5565_p5 = scmp.ge.s32.totalorder %s7581_s18, 1 }
  0x10   : > { %p7651_p6 = por %p142_p3, %p44_p0  ;;  %p149_p7 = scmp.lt.s32.totalorder %s7581_s18, 4 }
  0x11   : > { %s10513_s2 = sld [smem:[#allocation89_spill]]  ;;  %s7583_s27 = smov [#allocation7]  }
  0x12   : > { %p7659_p8 = pnand %p5565_p5, %p149_p7  ;;  %s162_s28 = sshll.u32 %s7583_s27, 4  ;;  %s163_s28 = int_to_ptr.vmem [resolvable:$true] %s162_s28 }
  0x13   : > { %s10515_s3 = sld [smem:[#allocation90_spill]]  ;;  %s10317_s6 = smov 384  }
  0x14   : > { %p7284_p9 = pneg %p7659_p8  ;;  %s10318_s7 = smov 24  }
  0x15   : > { %s7586_s8 = smov [#allocation8]   ;;  %s7674_s10 = sadd.s32 1, %s7581_s18  }
  0x16   : > { %p7285_p10 = pnand %p7284_p9, %p45_p1  ;;  %s177_s9 = sshll.u32 %s7586_s8, 4  ;;  %s178_s9 = int_to_ptr.vmem [resolvable:$true] %s177_s9 }
  0x17   : > { %s160_s25 = sshll.u32 %s10513_s2, 4  ;;  %s31_s11 = sadd.s32 1, %s7577_s17  ;;  %s161_s25 = int_to_ptr.hbm [resolvable:$true] %s160_s25 }
  0x18   : > { %7287 = dma.hbm_to_vmem [thread:$0]  (!%p7285_p10), %s161_s25, 36864, %s163_s28, [#allocation6], %s10317_s6, %s10317_s6, %s10318_s7  }
  0x19   : > { %s175_s5 = sshll.u32 %s10515_s3, 4  ;;  %s28_s12 = ssub.s32 %s7581_s18, %s7674_s10  ;;  %s176_s5 = int_to_ptr.hbm [resolvable:$true] %s175_s5 }
  0x1a   : > { %7290 = dma.hbm_to_vmem [thread:$0]  (!%p7285_p10), %s176_s5, 384, %s178_s9, [#allocation9]  }
  0x1b   : > { %p38_p11 = scmp.ne.s32.totalorder %s7577_s17, %s7573_s16  ;;  %p29_p12 = scmp.eq.s32.totalorder %s28_s12, 0 }
  0x1c   : > { %p39_p13 = scmp.eq.s32.totalorder %s7581_s18, 0  ;;  %p7304_p3 = scmp.lt.s32.totalorder %s7581_s18, 3 }
  0x1d   : > { %p7684_p0 = por %p136_p2, %p38_p11  ;;  %s7693_s20 = sand.u32 1, %s7577_s17  }
  0x1e   : > { %s7690_s14 = scalar_select %p29_p12, %s7577_s17, %s31_s11  }
  0x1f   : > { %p40_p5 = por %p39_p13, %p38_p11  ;;  %s7263_s23 = smul.u32 384, %s7693_s20 }
  0x20   : > { %10517 = sst [smem:[#allocation16_spill]] %s7690_s14  ;;  %s7264_s24 = smul.u32 384, %s7581_s18 }
  0x21   : > { %p7697_p7 = pnand %p7304_p3, %p40_p5  ;;  %s10519_s0 = sld [smem:[#allocation88_spill]] }
  0x22   : > { %s192_s5 = scalar_lea.vmem [#allocation2], %s7263_s23  ;;  %s189_s11 = scalar_lea.sflag [#allocation3], %s7693_s20 }
  0x23   : > { %s201_s8 = sshll.u32 %s192_s5, 4  ;;  %p7447_p9 = pneg %p7697_p7  ;;  %s202_s8 = int_to_ptr.vmem [resolvable:$true] %s201_s8 }
  0x27   : > { %s198_s30 = scalar_lea.hbm %s10519_s0, %s7264_s24  ;;  %s7450_s24 = scalar_lea.hbm %s10519_s0, 1152 }
  0x28   : > { %s199_s9 = sshll.u32 %s198_s30, 4  ;;  %s200_s9 = int_to_ptr.hbm [resolvable:$true] %s199_s9 }
  0x29   : > { %s7443_s12 = sshra.s32 %s200_s9, 4  ;;  %s7444_s12 = int_to_ptr.hbm [resolvable:$true] %s7443_s12 }
  0x2a   : > { %s7445_s6 = scalar_lea.hbm %s7444_s12, 384  ;;  %p7451_p12 = scmp.lt.s32.totalorder %s7444_s12, %s10519_s0 }
  0x2b   : > { %p7446_p2 = scmp.ne.s32.totalorder %s7444_s12, %s7445_s6  ;;  %p7452_p13 = scmp.lt.s32.totalorder %s7450_s24, %s7445_s6 }
  0x2d   : > { %p7448_p10 = pnand %p7447_p9, %p7446_p2  ;;  %p7453_p3 = por %p7452_p13, %p7451_p12 }
  0x2f   : > { %p7449_p11 = pneg %p7448_p10 }
  0x31   : > { %p7454_p5 = pnand %p7453_p3, %p7449_p11 }
  0x33   : > { %7457 = shalt.err (!%p7454_p5)
}
  0x34   : > { %s10520_s29 = smov 24   ;;  %s10521_s30 = smov 384  }
  0x35   : > { %7294 = dma.hbm_to_vmem [thread:$0]  (!%p7697_p7), %s200_s9, 6144, %s202_s8, %s189_s11, %s10521_s30, %s10521_s30, %s10520_s29  }
  0x36   : > { %s7265_s7 = smul.u32 768, %s7693_s20  ;;  %s10522_s28 = sand.u32 1, %s7581_s18  }
  0x37   : > { %s7266_s27 = smul.u32 768, %s7581_s18  ;;  %s212_s0 = scalar_lea.sflag [#allocation6], %s10522_s28 }
  0x38   : > { %s215_s6 = scalar_lea.vmem [#allocation5], %s7265_s7  ;;  %s7480_s2 = scalar_lea.hbm %s10313_s1, 2304 }
  0x39   : > { %s221_s12 = scalar_lea.hbm %s10313_s1, %s7266_s27  ;;  %s224_s24 = sshll.u32 %s215_s6, 4  ;;  %s225_s24 = int_to_ptr.vmem [resolvable:$true] %s224_s24 }
  0x3a   : > { %s222_s23 = sshll.u32 %s221_s12, 4  ;;  %s223_s23 = int_to_ptr.hbm [resolvable:$true] %s222_s23 }
  0x3b   : > { %s7473_s3 = sshra.s32 %s223_s23, 4  ;;  %s7474_s3 = int_to_ptr.hbm [resolvable:$true] %s7473_s3 }
  0x3c   : > { %s7475_s14 = scalar_lea.hbm %s7474_s3, 768  ;;  %p7481_p12 = scmp.lt.s32.totalorder %s7474_s3, %s10313_s1 }
  0x3d   : > { %p7476_p2 = scmp.ne.s32.totalorder %s7474_s3, %s7475_s14  ;;  %p7482_p13 = scmp.lt.s32.totalorder %s7480_s2, %s7475_s14 }
  0x3f   : > { %p7478_p10 = pnand %p7476_p2, %p7447_p9  ;;  %p7483_p3 = por %p7482_p13, %p7481_p12 }
  0x41   : > { %p7479_p11 = pneg %p7478_p10 }
  0x43   : > { %p7484_p5 = pnand %p7483_p3, %p7479_p11 }
  0x45   : > { %7487 = shalt.err (!%p7484_p5)
}
  0x46   : > { %s7587_s29 = smov 768   ;;  %s7588_s30 = smov 48  }
  0x47   : > { %7297 = dma.hbm_to_vmem [thread:$0]  (!%p7697_p7), %s223_s23, 12288, %s225_s24, %s212_s0, %s7587_s29, %s7587_s29, %s7588_s30  }
  0x48   : > { %236 = sbr.rel (%p7659_p8) target bundleno = 1708 (0x6ac), region = 36 }
  0x4d   : > { %s7743_s7 = sand.u32 1, %s7573_s16  }
  0x4e   : > { %s7267_s27 = smul.u32 384, %s7743_s7  ;;  %s239_s3 = scalar_lea.sflag [#allocation3], %s7743_s7 }
  0x50   : > { %s7747_s14 = scalar_lea.vmem [#allocation2], %s7267_s27 }
  0x51   : > { %7548 = dma.done.wait (%p7646_p4), %s239_s3, 6144  }
  0x52   : > { %7550 = vsyncadd (%p7646_p4), %s239_s3, 4294961152  ;;  %s248_s0 = sand.u32 1, %s7637_s19   ;;  %s7268_s26 = smul.u32 768, %s7743_s7 }
  0x53   : > { %s249_s25 = scalar_lea.sflag [#allocation6], %s248_s0 }
  0x54   : > { %s7757_s5 = scalar_lea.vmem [#allocation5], %s7268_s26 }
  0x55   : > { %7552 = dma.done.wait (%p7646_p4), %s249_s25, 12288  }
  0x56   : > { %7554 = vsyncadd (%p7646_p4), %s249_s25, 4294955008 }
  0x57   : > { %7556 = dma.done.wait (%p45_p1), [#allocation6], 36864  }
  0x58   : > { %7558 = vsyncadd (%p45_p1), [#allocation6], 4294930432 }
  0x59   : > { %7560 = dma.done.wait (%p45_p1), [#allocation9], 384  }
  0x5a   : > { %7562 = vsyncadd (%p45_p1), [#allocation9], 4294966912  ;;  %v5940_v0 = vld [vmem:[#allocation7 + $0x150] sm:$0xf]  ;;  %v7020_v1 = vld [vmem:[#allocation7 + $0x164] sm:$0xf0] }
  0x5b   : > { %v6132_v2 = vld [vmem:[#allocation7 + $0x2d0] sm:$0xf]  ;;  %v5941_v3 = vor.u32 %v7020_v1, %v5940_v0  ;;  %v7068_v4 = vld [vmem:[#allocation7 + $0x2e4] sm:$0xf0]  ;;  %v5916_v11 = vld [vmem:[#allocation7 + $0x120] sm:$0xf] }
  0x5c   : > { %v6324_v5 = vld [vmem:[#allocation7 + $0x450] sm:$0xf]  ;;  %v7116_v6 = vld [vmem:[#allocation7 + $0x464] sm:$0xf0]  ;;  %v6133_v7 = vor.u32 %v7068_v4, %v6132_v2  ;;  %v7014_v13 = vld [vmem:[#allocation7 + $0x134] sm:$0xf0] }
  0x5d   : > { %v6325_v8 = vor.u32 %v7116_v6, %v6324_v5  ;;  %v6516_v9 = vld [vmem:[#allocation7 + $0x5d0] sm:$0xf]  ;;  %v7164_v10 = vld [vmem:[#allocation7 + $0x5e4] sm:$0xf0]  ;;  %2312 = vmatpush.bf16.msra.mxu0 %v5941_v3  ;;  %v6108_v14 = vld [vmem:[#allocation7 + $0x2a0] sm:$0xf]  ;;  %v5917_v16 = vor.u32 %v7014_v13, %v5916_v11 }
  0x5e   : > { %v6517_v12 = vor.u32 %v7164_v10, %v6516_v9  ;;  %v7062_v15 = vld [vmem:[#allocation7 + $0x2b4] sm:$0xf0]  ;;  %2361 = vmatpush.bf16.msra.mxu1 %v6133_v7  ;;  %v6300_v18 = vld [vmem:[#allocation7 + $0x420] sm:$0xf]  ;;  %v5892_v23 = vld [vmem:[#allocation7 + $0xf0] sm:$0xf] }
  0x5f   : > { %2410 = vmatpush.bf16.msra.mxu2 %v6325_v8  ;;  %v6109_v17 = vor.u32 %v7062_v15, %v6108_v14  ;;  %v7110_v19 = vld [vmem:[#allocation7 + $0x434] sm:$0xf0]  ;;  %v6492_v20 = vld [vmem:[#allocation7 + $0x5a0] sm:$0xf]  ;;  %v7008_v24 = vld [vmem:[#allocation7 + $0x104] sm:$0xf0] }
  0x60   : > { %2459 = vmatpush.bf16.msra.mxu3 %v6517_v12  ;;  %v6301_v21 = vor.u32 %v7110_v19, %v6300_v18  ;;  %v7158_v22 = vld [vmem:[#allocation7 + $0x5b4] sm:$0xf0]  ;;  %v6084_v26 = vld [vmem:[#allocation7 + $0x270] sm:$0xf]  ;;  %v7056_v27 = vld [vmem:[#allocation7 + $0x284] sm:$0xf0]  ;;  %v5893_v29 = vor.u32 %v7008_v24, %v5892_v23 }
  0x61   : > { %v6493_v25 = vor.u32 %v7158_v22, %v6492_v20  ;;  %v6276_v28 = vld [vmem:[#allocation7 + $0x3f0] sm:$0xf]  ;;  %2313 = vmatpush.bf16.msra.mxu0 %v5917_v16  ;;  %v7104_v30 = vld [vmem:[#allocation7 + $0x404] sm:$0xf0]  ;;  %v6085_v33 = vor.u32 %v7056_v27, %v6084_v26  ;;  %v5868_v35 = vld [vmem:[#allocation7 + $0xc0] sm:$0xf] }
  0x62   : > { %v6468_v31 = vld [vmem:[#allocation7 + $0x570] sm:$0xf]  ;;  %v7152_v32 = vld [vmem:[#allocation7 + $0x584] sm:$0xf0]  ;;  %2362 = vmatpush.bf16.msra.mxu1 %v6109_v17  ;;  %v6277_v34 = vor.u32 %v7104_v30, %v6276_v28  ;;  %v7002_v36 = vld [vmem:[#allocation7 + $0xd4] sm:$0xf0] }
  0x63   : > { %2411 = vmatpush.bf16.msra.mxu2 %v6301_v21  ;;  %v6060_v37 = vld [vmem:[#allocation7 + $0x240] sm:$0xf]  ;;  %v6469_v38 = vor.u32 %v7152_v32, %v6468_v31  ;;  %v7050_v39 = vld [vmem:[#allocation7 + $0x254] sm:$0xf0]  ;;  %v5869_v44 = vor.u32 %v7002_v36, %v5868_v35  ;;  %v5844_v47 = vld [vmem:[#allocation7 + $0x90] sm:$0xf] }
  0x64   : > { %2460 = vmatpush.bf16.msra.mxu3 %v6493_v25  ;;  %v6252_v40 = vld [vmem:[#allocation7 + $0x3c0] sm:$0xf]  ;;  %v7098_v41 = vld [vmem:[#allocation7 + $0x3d4] sm:$0xf0]  ;;  %v6061_v45 = vor.u32 %v7050_v39, %v6060_v37  ;;  %v6996_v48 = vld [vmem:[#allocation7 + $0xa4] sm:$0xf0] }
  0x65   : > { %v6444_v42 = vld [vmem:[#allocation7 + $0x540] sm:$0xf]  ;;  %v7146_v43 = vld [vmem:[#allocation7 + $0x554] sm:$0xf0]  ;;  %2314 = vmatpush.bf16.msra.mxu0 %v5893_v29  ;;  %v6253_v46 = vor.u32 %v7098_v41, %v6252_v40  ;;  %v6036_v49 = vld [vmem:[#allocation7 + $0x210] sm:$0xf]  ;;  %v5845_v56 = vor.u32 %v6996_v48, %v5844_v47 }
  0x66   : > { %2363 = vmatpush.bf16.msra.mxu1 %v6085_v33  ;;  %v6445_v50 = vor.u32 %v7146_v43, %v6444_v42  ;;  %v7044_v51 = vld [vmem:[#allocation7 + $0x224] sm:$0xf0]  ;;  %v6228_v52 = vld [vmem:[#allocation7 + $0x390] sm:$0xf]  ;;  %v5820_v59 = vld [vmem:[#allocation7 + $0x60] sm:$0xf] }
  0x67   : > { %2412 = vmatpush.bf16.msra.mxu2 %v6277_v34  ;;  %v7092_v53 = vld [vmem:[#allocation7 + $0x3a4] sm:$0xf0]  ;;  %v6420_v54 = vld [vmem:[#allocation7 + $0x510] sm:$0xf]  ;;  %v6037_v57 = vor.u32 %v7044_v51, %v6036_v49  ;;  %v6990_v60 = vld [vmem:[#allocation7 + $0x74] sm:$0xf0] }
  0x68   : > { %2461 = vmatpush.bf16.msra.mxu3 %v6469_v38  ;;  %v7140_v55 = vld [vmem:[#allocation7 + $0x524] sm:$0xf0]  ;;  %v6229_v58 = vor.u32 %v7092_v53, %v6228_v52  ;;  %v6012_v61 = vld [vmem:[#allocation7 + $0x1e0] sm:$0xf]  ;;  %v7038_v63 = vld [vmem:[#allocation7 + $0x1f4] sm:$0xf0]  ;;  %v5821_v4 = vor.u32 %v6990_v60, %v5820_v59 }
  0x69   : > { %2315 = vmatpush.bf16.msra.mxu0 %v5869_v44  ;;  %v6421_v62 = vor.u32 %v7140_v55, %v6420_v54  ;;  %v6204_v0 = vld [vmem:[#allocation7 + $0x360] sm:$0xf]  ;;  %v7086_v1 = vld [vmem:[#allocation7 + $0x374] sm:$0xf0]  ;;  %v6013_v5 = vor.u32 %v7038_v63, %v6012_v61  ;;  %v5796_v7 = vld [vmem:[#allocation7 + $0x30] sm:$0xf] }
  0x6a   : > { %2364 = vmatpush.bf16.msra.mxu1 %v6061_v45  ;;  %v6396_v2 = vld [vmem:[#allocation7 + $0x4e0] sm:$0xf]  ;;  %v7134_v3 = vld [vmem:[#allocation7 + $0x4f4] sm:$0xf0]  ;;  %v6205_v6 = vor.u32 %v7086_v1, %v6204_v0  ;;  %v6984_v8 = vld [vmem:[#allocation7 + $0x44] sm:$0xf0] }
  0x6b   : > { %2413 = vmatpush.bf16.msra.mxu2 %v6253_v46  ;;  %v5988_v9 = vld [vmem:[#allocation7 + $0x1b0] sm:$0xf]  ;;  %v6397_v10 = vor.u32 %v7134_v3, %v6396_v2  ;;  %v7032_v11 = vld [vmem:[#allocation7 + $0x1c4] sm:$0xf0]  ;;  %v5772_v16 = vld [vmem:[#allocation7] sm:$0xf]  ;;  %v5797_v17 = vor.u32 %v6984_v8, %v5796_v7 }
  0x6c   : > { %2462 = vmatpush.bf16.msra.mxu3 %v6445_v50  ;;  %v6180_v12 = vld [vmem:[#allocation7 + $0x330] sm:$0xf]  ;;  %v7080_v13 = vld [vmem:[#allocation7 + $0x344] sm:$0xf0]  ;;  %v6978_v18 = vld [vmem:[#allocation7 + $0x14] sm:$0xf0]  ;;  %v5989_v21 = vor.u32 %v7032_v11, %v5988_v9 }
  0x6d   : > { %2316 = vmatpush.bf16.msra.mxu0 %v5845_v56  ;;  %v6372_v14 = vld [vmem:[#allocation7 + $0x4b0] sm:$0xf]  ;;  %v7128_v15 = vld [vmem:[#allocation7 + $0x4c4] sm:$0xf0]  ;;  %v5964_v19 = vld [vmem:[#allocation7 + $0x180] sm:$0xf]  ;;  %v6181_v22 = vor.u32 %v7080_v13, %v6180_v12  ;;  %v5773_v34 = vor.u32 %v6978_v18, %v5772_v16 }
  0x6e   : > { %2365 = vmatpush.bf16.msra.mxu1 %v6037_v57  ;;  %v7026_v20 = vld [vmem:[#allocation7 + $0x194] sm:$0xf0]  ;;  %v6156_v23 = vld [vmem:[#allocation7 + $0x300] sm:$0xf]  ;;  %v6373_v26 = vor.u32 %v7128_v15, %v6372_v14  ;;  %v6927_v30 = vld [vmem:[%s7747_s14 + $0x4] sm:$0xf] }
  0x6f   : > { %2414 = vmatpush.bf16.msra.mxu2 %v6229_v58  ;;  %v7074_v24 = vld [vmem:[#allocation7 + $0x314] sm:$0xf0]  ;;  %v6348_v25 = vld [vmem:[#allocation7 + $0x480] sm:$0xf]  ;;  %v5582_v31 = vld [vmem:[%s7747_s14 + $0x18] sm:$0xf0]  ;;  %v5965_v38 = vor.u32 %v7026_v20, %v5964_v19 }
  0x70   : > { %2463 = vmatpush.bf16.msra.mxu3 %v6421_v62  ;;  %v7122_v27 = vld [vmem:[#allocation7 + $0x494] sm:$0xf0]  ;;  %v5580_v28 = vld [vmem:[%s7747_s14] sm:$0xf]  ;;  %v7017_v32 = vld [vmem:[#allocation7 + $0x154] sm:$0xf]  ;;  %v6157_v39 = vor.u32 %v7074_v24, %v6156_v23  ;;  %v7781_v53 = vor.u32 %v6927_v30, %v5582_v31 }
  0x71   : > { %2317 = vmatpush.bf16.msra.mxu0 %v5821_v4  ;;  %v6930_v29 = vld [vmem:[%s7747_s14 + $0x14] sm:$0xf0]  ;;  %v5942_v33 = vld [vmem:[#allocation7 + $0x168] sm:$0xf0]  ;;  %v5588_v35 = vld [vmem:[%s7747_s14 + $0x8] sm:$0xf]  ;;  %v6349_v43 = vor.u32 %v7122_v27, %v6348_v25 }
  0x72   : > { %2366 = vmatpush.bf16.msra.mxu1 %v6013_v5  ;;  %v7065_v36 = vld [vmem:[#allocation7 + $0x2d4] sm:$0xf]  ;;  %v6134_v37 = vld [vmem:[#allocation7 + $0x2e8] sm:$0xf0]  ;;  %v6931_v40 = vld [vmem:[%s7747_s14 + $0x1c] sm:$0xf0]  ;;  %v5945_v44 = vor.u32 %v7017_v32, %v5942_v33  ;;  %v7779_v48 = vor.u32 %v6930_v29, %v5580_v28 }
  0x73   : > { %2415 = vmatpush.bf16.msra.mxu2 %v6205_v6  ;;  %v6928_v41 = vld [vmem:[%s7747_s14 + $0xc] sm:$0xf]  ;;  %v5590_v42 = vld [vmem:[%s7747_s14 + $0x20] sm:$0xf0]  ;;  %v6708_v45 = vld [vmem:[#allocation7 + $0x750] sm:$0xf]  ;;  %v6137_v49 = vor.u32 %v7065_v36, %v6134_v37  ;;  %v7783_v54 = vor.u32 %v6931_v40, %v5588_v35 }
  0x74   : > { %2464 = vmatpush.bf16.msra.mxu3 %v6397_v10  ;;  %v7212_v46 = vld [vmem:[#allocation7 + $0x764] sm:$0xf0]  ;;  %v6900_v47 = vld [vmem:[#allocation7 + $0x8d0] sm:$0xf]  ;;  %10523 = vst [vmem:[#allocation17_spill] sm:$0xff] %v7779_v48  ;;  %v7785_v57 = vor.u32 %v6928_v41, %v5590_v42  ;;  %s9803_s21 = scalar_lea.vmem [#allocation10], %s7268_s26 }
  0x75   : > { %2318 = vmatpush.bf16.msra.mxu0 %v5797_v17  ;;  %v7260_v50 = vld [vmem:[#allocation7 + $0x8e4] sm:$0xf0]  ;;  %v7011_v51 = vld [vmem:[#allocation7 + $0x124] sm:$0xf]  ;;  %v5918_v52 = vld [vmem:[#allocation7 + $0x138] sm:$0xf0]  ;;  %v6709_v58 = vor.u32 %v7212_v46, %v6708_v45 }
  0x76   : > { %2367 = vmatpush.bf16.msra.mxu1 %v5989_v21  ;;  %10524 = vst [vmem:[#allocation18_spill] sm:$0xff] %v7781_v53  ;;  %v7059_v55 = vld [vmem:[#allocation7 + $0x2a4] sm:$0xf]  ;;  %v6110_v56 = vld [vmem:[#allocation7 + $0x2b8] sm:$0xf0]  ;;  %v6901_v59 = vor.u32 %v7260_v50, %v6900_v47  ;;  %v5921_v60 = vor.u32 %v7011_v51, %v5918_v52  ;;  %s7269_s12 = smul.u32 768, %s7637_s19 }
  0x77   : > { %2416 = vmatpush.bf16.msra.mxu2 %v6181_v22  ;;  %10525 = vst [vmem:[#allocation19_spill] sm:$0xff] %v7783_v54  ;;  %v6684_v61 = vld [vmem:[#allocation7 + $0x720] sm:$0xf]  ;;  %v7206_v62 = vld [vmem:[#allocation7 + $0x734] sm:$0xf0]  ;;  %v6113_v63 = vor.u32 %v7059_v55, %v6110_v56  ;;  %s5446_s23 = sshll.u32 %s9803_s21, 4  ;;  %s5447_s23 = int_to_ptr.vmem [resolvable:$true] %s5446_s23 }
  0x78   : > { %2465 = vmatpush.bf16.msra.mxu3 %v6373_v26  ;;  %10526 = vst [vmem:[#allocation20_spill] sm:$0xff] %v7785_v57  ;;  %v6876_v0 = vld [vmem:[#allocation7 + $0x8a0] sm:$0xf]  ;;  %v7254_v1 = vld [vmem:[#allocation7 + $0x8b4] sm:$0xf0]  ;;  %v6685_v2 = vor.u32 %v7206_v62, %v6684_v61  ;;  %s5445_s24 = scalar_lea.hbm %s10316_s4, %s7269_s12  ;;  %s5433_s20 = scalar_lea.sflag [#allocation4], %s7743_s7 }
  0x79   : > { %2319 = vmatpush.bf16.msra.mxu0 %v5773_v34  ;;  %v7005_v3 = vld [vmem:[#allocation7 + $0xf4] sm:$0xf]  ;;  %v5894_v4 = vld [vmem:[#allocation7 + $0x108] sm:$0xf0]  ;;  %v6660_v5 = vld [vmem:[#allocation7 + $0x6f0] sm:$0xf]  ;;  %v6877_v6 = vor.u32 %v7254_v1, %v6876_v0 }
  0x7a   : > { %2368 = vmatpush.bf16.msra.mxu1 %v5965_v38  ;;  %v5897_v7 = vor.u32 %v7005_v3, %v5894_v4  ;;  %v7200_v8 = vld [vmem:[#allocation7 + $0x704] sm:$0xf0]  ;;  %v7053_v9 = vld [vmem:[#allocation7 + $0x274] sm:$0xf]  ;;  %v6086_v10 = vld [vmem:[#allocation7 + $0x288] sm:$0xf0] }
  0x7b   : > { %2417 = vmatpush.bf16.msra.mxu2 %v6157_v39  ;;  %v6089_v11 = vor.u32 %v7053_v9, %v6086_v10  ;;  %v6852_v12 = vld [vmem:[#allocation7 + $0x870] sm:$0xf]  ;;  %v7248_v13 = vld [vmem:[#allocation7 + $0x884] sm:$0xf0]  ;;  %v6661_v14 = vor.u32 %v7200_v8, %v6660_v5  ;;  %v6933_v18 = vld [vmem:[%s7747_s14 + $0x34] sm:$0xf] }
  0x7c   : > { %2466 = vmatpush.bf16.msra.mxu3 %v6349_v43  ;;  %2320 = vmatmul.bf16.vlgmr.msra.gmra.mxu0 %v7779_v48  ;;  %v6853_v15 = vor.u32 %v7248_v13, %v6852_v12  ;;  %v5604_v16 = vld [vmem:[%s7747_s14 + $0x30] sm:$0xf]  ;;  %v6936_v17 = vld [vmem:[%s7747_s14 + $0x44] sm:$0xf0]  ;;  %v5606_v19 = vld [vmem:[%s7747_s14 + $0x48] sm:$0xf0] }
  0x7d   : > { %2369 = vmatmul.bf16.vlgmr.msra.gmra.mxu1 %v7781_v53  ;;  %2508 = vmatpush.bf16.msrb.mxu0 %v6709_v58  ;;  %v5612_v20 = vld [vmem:[%s7747_s14 + $0x38] sm:$0xf]  ;;  %v6937_v21 = vld [vmem:[%s7747_s14 + $0x4c] sm:$0xf0]  ;;  %v6934_v22 = vld [vmem:[%s7747_s14 + $0x3c] sm:$0xf]  ;;  %v7799_v24 = vor.u32 %v6936_v17, %v5604_v16  ;;  %v7801_v25 = vor.u32 %v6933_v18, %v5606_v19 }
  0x7e   : > { %2418 = vmatmul.bf16.vlgmr.msra.gmra.mxu2 %v7783_v54  ;;  %2557 = vmatpush.bf16.msrb.mxu1 %v6901_v59  ;;  %v5614_v23 = vld [vmem:[%s7747_s14 + $0x50] sm:$0xf0]  ;;  %v7803_v26 = vor.u32 %v6937_v21, %v5612_v20  ;;  %v6999_v28 = vld [vmem:[#allocation7 + $0xc4] sm:$0xf]  ;;  %v5870_v29 = vld [vmem:[#allocation7 + $0xd8] sm:$0xf0] }
  0x7f   : > { %2606 = vmatpush.bf16.msrb.mxu2 %v5945_v44  ;;  %2467 = vmatmul.bf16.vlgmr.msra.gmra.mxu3 %v7785_v57  ;;  %10527 = vst [vmem:[#allocation21_spill] sm:$0xff] %v7799_v24  ;;  %v7805_v27 = vor.u32 %v6934_v22, %v5614_v23  ;;  %v6636_v30 = vld [vmem:[#allocation7 + $0x6c0] sm:$0xf]  ;;  %v5873_v31 = vor.u32 %v6999_v28, %v5870_v29  ;;  %v7194_v32 = vld [vmem:[#allocation7 + $0x6d4] sm:$0xf0]  ;;  %s5448_s28 = sshll.u32 %s5445_s24, 4  ;;  %s5449_s28 = int_to_ptr.hbm [resolvable:$true] %s5448_s28 }
  0x80   : > { %2655 = vmatpush.bf16.msrb.mxu3 %v6137_v49  ;;  %10528 = vst [vmem:[#allocation22_spill] sm:$0xff] %v7801_v25  ;;  %v7047_v33 = vld [vmem:[#allocation7 + $0x244] sm:$0xf]  ;;  %v6062_v34 = vld [vmem:[#allocation7 + $0x258] sm:$0xf0]  ;;  %v6637_v35 = vor.u32 %v7194_v32, %v6636_v30  ;;  %s7517_s8 = sshra.s32 %s5449_s28, 4  ;;  %s7518_s8 = int_to_ptr.hbm [resolvable:$true] %s7517_s8 }
  0x81   : > { %2509 = vmatpush.bf16.msrb.mxu0 %v6685_v2  ;;  %v6065_v36 = vor.u32 %v7047_v33, %v6062_v34  ;;  %v6828_v37 = vld [vmem:[#allocation7 + $0x840] sm:$0xf]  ;;  %v7242_v38 = vld [vmem:[#allocation7 + $0x854] sm:$0xf0]  ;;  %v6939_v42 = vld [vmem:[%s7747_s14 + $0x64] sm:$0xf]  ;;  %p7524_p7 = scmp.lt.s32.totalorder %s7518_s8, %s10316_s4 }
  0x82   : > { %2558 = vmatpush.bf16.msrb.mxu1 %v6877_v6  ;;  %v6829_v39 = vor.u32 %v7242_v38, %v6828_v37  ;;  %v5628_v40 = vld [vmem:[%s7747_s14 + $0x60] sm:$0xf]  ;;  %v6942_v41 = vld [vmem:[%s7747_s14 + $0x74] sm:$0xf0]  ;;  %v5630_v43 = vld [vmem:[%s7747_s14 + $0x78] sm:$0xf0] }
  0x83   : > { %2607 = vmatpush.bf16.msrb.mxu2 %v5921_v60  ;;  %v5636_v44 = vld [vmem:[%s7747_s14 + $0x68] sm:$0xf]  ;;  %v6943_v45 = vld [vmem:[%s7747_s14 + $0x7c] sm:$0xf0]  ;;  %v6940_v46 = vld [vmem:[%s7747_s14 + $0x6c] sm:$0xf]  ;;  %v7819_v49 = vor.u32 %v6942_v41, %v5628_v40  ;;  %v7821_v50 = vor.u32 %v6939_v42, %v5630_v43 }
  0x84   : > { %2656 = vmatpush.bf16.msrb.mxu3 %v6113_v63  ;;  %v5638_v47 = vld [vmem:[%s7747_s14 + $0x80] sm:$0xf0]  ;;  %v7823_v51 = vor.u32 %v6943_v45, %v5636_v44  ;;  %v6993_v55 = vld [vmem:[#allocation7 + $0x94] sm:$0xf]  ;;  %v5846_v56 = vld [vmem:[#allocation7 + $0xa8] sm:$0xf0] }
  0x85   : > { %2510 = vmatpush.bf16.msrb.mxu0 %v6661_v14  ;;  %10529 = vst [vmem:[#allocation23_spill] sm:$0xff] %v7819_v49  ;;  %v7825_v52 = vor.u32 %v6940_v46, %v5638_v47  ;;  %v6612_v58 = vld [vmem:[#allocation7 + $0x690] sm:$0xf]  ;;  %v5849_v59 = vor.u32 %v6993_v55, %v5846_v56  ;;  %v7188_v60 = vld [vmem:[#allocation7 + $0x6a4] sm:$0xf0]  ;;  %s7519_s2 = scalar_lea.hbm %s7518_s8, 768 }
  0x86   : > { %2559 = vmatpush.bf16.msrb.mxu1 %v6853_v15  ;;  %10530 = vst [vmem:[#allocation24_spill] sm:$0xff] %v7821_v50  ;;  %v7041_v61 = vld [vmem:[#allocation7 + $0x214] sm:$0xf]  ;;  %v6038_v62 = vld [vmem:[#allocation7 + $0x228] sm:$0xf0]  ;;  %v6613_v63 = vor.u32 %v7188_v60, %v6612_v58  ;;  %p7520_p1 = scmp.ne.s32.totalorder %s7518_s8, %s7519_s2  ;;  %s7523_s29 = scalar_lea.hbm %s10316_s4, 2304 }
  0x87   : > { %2608 = vmatpush.bf16.msrb.mxu2 %v5897_v7  ;;  %v6041_v0 = vor.u32 %v7041_v61, %v6038_v62  ;;  %v6804_v1 = vld [vmem:[#allocation7 + $0x810] sm:$0xf]  ;;  %v7236_v2 = vld [vmem:[#allocation7 + $0x824] sm:$0xf0]  ;;  %v6945_v6 = vld [vmem:[%s7747_s14 + $0x94] sm:$0xf]  ;;  %p7525_p9 = scmp.lt.s32.totalorder %s7523_s29, %s7519_s2 }
  0x88   : > { %2657 = vmatpush.bf16.msrb.mxu3 %v6089_v11  ;;  %v6805_v3 = vor.u32 %v7236_v2, %v6804_v1  ;;  %v5652_v4 = vld [vmem:[%s7747_s14 + $0x90] sm:$0xf]  ;;  %v6948_v5 = vld [vmem:[%s7747_s14 + $0xa4] sm:$0xf0]  ;;  %v5654_v7 = vld [vmem:[%s7747_s14 + $0xa8] sm:$0xf0]  ;;  %p7521_p4 = pnand %p7520_p1, %p7684_p0 }
  0x89   : > { %2511 = vmatpush.bf16.msrb.mxu0 %v6637_v35  ;;  %v5660_v8 = vld [vmem:[%s7747_s14 + $0x98] sm:$0xf]  ;;  %v6949_v9 = vld [vmem:[%s7747_s14 + $0xac] sm:$0xf0]  ;;  %v6946_v10 = vld [vmem:[%s7747_s14 + $0x9c] sm:$0xf]  ;;  %v7839_v12 = vor.u32 %v6948_v5, %v5652_v4  ;;  %v7841_v13 = vor.u32 %v6945_v6, %v5654_v7  ;;  %p7526_p2 = por %p7525_p9, %p7524_p7 }
  0x8a   : > { %2560 = vmatpush.bf16.msrb.mxu1 %v6829_v39  ;;  %v5662_v11 = vld [vmem:[%s7747_s14 + $0xb0] sm:$0xf0]  ;;  %v7843_v14 = vor.u32 %v6949_v9, %v5660_v8  ;;  %v6987_v16 = vld [vmem:[#allocation7 + $0x64] sm:$0xf]  ;;  %v5822_v17 = vld [vmem:[#allocation7 + $0x78] sm:$0xf0]  ;;  %p7522_p8 = pneg %p7521_p4 }
  0x8b   : > { %2609 = vmatpush.bf16.msrb.mxu2 %v5873_v31  ;;  %10531 = vst [vmem:[#allocation25_spill] sm:$0xff] %v7839_v12  ;;  %v7845_v15 = vor.u32 %v6946_v10, %v5662_v11  ;;  %v6588_v18 = vld [vmem:[#allocation7 + $0x660] sm:$0xf]  ;;  %v5825_v19 = vor.u32 %v6987_v16, %v5822_v17  ;;  %v7182_v20 = vld [vmem:[#allocation7 + $0x674] sm:$0xf0] }
  0x8c   : > { %2325 = vmatmul.bf16.gmra.mxu0 %v7799_v24  ;;  %2658 = vmatpush.bf16.msrb.mxu3 %v6065_v36  ;;  %10532 = vst [vmem:[#allocation26_spill] sm:$0xff] %v7841_v13  ;;  %v7035_v21 = vld [vmem:[#allocation7 + $0x1e4] sm:$0xf]  ;;  %v6014_v22 = vld [vmem:[#allocation7 + $0x1f8] sm:$0xf0]  ;;  %v6589_v23 = vor.u32 %v7182_v20, %v6588_v18  ;;  %p7527_p10 = pnand %p7526_p2, %p7522_p8 }
  0x8d   : > { %2374 = vmatmul.bf16.gmra.mxu1 %v7801_v25  ;;  %2512 = vmatpush.bf16.msrb.mxu0 %v6613_v63  ;;  %v6017_v28 = vor.u32 %v7035_v21, %v6014_v22  ;;  %v6780_v29 = vld [vmem:[#allocation7 + $0x7e0] sm:$0xf]  ;;  %v7230_v30 = vld [vmem:[#allocation7 + $0x7f4] sm:$0xf0]  ;;  %v6951_v34 = vld [vmem:[%s7747_s14 + $0xc4] sm:$0xf] }
  0x8e   : > { %2423 = vmatmul.bf16.gmra.mxu2 %v7803_v26  ;;  %2561 = vmatpush.bf16.msrb.mxu1 %v6805_v3  ;;  %v6781_v31 = vor.u32 %v7230_v30, %v6780_v29  ;;  %v5676_v32 = vld [vmem:[%s7747_s14 + $0xc0] sm:$0xf]  ;;  %v6954_v33 = vld [vmem:[%s7747_s14 + $0xd4] sm:$0xf0]  ;;  %v5678_v35 = vld [vmem:[%s7747_s14 + $0xd8] sm:$0xf0] }
  0x8f   : > { %2472 = vmatmul.bf16.gmra.mxu3 %v7805_v27  ;;  %2610 = vmatpush.bf16.msrb.mxu2 %v5849_v59  ;;  %v5684_v36 = vld [vmem:[%s7747_s14 + $0xc8] sm:$0xf]  ;;  %v6955_v37 = vld [vmem:[%s7747_s14 + $0xdc] sm:$0xf0]  ;;  %v6952_v38 = vld [vmem:[%s7747_s14 + $0xcc] sm:$0xf]  ;;  %v7859_v40 = vor.u32 %v6954_v33, %v5676_v32  ;;  %v7861_v41 = vor.u32 %v6951_v34, %v5678_v35 }
  0x90   : > { %2659 = vmatpush.bf16.msrb.mxu3 %v6041_v0  ;;  %v5686_v39 = vld [vmem:[%s7747_s14 + $0xe0] sm:$0xf0]  ;;  %v7863_v42 = vor.u32 %v6955_v37, %v5684_v36  ;;  %v6981_v44 = vld [vmem:[#allocation7 + $0x34] sm:$0xf]  ;;  %v5798_v45 = vld [vmem:[#allocation7 + $0x48] sm:$0xf0] }
  0x91   : > { %2513 = vmatpush.bf16.msrb.mxu0 %v6589_v23  ;;  %10533 = vst [vmem:[#allocation27_spill] sm:$0xff] %v7859_v40  ;;  %v7865_v43 = vor.u32 %v6952_v38, %v5686_v39  ;;  %v6564_v46 = vld [vmem:[#allocation7 + $0x630] sm:$0xf]  ;;  %v5801_v47 = vor.u32 %v6981_v44, %v5798_v45  ;;  %v7176_v55 = vld [vmem:[#allocation7 + $0x644] sm:$0xf0] }
  0x92   : > { %2562 = vmatpush.bf16.msrb.mxu1 %v6781_v31  ;;  %10534 = vst [vmem:[#allocation28_spill] sm:$0xff] %v7861_v41  ;;  %v7029_v56 = vld [vmem:[#allocation7 + $0x1b4] sm:$0xf]  ;;  %v5990_v58 = vld [vmem:[#allocation7 + $0x1c8] sm:$0xf0]  ;;  %v6565_v59 = vor.u32 %v7176_v55, %v6564_v46 }
  0x93   : > { %2611 = vmatpush.bf16.msrb.mxu2 %v5825_v19  ;;  %v5993_v60 = vor.u32 %v7029_v56, %v5990_v58  ;;  %v6756_v61 = vld [vmem:[#allocation7 + $0x7b0] sm:$0xf]  ;;  %v7224_v62 = vld [vmem:[#allocation7 + $0x7c4] sm:$0xf0]  ;;  %v6957_v2 = vld [vmem:[%s7747_s14 + $0xf4] sm:$0xf] }
  0x94   : > { %2660 = vmatpush.bf16.msrb.mxu3 %v6017_v28  ;;  %v6757_v63 = vor.u32 %v7224_v62, %v6756_v61  ;;  %v5700_v0 = vld [vmem:[%s7747_s14 + $0xf0] sm:$0xf]  ;;  %v6960_v1 = vld [vmem:[%s7747_s14 + $0x104] sm:$0xf0]  ;;  %v5702_v3 = vld [vmem:[%s7747_s14 + $0x108] sm:$0xf0] }
  0x95   : > { %2514 = vmatpush.bf16.msrb.mxu0 %v6565_v59  ;;  %v5708_v4 = vld [vmem:[%s7747_s14 + $0xf8] sm:$0xf]  ;;  %v6961_v5 = vld [vmem:[%s7747_s14 + $0x10c] sm:$0xf0]  ;;  %v6958_v6 = vld [vmem:[%s7747_s14 + $0xfc] sm:$0xf]  ;;  %v7879_v8 = vor.u32 %v6960_v1, %v5700_v0  ;;  %v7881_v9 = vor.u32 %v6957_v2, %v5702_v3 }
  0x96   : > { %2563 = vmatpush.bf16.msrb.mxu1 %v6757_v63  ;;  %v5710_v7 = vld [vmem:[%s7747_s14 + $0x110] sm:$0xf0]  ;;  %v7883_v10 = vor.u32 %v6961_v5, %v5708_v4  ;;  %v6975_v16 = vld [vmem:[#allocation7 + $0x4] sm:$0xf]  ;;  %v5774_v17 = vld [vmem:[#allocation7 + $0x18] sm:$0xf0] }
  0x97   : > { %2612 = vmatpush.bf16.msrb.mxu2 %v5801_v47  ;;  %10535 = vst [vmem:[#allocation29_spill] sm:$0xff] %v7879_v8  ;;  %v7885_v11 = vor.u32 %v6958_v6, %v5710_v7  ;;  %v6540_v18 = vld [vmem:[#allocation7 + $0x600] sm:$0xf]  ;;  %v5777_v19 = vor.u32 %v6975_v16, %v5774_v17  ;;  %v7170_v20 = vld [vmem:[#allocation7 + $0x614] sm:$0xf0] }
  0x98   : > { %2661 = vmatpush.bf16.msrb.mxu3 %v5993_v60  ;;  %10536 = vst [vmem:[#allocation30_spill] sm:$0xff] %v7881_v9  ;;  %v7023_v21 = vld [vmem:[#allocation7 + $0x184] sm:$0xf]  ;;  %v5966_v22 = vld [vmem:[#allocation7 + $0x198] sm:$0xf0]  ;;  %v6541_v23 = vor.u32 %v7170_v20, %v6540_v18 }
  0x99   : > { %v5969_v28 = vor.u32 %v7023_v21, %v5966_v22  ;;  %v6732_v29 = vld [vmem:[#allocation7 + $0x780] sm:$0xf]  ;;  %v7218_v30 = vld [vmem:[#allocation7 + $0x794] sm:$0xf0]  ;;  %v6963_v34 = vld [vmem:[%s7747_s14 + $0x124] sm:$0xf] }
  0x9a   : > { %v6733_v31 = vor.u32 %v7218_v30, %v6732_v29  ;;  %2515 = vmatpush.bf16.msrb.mxu0 %v6541_v23  ;;  %v5724_v32 = vld [vmem:[%s7747_s14 + $0x120] sm:$0xf]  ;;  %v6966_v33 = vld [vmem:[%s7747_s14 + $0x134] sm:$0xf0]  ;;  %v5726_v35 = vld [vmem:[%s7747_s14 + $0x138] sm:$0xf0] }
  0x9b   : > { %2613 = vmatpush.bf16.msrb.mxu2 %v5777_v19  ;;  %v5732_v36 = vld [vmem:[%s7747_s14 + $0x128] sm:$0xf]  ;;  %v6967_v37 = vld [vmem:[%s7747_s14 + $0x13c] sm:$0xf0]  ;;  %v6964_v38 = vld [vmem:[%s7747_s14 + $0x12c] sm:$0xf]  ;;  %v7899_v44 = vor.u32 %v6966_v33, %v5724_v32  ;;  %v7901_v45 = vor.u32 %v6963_v34, %v5726_v35 }
  0x9c   : > { %2330 = vmatmul.bf16.gmra.mxu0 %v7819_v49  ;;  %2662 = vmatpush.bf16.msrb.mxu3 %v5969_v28  ;;  %v5734_v39 = vld [vmem:[%s7747_s14 + $0x140] sm:$0xf0]  ;;  %v7903_v46 = vor.u32 %v6967_v37, %v5732_v36  ;;  %v7209_v55 = vld [vmem:[#allocation7 + $0x754] sm:$0xf]  ;;  %v6710_v56 = vld [vmem:[#allocation7 + $0x768] sm:$0xf0] }
  0x9d   : > { %2379 = vmatmul.bf16.gmra.mxu1 %v7821_v50  ;;  %10537 = vst [vmem:[#allocation31_spill] sm:$0xff] %v7899_v44  ;;  %v7905_v47 = vor.u32 %v6964_v38, %v5734_v39  ;;  %v7113_v58 = vld [vmem:[#allocation7 + $0x454] sm:$0xf]  ;;  %v6713_v59 = vor.u32 %v7209_v55, %v6710_v56  ;;  %v6326_v60 = vld [vmem:[#allocation7 + $0x468] sm:$0xf0] }
  0x9e   : > { %2428 = vmatmul.bf16.gmra.mxu2 %v7823_v51  ;;  %2564 = vmatpush.bf16.msrb.mxu1 %v6733_v31  ;;  %10538 = vst [vmem:[#allocation32_spill] sm:$0xff] %v7901_v45  ;;  %v7257_v61 = vld [vmem:[#allocation7 + $0x8d4] sm:$0xf]  ;;  %v6902_v62 = vld [vmem:[#allocation7 + $0x8e8] sm:$0xf0]  ;;  %v6329_v63 = vor.u32 %v7113_v58, %v6326_v60 }
  0x9f   : > { %2477 = vmatmul.bf16.gmra.mxu3 %v7825_v52  ;;  %v6905_v0 = vor.u32 %v7257_v61, %v6902_v62  ;;  %2802 = vmatpush.bf16.msra.mxu2 %v6713_v59  ;;  %v7161_v1 = vld [vmem:[#allocation7 + $0x5d4] sm:$0xf]  ;;  %v6518_v2 = vld [vmem:[#allocation7 + $0x5e8] sm:$0xf0]  ;;  %v5748_v4 = vld [vmem:[%s7747_s14 + $0x150] sm:$0xf] }
  0xa0   : > { %2704 = vmatpush.bf16.msra.mxu0 %v6329_v63  ;;  %v6521_v3 = vor.u32 %v7161_v1, %v6518_v2  ;;  %v6972_v5 = vld [vmem:[%s7747_s14 + $0x164] sm:$0xf0]  ;;  %v6969_v6 = vld [vmem:[%s7747_s14 + $0x154] sm:$0xf]  ;;  %v5750_v7 = vld [vmem:[%s7747_s14 + $0x168] sm:$0xf0] }
  0xa1   : > { %2851 = vmatpush.bf16.msra.mxu3 %v6905_v0  ;;  %v5756_v16 = vld [vmem:[%s7747_s14 + $0x158] sm:$0xf]  ;;  %v6973_v17 = vld [vmem:[%s7747_s14 + $0x16c] sm:$0xf0]  ;;  %v6970_v18 = vld [vmem:[%s7747_s14 + $0x15c] sm:$0xf]  ;;  %v7919_v20 = vor.u32 %v6972_v5, %v5748_v4  ;;  %v7921_v21 = vor.u32 %v6969_v6, %v5750_v7 }
  0xa2   : > { %2753 = vmatpush.bf16.msra.mxu1 %v6521_v3  ;;  %v5758_v19 = vld [vmem:[%s7747_s14 + $0x170] sm:$0xf0]  ;;  %v7923_v22 = vor.u32 %v6973_v17, %v5756_v16  ;;  %v7203_v28 = vld [vmem:[#allocation7 + $0x724] sm:$0xf]  ;;  %v6686_v29 = vld [vmem:[#allocation7 + $0x738] sm:$0xf0] }
  0xa3   : > { %10539 = vst [vmem:[#allocation33_spill] sm:$0xff] %v7919_v20  ;;  %v7925_v23 = vor.u32 %v6970_v18, %v5758_v19  ;;  %v7107_v30 = vld [vmem:[#allocation7 + $0x424] sm:$0xf]  ;;  %v6689_v31 = vor.u32 %v7203_v28, %v6686_v29  ;;  %v6302_v32 = vld [vmem:[#allocation7 + $0x438] sm:$0xf0] }
  0xa4   : > { %10540 = vst [vmem:[#allocation34_spill] sm:$0xff] %v7921_v21  ;;  %v7251_v33 = vld [vmem:[#allocation7 + $0x8a4] sm:$0xf]  ;;  %v6878_v34 = vld [vmem:[#allocation7 + $0x8b8] sm:$0xf0]  ;;  %v6305_v35 = vor.u32 %v7107_v30, %v6302_v32 }
  0xa5   : > { %10541 = vst [vmem:[#allocation35_spill] sm:$0xff] %v7923_v22  ;;  %v6881_v36 = vor.u32 %v7251_v33, %v6878_v34  ;;  %2803 = vmatpush.bf16.msra.mxu2 %v6689_v31  ;;  %v7155_v37 = vld [vmem:[#allocation7 + $0x5a4] sm:$0xf]  ;;  %v6494_v38 = vld [vmem:[#allocation7 + $0x5b8] sm:$0xf0] }
  0xa6   : > { %10542 = vst [vmem:[#allocation36_spill] sm:$0xff] %v7925_v23  ;;  %2705 = vmatpush.bf16.msra.mxu0 %v6305_v35  ;;  %v6497_v39 = vor.u32 %v7155_v37, %v6494_v38  ;;  %v5596_v55 = vld [vmem:[%s7747_s14 + $0x10] sm:$0xf]  ;;  %v6932_v56 = vld [vmem:[%s7747_s14 + $0x24] sm:$0xf0] }
  0xa7   : > { %2852 = vmatpush.bf16.msra.mxu3 %v6881_v36  ;;  %v6929_v58 = vld [vmem:[%s7747_s14 + $0x14] sm:$0xf]  ;;  %v5598_v59 = vld [vmem:[%s7747_s14 + $0x28] sm:$0xf0]  ;;  %v7935_v60 = vor.u32 %v6932_v56, %v5596_v55  ;;  %v5620_v36 = vld [vmem:[%s7747_s14 + $0x40] sm:$0xf] }
  0xa8   : > { %2754 = vmatpush.bf16.msra.mxu1 %v6497_v39  ;;  %v7937_v62 = vor.u32 %v6929_v58, %v5598_v59  ;;  %v7197_v1 = vld [vmem:[#allocation7 + $0x6f4] sm:$0xf]  ;;  %v6662_v2 = vld [vmem:[#allocation7 + $0x708] sm:$0xf0]  ;;  %v6938_v37 = vld [vmem:[%s7747_s14 + $0x54] sm:$0xf0] }
  0xa9   : > { %v7101_v3 = vld [vmem:[#allocation7 + $0x3f4] sm:$0xf]  ;;  %v6665_v4 = vor.u32 %v7197_v1, %v6662_v2  ;;  %v6278_v5 = vld [vmem:[#allocation7 + $0x408] sm:$0xf0]  ;;  %v6935_v38 = vld [vmem:[%s7747_s14 + $0x44] sm:$0xf]  ;;  %v7949_v56 = vor.u32 %v6938_v37, %v5620_v36 }
  0xaa   : > { %10543 = vst [vmem:[#allocation37_spill] sm:$0xff] %v7937_v62  ;;  %v7245_v6 = vld [vmem:[#allocation7 + $0x874] sm:$0xf]  ;;  %v6854_v7 = vld [vmem:[#allocation7 + $0x888] sm:$0xf0]  ;;  %v6281_v17 = vor.u32 %v7101_v3, %v6278_v5 }
  0xab   : > { %v6857_v18 = vor.u32 %v7245_v6, %v6854_v7  ;;  %2804 = vmatpush.bf16.msra.mxu2 %v6665_v4  ;;  %v7149_v33 = vld [vmem:[#allocation7 + $0x574] sm:$0xf]  ;;  %v6470_v34 = vld [vmem:[#allocation7 + $0x588] sm:$0xf0]  ;;  %v5622_v39 = vld [vmem:[%s7747_s14 + $0x58] sm:$0xf0] }
  0xac   : > { %2335 = vmatmul.bf16.gmra.mxu0 %v7839_v12  ;;  %v6473_v35 = vor.u32 %v7149_v33, %v6470_v34  ;;  %v7191_v3 = vld [vmem:[#allocation7 + $0x6c4] sm:$0xf]  ;;  %v6638_v4 = vld [vmem:[#allocation7 + $0x6d8] sm:$0xf0] }
  0xad   : > { %2384 = vmatmul.bf16.gmra.mxu1 %v7841_v13  ;;  %2706 = vmatpush.bf16.msra.mxu0 %v6281_v17  ;;  %v7095_v5 = vld [vmem:[#allocation7 + $0x3c4] sm:$0xf]  ;;  %v6641_v6 = vor.u32 %v7191_v3, %v6638_v4  ;;  %v6254_v7 = vld [vmem:[#allocation7 + $0x3d8] sm:$0xf0] }
  0xae   : > { %2433 = vmatmul.bf16.gmra.mxu2 %v7843_v14  ;;  %2853 = vmatpush.bf16.msra.mxu3 %v6857_v18  ;;  %v6830_v17 = vld [vmem:[#allocation7 + $0x858] sm:$0xf0]  ;;  %v7143_v36 = vld [vmem:[#allocation7 + $0x544] sm:$0xf] }
  0xaf   : > { %2482 = vmatmul.bf16.gmra.mxu3 %v7845_v15  ;;  %2755 = vmatpush.bf16.msra.mxu1 %v6473_v35  ;;  %v6446_v37 = vld [vmem:[#allocation7 + $0x558] sm:$0xf0] }
  0xb0   : > { %2805 = vmatpush.bf16.msra.mxu2 %v6641_v6 }
  0xbc   : > { %2340 = vmatmul.bf16.gmra.mxu0 %v7859_v40 }
  0xbd   : > { %2389 = vmatmul.bf16.gmra.mxu1 %v7861_v41 }
  0xbe   : > { %2438 = vmatmul.bf16.gmra.mxu2 %v7863_v42 }
  0xbf   : > { %2487 = vmatmul.bf16.gmra.mxu3 %v7865_v43 }
  0xcc   : > { %2345 = vmatmul.bf16.gmra.mxu0 %v7879_v8 }
  0xcd   : > { %2394 = vmatmul.bf16.gmra.mxu1 %v7881_v9 }
  0xce   : > { %2443 = vmatmul.bf16.gmra.mxu2 %v7883_v10 }
  0xcf   : > { %2492 = vmatmul.bf16.gmra.mxu3 %v7885_v11 }
  0xdc   : > { %2350 = vmatmul.bf16.gmra.mxu0 %v7899_v44 }
  0xdd   : > { %2399 = vmatmul.bf16.gmra.mxu1 %v7901_v45 }
  0xde   : > { %2448 = vmatmul.bf16.gmra.mxu2 %v7903_v46 }
  0xdf   : > { %2497 = vmatmul.bf16.gmra.mxu3 %v7905_v47 }
  0xec   : > { %2355 = vmatmul.bf16.gmra.mxu0 %v7919_v20 }
  0xed   : > { %2404 = vmatmul.bf16.gmra.mxu1 %v7921_v21 }
  0xee   : > { %2453 = vmatmul.bf16.gmra.mxu2 %v7923_v22 }
  0xef   : > { %2502 = vmatmul.bf16.gmra.mxu3 %v7925_v23 }
  0xf9   : > { %v2321_v61 = vpop.f32.mrf.mxu0 }
  0xfa   : > { %v2370_v63 = vpop.f32.mrf.mxu1 }
  0xfb   : > { %v2371_v0 = vadd.f32 %v2370_v63, %v2321_v61  ;;  %v7951_v63 = vor.u32 %v6935_v38, %v5622_v39  ;;  %v6449_v38 = vor.u32 %v7143_v36, %v6446_v37  ;;  %v5644_v39 = vld [vmem:[%s7747_s14 + $0x70] sm:$0xf] }
  0xfc   : > { %2516 = vmatmul.bf16.vlgmr.msrb.gmra.mxu0 %v7935_v60 }
  0xfd   : > { %2565 = vmatmul.bf16.vlgmr.msrb.gmra.mxu1 %v7937_v62 }
  0xfe   : > { %2614 = vmatmul.bf16.vlgmr.msrb.gmra.mxu2 %v7779_v48  ;;  %2756 = vmatpush.bf16.msra.mxu1 %v6449_v38  ;;  %v5766_v48 = vld [vmem:[%s7747_s14 + $0x178] sm:$0xf0] }
  0xff   : > { %2663 = vmatmul.bf16.vlgmr.msrb.gmra.mxu3 %v7781_v53  ;;  %v6965_v53 = vld [vmem:[%s7747_s14 + $0x134] sm:$0xf] }
 0x101   : > { %v2419_v16 = vpop.f32.mrf.mxu2  ;;  %v2323_v29 = vpop.f32.mrf.mxu0 }
 0x102   : > { %v2420_v19 = vadd.f32 %v2419_v16, %v2371_v0  ;;  %v2468_v28 = vpop.f32.mrf.mxu3  ;;  %v2372_v30 = vpop.f32.mrf.mxu1  ;;  %v7239_v16 = vld [vmem:[#allocation7 + $0x844] sm:$0xf] }
 0x103   : > { %v2373_v32 = vadd.f32 %v2372_v30, %v2323_v29 }
 0x104   : > { %v7943_v31 = vadd.f32 %v2468_v28, %v2420_v19  ;;  %v6257_v19 = vor.u32 %v7095_v5, %v6254_v7  ;;  %v6833_v28 = vor.u32 %v7239_v16, %v6830_v17  ;;  %v7185_v17 = vld [vmem:[#allocation7 + $0x694] sm:$0xf] }
 0x106   : > { %2707 = vmatpush.bf16.msra.mxu0 %v6257_v19  ;;  %2854 = vmatpush.bf16.msra.mxu3 %v6833_v28  ;;  %v7089_v19 = vld [vmem:[#allocation7 + $0x394] sm:$0xf] }
 0x109   : > { %v2421_v55 = vpop.f32.mrf.mxu2  ;;  %v2326_v61 = vpop.f32.mrf.mxu0 }
 0x10a   : > { %v2422_v58 = vadd.f32 %v2421_v55, %v2373_v32  ;;  %v2470_v59 = vpop.f32.mrf.mxu3  ;;  %v2375_v0 = vpop.f32.mrf.mxu1  ;;  %v6944_v55 = vld [vmem:[%s7747_s14 + $0x84] sm:$0xf0] }
 0x10b   : > { %v2376_v2 = vadd.f32 %v2375_v0, %v2326_v61  ;;  %v7965_v0 = vor.u32 %v6944_v55, %v5644_v39 }
 0x10c   : > { %v7953_v1 = vadd.f32 %v2470_v59, %v2422_v58  ;;  %2521 = vmatmul.bf16.gmra.mxu0 %v7949_v56  ;;  %v6941_v58 = vld [vmem:[%s7747_s14 + $0x74] sm:$0xf]  ;;  %v5646_v59 = vld [vmem:[%s7747_s14 + $0x88] sm:$0xf0] }
 0x10d   : > { %2570 = vmatmul.bf16.gmra.mxu1 %v7951_v63  ;;  %v7967_v5 = vor.u32 %v6941_v58, %v5646_v59 }
 0x10e   : > { %2619 = vmatmul.bf16.gmra.mxu2 %v7799_v24  ;;  %v6968_v24 = vld [vmem:[%s7747_s14 + $0x144] sm:$0xf0] }
 0x10f   : > { %2668 = vmatmul.bf16.gmra.mxu3 %v7801_v25  ;;  %v6959_v25 = vld [vmem:[%s7747_s14 + $0x104] sm:$0xf] }
 0x111   : > { %v2424_v18 = vpop.f32.mrf.mxu2  ;;  %v2328_v32 = vpop.f32.mrf.mxu0 }
 0x112   : > { %v2425_v29 = vadd.f32 %v2424_v18, %v2376_v2  ;;  %v2473_v30 = vpop.f32.mrf.mxu3  ;;  %v2377_v33 = vpop.f32.mrf.mxu1  ;;  %v6614_v18 = vld [vmem:[#allocation7 + $0x6a8] sm:$0xf0] }
 0x113   : > { %v2378_v35 = vadd.f32 %v2377_v33, %v2328_v32  ;;  %v6617_v28 = vor.u32 %v7185_v17, %v6614_v18  ;;  %v6806_v32 = vld [vmem:[#allocation7 + $0x828] sm:$0xf0]  ;;  %v6947_v17 = vld [vmem:[%s7747_s14 + $0xa4] sm:$0xf]  ;;  %v5670_v18 = vld [vmem:[%s7747_s14 + $0xb8] sm:$0xf0] }
 0x114   : > { %v7959_v34 = vadd.f32 %v2473_v30, %v2425_v29  ;;  %v6230_v29 = vld [vmem:[#allocation7 + $0x3a8] sm:$0xf0]  ;;  %v7233_v30 = vld [vmem:[#allocation7 + $0x814] sm:$0xf] }
 0x115   : > { %v6809_v36 = vor.u32 %v7233_v30, %v6806_v32  ;;  %2806 = vmatpush.bf16.msra.mxu2 %v6617_v28  ;;  %v7983_v32 = vor.u32 %v6947_v17, %v5670_v18 }
 0x117   : > { %2855 = vmatpush.bf16.msra.mxu3 %v6809_v36 }
 0x119   : > { %v2426_v61 = vpop.f32.mrf.mxu2  ;;  %v2331_v4 = vpop.f32.mrf.mxu0 }
 0x11a   : > { %v2427_v2 = vadd.f32 %v2426_v61, %v2378_v35  ;;  %v2475_v3 = vpop.f32.mrf.mxu3  ;;  %v2380_v6 = vpop.f32.mrf.mxu1  ;;  %v6233_v35 = vor.u32 %v7089_v19, %v6230_v29  ;;  %v7137_v61 = vld [vmem:[#allocation7 + $0x514] sm:$0xf] }
 0x11b   : > { %v2381_v16 = vadd.f32 %v2380_v6, %v2331_v4  ;;  %v5668_v4 = vld [vmem:[%s7747_s14 + $0xa0] sm:$0xf]  ;;  %v6950_v6 = vld [vmem:[%s7747_s14 + $0xb4] sm:$0xf0] }
 0x11c   : > { %v7969_v7 = vadd.f32 %v2475_v3, %v2427_v2  ;;  %2526 = vmatmul.bf16.gmra.mxu0 %v7965_v0  ;;  %v6422_v2 = vld [vmem:[#allocation7 + $0x528] sm:$0xf0]  ;;  %v7981_v29 = vor.u32 %v6950_v6, %v5668_v4 }
 0x11d   : > { %2575 = vmatmul.bf16.gmra.mxu1 %v7967_v5  ;;  %2708 = vmatpush.bf16.msra.mxu0 %v6233_v35  ;;  %v6425_v3 = vor.u32 %v7137_v61, %v6422_v2  ;;  %v7227_v61 = vld [vmem:[#allocation7 + $0x7e4] sm:$0xf]  ;;  %v6782_v2 = vld [vmem:[#allocation7 + $0x7f8] sm:$0xf0] }
 0x11e   : > { %2624 = vmatmul.bf16.gmra.mxu2 %v7819_v49  ;;  %v6785_v6 = vor.u32 %v7227_v61, %v6782_v2  ;;  %v6962_v49 = vld [vmem:[%s7747_s14 + $0x114] sm:$0xf0] }
 0x11f   : > { %2673 = vmatmul.bf16.gmra.mxu3 %v7821_v50  ;;  %2757 = vmatpush.bf16.msra.mxu1 %v6425_v3  ;;  %v6953_v50 = vld [vmem:[%s7747_s14 + $0xd4] sm:$0xf] }
 0x120   : > { %2856 = vmatpush.bf16.msra.mxu3 %v6785_v6 }
 0x121   : > { %v2429_v33 = vpop.f32.mrf.mxu2  ;;  %v2333_v39 = vpop.f32.mrf.mxu0 }
 0x122   : > { %v2430_v37 = vadd.f32 %v2429_v33, %v2381_v16  ;;  %v2478_v38 = vpop.f32.mrf.mxu3  ;;  %v2382_v55 = vpop.f32.mrf.mxu1 }
 0x123   : > { %v2383_v59 = vadd.f32 %v2382_v55, %v2333_v39  ;;  %v7083_v39 = vld [vmem:[#allocation7 + $0x364] sm:$0xf] }
 0x124   : > { %v7975_v58 = vadd.f32 %v2478_v38, %v2430_v37  ;;  %v7179_v37 = vld [vmem:[#allocation7 + $0x664] sm:$0xf]  ;;  %v6590_v38 = vld [vmem:[#allocation7 + $0x678] sm:$0xf0] }
 0x125   : > { %v6593_v55 = vor.u32 %v7179_v37, %v6590_v38  ;;  %v6398_v37 = vld [vmem:[#allocation7 + $0x4f8] sm:$0xf0] }
 0x127   : > { %2807 = vmatpush.bf16.msra.mxu2 %v6593_v55 }
 0x129   : > { %v2431_v19 = vpop.f32.mrf.mxu2  ;;  %v2336_v28 = vpop.f32.mrf.mxu0 }
 0x12a   : > { %v2432_v16 = vadd.f32 %v2431_v19, %v2383_v59  ;;  %v2480_v30 = vpop.f32.mrf.mxu3  ;;  %v2385_v33 = vpop.f32.mrf.mxu1  ;;  %v6206_v59 = vld [vmem:[#allocation7 + $0x378] sm:$0xf0] }
 0x12b   : > { %v2386_v36 = vadd.f32 %v2385_v33, %v2336_v28  ;;  %v6209_v4 = vor.u32 %v7083_v39, %v6206_v59  ;;  %v7131_v33 = vld [vmem:[#allocation7 + $0x4e4] sm:$0xf]  ;;  %v5694_v39 = vld [vmem:[%s7747_s14 + $0xe8] sm:$0xf0] }
 0x12c   : > { %v7985_v35 = vadd.f32 %v2480_v30, %v2432_v16  ;;  %2531 = vmatmul.bf16.gmra.mxu0 %v7981_v29  ;;  %v6401_v38 = vor.u32 %v7131_v33, %v6398_v37 }
 0x12d   : > { %2580 = vmatmul.bf16.gmra.mxu1 %v7983_v32  ;;  %2709 = vmatpush.bf16.msra.mxu0 %v6209_v4 }
 0x12e   : > { %2629 = vmatmul.bf16.gmra.mxu2 %v7839_v12  ;;  %v6956_v12 = vld [vmem:[%s7747_s14 + $0xe4] sm:$0xf0]  ;;  %2758 = vmatpush.bf16.msra.mxu1 %v6401_v38 }
 0x12f   : > { %2678 = vmatmul.bf16.gmra.mxu3 %v7841_v13  ;;  %v5692_v13 = vld [vmem:[%s7747_s14 + $0xd0] sm:$0xf] }
 0x130   : > { %v7997_v61 = vor.u32 %v6956_v12, %v5692_v13  ;;  %v6566_v12 = vld [vmem:[#allocation7 + $0x648] sm:$0xf0]  ;;  %v7077_v13 = vld [vmem:[#allocation7 + $0x334] sm:$0xf] }
 0x131   : > { %v2434_v3 = vpop.f32.mrf.mxu2  ;;  %v2338_v19 = vpop.f32.mrf.mxu0 }
 0x132   : > { %v2435_v17 = vadd.f32 %v2434_v3, %v2386_v36  ;;  %v2483_v18 = vpop.f32.mrf.mxu3  ;;  %v2387_v16 = vpop.f32.mrf.mxu1  ;;  %v7999_v3 = vor.u32 %v6953_v50, %v5694_v39  ;;  %v6758_v50 = vld [vmem:[#allocation7 + $0x7c8] sm:$0xf0] }
 0x133   : > { %v2388_v28 = vadd.f32 %v2387_v16, %v2338_v19  ;;  %v6182_v16 = vld [vmem:[#allocation7 + $0x348] sm:$0xf0] }
 0x134   : > { %v7991_v30 = vadd.f32 %v2483_v18, %v2435_v17  ;;  %v7173_v18 = vld [vmem:[#allocation7 + $0x634] sm:$0xf]  ;;  %v6185_v37 = vor.u32 %v7077_v13, %v6182_v16  ;;  %v5718_v13 = vld [vmem:[%s7747_s14 + $0x118] sm:$0xf0] }
 0x135   : > { %v6569_v19 = vor.u32 %v7173_v18, %v6566_v12  ;;  %v7125_v18 = vld [vmem:[#allocation7 + $0x4b4] sm:$0xf]  ;;  %v6374_v12 = vld [vmem:[#allocation7 + $0x4c8] sm:$0xf0] }
 0x136   : > { %2710 = vmatpush.bf16.msra.mxu0 %v6185_v37 }
 0x137   : > { %2808 = vmatpush.bf16.msra.mxu2 %v6569_v19 }
 0x139   : > { %v2436_v59 = vpop.f32.mrf.mxu2  ;;  %v2341_v55 = vpop.f32.mrf.mxu0 }
 0x13a   : > { %v2437_v36 = vadd.f32 %v2436_v59, %v2388_v28  ;;  %v2485_v2 = vpop.f32.mrf.mxu3  ;;  %v2390_v4 = vpop.f32.mrf.mxu1  ;;  %v7221_v28 = vld [vmem:[#allocation7 + $0x7b4] sm:$0xf] }
 0x13b   : > { %v2391_v17 = vadd.f32 %v2390_v4, %v2341_v55  ;;  %v6761_v38 = vor.u32 %v7221_v28, %v6758_v50 }
 0x13c   : > { %v8001_v6 = vadd.f32 %v2485_v2, %v2437_v36  ;;  %2536 = vmatmul.bf16.gmra.mxu0 %v7997_v61 }
 0x13d   : > { %2585 = vmatmul.bf16.gmra.mxu1 %v7999_v3  ;;  %2857 = vmatpush.bf16.msra.mxu3 %v6761_v38 }
 0x13e   : > { %2634 = vmatmul.bf16.gmra.mxu2 %v7859_v40  ;;  %v5716_v40 = vld [vmem:[%s7747_s14 + $0x100] sm:$0xf] }
 0x13f   : > { %2683 = vmatmul.bf16.gmra.mxu3 %v7861_v41  ;;  %v6377_v41 = vor.u32 %v7125_v18, %v6374_v12  ;;  %v8013_v28 = vor.u32 %v6962_v49, %v5716_v40  ;;  %v6542_v49 = vld [vmem:[#allocation7 + $0x618] sm:$0xf0]  ;;  %v7071_v40 = vld [vmem:[#allocation7 + $0x304] sm:$0xf] }
 0x141   : > { %v2439_v33 = vpop.f32.mrf.mxu2  ;;  %v2343_v36 = vpop.f32.mrf.mxu0  ;;  %2759 = vmatpush.bf16.msra.mxu1 %v6377_v41  ;;  %v7167_v41 = vld [vmem:[#allocation7 + $0x604] sm:$0xf] }
 0x142   : > { %v2440_v39 = vadd.f32 %v2439_v33, %v2391_v17  ;;  %v2488_v59 = vpop.f32.mrf.mxu3  ;;  %v2392_v2 = vpop.f32.mrf.mxu1  ;;  %v8015_v33 = vor.u32 %v6959_v25, %v5718_v13  ;;  %v6734_v25 = vld [vmem:[#allocation7 + $0x798] sm:$0xf0] }
 0x143   : > { %v2393_v4 = vadd.f32 %v2392_v2, %v2343_v36  ;;  %v6158_v36 = vld [vmem:[#allocation7 + $0x318] sm:$0xf0]  ;;  %v7215_v2 = vld [vmem:[#allocation7 + $0x784] sm:$0xf] }
 0x144   : > { %v8007_v55 = vadd.f32 %v2488_v59, %v2440_v39  ;;  %10544 = vst [vmem:[#allocation38_spill] sm:$0xff] %v8015_v33  ;;  %v6545_v59 = vor.u32 %v7167_v41, %v6542_v49  ;;  %v6161_v18 = vor.u32 %v7071_v40, %v6158_v36  ;;  %v6737_v12 = vor.u32 %v7215_v2, %v6734_v25  ;;  %v7119_v41 = vld [vmem:[#allocation7 + $0x484] sm:$0xf]  ;;  %v6350_v49 = vld [vmem:[#allocation7 + $0x498] sm:$0xf0] }
 0x145   : > { %v5742_v40 = vld [vmem:[%s7747_s14 + $0x148] sm:$0xf0] }
 0x146   : > { %2809 = vmatpush.bf16.msra.mxu2 %v6545_v59  ;;  %2711 = vmatpush.bf16.msra.mxu0 %v6161_v18 }
 0x147   : > { %2858 = vmatpush.bf16.msra.mxu3 %v6737_v12 }
 0x149   : > { %v2441_v16 = vpop.f32.mrf.mxu2  ;;  %v2346_v19 = vpop.f32.mrf.mxu0 }
 0x14a   : > { %v2442_v17 = vadd.f32 %v2441_v16, %v2393_v4  ;;  %v2490_v50 = vpop.f32.mrf.mxu3  ;;  %v2395_v37 = vpop.f32.mrf.mxu1 }
 0x14b   : > { %v2396_v39 = vadd.f32 %v2395_v37, %v2346_v19 }
 0x14c   : > { %v8017_v38 = vadd.f32 %v2490_v50, %v2442_v17  ;;  %2541 = vmatmul.bf16.gmra.mxu0 %v8013_v28 }
 0x14d   : > { %2590 = vmatmul.bf16.gmra.mxu1 %v8015_v33 }
 0x14e   : > { %2639 = vmatmul.bf16.gmra.mxu2 %v7879_v8  ;;  %v5740_v8 = vld [vmem:[%s7747_s14 + $0x130] sm:$0xf] }
 0x14f   : > { %2688 = vmatmul.bf16.gmra.mxu3 %v7881_v9  ;;  %v6353_v9 = vor.u32 %v7119_v41, %v6350_v49  ;;  %v8029_v2 = vor.u32 %v6968_v24, %v5740_v8  ;;  %v6332_v24 = vld [vmem:[#allocation7 + $0x458] sm:$0xf]  ;;  %v7117_v8 = vld [vmem:[#allocation7 + $0x46c] sm:$0xf0] }
 0x150   : > { %v7021_v41 = vld [vmem:[#allocation7 + $0x16c] sm:$0xf0]  ;;  %v6524_v49 = vld [vmem:[#allocation7 + $0x5d8] sm:$0xf] }
 0x151   : > { %v2444_v4 = vpop.f32.mrf.mxu2  ;;  %v2348_v17 = vpop.f32.mrf.mxu0  ;;  %2760 = vmatpush.bf16.msra.mxu1 %v6353_v9  ;;  %10545 = vst [vmem:[#allocation39_spill] sm:$0xff] %v8029_v2 }
 0x152   : > { %v2445_v13 = vadd.f32 %v2444_v4, %v2396_v39  ;;  %v2493_v16 = vpop.f32.mrf.mxu3  ;;  %v2397_v50 = vpop.f32.mrf.mxu1  ;;  %v8031_v4 = vor.u32 %v6965_v53, %v5742_v40  ;;  %v6333_v53 = vor.u32 %v7117_v8, %v6332_v24  ;;  %v6974_v24 = vld [vmem:[%s7747_s14 + $0x174] sm:$0xf0]  ;;  %v6971_v8 = vld [vmem:[%s7747_s14 + $0x164] sm:$0xf] }
 0x153   : > { %v2398_v37 = vadd.f32 %v2397_v50, %v2348_v17 }
 0x154   : > { %v8023_v19 = vadd.f32 %v2493_v16, %v2445_v13  ;;  %10546 = vst [vmem:[#allocation40_spill] sm:$0xff] %v8031_v4  ;;  %2998 = vmatpush.bf16.msrb.mxu2 %v6333_v53 }
 0x159   : > { %v2446_v36 = vpop.f32.mrf.mxu2  ;;  %v2351_v59 = vpop.f32.mrf.mxu0 }
 0x15a   : > { %v2447_v39 = vadd.f32 %v2446_v36, %v2398_v37  ;;  %v2495_v25 = vpop.f32.mrf.mxu3  ;;  %v2400_v18 = vpop.f32.mrf.mxu1  ;;  %v5948_v37 = vld [vmem:[#allocation7 + $0x158] sm:$0xf] }
 0x15b   : > { %v2401_v13 = vadd.f32 %v2400_v18, %v2351_v59  ;;  %v5949_v36 = vor.u32 %v7021_v41, %v5948_v37  ;;  %v7069_v59 = vld [vmem:[#allocation7 + $0x2ec] sm:$0xf0] }
 0x15c   : > { %v8033_v12 = vadd.f32 %v2495_v25, %v2447_v39  ;;  %2546 = vmatmul.bf16.gmra.mxu0 %v8029_v2  ;;  %v7165_v39 = vld [vmem:[#allocation7 + $0x5ec] sm:$0xf0]  ;;  %v6140_v25 = vld [vmem:[#allocation7 + $0x2d8] sm:$0xf]  ;;  %v8047_v2 = vor.u32 %v6971_v8, %v5766_v48  ;;  %v7063_v8 = vld [vmem:[#allocation7 + $0x2bc] sm:$0xf0] }
 0x15d   : > { %2595 = vmatmul.bf16.gmra.mxu1 %v8031_v4  ;;  %2900 = vmatpush.bf16.msrb.mxu0 %v5949_v36 }
 0x15e   : > { %2644 = vmatmul.bf16.gmra.mxu2 %v7899_v44  ;;  %v5764_v44 = vld [vmem:[%s7747_s14 + $0x160] sm:$0xf]  ;;  %10548 = vst [vmem:[#allocation42_spill] sm:$0xff] %v8047_v2 }
 0x15f   : > { %2693 = vmatmul.bf16.gmra.mxu3 %v7901_v45  ;;  %v8045_v22 = vor.u32 %v6974_v24, %v5764_v44  ;;  %v6308_v44 = vld [vmem:[#allocation7 + $0x428] sm:$0xf] }
 0x160   : > { %v6116_v24 = vld [vmem:[#allocation7 + $0x2a8] sm:$0xf] }
 0x161   : > { %v2449_v9 = vpop.f32.mrf.mxu2  ;;  %v2353_v50 = vpop.f32.mrf.mxu0  ;;  %10547 = vst [vmem:[#allocation41_spill] sm:$0xff] %v8045_v22 }
 0x162   : > { %v2450_v16 = vadd.f32 %v2449_v9, %v2401_v13  ;;  %v2498_v17 = vpop.f32.mrf.mxu3  ;;  %v2402_v40 = vpop.f32.mrf.mxu1  ;;  %v6525_v13 = vor.u32 %v7165_v39, %v6524_v49  ;;  %v6141_v9 = vor.u32 %v7069_v59, %v6140_v25  ;;  %v7111_v49 = vld [vmem:[#allocation7 + $0x43c] sm:$0xf0]  ;;  %v6500_v25 = vld [vmem:[#allocation7 + $0x5a8] sm:$0xf] }
 0x163   : > { %v2403_v45 = vadd.f32 %v2402_v40, %v2353_v50  ;;  %v6309_v36 = vor.u32 %v7111_v49, %v6308_v44  ;;  %v7015_v39 = vld [vmem:[#allocation7 + $0x13c] sm:$0xf0] }
 0x164   : > { %v8039_v18 = vadd.f32 %v2498_v17, %v2450_v16  ;;  %3047 = vmatpush.bf16.msrb.mxu3 %v6525_v13  ;;  %2949 = vmatpush.bf16.msrb.mxu1 %v6141_v9  ;;  %v7159_v59 = vld [vmem:[#allocation7 + $0x5bc] sm:$0xf0] }
 0x165   : > { %v6501_v9 = vor.u32 %v7159_v59, %v6500_v25  ;;  %2999 = vmatpush.bf16.msrb.mxu2 %v6309_v36  ;;  %v5900_v36 = vld [vmem:[#allocation7 + $0xf8] sm:$0xf]  ;;  %v7009_v59 = vld [vmem:[#allocation7 + $0x10c] sm:$0xf0] }
 0x168   : > { %3048 = vmatpush.bf16.msrb.mxu3 %v6501_v9 }
 0x169   : > { %v2451_v23 = vpop.f32.mrf.mxu2  ;;  %v2356_v4 = vpop.f32.mrf.mxu0 }
 0x16a   : > { %v2452_v37 = vadd.f32 %v2451_v23, %v2403_v45  ;;  %v2500_v41 = vpop.f32.mrf.mxu3  ;;  %v2405_v16 = vpop.f32.mrf.mxu1  ;;  %v5924_v45 = vld [vmem:[#allocation7 + $0x128] sm:$0xf] }
 0x16b   : > { %v2406_v50 = vadd.f32 %v2405_v16, %v2356_v4  ;;  %v5925_v13 = vor.u32 %v7015_v39, %v5924_v45  ;;  %v6117_v16 = vor.u32 %v7063_v8, %v6116_v24  ;;  %v5901_v24 = vor.u32 %v7009_v59, %v5900_v36  ;;  %v5876_v59 = vld [vmem:[#allocation7 + $0xc8] sm:$0xf] }
 0x16c   : > { %v8049_v17 = vadd.f32 %v2500_v41, %v2452_v37  ;;  %2551 = vmatmul.bf16.gmra.mxu0 %v8045_v22 }
 0x16d   : > { %2600 = vmatmul.bf16.gmra.mxu1 %v8047_v2  ;;  %2901 = vmatpush.bf16.msrb.mxu0 %v5925_v13 }
 0x16e   : > { %2649 = vmatmul.bf16.gmra.mxu2 %v7919_v20  ;;  %2950 = vmatpush.bf16.msrb.mxu1 %v6117_v16  ;;  %v7057_v16 = vld [vmem:[#allocation7 + $0x28c] sm:$0xf0] }
 0x16f   : > { %2698 = vmatmul.bf16.gmra.mxu3 %v7921_v21 }
 0x171   : > { %v2454_v53 = vpop.f32.mrf.mxu2  ;;  %v2358_v48 = vpop.f32.mrf.mxu0  ;;  %2902 = vmatpush.bf16.msrb.mxu0 %v5901_v24  ;;  %v7147_v24 = vld [vmem:[#allocation7 + $0x55c] sm:$0xf0] }
 0x172   : > { %v2455_v23 = vadd.f32 %v2454_v53, %v2406_v50  ;;  %v2503_v40 = vpop.f32.mrf.mxu3  ;;  %v2407_v4 = vpop.f32.mrf.mxu1 }
 0x173   : > { %v2408_v41 = vadd.f32 %v2407_v4, %v2358_v48  ;;  %v7105_v48 = vld [vmem:[#allocation7 + $0x40c] sm:$0xf0] }
 0x174   : > { %v8055_v37 = vadd.f32 %v2503_v40, %v2455_v23  ;;  %v6284_v40 = vld [vmem:[#allocation7 + $0x3f8] sm:$0xf]  ;;  %v7153_v4 = vld [vmem:[#allocation7 + $0x58c] sm:$0xf0] }
 0x179   : > { %v2456_v50 = vpop.f32.mrf.mxu2  ;;  %v2517_v44 = vpop.f32.mrf.mxu0 }
 0x17a   : > { %v2457_v53 = vadd.f32 %v2456_v50, %v2408_v41  ;;  %v2505_v21 = vpop.f32.mrf.mxu3  ;;  %v2518_v49 = vadd.f32 %v2517_v44, %v7943_v31  ;;  %v2566_v20 = vpop.f32.mrf.mxu1  ;;  %v6285_v31 = vor.u32 %v7105_v48, %v6284_v40  ;;  %v6092_v41 = vld [vmem:[#allocation7 + $0x278] sm:$0xf] }
 0x17b   : > { %v6093_v50 = vor.u32 %v7057_v16, %v6092_v41 }
 0x17c   : > { %v8058_v2 = vadd.f32 %v2505_v21, %v2457_v53  ;;  %v8060_v45 = vadd.f32 %v2566_v20, %v2518_v49  ;;  %2712 = vmatmul.bf16.vlgmr.msra.gmra.mxu0 %v7783_v54  ;;  %v6476_v21 = vld [vmem:[#allocation7 + $0x578] sm:$0xf]  ;;  %3000 = vmatpush.bf16.msrb.mxu2 %v6285_v31  ;;  %v7099_v31 = vld [vmem:[#allocation7 + $0x3dc] sm:$0xf0] }
 0x17d   : > { %2761 = vmatmul.bf16.vlgmr.msra.gmra.mxu1 %v7785_v57  ;;  %v6477_v8 = vor.u32 %v7153_v4, %v6476_v21 }
 0x17e   : > { %10549 = vst [vmem:[#allocation43_spill] sm:$0xff] %v8060_v45  ;;  %2810 = vmatmul.bf16.vlgmr.msra.gmra.mxu2 %v7935_v60  ;;  %2951 = vmatpush.bf16.msrb.mxu1 %v6093_v50 }
 0x17f   : > { %2859 = vmatmul.bf16.vlgmr.msra.gmra.mxu3 %v7937_v62 }
 0x180   : > { %3049 = vmatpush.bf16.msrb.mxu3 %v6477_v8 }
 0x181   : > { %v2615_v23 = vpop.f32.mrf.mxu2  ;;  %v2519_v25 = vpop.f32.mrf.mxu0 }
 0x182   : > { %v2664_v39 = vpop.f32.mrf.mxu3  ;;  %v2520_v13 = vadd.f32 %v2519_v25, %v7953_v1  ;;  %v2568_v9 = vpop.f32.mrf.mxu1  ;;  %v6260_v25 = vld [vmem:[#allocation7 + $0x3c8] sm:$0xf] }
 0x183   : > { %v8066_v20 = vadd.f32 %v2664_v39, %v2615_v23 }
 0x184   : > { %v8069_v53 = vadd.f32 %v2568_v9, %v2520_v13  ;;  %v6261_v13 = vor.u32 %v7099_v31, %v6260_v25  ;;  %v7003_v9 = vld [vmem:[#allocation7 + $0xdc] sm:$0xf0] }
 0x185   : > { %v5877_v50 = vor.u32 %v7003_v9, %v5876_v59  ;;  %v5852_v9 = vld [vmem:[#allocation7 + $0x98] sm:$0xf] }
 0x186   : > { %10550 = vst [vmem:[#allocation44_spill] sm:$0xff] %v8069_v53  ;;  %3001 = vmatpush.bf16.msrb.mxu2 %v6261_v13  ;;  %v7093_v13 = vld [vmem:[#allocation7 + $0x3ac] sm:$0xf0] }
 0x187   : > { %2903 = vmatpush.bf16.msrb.mxu0 %v5877_v50 }
 0x189   : > { %v2617_v44 = vpop.f32.mrf.mxu2  ;;  %v2522_v40 = vpop.f32.mrf.mxu0 }
 0x18a   : > { %v2666_v49 = vpop.f32.mrf.mxu3  ;;  %v2523_v23 = vadd.f32 %v2522_v40, %v7959_v34  ;;  %v2571_v1 = vpop.f32.mrf.mxu1  ;;  %v6452_v34 = vld [vmem:[#allocation7 + $0x548] sm:$0xf]  ;;  %v7051_v40 = vld [vmem:[#allocation7 + $0x25c] sm:$0xf0] }
 0x18b   : > { %v8071_v48 = vadd.f32 %v2666_v49, %v2617_v44  ;;  %v6453_v44 = vor.u32 %v7147_v24, %v6452_v34  ;;  %v6068_v49 = vld [vmem:[#allocation7 + $0x248] sm:$0xf] }
 0x18c   : > { %v8074_v39 = vadd.f32 %v2571_v1, %v2523_v23  ;;  %2717 = vmatmul.bf16.gmra.mxu0 %v7803_v26  ;;  %v6069_v23 = vor.u32 %v7051_v40, %v6068_v49 }
 0x18d   : > { %2766 = vmatmul.bf16.gmra.mxu1 %v7805_v27  ;;  %3050 = vmatpush.bf16.msrb.mxu3 %v6453_v44 }
 0x18e   : > { %10551 = vst [vmem:[#allocation45_spill] sm:$0xff] %v8074_v39  ;;  %2815 = vmatmul.bf16.gmra.mxu2 %v7949_v56  ;;  %2952 = vmatpush.bf16.msrb.mxu1 %v6069_v23 }
 0x18f   : > { %2864 = vmatmul.bf16.gmra.mxu3 %v7951_v63 }
 0x191   : > { %v2620_v36 = vpop.f32.mrf.mxu2  ;;  %v2524_v4 = vpop.f32.mrf.mxu0 }
 0x192   : > { %v2669_v21 = vpop.f32.mrf.mxu3  ;;  %v2525_v41 = vadd.f32 %v2524_v4, %v7969_v7  ;;  %v2573_v16 = vpop.f32.mrf.mxu1  ;;  %v6236_v4 = vld [vmem:[#allocation7 + $0x398] sm:$0xf] }
 0x193   : > { %v8080_v8 = vadd.f32 %v2669_v21, %v2620_v36 }
 0x194   : > { %v8083_v1 = vadd.f32 %v2573_v16, %v2525_v41  ;;  %v6237_v41 = vor.u32 %v7093_v13, %v6236_v4  ;;  %v6997_v16 = vld [vmem:[#allocation7 + $0xac] sm:$0xf0] }
 0x195   : > { %v5853_v40 = vor.u32 %v6997_v16, %v5852_v9  ;;  %v5828_v16 = vld [vmem:[#allocation7 + $0x68] sm:$0xf] }
 0x196   : > { %10552 = vst [vmem:[#allocation46_spill] sm:$0xff] %v8083_v1  ;;  %3002 = vmatpush.bf16.msrb.mxu2 %v6237_v41  ;;  %v7087_v41 = vld [vmem:[#allocation7 + $0x37c] sm:$0xf0] }
 0x197   : > { %2904 = vmatpush.bf16.msrb.mxu0 %v5853_v40 }
 0x199   : > { %v2622_v25 = vpop.f32.mrf.mxu2  ;;  %v2527_v39 = vpop.f32.mrf.mxu0 }
 0x19a   : > { %v2671_v31 = vpop.f32.mrf.mxu3  ;;  %v2528_v36 = vadd.f32 %v2527_v39, %v7975_v58  ;;  %v2576_v7 = vpop.f32.mrf.mxu1  ;;  %v6428_v58 = vld [vmem:[#allocation7 + $0x518] sm:$0xf]  ;;  %v7141_v39 = vld [vmem:[#allocation7 + $0x52c] sm:$0xf0] }
 0x19b   : > { %v8085_v53 = vadd.f32 %v2671_v31, %v2622_v25  ;;  %v6429_v23 = vor.u32 %v7141_v39, %v6428_v58  ;;  %v6044_v25 = vld [vmem:[#allocation7 + $0x218] sm:$0xf]  ;;  %v7045_v31 = vld [vmem:[#allocation7 + $0x22c] sm:$0xf0] }
 0x19c   : > { %v8088_v21 = vadd.f32 %v2576_v7, %v2528_v36  ;;  %2722 = vmatmul.bf16.gmra.mxu0 %v7823_v51  ;;  %v6045_v36 = vor.u32 %v7045_v31, %v6044_v25 }
 0x19d   : > { %2771 = vmatmul.bf16.gmra.mxu1 %v7825_v52  ;;  %3051 = vmatpush.bf16.msrb.mxu3 %v6429_v23 }
 0x19e   : > { %10553 = vst [vmem:[#allocation47_spill] sm:$0xff] %v8088_v21  ;;  %2820 = vmatmul.bf16.gmra.mxu2 %v7965_v0  ;;  %2953 = vmatpush.bf16.msrb.mxu1 %v6045_v36 }
 0x19f   : > { %2869 = vmatmul.bf16.gmra.mxu3 %v7967_v5 }
 0x1a1   : > { %v2625_v59 = vpop.f32.mrf.mxu2  ;;  %v2529_v24 = vpop.f32.mrf.mxu0 }
 0x1a2   : > { %v2674_v34 = vpop.f32.mrf.mxu3  ;;  %v2530_v44 = vadd.f32 %v2529_v24, %v7985_v35  ;;  %v2578_v49 = vpop.f32.mrf.mxu1  ;;  %v6212_v24 = vld [vmem:[#allocation7 + $0x368] sm:$0xf] }
 0x1a3   : > { %v8094_v50 = vadd.f32 %v2674_v34, %v2625_v59 }
 0x1a4   : > { %v8097_v7 = vadd.f32 %v2578_v49, %v2530_v44  ;;  %v6213_v44 = vor.u32 %v7087_v41, %v6212_v24  ;;  %v6991_v49 = vld [vmem:[#allocation7 + $0x7c] sm:$0xf0] }
 0x1a5   : > { %v5829_v31 = vor.u32 %v6991_v49, %v5828_v16  ;;  %v5804_v49 = vld [vmem:[#allocation7 + $0x38] sm:$0xf] }
 0x1a6   : > { %10554 = vst [vmem:[#allocation48_spill] sm:$0xff] %v8097_v7  ;;  %3003 = vmatpush.bf16.msrb.mxu2 %v6213_v44  ;;  %v7081_v44 = vld [vmem:[#allocation7 + $0x34c] sm:$0xf0] }
 0x1a7   : > { %2905 = vmatpush.bf16.msrb.mxu0 %v5829_v31 }
 0x1a9   : > { %v2627_v4 = vpop.f32.mrf.mxu2  ;;  %v2532_v21 = vpop.f32.mrf.mxu0 }
 0x1aa   : > { %v2676_v13 = vpop.f32.mrf.mxu3  ;;  %v2533_v59 = vadd.f32 %v2532_v21, %v7991_v30  ;;  %v2581_v35 = vpop.f32.mrf.mxu1  ;;  %v6404_v30 = vld [vmem:[#allocation7 + $0x4e8] sm:$0xf]  ;;  %v7135_v21 = vld [vmem:[#allocation7 + $0x4fc] sm:$0xf0] }
 0x1ab   : > { %v8099_v1 = vadd.f32 %v2676_v13, %v2627_v4  ;;  %v6405_v36 = vor.u32 %v7135_v21, %v6404_v30  ;;  %v6020_v4 = vld [vmem:[#allocation7 + $0x1e8] sm:$0xf]  ;;  %v7039_v13 = vld [vmem:[#allocation7 + $0x1fc] sm:$0xf0] }
 0x1ac   : > { %v8102_v34 = vadd.f32 %v2581_v35, %v2533_v59  ;;  %2727 = vmatmul.bf16.gmra.mxu0 %v7843_v14  ;;  %v6021_v59 = vor.u32 %v7039_v13, %v6020_v4 }
 0x1ad   : > { %2776 = vmatmul.bf16.gmra.mxu1 %v7845_v15  ;;  %3052 = vmatpush.bf16.msrb.mxu3 %v6405_v36 }
 0x1ae   : > { %10555 = vst [vmem:[#allocation49_spill] sm:$0xff] %v8102_v34  ;;  %2825 = vmatmul.bf16.gmra.mxu2 %v7981_v29  ;;  %2954 = vmatpush.bf16.msrb.mxu1 %v6021_v59 }
 0x1af   : > { %2874 = vmatmul.bf16.gmra.mxu3 %v7983_v32 }
 0x1b1   : > { %v2630_v9 = vpop.f32.mrf.mxu2  ;;  %v2534_v39 = vpop.f32.mrf.mxu0 }
 0x1b2   : > { %v2679_v58 = vpop.f32.mrf.mxu3  ;;  %v2535_v23 = vadd.f32 %v2534_v39, %v8001_v6  ;;  %v2583_v25 = vpop.f32.mrf.mxu1  ;;  %v6188_v39 = vld [vmem:[#allocation7 + $0x338] sm:$0xf] }
 0x1b3   : > { %v8108_v40 = vadd.f32 %v2679_v58, %v2630_v9 }
 0x1b4   : > { %v8111_v35 = vadd.f32 %v2583_v25, %v2535_v23  ;;  %v6189_v23 = vor.u32 %v7081_v44, %v6188_v39  ;;  %v6985_v25 = vld [vmem:[#allocation7 + $0x4c] sm:$0xf0] }
 0x1b5   : > { %v5805_v13 = vor.u32 %v6985_v25, %v5804_v49  ;;  %v5780_v25 = vld [vmem:[#allocation7 + $0x8] sm:$0xf] }
 0x1b6   : > { %10556 = vst [vmem:[#allocation50_spill] sm:$0xff] %v8111_v35  ;;  %3004 = vmatpush.bf16.msrb.mxu2 %v6189_v23  ;;  %v7075_v23 = vld [vmem:[#allocation7 + $0x31c] sm:$0xf0] }
 0x1b7   : > { %2906 = vmatpush.bf16.msrb.mxu0 %v5805_v13 }
 0x1b9   : > { %v2632_v24 = vpop.f32.mrf.mxu2  ;;  %v2537_v34 = vpop.f32.mrf.mxu0 }
 0x1ba   : > { %v2681_v41 = vpop.f32.mrf.mxu3  ;;  %v2538_v9 = vadd.f32 %v2537_v34, %v8007_v55  ;;  %v2586_v6 = vpop.f32.mrf.mxu1  ;;  %v6380_v55 = vld [vmem:[#allocation7 + $0x4b8] sm:$0xf]  ;;  %v7129_v34 = vld [vmem:[#allocation7 + $0x4cc] sm:$0xf0] }
 0x1bb   : > { %v8113_v7 = vadd.f32 %v2681_v41, %v2632_v24  ;;  %v6381_v59 = vor.u32 %v7129_v34, %v6380_v55  ;;  %v5996_v24 = vld [vmem:[#allocation7 + $0x1b8] sm:$0xf]  ;;  %v7033_v41 = vld [vmem:[#allocation7 + $0x1cc] sm:$0xf0] }
 0x1bc   : > { %v8116_v58 = vadd.f32 %v2586_v6, %v2538_v9  ;;  %2732 = vmatmul.bf16.gmra.mxu0 %v7863_v42  ;;  %v5997_v9 = vor.u32 %v7033_v41, %v5996_v24 }
 0x1bd   : > { %2781 = vmatmul.bf16.gmra.mxu1 %v7865_v43  ;;  %3053 = vmatpush.bf16.msrb.mxu3 %v6381_v59 }
 0x1be   : > { %10557 = vst [vmem:[#allocation51_spill] sm:$0xff] %v8116_v58  ;;  %2830 = vmatmul.bf16.gmra.mxu2 %v7997_v61  ;;  %2955 = vmatpush.bf16.msrb.mxu1 %v5997_v9 }
 0x1bf   : > { %2879 = vmatmul.bf16.gmra.mxu3 %v7999_v3 }
 0x1c1   : > { %v2635_v16 = vpop.f32.mrf.mxu2  ;;  %v2539_v21 = vpop.f32.mrf.mxu0 }
 0x1c2   : > { %v2684_v30 = vpop.f32.mrf.mxu3  ;;  %v2540_v36 = vadd.f32 %v2539_v21, %v8017_v38  ;;  %v2588_v4 = vpop.f32.mrf.mxu1  ;;  %v6164_v21 = vld [vmem:[#allocation7 + $0x308] sm:$0xf] }
 0x1c3   : > { %v8122_v31 = vadd.f32 %v2684_v30, %v2635_v16 }
 0x1c4   : > { %v8125_v6 = vadd.f32 %v2588_v4, %v2540_v36  ;;  %v6165_v36 = vor.u32 %v7075_v23, %v6164_v21  ;;  %v6979_v4 = vld [vmem:[#allocation7 + $0x1c] sm:$0xf0] }
 0x1c5   : > { %v5781_v41 = vor.u32 %v6979_v4, %v5780_v25  ;;  %v10562_v25 = vld [vmem:[#allocation39_spill] sm:$0xff]  ;;  %v5950_v4 = vld [vmem:[#allocation7 + $0x170] sm:$0xf0] }
 0x1c6   : > { %10558 = vst [vmem:[#allocation52_spill] sm:$0xff] %v8125_v6  ;;  %3005 = vmatpush.bf16.msrb.mxu2 %v6165_v36  ;;  %v7018_v36 = vld [vmem:[#allocation7 + $0x15c] sm:$0xf] }
 0x1c7   : > { %2907 = vmatpush.bf16.msrb.mxu0 %v5781_v41  ;;  %v6142_v41 = vld [vmem:[#allocation7 + $0x2f0] sm:$0xf0] }
 0x1c9   : > { %v2637_v39 = vpop.f32.mrf.mxu2  ;;  %v2542_v58 = vpop.f32.mrf.mxu0 }
 0x1ca   : > { %v2686_v44 = vpop.f32.mrf.mxu3  ;;  %v2543_v16 = vadd.f32 %v2542_v58, %v8023_v19  ;;  %v2591_v38 = vpop.f32.mrf.mxu1  ;;  %v6356_v19 = vld [vmem:[#allocation7 + $0x488] sm:$0xf]  ;;  %v7123_v58 = vld [vmem:[#allocation7 + $0x49c] sm:$0xf0] }
 0x1cb   : > { %v8127_v35 = vadd.f32 %v2686_v44, %v2637_v39  ;;  %v6357_v9 = vor.u32 %v7123_v58, %v6356_v19  ;;  %v5972_v39 = vld [vmem:[#allocation7 + $0x188] sm:$0xf]  ;;  %v7027_v44 = vld [vmem:[#allocation7 + $0x19c] sm:$0xf0]  ;;  %v6716_v19 = vld [vmem:[#allocation7 + $0x758] sm:$0xf]  ;;  %v5953_v58 = vor.u32 %v7018_v36, %v5950_v4 }
 0x1cc   : > { %v8130_v30 = vadd.f32 %v2591_v38, %v2543_v16  ;;  %2737 = vmatmul.bf16.gmra.mxu0 %v7883_v10  ;;  %v5973_v16 = vor.u32 %v7027_v44, %v5972_v39 }
 0x1cd   : > { %2786 = vmatmul.bf16.gmra.mxu1 %v7885_v11  ;;  %3054 = vmatpush.bf16.msrb.mxu3 %v6357_v9 }
 0x1ce   : > { %10559 = vst [vmem:[#allocation53_spill] sm:$0xff] %v8130_v30  ;;  %2835 = vmatmul.bf16.gmra.mxu2 %v8013_v28  ;;  %2956 = vmatpush.bf16.msrb.mxu1 %v5973_v16 }
 0x1cf   : > { %2884 = vmatmul.bf16.gmra.mxu3 %v8015_v33  ;;  %3194 = vmatpush.bf16.msra.mxu2 %v5953_v58  ;;  %v7249_v33 = vld [vmem:[#allocation7 + $0x88c] sm:$0xf0] }
 0x1d1   : > { %v2640_v49 = vpop.f32.mrf.mxu2  ;;  %v2544_v34 = vpop.f32.mrf.mxu0 }
 0x1d2   : > { %v2689_v55 = vpop.f32.mrf.mxu3  ;;  %v2545_v59 = vadd.f32 %v2544_v34, %v8033_v12  ;;  %v2593_v24 = vpop.f32.mrf.mxu1  ;;  %v10563_v34 = vld [vmem:[#allocation40_spill] sm:$0xff] }
 0x1d3   : > { %v8136_v13 = vadd.f32 %v2689_v55, %v2640_v49 }
 0x1d4   : > { %v8139_v38 = vadd.f32 %v2593_v24, %v2545_v59  ;;  %v7213_v59 = vld [vmem:[#allocation7 + $0x76c] sm:$0xf0]  ;;  %v7066_v24 = vld [vmem:[#allocation7 + $0x2dc] sm:$0xf] }
 0x1d6   : > { %10560 = vst [vmem:[#allocation54_spill] sm:$0xff] %v8139_v38  ;;  %v7261_v38 = vld [vmem:[#allocation7 + $0x8ec] sm:$0xf0] }
 0x1d9   : > { %v2642_v21 = vpop.f32.mrf.mxu2  ;;  %v2547_v30 = vpop.f32.mrf.mxu0 }
 0x1da   : > { %v2691_v23 = vpop.f32.mrf.mxu3  ;;  %v2548_v49 = vadd.f32 %v2547_v30, %v8039_v18  ;;  %v2596_v12 = vpop.f32.mrf.mxu1  ;;  %v6717_v18 = vor.u32 %v7213_v59, %v6716_v19  ;;  %v6145_v30 = vor.u32 %v7066_v24, %v6142_v41  ;;  %v10566_v41 = vld [vmem:[#allocation35_spill] sm:$0xff] }
 0x1db   : > { %v8141_v6 = vadd.f32 %v2691_v23, %v2642_v21 }
 0x1dc   : > { %v8144_v55 = vadd.f32 %v2596_v12, %v2548_v49  ;;  %2742 = vmatmul.bf16.gmra.mxu0 %v7903_v46  ;;  %3243 = vmatpush.bf16.msra.mxu3 %v6145_v30 }
 0x1dd   : > { %2791 = vmatmul.bf16.gmra.mxu1 %v7905_v47  ;;  %3096 = vmatpush.bf16.msra.mxu0 %v6717_v18 }
 0x1de   : > { %10561 = vst [vmem:[#allocation55_spill] sm:$0xff] %v8144_v55  ;;  %2840 = vmatmul.bf16.gmra.mxu2 %v10562_v25  ;;  %v6908_v55 = vld [vmem:[#allocation7 + $0x8d8] sm:$0xf] }
 0x1df   : > { %2889 = vmatmul.bf16.gmra.mxu3 %v10563_v34  ;;  %v6909_v58 = vor.u32 %v7261_v38, %v6908_v55  ;;  %v6884_v34 = vld [vmem:[#allocation7 + $0x8a8] sm:$0xf]  ;;  %v10570_v25 = vld [vmem:[#allocation17_spill] sm:$0xff] }
 0x1e1   : > { %v2645_v9 = vpop.f32.mrf.mxu2  ;;  %v2549_v44 = vpop.f32.mrf.mxu0  ;;  %3145 = vmatpush.bf16.msra.mxu1 %v6909_v58 }
 0x1e2   : > { %v2694_v39 = vpop.f32.mrf.mxu3  ;;  %v2550_v21 = vadd.f32 %v2549_v44, %v8049_v17  ;;  %v2598_v23 = vpop.f32.mrf.mxu1  ;;  %v10567_v17 = vld [vmem:[#allocation36_spill] sm:$0xff]  ;;  %v7012_v44 = vld [vmem:[#allocation7 + $0x12c] sm:$0xf] }
 0x1e3   : > { %v8150_v16 = vadd.f32 %v2694_v39, %v2645_v9  ;;  %v10568_v9 = vld [vmem:[#allocation42_spill] sm:$0xff] }
 0x1e4   : > { %v8153_v49 = vadd.f32 %v2598_v23, %v2550_v21  ;;  %v5926_v21 = vld [vmem:[#allocation7 + $0x140] sm:$0xf0]  ;;  %v6692_v23 = vld [vmem:[#allocation7 + $0x728] sm:$0xf] }
 0x1e6   : > { %10564 = vst [vmem:[#allocation56_spill] sm:$0xff] %v8153_v49 }
 0x1e9   : > { %v2647_v12 = vpop.f32.mrf.mxu2  ;;  %v2552_v4 = vpop.f32.mrf.mxu0 }
 0x1ea   : > { %v2696_v36 = vpop.f32.mrf.mxu3  ;;  %v2553_v19 = vadd.f32 %v2552_v4, %v8055_v37  ;;  %v2601_v59 = vpop.f32.mrf.mxu1  ;;  %v7060_v4 = vld [vmem:[#allocation7 + $0x2ac] sm:$0xf] }
 0x1eb   : > { %v8155_v45 = vadd.f32 %v2696_v36, %v2647_v12  ;;  %v5929_v12 = vor.u32 %v7012_v44, %v5926_v21  ;;  %v7207_v36 = vld [vmem:[#allocation7 + $0x73c] sm:$0xf0] }
 0x1ec   : > { %v8158_v24 = vadd.f32 %v2601_v59, %v2553_v19  ;;  %2747 = vmatmul.bf16.gmra.mxu0 %v10566_v41  ;;  %v6118_v19 = vld [vmem:[#allocation7 + $0x2c0] sm:$0xf0]  ;;  %v6693_v59 = vor.u32 %v7207_v36, %v6692_v23 }
 0x1ed   : > { %2796 = vmatmul.bf16.gmra.mxu1 %v10567_v17  ;;  %v6121_v58 = vor.u32 %v7060_v4, %v6118_v19  ;;  %3195 = vmatpush.bf16.msra.mxu2 %v5929_v12  ;;  %v10571_v23 = vld [vmem:[#allocation18_spill] sm:$0xff]  ;;  %v6668_v4 = vld [vmem:[#allocation7 + $0x6f8] sm:$0xf]  ;;  %v7201_v19 = vld [vmem:[#allocation7 + $0x70c] sm:$0xf0] }
 0x1ee   : > { %10565 = vst [vmem:[#allocation57_spill] sm:$0xff] %v8158_v24  ;;  %2845 = vmatmul.bf16.gmra.mxu2 %v8045_v22  ;;  %3097 = vmatpush.bf16.msra.mxu0 %v6693_v59  ;;  %v7054_v59 = vld [vmem:[#allocation7 + $0x27c] sm:$0xf] }
 0x1ef   : > { %2894 = vmatmul.bf16.gmra.mxu3 %v10568_v9 }
 0x1f0   : > { %3244 = vmatpush.bf16.msra.mxu3 %v6121_v58  ;;  %v6094_v58 = vld [vmem:[#allocation7 + $0x290] sm:$0xf0] }
 0x1f1   : > { %v2650_v18 = vpop.f32.mrf.mxu2  ;;  %v2554_v39 = vpop.f32.mrf.mxu0 }
 0x1f2   : > { %v2699_v30 = vpop.f32.mrf.mxu3  ;;  %v2555_v38 = vadd.f32 %v2554_v39, %v8058_v2  ;;  %v2603_v55 = vpop.f32.mrf.mxu1 }
 0x1f3   : > { %v8164_v37 = vadd.f32 %v2699_v30, %v2650_v18  ;;  %v7255_v18 = vld [vmem:[#allocation7 + $0x8bc] sm:$0xf0] }
 0x1f4   : > { %v8167_v24 = vadd.f32 %v2603_v55, %v2555_v38  ;;  %v6885_v44 = vor.u32 %v7255_v18, %v6884_v34 }
 0x1f6   : > { %10569 = vst [vmem:[#allocation35_spill] sm:$0xff] %v8167_v24  ;;  %3146 = vmatpush.bf16.msra.mxu1 %v6885_v44 }
 0x1f9   : > { %v2652_v49 = vpop.f32.mrf.mxu2  ;;  %v2713_v22 = vpop.f32.mrf.mxu0 }
 0x1fa   : > { %v2701_v9 = vpop.f32.mrf.mxu3  ;;  %v2714_v2 = vadd.f32 %v2713_v22, %v8066_v20  ;;  %v2762_v39 = vpop.f32.mrf.mxu1 }
 0x1fb   : > { %v8169_v30 = vadd.f32 %v2701_v9, %v2652_v49  ;;  %v7006_v49 = vld [vmem:[#allocation7 + $0xfc] sm:$0xf]  ;;  %v5902_v9 = vld [vmem:[#allocation7 + $0x110] sm:$0xf0] }
 0x1fc   : > { %v2763_v21 = vadd.f32 %v2762_v39, %v2714_v2  ;;  %2908 = vmatmul.bf16.vlgmr.msrb.gmra.mxu0 %v10570_v25  ;;  %v5905_v34 = vor.u32 %v7006_v49, %v5902_v9  ;;  %v6669_v2 = vor.u32 %v7201_v19, %v6668_v4  ;;  %v6097_v39 = vor.u32 %v7054_v59, %v6094_v58  ;;  %v10575_v4 = vld [vmem:[#allocation22_spill] sm:$0xff]  ;;  %v7000_v59 = vld [vmem:[#allocation7 + $0xcc] sm:$0xf] }
 0x1fd   : > { %2957 = vmatmul.bf16.vlgmr.msrb.gmra.mxu1 %v10571_v23  ;;  %v7195_v58 = vld [vmem:[#allocation7 + $0x6dc] sm:$0xf0] }
 0x1fe   : > { %3006 = vmatmul.bf16.vlgmr.msrb.gmra.mxu2 %v7783_v54  ;;  %3098 = vmatpush.bf16.msra.mxu0 %v6669_v2  ;;  %v6860_v54 = vld [vmem:[#allocation7 + $0x878] sm:$0xf]  ;;  %v7048_v2 = vld [vmem:[#allocation7 + $0x24c] sm:$0xf] }
 0x1ff   : > { %3055 = vmatmul.bf16.vlgmr.msrb.gmra.mxu3 %v7785_v57  ;;  %3196 = vmatpush.bf16.msra.mxu2 %v5905_v34  ;;  %v6861_v49 = vor.u32 %v7249_v33, %v6860_v54 }
 0x200   : > { %3245 = vmatpush.bf16.msra.mxu3 %v6097_v39  ;;  %v6070_v39 = vld [vmem:[#allocation7 + $0x260] sm:$0xf0] }
 0x201   : > { %v2811_v38 = vpop.f32.mrf.mxu2  ;;  %v2715_v36 = vpop.f32.mrf.mxu0  ;;  %3147 = vmatpush.bf16.msra.mxu1 %v6861_v49 }
 0x202   : > { %v2812_v55 = vadd.f32 %v2811_v38, %v2763_v21  ;;  %v2860_v12 = vpop.f32.mrf.mxu3  ;;  %v2716_v22 = vadd.f32 %v2715_v36, %v8071_v48  ;;  %v2764_v20 = vpop.f32.mrf.mxu1 }
 0x204   : > { %v8177_v18 = vadd.f32 %v2860_v12, %v2812_v55  ;;  %v2765_v44 = vadd.f32 %v2764_v20, %v2716_v22  ;;  %v10574_v12 = vld [vmem:[#allocation21_spill] sm:$0xff] }
 0x206   : > { %10572 = vst [vmem:[#allocation58_spill] sm:$0xff] %v8177_v18  ;;  %v7243_v18 = vld [vmem:[#allocation7 + $0x85c] sm:$0xf0] }
 0x209   : > { %v2813_v21 = vpop.f32.mrf.mxu2  ;;  %v2718_v57 = vpop.f32.mrf.mxu0 }
 0x20a   : > { %v2814_v38 = vadd.f32 %v2813_v21, %v2765_v44  ;;  %v2862_v24 = vpop.f32.mrf.mxu3  ;;  %v2719_v48 = vadd.f32 %v2718_v57, %v8080_v8  ;;  %v2767_v36 = vpop.f32.mrf.mxu1  ;;  %v5878_v57 = vld [vmem:[#allocation7 + $0xe0] sm:$0xf0]  ;;  %v6644_v8 = vld [vmem:[#allocation7 + $0x6c8] sm:$0xf] }
 0x20b   : > { %v6645_v21 = vor.u32 %v7195_v58, %v6644_v8  ;;  %v10579_v8 = vld [vmem:[#allocation24_spill] sm:$0xff] }
 0x20c   : > { %v8180_v9 = vadd.f32 %v2862_v24, %v2814_v38  ;;  %v2768_v55 = vadd.f32 %v2767_v36, %v2719_v48  ;;  %2913 = vmatmul.bf16.gmra.mxu0 %v10574_v12  ;;  %v5881_v24 = vor.u32 %v7000_v59, %v5878_v57  ;;  %v6073_v38 = vor.u32 %v7048_v2, %v6070_v39  ;;  %v6994_v2 = vld [vmem:[#allocation7 + $0x9c] sm:$0xf]  ;;  %v6620_v39 = vld [vmem:[#allocation7 + $0x698] sm:$0xf] }
 0x20d   : > { %2962 = vmatmul.bf16.gmra.mxu1 %v10575_v4  ;;  %3099 = vmatpush.bf16.msra.mxu0 %v6645_v21 }
 0x20e   : > { %10573 = vst [vmem:[#allocation59_spill] sm:$0xff] %v8180_v9  ;;  %3011 = vmatmul.bf16.gmra.mxu2 %v7803_v26  ;;  %3246 = vmatpush.bf16.msra.mxu3 %v6073_v38  ;;  %v6836_v9 = vld [vmem:[#allocation7 + $0x848] sm:$0xf]  ;;  %v7189_v38 = vld [vmem:[#allocation7 + $0x6ac] sm:$0xf0] }
 0x20f   : > { %3060 = vmatmul.bf16.gmra.mxu3 %v7805_v27  ;;  %3197 = vmatpush.bf16.msra.mxu2 %v5881_v24  ;;  %v6837_v59 = vor.u32 %v7243_v18, %v6836_v9 }
 0x211   : > { %v2816_v22 = vpop.f32.mrf.mxu2  ;;  %v2720_v19 = vpop.f32.mrf.mxu0  ;;  %3148 = vmatpush.bf16.msra.mxu1 %v6837_v59 }
 0x212   : > { %v2817_v20 = vadd.f32 %v2816_v22, %v2768_v55  ;;  %v2865_v34 = vpop.f32.mrf.mxu3  ;;  %v2721_v54 = vadd.f32 %v2720_v19, %v8085_v53  ;;  %v2769_v33 = vpop.f32.mrf.mxu1 }
 0x214   : > { %v8187_v44 = vadd.f32 %v2865_v34, %v2817_v20  ;;  %v2770_v48 = vadd.f32 %v2769_v33, %v2721_v54  ;;  %v10578_v34 = vld [vmem:[#allocation23_spill] sm:$0xff] }
 0x216   : > { %10576 = vst [vmem:[#allocation60_spill] sm:$0xff] %v8187_v44  ;;  %v7237_v44 = vld [vmem:[#allocation7 + $0x82c] sm:$0xf0] }
 0x219   : > { %v2818_v36 = vpop.f32.mrf.mxu2  ;;  %v2723_v22 = vpop.f32.mrf.mxu0 }
 0x21a   : > { %v2819_v49 = vadd.f32 %v2818_v36, %v2770_v48  ;;  %v2867_v55 = vpop.f32.mrf.mxu3  ;;  %v2724_v53 = vadd.f32 %v2723_v22, %v8094_v50  ;;  %v2772_v19 = vpop.f32.mrf.mxu1  ;;  %v5854_v50 = vld [vmem:[#allocation7 + $0xb0] sm:$0xf0]  ;;  %v7042_v48 = vld [vmem:[#allocation7 + $0x21c] sm:$0xf] }
 0x21b   : > { %v5857_v21 = vor.u32 %v6994_v2, %v5854_v50  ;;  %v6046_v36 = vld [vmem:[#allocation7 + $0x230] sm:$0xf0] }
 0x21c   : > { %v8190_v57 = vadd.f32 %v2867_v55, %v2819_v49  ;;  %v2773_v20 = vadd.f32 %v2772_v19, %v2724_v53  ;;  %2918 = vmatmul.bf16.gmra.mxu0 %v10578_v34  ;;  %v6621_v55 = vor.u32 %v7189_v38, %v6620_v39  ;;  %v6049_v22 = vor.u32 %v7042_v48, %v6046_v36  ;;  %v10583_v39 = vld [vmem:[#allocation26_spill] sm:$0xff]  ;;  %v6988_v48 = vld [vmem:[#allocation7 + $0x6c] sm:$0xf]  ;;  %v6596_v36 = vld [vmem:[#allocation7 + $0x668] sm:$0xf] }
 0x21d   : > { %2967 = vmatmul.bf16.gmra.mxu1 %v10579_v8  ;;  %3198 = vmatpush.bf16.msra.mxu2 %v5857_v21 }
 0x21e   : > { %10577 = vst [vmem:[#allocation61_spill] sm:$0xff] %v8190_v57  ;;  %3016 = vmatmul.bf16.gmra.mxu2 %v7823_v51  ;;  %3100 = vmatpush.bf16.msra.mxu0 %v6621_v55  ;;  %v6812_v57 = vld [vmem:[#allocation7 + $0x818] sm:$0xf] }
 0x21f   : > { %3065 = vmatmul.bf16.gmra.mxu3 %v7825_v52  ;;  %v6813_v2 = vor.u32 %v7237_v44, %v6812_v57 }
 0x220   : > { %3247 = vmatpush.bf16.msra.mxu3 %v6049_v22  ;;  %v7183_v22 = vld [vmem:[#allocation7 + $0x67c] sm:$0xf0] }
 0x221   : > { %v2821_v54 = vpop.f32.mrf.mxu2  ;;  %v2725_v58 = vpop.f32.mrf.mxu0  ;;  %3149 = vmatpush.bf16.msra.mxu1 %v6813_v2 }
 0x222   : > { %v2822_v33 = vadd.f32 %v2821_v54, %v2773_v20  ;;  %v2870_v24 = vpop.f32.mrf.mxu3  ;;  %v2726_v18 = vadd.f32 %v2725_v58, %v8099_v1  ;;  %v2774_v9 = vpop.f32.mrf.mxu1 }
 0x224   : > { %v8197_v49 = vadd.f32 %v2870_v24, %v2822_v33  ;;  %v2775_v53 = vadd.f32 %v2774_v9, %v2726_v18  ;;  %v10582_v24 = vld [vmem:[#allocation25_spill] sm:$0xff] }
 0x226   : > { %10580 = vst [vmem:[#allocation62_spill] sm:$0xff] %v8197_v49  ;;  %v7231_v49 = vld [vmem:[#allocation7 + $0x7fc] sm:$0xf0] }
 0x229   : > { %v2823_v19 = vpop.f32.mrf.mxu2  ;;  %v2728_v54 = vpop.f32.mrf.mxu0 }
 0x22a   : > { %v2824_v59 = vadd.f32 %v2823_v19, %v2775_v53  ;;  %v2872_v20 = vpop.f32.mrf.mxu3  ;;  %v2729_v1 = vadd.f32 %v2728_v54, %v8108_v40  ;;  %v2777_v58 = vpop.f32.mrf.mxu1  ;;  %v5830_v40 = vld [vmem:[#allocation7 + $0x80] sm:$0xf0]  ;;  %v7036_v53 = vld [vmem:[#allocation7 + $0x1ec] sm:$0xf] }
 0x22b   : > { %v5833_v55 = vor.u32 %v6988_v48, %v5830_v40  ;;  %v6022_v19 = vld [vmem:[#allocation7 + $0x200] sm:$0xf0] }
 0x22c   : > { %v8200_v50 = vadd.f32 %v2872_v20, %v2824_v59  ;;  %v2778_v33 = vadd.f32 %v2777_v58, %v2729_v1  ;;  %2923 = vmatmul.bf16.gmra.mxu0 %v10582_v24  ;;  %v6597_v20 = vor.u32 %v7183_v22, %v6596_v36  ;;  %v6025_v54 = vor.u32 %v7036_v53, %v6022_v19  ;;  %v10587_v36 = vld [vmem:[#allocation28_spill] sm:$0xff]  ;;  %v6982_v53 = vld [vmem:[#allocation7 + $0x3c] sm:$0xf]  ;;  %v6572_v19 = vld [vmem:[#allocation7 + $0x638] sm:$0xf] }
 0x22d   : > { %2972 = vmatmul.bf16.gmra.mxu1 %v10583_v39  ;;  %3199 = vmatpush.bf16.msra.mxu2 %v5833_v55 }
 0x22e   : > { %10581 = vst [vmem:[#allocation63_spill] sm:$0xff] %v8200_v50  ;;  %3021 = vmatmul.bf16.gmra.mxu2 %v7843_v14  ;;  %3101 = vmatpush.bf16.msra.mxu0 %v6597_v20  ;;  %v6788_v50 = vld [vmem:[#allocation7 + $0x7e8] sm:$0xf] }
 0x22f   : > { %3070 = vmatmul.bf16.gmra.mxu3 %v7845_v15  ;;  %v6789_v48 = vor.u32 %v7231_v49, %v6788_v50 }
 0x230   : > { %3248 = vmatpush.bf16.msra.mxu3 %v6025_v54  ;;  %v7177_v54 = vld [vmem:[#allocation7 + $0x64c] sm:$0xf0] }
 0x231   : > { %v2826_v18 = vpop.f32.mrf.mxu2  ;;  %v2730_v38 = vpop.f32.mrf.mxu0  ;;  %3150 = vmatpush.bf16.msra.mxu1 %v6789_v48 }
 0x232   : > { %v2827_v9 = vadd.f32 %v2826_v18, %v2778_v33  ;;  %v2875_v21 = vpop.f32.mrf.mxu3  ;;  %v2731_v44 = vadd.f32 %v2730_v38, %v8113_v7  ;;  %v2779_v57 = vpop.f32.mrf.mxu1 }
 0x234   : > { %v8207_v59 = vadd.f32 %v2875_v21, %v2827_v9  ;;  %v2780_v1 = vadd.f32 %v2779_v57, %v2731_v44  ;;  %v10586_v21 = vld [vmem:[#allocation27_spill] sm:$0xff] }
 0x236   : > { %10584 = vst [vmem:[#allocation64_spill] sm:$0xff] %v8207_v59  ;;  %v7225_v59 = vld [vmem:[#allocation7 + $0x7cc] sm:$0xf0] }
 0x239   : > { %v2828_v58 = vpop.f32.mrf.mxu2  ;;  %v2733_v18 = vpop.f32.mrf.mxu0 }
 0x23a   : > { %v2829_v2 = vadd.f32 %v2828_v58, %v2780_v1  ;;  %v2877_v33 = vpop.f32.mrf.mxu3  ;;  %v2734_v7 = vadd.f32 %v2733_v18, %v8122_v31  ;;  %v2782_v38 = vpop.f32.mrf.mxu1  ;;  %v5806_v31 = vld [vmem:[#allocation7 + $0x50] sm:$0xf0]  ;;  %v7030_v1 = vld [vmem:[#allocation7 + $0x1bc] sm:$0xf] }
 0x23b   : > { %v5809_v20 = vor.u32 %v6982_v53, %v5806_v31  ;;  %v5998_v58 = vld [vmem:[#allocation7 + $0x1d0] sm:$0xf0] }
 0x23c   : > { %v8210_v40 = vadd.f32 %v2877_v33, %v2829_v2  ;;  %v2783_v9 = vadd.f32 %v2782_v38, %v2734_v7  ;;  %2928 = vmatmul.bf16.gmra.mxu0 %v10586_v21  ;;  %v6573_v33 = vor.u32 %v7177_v54, %v6572_v19  ;;  %v6001_v18 = vor.u32 %v7030_v1, %v5998_v58  ;;  %v10591_v19 = vld [vmem:[#allocation30_spill] sm:$0xff]  ;;  %v6976_v1 = vld [vmem:[#allocation7 + $0xc] sm:$0xf]  ;;  %v6548_v58 = vld [vmem:[#allocation7 + $0x608] sm:$0xf] }
 0x23d   : > { %2977 = vmatmul.bf16.gmra.mxu1 %v10587_v36  ;;  %3200 = vmatpush.bf16.msra.mxu2 %v5809_v20 }
 0x23e   : > { %10585 = vst [vmem:[#allocation65_spill] sm:$0xff] %v8210_v40  ;;  %3026 = vmatmul.bf16.gmra.mxu2 %v7863_v42  ;;  %3102 = vmatpush.bf16.msra.mxu0 %v6573_v33  ;;  %v6764_v40 = vld [vmem:[#allocation7 + $0x7b8] sm:$0xf] }
 0x23f   : > { %3075 = vmatmul.bf16.gmra.mxu3 %v7865_v43  ;;  %v6765_v53 = vor.u32 %v7225_v59, %v6764_v40 }
 0x240   : > { %3249 = vmatpush.bf16.msra.mxu3 %v6001_v18  ;;  %v7171_v18 = vld [vmem:[#allocation7 + $0x61c] sm:$0xf0] }
 0x241   : > { %v2831_v44 = vpop.f32.mrf.mxu2  ;;  %v2735_v22 = vpop.f32.mrf.mxu0  ;;  %3151 = vmatpush.bf16.msra.mxu1 %v6765_v53  ;;  %v6740_v53 = vld [vmem:[#allocation7 + $0x788] sm:$0xf] }
 0x242   : > { %v2832_v57 = vadd.f32 %v2831_v44, %v2783_v9  ;;  %v2880_v55 = vpop.f32.mrf.mxu3  ;;  %v2736_v49 = vadd.f32 %v2735_v22, %v8127_v35  ;;  %v2784_v50 = vpop.f32.mrf.mxu1 }
 0x244   : > { %v8217_v2 = vadd.f32 %v2880_v55, %v2832_v57  ;;  %v2785_v7 = vadd.f32 %v2784_v50, %v2736_v49  ;;  %v10590_v55 = vld [vmem:[#allocation29_spill] sm:$0xff] }
 0x246   : > { %10588 = vst [vmem:[#allocation66_spill] sm:$0xff] %v8217_v2 }
 0x249   : > { %v2833_v38 = vpop.f32.mrf.mxu2  ;;  %v2738_v44 = vpop.f32.mrf.mxu0 }
 0x24a   : > { %v2834_v48 = vadd.f32 %v2833_v38, %v2785_v7  ;;  %v2882_v9 = vpop.f32.mrf.mxu3  ;;  %v2739_v35 = vadd.f32 %v2738_v44, %v8136_v13  ;;  %v2787_v22 = vpop.f32.mrf.mxu1  ;;  %v5782_v13 = vld [vmem:[#allocation7 + $0x20] sm:$0xf0]  ;;  %v7024_v7 = vld [vmem:[#allocation7 + $0x18c] sm:$0xf] }
 0x24b   : > { %v5785_v33 = vor.u32 %v6976_v1, %v5782_v13  ;;  %v5974_v38 = vld [vmem:[#allocation7 + $0x1a0] sm:$0xf0] }
 0x24c   : > { %v8220_v31 = vadd.f32 %v2882_v9, %v2834_v48  ;;  %v2788_v57 = vadd.f32 %v2787_v22, %v2739_v35  ;;  %2933 = vmatmul.bf16.gmra.mxu0 %v10590_v55  ;;  %v6549_v9 = vor.u32 %v7171_v18, %v6548_v58  ;;  %v5977_v44 = vor.u32 %v7024_v7, %v5974_v38  ;;  %v10595_v58 = vld [vmem:[#allocation32_spill] sm:$0xff]  ;;  %v7210_v7 = vld [vmem:[#allocation7 + $0x75c] sm:$0xf] }
 0x24d   : > { %2982 = vmatmul.bf16.gmra.mxu1 %v10591_v19  ;;  %3201 = vmatpush.bf16.msra.mxu2 %v5785_v33  ;;  %v6718_v38 = vld [vmem:[#allocation7 + $0x770] sm:$0xf0] }
 0x24e   : > { %10589 = vst [vmem:[#allocation67_spill] sm:$0xff] %v8220_v31  ;;  %3031 = vmatmul.bf16.gmra.mxu2 %v7883_v10  ;;  %3103 = vmatpush.bf16.msra.mxu0 %v6549_v9  ;;  %v6721_v9 = vor.u32 %v7210_v7, %v6718_v38 }
 0x24f   : > { %3080 = vmatmul.bf16.gmra.mxu3 %v7885_v11 }
 0x250   : > { %3250 = vmatpush.bf16.msra.mxu3 %v5977_v44  ;;  %v6334_v44 = vld [vmem:[#allocation7 + $0x470] sm:$0xf0] }
 0x251   : > { %v2836_v49 = vpop.f32.mrf.mxu2  ;;  %v2740_v54 = vpop.f32.mrf.mxu0  ;;  %3390 = vmatpush.bf16.msrb.mxu2 %v6721_v9  ;;  %v7108_v9 = vld [vmem:[#allocation7 + $0x42c] sm:$0xf] }
 0x252   : > { %v2837_v50 = vadd.f32 %v2836_v49, %v2788_v57  ;;  %v2885_v20 = vpop.f32.mrf.mxu3  ;;  %v2741_v59 = vadd.f32 %v2740_v54, %v8141_v6  ;;  %v2789_v40 = vpop.f32.mrf.mxu1  ;;  %v7219_v57 = vld [vmem:[#allocation7 + $0x79c] sm:$0xf0] }
 0x253   : > { %v6741_v6 = vor.u32 %v7219_v57, %v6740_v53 }
 0x254   : > { %v8227_v48 = vadd.f32 %v2885_v20, %v2837_v50  ;;  %v2790_v35 = vadd.f32 %v2789_v40, %v2741_v59  ;;  %v10594_v20 = vld [vmem:[#allocation31_spill] sm:$0xff] }
 0x255   : > { %3152 = vmatpush.bf16.msra.mxu1 %v6741_v6  ;;  %v7162_v6 = vld [vmem:[#allocation7 + $0x5dc] sm:$0xf] }
 0x256   : > { %10592 = vst [vmem:[#allocation68_spill] sm:$0xff] %v8227_v48 }
 0x259   : > { %v2838_v22 = vpop.f32.mrf.mxu2  ;;  %v2743_v2 = vpop.f32.mrf.mxu0 }
 0x25a   : > { %v2839_v49 = vadd.f32 %v2838_v22, %v2790_v35  ;;  %v2887_v31 = vpop.f32.mrf.mxu3  ;;  %v2744_v54 = vadd.f32 %v2743_v2, %v8150_v16  ;;  %v2792_v1 = vpop.f32.mrf.mxu1  ;;  %v7114_v16 = vld [vmem:[#allocation7 + $0x45c] sm:$0xf]  ;;  %v6910_v22 = vld [vmem:[#allocation7 + $0x8f0] sm:$0xf0] }
 0x25b   : > { %v7258_v35 = vld [vmem:[#allocation7 + $0x8dc] sm:$0xf]  ;;  %v6337_v57 = vor.u32 %v7114_v16, %v6334_v44  ;;  %v10599_v16 = vld [vmem:[#allocation34_spill] sm:$0xff] }
 0x25c   : > { %v8230_v13 = vadd.f32 %v2887_v31, %v2839_v49  ;;  %v2793_v50 = vadd.f32 %v2792_v1, %v2744_v54  ;;  %2938 = vmatmul.bf16.gmra.mxu0 %v10594_v20  ;;  %v6913_v49 = vor.u32 %v7258_v35, %v6910_v22  ;;  %v6526_v54 = vld [vmem:[#allocation7 + $0x5f0] sm:$0xf0]  ;;  %v6310_v35 = vld [vmem:[#allocation7 + $0x440] sm:$0xf0]  ;;  %v7252_v22 = vld [vmem:[#allocation7 + $0x8ac] sm:$0xf] }
 0x25d   : > { %2987 = vmatmul.bf16.gmra.mxu1 %v10595_v58  ;;  %3292 = vmatpush.bf16.msrb.mxu0 %v6337_v57  ;;  %v6886_v57 = vld [vmem:[#allocation7 + $0x8c0] sm:$0xf0] }
 0x25e   : > { %10593 = vst [vmem:[#allocation69_spill] sm:$0xff] %v8230_v13  ;;  %3036 = vmatmul.bf16.gmra.mxu2 %v7903_v46  ;;  %3439 = vmatpush.bf16.msrb.mxu3 %v6913_v49  ;;  %v6313_v49 = vor.u32 %v7108_v9, %v6310_v35 }
 0x25f   : > { %3085 = vmatmul.bf16.gmra.mxu3 %v7905_v47 }
 0x261   : > { %v2841_v59 = vpop.f32.mrf.mxu2  ;;  %v2745_v18 = vpop.f32.mrf.mxu0  ;;  %3293 = vmatpush.bf16.msrb.mxu0 %v6313_v49 }
 0x262   : > { %v2842_v40 = vadd.f32 %v2841_v59, %v2793_v50  ;;  %v2890_v33 = vpop.f32.mrf.mxu3  ;;  %v2746_v2 = vadd.f32 %v2745_v18, %v8155_v45  ;;  %v2794_v31 = vpop.f32.mrf.mxu1  ;;  %v6529_v50 = vor.u32 %v7162_v6, %v6526_v54 }
 0x264   : > { %v8237_v53 = vadd.f32 %v2890_v33, %v2842_v40  ;;  %v2795_v1 = vadd.f32 %v2794_v31, %v2746_v2  ;;  %3341 = vmatpush.bf16.msrb.mxu1 %v6529_v50  ;;  %v10598_v33 = vld [vmem:[#allocation33_spill] sm:$0xff]  ;;  %v7204_v2 = vld [vmem:[#allocation7 + $0x72c] sm:$0xf]  ;;  %v6694_v31 = vld [vmem:[#allocation7 + $0x740] sm:$0xf0] }
 0x265   : > { %v6697_v44 = vor.u32 %v7204_v2, %v6694_v31 }
 0x266   : > { %10596 = vst [vmem:[#allocation70_spill] sm:$0xff] %v8237_v53 }
 0x267   : > { %3391 = vmatpush.bf16.msrb.mxu2 %v6697_v44 }
 0x269   : > { %v2843_v59 = vpop.f32.mrf.mxu2  ;;  %v2748_v18 = vpop.f32.mrf.mxu0 }
 0x26a   : > { %v2844_v13 = vadd.f32 %v2843_v59, %v2795_v1  ;;  %v2892_v45 = vpop.f32.mrf.mxu3  ;;  %v2749_v7 = vadd.f32 %v2748_v18, %v8164_v37  ;;  %v2797_v38 = vpop.f32.mrf.mxu1  ;;  %v7156_v18 = vld [vmem:[#allocation7 + $0x5ac] sm:$0xf] }
 0x26c   : > { %v8240_v48 = vadd.f32 %v2892_v45, %v2844_v13  ;;  %v2798_v40 = vadd.f32 %v2797_v38, %v2749_v7  ;;  %2943 = vmatmul.bf16.gmra.mxu0 %v10598_v33  ;;  %v6889_v13 = vor.u32 %v7252_v22, %v6886_v57  ;;  %v6502_v7 = vld [vmem:[#allocation7 + $0x5c0] sm:$0xf0]  ;;  %v6670_v57 = vld [vmem:[#allocation7 + $0x710] sm:$0xf0] }
 0x26d   : > { %2992 = vmatmul.bf16.gmra.mxu1 %v10599_v16  ;;  %v6505_v2 = vor.u32 %v7156_v18, %v6502_v7 }
 0x26e   : > { %10597 = vst [vmem:[#allocation71_spill] sm:$0xff] %v8240_v48  ;;  %3041 = vmatmul.bf16.gmra.mxu2 %v10566_v41  ;;  %3440 = vmatpush.bf16.msrb.mxu3 %v6889_v13  ;;  %v6286_v13 = vld [vmem:[#allocation7 + $0x410] sm:$0xf0] }
 0x26f   : > { %3090 = vmatmul.bf16.gmra.mxu3 %v10567_v17  ;;  %3342 = vmatpush.bf16.msrb.mxu1 %v6505_v2  ;;  %v10606_v17 = vld [vmem:[#allocation42_spill] sm:$0xff] }
 0x271   : > { %v2846_v37 = vpop.f32.mrf.mxu2  ;;  %v2750_v1 = vpop.f32.mrf.mxu0 }
 0x272   : > { %v2847_v6 = vadd.f32 %v2846_v37, %v2798_v40  ;;  %v2895_v54 = vpop.f32.mrf.mxu3  ;;  %v2751_v50 = vadd.f32 %v2750_v1, %v8169_v30  ;;  %v2799_v59 = vpop.f32.mrf.mxu1  ;;  %v7198_v30 = vld [vmem:[#allocation7 + $0x6fc] sm:$0xf] }
 0x273   : > { %v7102_v37 = vld [vmem:[#allocation7 + $0x3fc] sm:$0xf]  ;;  %v6673_v49 = vor.u32 %v7198_v30, %v6670_v57 }
 0x274   : > { %v8247_v45 = vadd.f32 %v2895_v54, %v2847_v6  ;;  %v2800_v38 = vadd.f32 %v2799_v59, %v2751_v50  ;;  %v7246_v6 = vld [vmem:[#allocation7 + $0x87c] sm:$0xf]  ;;  %v6862_v54 = vld [vmem:[#allocation7 + $0x890] sm:$0xf0]  ;;  %v6289_v50 = vor.u32 %v7102_v37, %v6286_v13 }
 0x275   : > { %3392 = vmatpush.bf16.msrb.mxu2 %v6673_v49  ;;  %v7192_v49 = vld [vmem:[#allocation7 + $0x6cc] sm:$0xf] }
 0x276   : > { %10600 = vst [vmem:[#allocation72_spill] sm:$0xff] %v8247_v45  ;;  %3294 = vmatpush.bf16.msrb.mxu0 %v6289_v50  ;;  %v6262_v50 = vld [vmem:[#allocation7 + $0x3e0] sm:$0xf0] }
 0x279   : > { %v2848_v31 = vpop.f32.mrf.mxu2  ;;  %v2909_v35 = vpop.f32.mrf.mxu0 }
 0x27a   : > { %v2849_v48 = vadd.f32 %v2848_v31, %v2800_v38  ;;  %v2897_v9 = vpop.f32.mrf.mxu3  ;;  %v2958_v40 = vpop.f32.mrf.mxu1 }
 0x27b   : > { %v2959_v44 = vadd.f32 %v2958_v40, %v2909_v35  ;;  %v6478_v35 = vld [vmem:[#allocation7 + $0x590] sm:$0xf0] }
 0x27c   : > { %v8249_v22 = vadd.f32 %v2897_v9, %v2849_v48  ;;  %3104 = vmatmul.bf16.vlgmr.msra.gmra.mxu0 %v7935_v60  ;;  %v6865_v48 = vor.u32 %v7246_v6, %v6862_v54  ;;  %v7150_v9 = vld [vmem:[#allocation7 + $0x57c] sm:$0xf]  ;;  %v6646_v6 = vld [vmem:[#allocation7 + $0x6e0] sm:$0xf0]  ;;  %v7096_v54 = vld [vmem:[#allocation7 + $0x3cc] sm:$0xf] }
 0x27d   : > { %3153 = vmatmul.bf16.vlgmr.msra.gmra.mxu1 %v7937_v62  ;;  %v6481_v40 = vor.u32 %v7150_v9, %v6478_v35 }
 0x27e   : > { %10601 = vst [vmem:[#allocation73_spill] sm:$0xff] %v8249_v22  ;;  %3202 = vmatmul.bf16.vlgmr.msra.gmra.mxu2 %v10570_v25  ;;  %3441 = vmatpush.bf16.msrb.mxu3 %v6865_v48  ;;  %v7240_v48 = vld [vmem:[#allocation7 + $0x84c] sm:$0xf] }
 0x27f   : > { %3251 = vmatmul.bf16.vlgmr.msra.gmra.mxu3 %v10571_v23  ;;  %3343 = vmatpush.bf16.msrb.mxu1 %v6481_v40 }
 0x281   : > { %v3007_v1 = vpop.f32.mrf.mxu2  ;;  %v2911_v7 = vpop.f32.mrf.mxu0 }
 0x282   : > { %v3008_v59 = vadd.f32 %v3007_v1, %v2959_v44  ;;  %v3056_v18 = vpop.f32.mrf.mxu3  ;;  %v2960_v38 = vpop.f32.mrf.mxu1  ;;  %v6649_v1 = vor.u32 %v7192_v49, %v6646_v6 }
 0x283   : > { %v2961_v31 = vadd.f32 %v2960_v38, %v2911_v7  ;;  %v6265_v7 = vor.u32 %v7096_v54, %v6262_v50 }
 0x284   : > { %v8255_v2 = vadd.f32 %v3056_v18, %v3008_v59  ;;  %v6838_v59 = vld [vmem:[#allocation7 + $0x860] sm:$0xf0]  ;;  %3393 = vmatpush.bf16.msrb.mxu2 %v6649_v1  ;;  %v7186_v1 = vld [vmem:[#allocation7 + $0x69c] sm:$0xf] }
 0x285   : > { %3295 = vmatpush.bf16.msrb.mxu0 %v6265_v7  ;;  %v6238_v7 = vld [vmem:[#allocation7 + $0x3b0] sm:$0xf0] }
 0x289   : > { %v3009_v30 = vpop.f32.mrf.mxu2  ;;  %v2914_v45 = vpop.f32.mrf.mxu0 }
 0x28a   : > { %v3010_v57 = vadd.f32 %v3009_v30, %v2961_v31  ;;  %v3058_v22 = vpop.f32.mrf.mxu3  ;;  %v2963_v37 = vpop.f32.mrf.mxu1  ;;  %v7144_v30 = vld [vmem:[#allocation7 + $0x54c] sm:$0xf] }
 0x28b   : > { %v2964_v44 = vadd.f32 %v2963_v37, %v2914_v45 }
 0x28c   : > { %v8257_v13 = vadd.f32 %v3058_v22, %v3010_v57  ;;  %3109 = vmatmul.bf16.gmra.mxu0 %v7949_v56  ;;  %v6841_v22 = vor.u32 %v7240_v48, %v6838_v59  ;;  %v6454_v57 = vld [vmem:[#allocation7 + $0x560] sm:$0xf0]  ;;  %v6622_v48 = vld [vmem:[#allocation7 + $0x6b0] sm:$0xf0]  ;;  %v7090_v59 = vld [vmem:[#allocation7 + $0x39c] sm:$0xf] }
 0x28d   : > { %3158 = vmatmul.bf16.gmra.mxu1 %v7951_v63  ;;  %v6457_v37 = vor.u32 %v7144_v30, %v6454_v57 }
 0x28e   : > { %3207 = vmatmul.bf16.gmra.mxu2 %v10574_v12  ;;  %3442 = vmatpush.bf16.msrb.mxu3 %v6841_v22  ;;  %v7234_v22 = vld [vmem:[#allocation7 + $0x81c] sm:$0xf] }
 0x28f   : > { %3256 = vmatmul.bf16.gmra.mxu3 %v10575_v4  ;;  %3344 = vmatpush.bf16.msrb.mxu1 %v6457_v37 }
 0x291   : > { %v3012_v18 = vpop.f32.mrf.mxu2  ;;  %v2916_v31 = vpop.f32.mrf.mxu0 }
 0x292   : > { %v3013_v38 = vadd.f32 %v3012_v18, %v2964_v44  ;;  %v3061_v45 = vpop.f32.mrf.mxu3  ;;  %v2965_v9 = vpop.f32.mrf.mxu1  ;;  %v6625_v18 = vor.u32 %v7186_v1, %v6622_v48 }
 0x293   : > { %v2966_v40 = vadd.f32 %v2965_v9, %v2916_v31  ;;  %v6241_v31 = vor.u32 %v7090_v59, %v6238_v7 }
 0x294   : > { %v8263_v35 = vadd.f32 %v3061_v45, %v3013_v38  ;;  %v6814_v38 = vld [vmem:[#allocation7 + $0x830] sm:$0xf0]  ;;  %3394 = vmatpush.bf16.msrb.mxu2 %v6625_v18  ;;  %v7180_v18 = vld [vmem:[#allocation7 + $0x66c] sm:$0xf] }
 0x295   : > { %3296 = vmatpush.bf16.msrb.mxu0 %v6241_v31  ;;  %v6214_v31 = vld [vmem:[#allocation7 + $0x380] sm:$0xf0] }
 0x299   : > { %v3014_v49 = vpop.f32.mrf.mxu2  ;;  %v2919_v4 = vpop.f32.mrf.mxu0 }
 0x29a   : > { %v3015_v6 = vadd.f32 %v3014_v49, %v2966_v40  ;;  %v3063_v53 = vpop.f32.mrf.mxu3  ;;  %v2968_v54 = vpop.f32.mrf.mxu1  ;;  %v7138_v49 = vld [vmem:[#allocation7 + $0x51c] sm:$0xf] }
 0x29b   : > { %v2969_v44 = vadd.f32 %v2968_v54, %v2919_v4 }
 0x29c   : > { %v8265_v50 = vadd.f32 %v3063_v53, %v3015_v6  ;;  %3114 = vmatmul.bf16.gmra.mxu0 %v7965_v0  ;;  %v6817_v53 = vor.u32 %v7234_v22, %v6814_v38  ;;  %v6430_v6 = vld [vmem:[#allocation7 + $0x530] sm:$0xf0]  ;;  %v6598_v22 = vld [vmem:[#allocation7 + $0x680] sm:$0xf0]  ;;  %v7084_v38 = vld [vmem:[#allocation7 + $0x36c] sm:$0xf] }
 0x29d   : > { %3163 = vmatmul.bf16.gmra.mxu1 %v7967_v5  ;;  %v6433_v54 = vor.u32 %v7138_v49, %v6430_v6 }
 0x29e   : > { %3212 = vmatmul.bf16.gmra.mxu2 %v10578_v34  ;;  %3443 = vmatpush.bf16.msrb.mxu3 %v6817_v53  ;;  %v7228_v53 = vld [vmem:[#allocation7 + $0x7ec] sm:$0xf] }
 0x29f   : > { %3261 = vmatmul.bf16.gmra.mxu3 %v10579_v8  ;;  %3345 = vmatpush.bf16.msrb.mxu1 %v6433_v54 }
 0x2a1   : > { %v3017_v45 = vpop.f32.mrf.mxu2  ;;  %v2921_v40 = vpop.f32.mrf.mxu0 }
 0x2a2   : > { %v3018_v9 = vadd.f32 %v3017_v45, %v2969_v44  ;;  %v3066_v4 = vpop.f32.mrf.mxu3  ;;  %v2970_v30 = vpop.f32.mrf.mxu1  ;;  %v6601_v45 = vor.u32 %v7180_v18, %v6598_v22 }
 0x2a3   : > { %v2971_v37 = vadd.f32 %v2970_v30, %v2921_v40  ;;  %v6217_v40 = vor.u32 %v7084_v38, %v6214_v31 }
 0x2a4   : > { %v8271_v57 = vadd.f32 %v3066_v4, %v3018_v9  ;;  %v6790_v9 = vld [vmem:[#allocation7 + $0x800] sm:$0xf0]  ;;  %3395 = vmatpush.bf16.msrb.mxu2 %v6601_v45  ;;  %v7174_v45 = vld [vmem:[#allocation7 + $0x63c] sm:$0xf] }
 0x2a5   : > { %3297 = vmatpush.bf16.msrb.mxu0 %v6217_v40  ;;  %v6190_v40 = vld [vmem:[#allocation7 + $0x350] sm:$0xf0] }
 0x2a9   : > { %v3019_v1 = vpop.f32.mrf.mxu2  ;;  %v2924_v34 = vpop.f32.mrf.mxu0 }
 0x2aa   : > { %v3020_v48 = vadd.f32 %v3019_v1, %v2971_v37  ;;  %v3068_v8 = vpop.f32.mrf.mxu3  ;;  %v2973_v59 = vpop.f32.mrf.mxu1  ;;  %v7132_v1 = vld [vmem:[#allocation7 + $0x4ec] sm:$0xf] }
 0x2ab   : > { %v2974_v44 = vadd.f32 %v2973_v59, %v2924_v34 }
 0x2ac   : > { %v8273_v7 = vadd.f32 %v3068_v8, %v3020_v48  ;;  %3119 = vmatmul.bf16.gmra.mxu0 %v7981_v29  ;;  %v6793_v8 = vor.u32 %v7228_v53, %v6790_v9  ;;  %v6406_v48 = vld [vmem:[#allocation7 + $0x500] sm:$0xf0]  ;;  %v6574_v53 = vld [vmem:[#allocation7 + $0x650] sm:$0xf0]  ;;  %v7078_v9 = vld [vmem:[#allocation7 + $0x33c] sm:$0xf] }
 0x2ad   : > { %3168 = vmatmul.bf16.gmra.mxu1 %v7983_v32  ;;  %v6409_v59 = vor.u32 %v7132_v1, %v6406_v48 }
 0x2ae   : > { %3217 = vmatmul.bf16.gmra.mxu2 %v10582_v24  ;;  %3444 = vmatpush.bf16.msrb.mxu3 %v6793_v8  ;;  %v7222_v8 = vld [vmem:[#allocation7 + $0x7bc] sm:$0xf] }
 0x2af   : > { %3266 = vmatmul.bf16.gmra.mxu3 %v10583_v39  ;;  %3346 = vmatpush.bf16.msrb.mxu1 %v6409_v59 }
 0x2b1   : > { %v3022_v4 = vpop.f32.mrf.mxu2  ;;  %v2926_v37 = vpop.f32.mrf.mxu0 }
 0x2b2   : > { %v3023_v30 = vadd.f32 %v3022_v4, %v2974_v44  ;;  %v3071_v34 = vpop.f32.mrf.mxu3  ;;  %v2975_v49 = vpop.f32.mrf.mxu1  ;;  %v6577_v4 = vor.u32 %v7174_v45, %v6574_v53 }
 0x2b3   : > { %v2976_v54 = vadd.f32 %v2975_v49, %v2926_v37  ;;  %v6193_v37 = vor.u32 %v7078_v9, %v6190_v40 }
 0x2b4   : > { %v8279_v6 = vadd.f32 %v3071_v34, %v3023_v30  ;;  %v6766_v30 = vld [vmem:[#allocation7 + $0x7d0] sm:$0xf0]  ;;  %3396 = vmatpush.bf16.msrb.mxu2 %v6577_v4  ;;  %v10602_v4 = vld [vmem:[#allocation38_spill] sm:$0xff] }
 0x2b5   : > { %3298 = vmatpush.bf16.msrb.mxu0 %v6193_v37 }
 0x2b9   : > { %v3024_v18 = vpop.f32.mrf.mxu2  ;;  %v2929_v24 = vpop.f32.mrf.mxu0 }
 0x2ba   : > { %v3025_v22 = vadd.f32 %v3024_v18, %v2976_v54  ;;  %v3073_v39 = vpop.f32.mrf.mxu3  ;;  %v2978_v38 = vpop.f32.mrf.mxu1  ;;  %v7126_v18 = vld [vmem:[#allocation7 + $0x4bc] sm:$0xf] }
 0x2bb   : > { %v2979_v44 = vadd.f32 %v2978_v38, %v2929_v24 }
 0x2bc   : > { %v8281_v31 = vadd.f32 %v3073_v39, %v3025_v22  ;;  %3124 = vmatmul.bf16.gmra.mxu0 %v7997_v61  ;;  %v6769_v39 = vor.u32 %v7222_v8, %v6766_v30  ;;  %v6382_v22 = vld [vmem:[#allocation7 + $0x4d0] sm:$0xf0]  ;;  %v7168_v8 = vld [vmem:[#allocation7 + $0x60c] sm:$0xf]  ;;  %v6550_v30 = vld [vmem:[#allocation7 + $0x620] sm:$0xf0] }
 0x2bd   : > { %3173 = vmatmul.bf16.gmra.mxu1 %v7999_v3  ;;  %v6385_v38 = vor.u32 %v7126_v18, %v6382_v22  ;;  %v6553_v37 = vor.u32 %v7168_v8, %v6550_v30 }
 0x2be   : > { %3222 = vmatmul.bf16.gmra.mxu2 %v10586_v21  ;;  %3445 = vmatpush.bf16.msrb.mxu3 %v6769_v39  ;;  %v6166_v39 = vld [vmem:[#allocation7 + $0x320] sm:$0xf0] }
 0x2bf   : > { %3271 = vmatmul.bf16.gmra.mxu3 %v10587_v36  ;;  %3347 = vmatpush.bf16.msrb.mxu1 %v6385_v38 }
 0x2c0   : > { %3397 = vmatpush.bf16.msrb.mxu2 %v6553_v37  ;;  %v10604_v37 = vld [vmem:[#allocation40_spill] sm:$0xff] }
 0x2c1   : > { %v3027_v34 = vpop.f32.mrf.mxu2  ;;  %v2931_v54 = vpop.f32.mrf.mxu0 }
 0x2c2   : > { %v3028_v49 = vadd.f32 %v3027_v34, %v2979_v44  ;;  %v3076_v24 = vpop.f32.mrf.mxu3  ;;  %v2980_v1 = vpop.f32.mrf.mxu1  ;;  %v7072_v34 = vld [vmem:[#allocation7 + $0x30c] sm:$0xf] }
 0x2c3   : > { %v2981_v59 = vadd.f32 %v2980_v1, %v2931_v54  ;;  %v6169_v1 = vor.u32 %v7072_v34, %v6166_v39 }
 0x2c4   : > { %v8287_v48 = vadd.f32 %v3076_v24, %v3028_v49  ;;  %v7216_v49 = vld [vmem:[#allocation7 + $0x78c] sm:$0xf]  ;;  %v6742_v24 = vld [vmem:[#allocation7 + $0x7a0] sm:$0xf0] }
 0x2c5   : > { %3299 = vmatpush.bf16.msrb.mxu0 %v6169_v1  ;;  %v7118_v1 = vld [vmem:[#allocation7 + $0x474] sm:$0xf0] }
 0x2c9   : > { %v3029_v45 = vpop.f32.mrf.mxu2  ;;  %v2934_v21 = vpop.f32.mrf.mxu0 }
 0x2ca   : > { %v3030_v53 = vadd.f32 %v3029_v45, %v2981_v59  ;;  %v3078_v36 = vpop.f32.mrf.mxu3  ;;  %v2983_v9 = vpop.f32.mrf.mxu1 }
 0x2cb   : > { %v2984_v44 = vadd.f32 %v2983_v9, %v2934_v21  ;;  %v6358_v9 = vld [vmem:[#allocation7 + $0x4a0] sm:$0xf0] }
 0x2cc   : > { %v8289_v40 = vadd.f32 %v3078_v36, %v3030_v53  ;;  %3129 = vmatmul.bf16.gmra.mxu0 %v8013_v28  ;;  %v6745_v36 = vor.u32 %v7216_v49, %v6742_v24  ;;  %v7120_v53 = vld [vmem:[#allocation7 + $0x48c] sm:$0xf] }
 0x2cd   : > { %3178 = vmatmul.bf16.gmra.mxu1 %v10602_v4  ;;  %v10603_v49 = vld [vmem:[#allocation39_spill] sm:$0xff] }
 0x2ce   : > { %3227 = vmatmul.bf16.gmra.mxu2 %v10590_v55  ;;  %3446 = vmatpush.bf16.msrb.mxu3 %v6745_v36 }
 0x2cf   : > { %3276 = vmatmul.bf16.gmra.mxu3 %v10591_v19  ;;  %v6361_v19 = vor.u32 %v7120_v53, %v6358_v9  ;;  %v7166_v53 = vld [vmem:[#allocation7 + $0x5f4] sm:$0xf0]  ;;  %v6148_v9 = vld [vmem:[#allocation7 + $0x2e0] sm:$0xf] }
 0x2d1   : > { %v3032_v54 = vpop.f32.mrf.mxu2  ;;  %v2936_v18 = vpop.f32.mrf.mxu0  ;;  %3348 = vmatpush.bf16.msrb.mxu1 %v6361_v19 }
 0x2d2   : > { %v3033_v59 = vadd.f32 %v3032_v54, %v2984_v44  ;;  %v3081_v21 = vpop.f32.mrf.mxu3  ;;  %v2985_v22 = vpop.f32.mrf.mxu1  ;;  %v6340_v54 = vld [vmem:[#allocation7 + $0x460] sm:$0xf] }
 0x2d3   : > { %v2986_v45 = vadd.f32 %v2985_v22, %v2936_v18  ;;  %v5956_v18 = vld [vmem:[#allocation7 + $0x160] sm:$0xf]  ;;  %v7022_v22 = vld [vmem:[#allocation7 + $0x174] sm:$0xf0] }
 0x2d4   : > { %v8295_v38 = vadd.f32 %v3081_v21, %v3033_v59  ;;  %v6341_v21 = vor.u32 %v7118_v1, %v6340_v54 }
 0x2d6   : > { %3586 = vmatpush.bf16.msra.mxu2 %v6341_v21 }
 0x2d9   : > { %v3034_v8 = vpop.f32.mrf.mxu2  ;;  %v2939_v12 = vpop.f32.mrf.mxu0 }
 0x2da   : > { %v3035_v30 = vadd.f32 %v3034_v8, %v2986_v45  ;;  %v3083_v55 = vpop.f32.mrf.mxu3  ;;  %v2988_v34 = vpop.f32.mrf.mxu1  ;;  %v7070_v8 = vld [vmem:[#allocation7 + $0x2f4] sm:$0xf0] }
 0x2db   : > { %v2989_v44 = vadd.f32 %v2988_v34, %v2939_v12  ;;  %v5957_v12 = vor.u32 %v7022_v22, %v5956_v18  ;;  %v10605_v22 = vld [vmem:[#allocation41_spill] sm:$0xff] }
 0x2dc   : > { %v8297_v39 = vadd.f32 %v3083_v55, %v3035_v30  ;;  %3134 = vmatmul.bf16.gmra.mxu0 %v10603_v49  ;;  %v6532_v55 = vld [vmem:[#allocation7 + $0x5e0] sm:$0xf] }
 0x2dd   : > { %3183 = vmatmul.bf16.gmra.mxu1 %v10604_v37  ;;  %3488 = vmatpush.bf16.msra.mxu0 %v5957_v12  ;;  %v7016_v12 = vld [vmem:[#allocation7 + $0x144] sm:$0xf0] }
 0x2de   : > { %3232 = vmatmul.bf16.gmra.mxu2 %v10594_v20  ;;  %v6149_v20 = vor.u32 %v7070_v8, %v6148_v9  ;;  %v7160_v9 = vld [vmem:[#allocation7 + $0x5c4] sm:$0xf0] }
 0x2df   : > { %3281 = vmatmul.bf16.gmra.mxu3 %v10595_v58  ;;  %v6533_v58 = vor.u32 %v7166_v53, %v6532_v55  ;;  %v6508_v53 = vld [vmem:[#allocation7 + $0x5b0] sm:$0xf] }
 0x2e0   : > { %3537 = vmatpush.bf16.msra.mxu1 %v6149_v20  ;;  %v5932_v20 = vld [vmem:[#allocation7 + $0x130] sm:$0xf] }
 0x2e1   : > { %v3037_v24 = vpop.f32.mrf.mxu2  ;;  %v2941_v59 = vpop.f32.mrf.mxu0  ;;  %3635 = vmatpush.bf16.msra.mxu3 %v6533_v58  ;;  %v7112_v58 = vld [vmem:[#allocation7 + $0x444] sm:$0xf0]  ;;  %v5933_v8 = vor.u32 %v7016_v12, %v5932_v20 }
 0x2e2   : > { %v3038_v19 = vadd.f32 %v3037_v24, %v2989_v44  ;;  %v3086_v36 = vpop.f32.mrf.mxu3  ;;  %v2990_v45 = vpop.f32.mrf.mxu1  ;;  %v10608_v12 = vld [vmem:[#allocation19_spill] sm:$0xff] }
 0x2e3   : > { %v2991_v34 = vadd.f32 %v2990_v45, %v2941_v59  ;;  %3489 = vmatpush.bf16.msra.mxu0 %v5933_v8  ;;  %v7154_v8 = vld [vmem:[#allocation7 + $0x594] sm:$0xf0] }
 0x2e4   : > { %v8303_v30 = vadd.f32 %v3086_v36, %v3038_v19  ;;  %v6316_v36 = vld [vmem:[#allocation7 + $0x430] sm:$0xf] }
 0x2e5   : > { %v6317_v45 = vor.u32 %v7112_v58, %v6316_v36 }
 0x2e7   : > { %3587 = vmatpush.bf16.msra.mxu2 %v6317_v45  ;;  %v5908_v45 = vld [vmem:[#allocation7 + $0x100] sm:$0xf] }
 0x2e9   : > { %v3039_v44 = vpop.f32.mrf.mxu2  ;;  %v2944_v1 = vpop.f32.mrf.mxu0 }
 0x2ea   : > { %v3040_v24 = vadd.f32 %v3039_v44, %v2991_v34  ;;  %v3088_v54 = vpop.f32.mrf.mxu3  ;;  %v2993_v23 = vpop.f32.mrf.mxu1  ;;  %v6509_v34 = vor.u32 %v7160_v9, %v6508_v53  ;;  %v6124_v44 = vld [vmem:[#allocation7 + $0x2b0] sm:$0xf] }
 0x2eb   : > { %v2994_v18 = vadd.f32 %v2993_v23, %v2944_v1 }
 0x2ec   : > { %v8305_v25 = vadd.f32 %v3088_v54, %v3040_v24  ;;  %3139 = vmatmul.bf16.gmra.mxu0 %v10605_v22  ;;  %v7064_v24 = vld [vmem:[#allocation7 + $0x2c4] sm:$0xf0]  ;;  %3636 = vmatpush.bf16.msra.mxu3 %v6509_v34 }
 0x2ed   : > { %3188 = vmatmul.bf16.gmra.mxu1 %v10606_v17 }
 0x2ee   : > { %3237 = vmatmul.bf16.gmra.mxu2 %v10598_v33 }
 0x2ef   : > { %3286 = vmatmul.bf16.gmra.mxu3 %v10599_v16  ;;  %v6125_v16 = vor.u32 %v7064_v24, %v6124_v44 }
 0x2f1   : > { %v3042_v19 = vpop.f32.mrf.mxu2  ;;  %v2946_v55 = vpop.f32.mrf.mxu0  ;;  %3538 = vmatpush.bf16.msra.mxu1 %v6125_v16 }
 0x2f2   : > { %v3043_v59 = vadd.f32 %v3042_v19, %v2994_v18  ;;  %v3091_v21 = vpop.f32.mrf.mxu3  ;;  %v2995_v23 = vpop.f32.mrf.mxu1 }
 0x2f3   : > { %v2996_v1 = vadd.f32 %v2995_v23, %v2946_v55  ;;  %v7106_v55 = vld [vmem:[#allocation7 + $0x414] sm:$0xf0] }
 0x2f4   : > { %v8311_v54 = vadd.f32 %v3091_v21, %v3043_v59  ;;  %v10609_v59 = vld [vmem:[#allocation20_spill] sm:$0xff]  ;;  %v6292_v21 = vld [vmem:[#allocation7 + $0x400] sm:$0xf]  ;;  %v7010_v23 = vld [vmem:[#allocation7 + $0x114] sm:$0xf0] }
 0x2f5   : > { %v5909_v24 = vor.u32 %v7010_v23, %v5908_v45 }
 0x2f7   : > { %3490 = vmatpush.bf16.msra.mxu0 %v5909_v24  ;;  %v7004_v24 = vld [vmem:[#allocation7 + $0xe4] sm:$0xf0] }
 0x2f9   : > { %v3044_v18 = vpop.f32.mrf.mxu2  ;;  %v3105_v36 = vpop.f32.mrf.mxu0 }
 0x2fa   : > { %v3045_v19 = vadd.f32 %v3044_v18, %v2996_v1  ;;  %v3093_v33 = vpop.f32.mrf.mxu3  ;;  %v3106_v58 = vadd.f32 %v3105_v36, %v8255_v2  ;;  %v3154_v17 = vpop.f32.mrf.mxu1  ;;  %v6293_v2 = vor.u32 %v7106_v55, %v6292_v21  ;;  %v6100_v18 = vld [vmem:[#allocation7 + $0x280] sm:$0xf] }
 0x2fc   : > { %v8314_v22 = vadd.f32 %v3093_v33, %v3045_v19  ;;  %v8316_v20 = vadd.f32 %v3154_v17, %v3106_v58  ;;  %3300 = vmatmul.bf16.vlgmr.msrb.gmra.mxu0 %v10608_v12  ;;  %v6484_v33 = vld [vmem:[#allocation7 + $0x580] sm:$0xf]  ;;  %v7058_v19 = vld [vmem:[#allocation7 + $0x294] sm:$0xf0]  ;;  %3588 = vmatpush.bf16.msra.mxu2 %v6293_v2 }
 0x2fd   : > { %3349 = vmatmul.bf16.vlgmr.msrb.gmra.mxu1 %v10609_v59  ;;  %v6485_v1 = vor.u32 %v7154_v8, %v6484_v33  ;;  %v6101_v36 = vor.u32 %v7058_v19, %v6100_v18  ;;  %v7148_v18 = vld [vmem:[#allocation7 + $0x564] sm:$0xf0] }
 0x2fe   : > { %10607 = vst [vmem:[#allocation38_spill] sm:$0xff] %v8316_v20  ;;  %3398 = vmatmul.bf16.vlgmr.msrb.gmra.mxu2 %v7935_v60 }
 0x2ff   : > { %3447 = vmatmul.bf16.vlgmr.msrb.gmra.mxu3 %v7937_v62  ;;  %3539 = vmatpush.bf16.msra.mxu1 %v6101_v36 }
 0x300   : > { %3637 = vmatpush.bf16.msra.mxu3 %v6485_v1  ;;  %v6460_v1 = vld [vmem:[#allocation7 + $0x550] sm:$0xf] }
 0x301   : > { %v3203_v16 = vpop.f32.mrf.mxu2  ;;  %v3107_v9 = vpop.f32.mrf.mxu0 }
 0x302   : > { %v3252_v53 = vpop.f32.mrf.mxu3  ;;  %v3108_v34 = vadd.f32 %v3107_v9, %v8257_v13  ;;  %v3156_v44 = vpop.f32.mrf.mxu1 }
 0x303   : > { %v8322_v17 = vadd.f32 %v3252_v53, %v3203_v16 }
 0x304   : > { %v8325_v58 = vadd.f32 %v3156_v44, %v3108_v34  ;;  %v5884_v34 = vld [vmem:[#allocation7 + $0xd0] sm:$0xf] }
 0x305   : > { %v5885_v36 = vor.u32 %v7004_v24, %v5884_v34 }
 0x306   : > { %10610 = vst [vmem:[#allocation74_spill] sm:$0xff] %v8325_v58  ;;  %v7256_v58 = vld [vmem:[#allocation7 + $0x8c4] sm:$0xf0] }
 0x307   : > { %3491 = vmatpush.bf16.msra.mxu0 %v5885_v36  ;;  %v5860_v36 = vld [vmem:[#allocation7 + $0xa0] sm:$0xf] }
 0x309   : > { %v3205_v21 = vpop.f32.mrf.mxu2  ;;  %v3110_v20 = vpop.f32.mrf.mxu0 }
 0x30a   : > { %v3254_v55 = vpop.f32.mrf.mxu3  ;;  %v3111_v16 = vadd.f32 %v3110_v20, %v8263_v35  ;;  %v3159_v13 = vpop.f32.mrf.mxu1  ;;  %v6268_v35 = vld [vmem:[#allocation7 + $0x3d0] sm:$0xf]  ;;  %v7100_v20 = vld [vmem:[#allocation7 + $0x3e4] sm:$0xf0] }
 0x30b   : > { %v8327_v62 = vadd.f32 %v3254_v55, %v3205_v21  ;;  %v6269_v44 = vor.u32 %v7100_v20, %v6268_v35  ;;  %v6461_v21 = vor.u32 %v7148_v18, %v6460_v1  ;;  %v6076_v55 = vld [vmem:[#allocation7 + $0x250] sm:$0xf]  ;;  %v7094_v18 = vld [vmem:[#allocation7 + $0x3b4] sm:$0xf0] }
 0x30c   : > { %v8330_v53 = vadd.f32 %v3159_v13, %v3111_v16  ;;  %3305 = vmatmul.bf16.gmra.mxu0 %v7803_v26  ;;  %v7052_v16 = vld [vmem:[#allocation7 + $0x264] sm:$0xf0] }
 0x30d   : > { %3354 = vmatmul.bf16.gmra.mxu1 %v7805_v27  ;;  %3589 = vmatpush.bf16.msra.mxu2 %v6269_v44  ;;  %v6077_v13 = vor.u32 %v7052_v16, %v6076_v55  ;;  %v6998_v55 = vld [vmem:[#allocation7 + $0xb4] sm:$0xf0]  ;;  %v6436_v16 = vld [vmem:[#allocation7 + $0x520] sm:$0xf] }
 0x30e   : > { %10611 = vst [vmem:[#allocation75_spill] sm:$0xff] %v8330_v53  ;;  %3403 = vmatmul.bf16.gmra.mxu2 %v7949_v56  ;;  %3638 = vmatpush.bf16.msra.mxu3 %v6461_v21 }
 0x30f   : > { %3452 = vmatmul.bf16.gmra.mxu3 %v7951_v63  ;;  %3540 = vmatpush.bf16.msra.mxu1 %v6077_v13  ;;  %v7142_v13 = vld [vmem:[#allocation7 + $0x534] sm:$0xf0] }
 0x311   : > { %v3208_v45 = vpop.f32.mrf.mxu2  ;;  %v3112_v2 = vpop.f32.mrf.mxu0 }
 0x312   : > { %v3257_v9 = vpop.f32.mrf.mxu3  ;;  %v3113_v33 = vadd.f32 %v3112_v2, %v8265_v50  ;;  %v3161_v8 = vpop.f32.mrf.mxu1 }
 0x313   : > { %v8336_v23 = vadd.f32 %v3257_v9, %v3208_v45 }
 0x314   : > { %v8339_v19 = vadd.f32 %v3161_v8, %v3113_v33 }
 0x316   : > { %10612 = vst [vmem:[#allocation76_spill] sm:$0xff] %v8339_v19 }
 0x319   : > { %v3210_v50 = vpop.f32.mrf.mxu2  ;;  %v3115_v9 = vpop.f32.mrf.mxu0 }
 0x31a   : > { %v3259_v45 = vpop.f32.mrf.mxu3  ;;  %v3116_v35 = vadd.f32 %v3115_v9, %v8271_v57  ;;  %v3164_v20 = vpop.f32.mrf.mxu1  ;;  %v6244_v57 = vld [vmem:[#allocation7 + $0x3a0] sm:$0xf]  ;;  %v6437_v9 = vor.u32 %v7142_v13, %v6436_v16  ;;  %v7088_v16 = vld [vmem:[#allocation7 + $0x384] sm:$0xf0]  ;;  %v5836_v13 = vld [vmem:[#allocation7 + $0x70] sm:$0xf] }
 0x31b   : > { %v8341_v2 = vadd.f32 %v3259_v45, %v3210_v50  ;;  %v6245_v21 = vor.u32 %v7094_v18, %v6244_v57  ;;  %v5861_v45 = vor.u32 %v6998_v55, %v5860_v36 }
 0x31c   : > { %v8344_v53 = vadd.f32 %v3164_v20, %v3116_v35  ;;  %3310 = vmatmul.bf16.gmra.mxu0 %v7823_v51  ;;  %v6052_v35 = vld [vmem:[#allocation7 + $0x220] sm:$0xf]  ;;  %v7046_v20 = vld [vmem:[#allocation7 + $0x234] sm:$0xf0]  ;;  %3639 = vmatpush.bf16.msra.mxu3 %v6437_v9  ;;  %v6992_v9 = vld [vmem:[#allocation7 + $0x84] sm:$0xf0] }
 0x31d   : > { %3359 = vmatmul.bf16.gmra.mxu1 %v7825_v52  ;;  %3590 = vmatpush.bf16.msra.mxu2 %v6245_v21 }
 0x31e   : > { %10613 = vst [vmem:[#allocation77_spill] sm:$0xff] %v8344_v53  ;;  %3408 = vmatmul.bf16.gmra.mxu2 %v7965_v0  ;;  %v6053_v53 = vor.u32 %v7046_v20, %v6052_v35  ;;  %3492 = vmatpush.bf16.msra.mxu0 %v5861_v45  ;;  %v6412_v35 = vld [vmem:[#allocation7 + $0x4f0] sm:$0xf]  ;;  %v7136_v20 = vld [vmem:[#allocation7 + $0x504] sm:$0xf0] }
 0x31f   : > { %3457 = vmatmul.bf16.gmra.mxu3 %v7967_v5 }
 0x320   : > { %3541 = vmatpush.bf16.msra.mxu1 %v6053_v53 }
 0x321   : > { %v3213_v33 = vpop.f32.mrf.mxu2  ;;  %v3117_v34 = vpop.f32.mrf.mxu0 }
 0x322   : > { %v3262_v8 = vpop.f32.mrf.mxu3  ;;  %v3118_v24 = vadd.f32 %v3117_v34, %v8273_v7  ;;  %v3166_v1 = vpop.f32.mrf.mxu1 }
 0x323   : > { %v8350_v44 = vadd.f32 %v3262_v8, %v3213_v33 }
 0x324   : > { %v8353_v50 = vadd.f32 %v3166_v1, %v3118_v24 }
 0x326   : > { %10614 = vst [vmem:[#allocation78_spill] sm:$0xff] %v8353_v50 }
 0x329   : > { %v3215_v7 = vpop.f32.mrf.mxu2  ;;  %v3120_v8 = vpop.f32.mrf.mxu0 }
 0x32a   : > { %v3264_v33 = vpop.f32.mrf.mxu3  ;;  %v3121_v57 = vadd.f32 %v3120_v8, %v8279_v6  ;;  %v3169_v18 = vpop.f32.mrf.mxu1  ;;  %v6220_v6 = vld [vmem:[#allocation7 + $0x370] sm:$0xf]  ;;  %v6413_v8 = vor.u32 %v7136_v20, %v6412_v35  ;;  %v7082_v35 = vld [vmem:[#allocation7 + $0x354] sm:$0xf0]  ;;  %v5812_v20 = vld [vmem:[#allocation7 + $0x40] sm:$0xf] }
 0x32b   : > { %v8355_v34 = vadd.f32 %v3264_v33, %v3215_v7  ;;  %v6221_v45 = vor.u32 %v7088_v16, %v6220_v6  ;;  %v5837_v33 = vor.u32 %v6992_v9, %v5836_v13 }
 0x32c   : > { %v8358_v19 = vadd.f32 %v3169_v18, %v3121_v57  ;;  %3315 = vmatmul.bf16.gmra.mxu0 %v7843_v14  ;;  %v6028_v57 = vld [vmem:[#allocation7 + $0x1f0] sm:$0xf]  ;;  %v7040_v18 = vld [vmem:[#allocation7 + $0x204] sm:$0xf0]  ;;  %3640 = vmatpush.bf16.msra.mxu3 %v6413_v8  ;;  %v6986_v8 = vld [vmem:[#allocation7 + $0x54] sm:$0xf0] }
 0x32d   : > { %3364 = vmatmul.bf16.gmra.mxu1 %v7845_v15  ;;  %3591 = vmatpush.bf16.msra.mxu2 %v6221_v45 }
 0x32e   : > { %10615 = vst [vmem:[#allocation79_spill] sm:$0xff] %v8358_v19  ;;  %3413 = vmatmul.bf16.gmra.mxu2 %v7981_v29  ;;  %v6029_v19 = vor.u32 %v7040_v18, %v6028_v57  ;;  %3493 = vmatpush.bf16.msra.mxu0 %v5837_v33  ;;  %v6388_v57 = vld [vmem:[#allocation7 + $0x4c0] sm:$0xf]  ;;  %v7130_v18 = vld [vmem:[#allocation7 + $0x4d4] sm:$0xf0] }
 0x32f   : > { %3462 = vmatmul.bf16.gmra.mxu3 %v7983_v32 }
 0x330   : > { %3542 = vmatpush.bf16.msra.mxu1 %v6029_v19 }
 0x331   : > { %v3218_v24 = vpop.f32.mrf.mxu2  ;;  %v3122_v1 = vpop.f32.mrf.mxu0 }
 0x332   : > { %v3267_v53 = vpop.f32.mrf.mxu3  ;;  %v3123_v21 = vadd.f32 %v3122_v1, %v8281_v31  ;;  %v3171_v55 = vpop.f32.mrf.mxu1 }
 0x333   : > { %v8364_v36 = vadd.f32 %v3267_v53, %v3218_v24 }
 0x334   : > { %v8367_v7 = vadd.f32 %v3171_v55, %v3123_v21 }
 0x336   : > { %10616 = vst [vmem:[#allocation80_spill] sm:$0xff] %v8367_v7 }
 0x339   : > { %v3220_v31 = vpop.f32.mrf.mxu2  ;;  %v3125_v53 = vpop.f32.mrf.mxu0 }
 0x33a   : > { %v3269_v24 = vpop.f32.mrf.mxu3  ;;  %v3126_v6 = vadd.f32 %v3125_v53, %v8287_v48  ;;  %v3174_v16 = vpop.f32.mrf.mxu1  ;;  %v6196_v48 = vld [vmem:[#allocation7 + $0x340] sm:$0xf]  ;;  %v6389_v53 = vor.u32 %v7130_v18, %v6388_v57  ;;  %v7076_v57 = vld [vmem:[#allocation7 + $0x324] sm:$0xf0]  ;;  %v5788_v18 = vld [vmem:[#allocation7 + $0x10] sm:$0xf] }
 0x33b   : > { %v8369_v1 = vadd.f32 %v3269_v24, %v3220_v31  ;;  %v6197_v33 = vor.u32 %v7082_v35, %v6196_v48  ;;  %v5813_v24 = vor.u32 %v6986_v8, %v5812_v20 }
 0x33c   : > { %v8372_v50 = vadd.f32 %v3174_v16, %v3126_v6  ;;  %3320 = vmatmul.bf16.gmra.mxu0 %v7863_v42  ;;  %v6004_v6 = vld [vmem:[#allocation7 + $0x1c0] sm:$0xf]  ;;  %v7034_v16 = vld [vmem:[#allocation7 + $0x1d4] sm:$0xf0]  ;;  %3641 = vmatpush.bf16.msra.mxu3 %v6389_v53  ;;  %v6980_v53 = vld [vmem:[#allocation7 + $0x24] sm:$0xf0] }
 0x33d   : > { %3369 = vmatmul.bf16.gmra.mxu1 %v7865_v43  ;;  %3592 = vmatpush.bf16.msra.mxu2 %v6197_v33 }
 0x33e   : > { %10617 = vst [vmem:[#allocation81_spill] sm:$0xff] %v8372_v50  ;;  %3418 = vmatmul.bf16.gmra.mxu2 %v7997_v61  ;;  %v6005_v50 = vor.u32 %v7034_v16, %v6004_v6  ;;  %3494 = vmatpush.bf16.msra.mxu0 %v5813_v24  ;;  %v6364_v6 = vld [vmem:[#allocation7 + $0x490] sm:$0xf]  ;;  %v7124_v16 = vld [vmem:[#allocation7 + $0x4a4] sm:$0xf0] }
 0x33f   : > { %3467 = vmatmul.bf16.gmra.mxu3 %v7999_v3 }
 0x340   : > { %3543 = vmatpush.bf16.msra.mxu1 %v6005_v50 }
 0x341   : > { %v3223_v21 = vpop.f32.mrf.mxu2  ;;  %v3127_v55 = vpop.f32.mrf.mxu0 }
 0x342   : > { %v3272_v19 = vpop.f32.mrf.mxu3  ;;  %v3128_v45 = vadd.f32 %v3127_v55, %v8289_v40  ;;  %v3176_v9 = vpop.f32.mrf.mxu1 }
 0x343   : > { %v8378_v13 = vadd.f32 %v3272_v19, %v3223_v21 }
 0x344   : > { %v8381_v31 = vadd.f32 %v3176_v9, %v3128_v45 }
 0x346   : > { %10618 = vst [vmem:[#allocation82_spill] sm:$0xff] %v8381_v31 }
 0x349   : > { %v3225_v40 = vpop.f32.mrf.mxu2  ;;  %v3130_v19 = vpop.f32.mrf.mxu0 }
 0x34a   : > { %v3274_v21 = vpop.f32.mrf.mxu3  ;;  %v3131_v48 = vadd.f32 %v3130_v19, %v8295_v38  ;;  %v3179_v35 = vpop.f32.mrf.mxu1  ;;  %v6172_v38 = vld [vmem:[#allocation7 + $0x310] sm:$0xf]  ;;  %v6365_v19 = vor.u32 %v7124_v16, %v6364_v6  ;;  %v6150_v6 = vld [vmem:[#allocation7 + $0x2f8] sm:$0xf0] }
 0x34b   : > { %v8383_v55 = vadd.f32 %v3274_v21, %v3225_v40  ;;  %v6173_v24 = vor.u32 %v7076_v57, %v6172_v38  ;;  %v5789_v21 = vor.u32 %v6980_v53, %v5788_v18  ;;  %v7067_v53 = vld [vmem:[#allocation7 + $0x2e4] sm:$0xf] }
 0x34c   : > { %v8386_v7 = vadd.f32 %v3179_v35, %v3131_v48  ;;  %3325 = vmatmul.bf16.gmra.mxu0 %v7883_v10  ;;  %v5980_v48 = vld [vmem:[#allocation7 + $0x190] sm:$0xf]  ;;  %v7028_v35 = vld [vmem:[#allocation7 + $0x1a4] sm:$0xf0]  ;;  %3642 = vmatpush.bf16.msra.mxu3 %v6365_v19 }
 0x34d   : > { %3374 = vmatmul.bf16.gmra.mxu1 %v7885_v11  ;;  %3593 = vmatpush.bf16.msra.mxu2 %v6173_v24  ;;  %v7214_v24 = vld [vmem:[#allocation7 + $0x774] sm:$0xf0] }
 0x34e   : > { %10619 = vst [vmem:[#allocation83_spill] sm:$0xff] %v8386_v7  ;;  %3423 = vmatmul.bf16.gmra.mxu2 %v8013_v28  ;;  %v5981_v7 = vor.u32 %v7028_v35, %v5980_v48  ;;  %3495 = vmatpush.bf16.msra.mxu0 %v5789_v21  ;;  %v6153_v21 = vor.u32 %v7067_v53, %v6150_v6  ;;  %v10625_v6 = vld [vmem:[#allocation41_spill] sm:$0xff] }
 0x34f   : > { %3472 = vmatmul.bf16.gmra.mxu3 %v10602_v4 }
 0x350   : > { %3544 = vmatpush.bf16.msra.mxu1 %v5981_v7  ;;  %v5958_v7 = vld [vmem:[#allocation7 + $0x178] sm:$0xf0]  ;;  %3831 = vmatpush.bf16.msrb.mxu3 %v6153_v21  ;;  %v5934_v21 = vld [vmem:[#allocation7 + $0x148] sm:$0xf0] }
 0x351   : > { %v3228_v45 = vpop.f32.mrf.mxu2  ;;  %v3132_v9 = vpop.f32.mrf.mxu0 }
 0x352   : > { %v3277_v50 = vpop.f32.mrf.mxu3  ;;  %v3133_v33 = vadd.f32 %v3132_v9, %v8297_v39  ;;  %v3181_v8 = vpop.f32.mrf.mxu1 }
 0x353   : > { %v8392_v20 = vadd.f32 %v3277_v50, %v3228_v45 }
 0x354   : > { %v8395_v40 = vadd.f32 %v3181_v8, %v3133_v33  ;;  %v7019_v33 = vld [vmem:[#allocation7 + $0x164] sm:$0xf]  ;;  %v6724_v8 = vld [vmem:[#allocation7 + $0x760] sm:$0xf] }
 0x355   : > { %v5961_v18 = vor.u32 %v7019_v33, %v5958_v7 }
 0x356   : > { %10620 = vst [vmem:[#allocation84_spill] sm:$0xff] %v8395_v40 }
 0x357   : > { %3782 = vmatpush.bf16.msrb.mxu2 %v5961_v18 }
 0x359   : > { %v3230_v39 = vpop.f32.mrf.mxu2  ;;  %v3135_v50 = vpop.f32.mrf.mxu0 }
 0x35a   : > { %v3279_v45 = vpop.f32.mrf.mxu3  ;;  %v3136_v38 = vadd.f32 %v3135_v50, %v8303_v30  ;;  %v3184_v57 = vpop.f32.mrf.mxu1  ;;  %v6725_v30 = vor.u32 %v7214_v24, %v6724_v8 }
 0x35b   : > { %v8397_v9 = vadd.f32 %v3279_v45, %v3230_v39 }
 0x35c   : > { %v8400_v31 = vadd.f32 %v3184_v57, %v3136_v38  ;;  %3330 = vmatmul.bf16.gmra.mxu0 %v7903_v46  ;;  %v6916_v38 = vld [vmem:[#allocation7 + $0x8e0] sm:$0xf]  ;;  %v7262_v57 = vld [vmem:[#allocation7 + $0x8f4] sm:$0xf0] }
 0x35d   : > { %3379 = vmatmul.bf16.gmra.mxu1 %v7905_v47  ;;  %3684 = vmatpush.bf16.msrb.mxu0 %v6725_v30  ;;  %v6917_v7 = vor.u32 %v7262_v57, %v6916_v38  ;;  %v7013_v30 = vld [vmem:[#allocation7 + $0x134] sm:$0xf] }
 0x35e   : > { %10621 = vst [vmem:[#allocation85_spill] sm:$0xff] %v8400_v31  ;;  %3428 = vmatmul.bf16.gmra.mxu2 %v10603_v49 }
 0x35f   : > { %3477 = vmatmul.bf16.gmra.mxu3 %v10604_v37  ;;  %3733 = vmatpush.bf16.msrb.mxu1 %v6917_v7 }
 0x361   : > { %v3233_v16 = vpop.f32.mrf.mxu2  ;;  %v3137_v48 = vpop.f32.mrf.mxu0 }
 0x362   : > { %v3282_v19 = vpop.f32.mrf.mxu3  ;;  %v3138_v39 = vadd.f32 %v3137_v48, %v8305_v25  ;;  %v3186_v45 = vpop.f32.mrf.mxu1  ;;  %v10624_v25 = vld [vmem:[#allocation36_spill] sm:$0xff] }
 0x363   : > { %v8406_v35 = vadd.f32 %v3282_v19, %v3233_v16  ;;  %v10626_v16 = vld [vmem:[#allocation42_spill] sm:$0xff]  ;;  %v6700_v19 = vld [vmem:[#allocation7 + $0x730] sm:$0xf] }
 0x364   : > { %v8409_v50 = vadd.f32 %v3186_v45, %v3138_v39  ;;  %v7208_v39 = vld [vmem:[#allocation7 + $0x744] sm:$0xf0]  ;;  %v7061_v45 = vld [vmem:[#allocation7 + $0x2b4] sm:$0xf] }
 0x365   : > { %v6701_v57 = vor.u32 %v7208_v39, %v6700_v19 }
 0x366   : > { %10622 = vst [vmem:[#allocation86_spill] sm:$0xff] %v8409_v50  ;;  %v6892_v50 = vld [vmem:[#allocation7 + $0x8b0] sm:$0xf] }
 0x367   : > { %3685 = vmatpush.bf16.msrb.mxu0 %v6701_v57  ;;  %v6102_v57 = vld [vmem:[#allocation7 + $0x298] sm:$0xf0] }
 0x369   : > { %v3235_v33 = vpop.f32.mrf.mxu2  ;;  %v3140_v40 = vpop.f32.mrf.mxu0 }
 0x36a   : > { %v3284_v31 = vpop.f32.mrf.mxu3  ;;  %v3141_v24 = vadd.f32 %v3140_v40, %v8311_v54  ;;  %v3189_v18 = vpop.f32.mrf.mxu1  ;;  %v6126_v54 = vld [vmem:[#allocation7 + $0x2c8] sm:$0xf0] }
 0x36b   : > { %v8411_v8 = vadd.f32 %v3284_v31, %v3235_v33  ;;  %v5937_v31 = vor.u32 %v7013_v30, %v5934_v21  ;;  %v6129_v33 = vor.u32 %v7061_v45, %v6126_v54  ;;  %v6893_v21 = vor.u32 %v7256_v58, %v6892_v50  ;;  %v7007_v45 = vld [vmem:[#allocation7 + $0x104] sm:$0xf]  ;;  %v5910_v54 = vld [vmem:[#allocation7 + $0x118] sm:$0xf0]  ;;  %v6676_v58 = vld [vmem:[#allocation7 + $0x700] sm:$0xf] }
 0x36c   : > { %v8414_v53 = vadd.f32 %v3189_v18, %v3141_v24  ;;  %3335 = vmatmul.bf16.gmra.mxu0 %v10566_v41 }
 0x36d   : > { %3384 = vmatmul.bf16.gmra.mxu1 %v10624_v25  ;;  %3783 = vmatpush.bf16.msrb.mxu2 %v5937_v31  ;;  %v10629_v31 = vld [vmem:[#allocation18_spill] sm:$0xff] }
 0x36e   : > { %10623 = vst [vmem:[#allocation87_spill] sm:$0xff] %v8414_v53  ;;  %3433 = vmatmul.bf16.gmra.mxu2 %v10625_v6  ;;  %3832 = vmatpush.bf16.msrb.mxu3 %v6129_v33 }
 0x36f   : > { %3482 = vmatmul.bf16.gmra.mxu3 %v10626_v16  ;;  %3734 = vmatpush.bf16.msrb.mxu1 %v6893_v21 }
 0x371   : > { %v3238_v48 = vpop.f32.mrf.mxu2  ;;  %v3142_v38 = vpop.f32.mrf.mxu0 }
 0x372   : > { %v3287_v40 = vpop.f32.mrf.mxu3  ;;  %v3143_v24 = vadd.f32 %v3142_v38, %v8314_v22  ;;  %v3191_v18 = vpop.f32.mrf.mxu1  ;;  %v10628_v22 = vld [vmem:[#allocation17_spill] sm:$0xff]  ;;  %v7055_v38 = vld [vmem:[#allocation7 + $0x284] sm:$0xf] }
 0x373   : > { %v8420_v7 = vadd.f32 %v3287_v40, %v3238_v48  ;;  %v5913_v40 = vor.u32 %v7007_v45, %v5910_v54 }
 0x374   : > { %v8423_v53 = vadd.f32 %v3191_v18, %v3143_v24  ;;  %v6105_v18 = vor.u32 %v7055_v38, %v6102_v57  ;;  %v10633_v38 = vld [vmem:[#allocation22_spill] sm:$0xff]  ;;  %v7001_v57 = vld [vmem:[#allocation7 + $0xd4] sm:$0xf] }
 0x375   : > { %3784 = vmatpush.bf16.msrb.mxu2 %v5913_v40  ;;  %v10632_v40 = vld [vmem:[#allocation21_spill] sm:$0xff] }
 0x376   : > { %10627 = vst [vmem:[#allocation36_spill] sm:$0xff] %v8423_v53  ;;  %3833 = vmatpush.bf16.msrb.mxu3 %v6105_v18  ;;  %v6868_v53 = vld [vmem:[#allocation7 + $0x880] sm:$0xf] }
 0x379   : > { %v3240_v30 = vpop.f32.mrf.mxu2  ;;  %v3301_v6 = vpop.f32.mrf.mxu0 }
 0x37a   : > { %v3289_v16 = vpop.f32.mrf.mxu3  ;;  %v3302_v19 = vadd.f32 %v3301_v6, %v8322_v17  ;;  %v3350_v48 = vpop.f32.mrf.mxu1 }
 0x37b   : > { %v8425_v37 = vadd.f32 %v3289_v16, %v3240_v30  ;;  %v7202_v16 = vld [vmem:[#allocation7 + $0x714] sm:$0xf0] }
 0x37c   : > { %v3351_v39 = vadd.f32 %v3350_v48, %v3302_v19  ;;  %3496 = vmatmul.bf16.vlgmr.msra.gmra.mxu0 %v10628_v22  ;;  %v6677_v24 = vor.u32 %v7202_v16, %v6676_v58 }
 0x37d   : > { %3545 = vmatmul.bf16.vlgmr.msra.gmra.mxu1 %v10629_v31 }
 0x37e   : > { %3594 = vmatmul.bf16.vlgmr.msra.gmra.mxu2 %v10608_v12  ;;  %3686 = vmatpush.bf16.msrb.mxu0 %v6677_v24  ;;  %v6078_v24 = vld [vmem:[#allocation7 + $0x268] sm:$0xf0] }
 0x37f   : > { %3643 = vmatmul.bf16.vlgmr.msra.gmra.mxu3 %v10609_v59  ;;  %v7250_v59 = vld [vmem:[#allocation7 + $0x894] sm:$0xf0] }
 0x380   : > { %v6869_v54 = vor.u32 %v7250_v59, %v6868_v53  ;;  %v5886_v59 = vld [vmem:[#allocation7 + $0xe8] sm:$0xf0]  ;;  %v6652_v53 = vld [vmem:[#allocation7 + $0x6d0] sm:$0xf] }
 0x381   : > { %v3399_v50 = vpop.f32.mrf.mxu2  ;;  %v3303_v33 = vpop.f32.mrf.mxu0 }
 0x382   : > { %v3400_v17 = vadd.f32 %v3399_v50, %v3351_v39  ;;  %v3448_v6 = vpop.f32.mrf.mxu3  ;;  %v3304_v30 = vadd.f32 %v3303_v33, %v8327_v62  ;;  %v3352_v21 = vpop.f32.mrf.mxu1  ;;  %3735 = vmatpush.bf16.msrb.mxu1 %v6869_v54  ;;  %v7196_v33 = vld [vmem:[#allocation7 + $0x6e4] sm:$0xf0] }
 0x384   : > { %v8433_v19 = vadd.f32 %v3448_v6, %v3400_v17  ;;  %v3353_v48 = vadd.f32 %v3352_v21, %v3304_v30  ;;  %v5889_v6 = vor.u32 %v7001_v57, %v5886_v59  ;;  %v6653_v30 = vor.u32 %v7196_v33, %v6652_v53 }
 0x386   : > { %10630 = vst [vmem:[#allocation17_spill] sm:$0xff] %v8433_v19  ;;  %3785 = vmatpush.bf16.msrb.mxu2 %v5889_v6  ;;  %3687 = vmatpush.bf16.msrb.mxu0 %v6653_v30  ;;  %v10636_v6 = vld [vmem:[#allocation23_spill] sm:$0xff] }
 0x389   : > { %v3401_v45 = vpop.f32.mrf.mxu2  ;;  %v3306_v39 = vpop.f32.mrf.mxu0 }
 0x38a   : > { %v3402_v12 = vadd.f32 %v3401_v45, %v3353_v48  ;;  %v3450_v49 = vpop.f32.mrf.mxu3  ;;  %v3307_v50 = vadd.f32 %v3306_v39, %v8336_v23  ;;  %v3355_v58 = vpop.f32.mrf.mxu1  ;;  %v7049_v23 = vld [vmem:[#allocation7 + $0x254] sm:$0xf] }
 0x38b   : > { %v6081_v21 = vor.u32 %v7049_v23, %v6078_v24  ;;  %v10637_v23 = vld [vmem:[#allocation24_spill] sm:$0xff]  ;;  %v6995_v24 = vld [vmem:[#allocation7 + $0xa4] sm:$0xf] }
 0x38c   : > { %v8436_v16 = vadd.f32 %v3450_v49, %v3402_v12  ;;  %v3356_v62 = vadd.f32 %v3355_v58, %v3307_v50  ;;  %3501 = vmatmul.bf16.gmra.mxu0 %v10632_v40  ;;  %v6844_v50 = vld [vmem:[#allocation7 + $0x850] sm:$0xf]  ;;  %v7244_v58 = vld [vmem:[#allocation7 + $0x864] sm:$0xf0] }
 0x38d   : > { %3550 = vmatmul.bf16.gmra.mxu1 %v10633_v38  ;;  %3834 = vmatpush.bf16.msrb.mxu3 %v6081_v21  ;;  %v6845_v59 = vor.u32 %v7244_v58, %v6844_v50  ;;  %v7190_v21 = vld [vmem:[#allocation7 + $0x6b4] sm:$0xf0] }
 0x38e   : > { %10631 = vst [vmem:[#allocation18_spill] sm:$0xff] %v8436_v16  ;;  %3599 = vmatmul.bf16.gmra.mxu2 %v7803_v26 }
 0x38f   : > { %3648 = vmatmul.bf16.gmra.mxu3 %v7805_v27  ;;  %3736 = vmatpush.bf16.msrb.mxu1 %v6845_v59 }
 0x391   : > { %v3404_v17 = vpop.f32.mrf.mxu2  ;;  %v3308_v12 = vpop.f32.mrf.mxu0 }
 0x392   : > { %v3405_v18 = vadd.f32 %v3404_v17, %v3356_v62  ;;  %v3453_v49 = vpop.f32.mrf.mxu3  ;;  %v3309_v48 = vadd.f32 %v3308_v12, %v8341_v2  ;;  %v3357_v45 = vpop.f32.mrf.mxu1 }
 0x394   : > { %v8443_v54 = vadd.f32 %v3453_v49, %v3405_v18  ;;  %v3358_v39 = vadd.f32 %v3357_v45, %v3309_v48  ;;  %v5862_v18 = vld [vmem:[#allocation7 + $0xb8] sm:$0xf0]  ;;  %v6628_v49 = vld [vmem:[#allocation7 + $0x6a0] sm:$0xf] }
 0x395   : > { %v5865_v30 = vor.u32 %v6995_v24, %v5862_v18  ;;  %v6054_v48 = vld [vmem:[#allocation7 + $0x238] sm:$0xf0] }
 0x396   : > { %10634 = vst [vmem:[#allocation21_spill] sm:$0xff] %v8443_v54 }
 0x397   : > { %3786 = vmatpush.bf16.msrb.mxu2 %v5865_v30  ;;  %v10640_v30 = vld [vmem:[#allocation25_spill] sm:$0xff] }
 0x399   : > { %v3406_v57 = vpop.f32.mrf.mxu2  ;;  %v3311_v62 = vpop.f32.mrf.mxu0 }
 0x39a   : > { %v3407_v16 = vadd.f32 %v3406_v57, %v3358_v39  ;;  %v3455_v19 = vpop.f32.mrf.mxu3  ;;  %v3312_v17 = vadd.f32 %v3311_v62, %v8350_v44  ;;  %v3360_v53 = vpop.f32.mrf.mxu1  ;;  %v7043_v44 = vld [vmem:[#allocation7 + $0x224] sm:$0xf]  ;;  %v6629_v39 = vor.u32 %v7190_v21, %v6628_v49 }
 0x39b   : > { %v6057_v50 = vor.u32 %v7043_v44, %v6054_v48  ;;  %v10641_v44 = vld [vmem:[#allocation26_spill] sm:$0xff]  ;;  %v6989_v48 = vld [vmem:[#allocation7 + $0x74] sm:$0xf] }
 0x39c   : > { %v8446_v33 = vadd.f32 %v3455_v19, %v3407_v16  ;;  %v3361_v2 = vadd.f32 %v3360_v53, %v3312_v17  ;;  %3506 = vmatmul.bf16.gmra.mxu0 %v10636_v6  ;;  %v6820_v17 = vld [vmem:[#allocation7 + $0x820] sm:$0xf]  ;;  %v7238_v53 = vld [vmem:[#allocation7 + $0x834] sm:$0xf0] }
 0x39d   : > { %3555 = vmatmul.bf16.gmra.mxu1 %v10637_v23  ;;  %3688 = vmatpush.bf16.msrb.mxu0 %v6629_v39  ;;  %v6821_v18 = vor.u32 %v7238_v53, %v6820_v17 }
 0x39e   : > { %10635 = vst [vmem:[#allocation22_spill] sm:$0xff] %v8446_v33  ;;  %3604 = vmatmul.bf16.gmra.mxu2 %v7823_v51  ;;  %3835 = vmatpush.bf16.msrb.mxu3 %v6057_v50  ;;  %v7184_v50 = vld [vmem:[#allocation7 + $0x684] sm:$0xf0] }
 0x39f   : > { %3653 = vmatmul.bf16.gmra.mxu3 %v7825_v52  ;;  %3737 = vmatpush.bf16.msrb.mxu1 %v6821_v18 }
 0x3a1   : > { %v3409_v12 = vpop.f32.mrf.mxu2  ;;  %v3313_v16 = vpop.f32.mrf.mxu0 }
 0x3a2   : > { %v3410_v45 = vadd.f32 %v3409_v12, %v3361_v2  ;;  %v3458_v19 = vpop.f32.mrf.mxu3  ;;  %v3314_v58 = vadd.f32 %v3313_v16, %v8355_v34  ;;  %v3362_v57 = vpop.f32.mrf.mxu1 }
 0x3a4   : > { %v8453_v59 = vadd.f32 %v3458_v19, %v3410_v45  ;;  %v3363_v62 = vadd.f32 %v3362_v57, %v3314_v58  ;;  %v5838_v45 = vld [vmem:[#allocation7 + $0x88] sm:$0xf0]  ;;  %v6604_v19 = vld [vmem:[#allocation7 + $0x670] sm:$0xf] }
 0x3a5   : > { %v5841_v39 = vor.u32 %v6989_v48, %v5838_v45  ;;  %v6030_v58 = vld [vmem:[#allocation7 + $0x208] sm:$0xf0] }
 0x3a6   : > { %10638 = vst [vmem:[#allocation23_spill] sm:$0xff] %v8453_v59 }
 0x3a7   : > { %3787 = vmatpush.bf16.msrb.mxu2 %v5841_v39  ;;  %v10644_v39 = vld [vmem:[#allocation27_spill] sm:$0xff] }
 0x3a9   : > { %v3411_v24 = vpop.f32.mrf.mxu2  ;;  %v3316_v2 = vpop.f32.mrf.mxu0 }
 0x3aa   : > { %v3412_v33 = vadd.f32 %v3411_v24, %v3363_v62  ;;  %v3460_v54 = vpop.f32.mrf.mxu3  ;;  %v3317_v12 = vadd.f32 %v3316_v2, %v8364_v36  ;;  %v3365_v49 = vpop.f32.mrf.mxu1  ;;  %v7037_v36 = vld [vmem:[#allocation7 + $0x1f4] sm:$0xf]  ;;  %v6605_v62 = vor.u32 %v7184_v50, %v6604_v19 }
 0x3ab   : > { %v6033_v17 = vor.u32 %v7037_v36, %v6030_v58  ;;  %v10645_v36 = vld [vmem:[#allocation28_spill] sm:$0xff]  ;;  %v6983_v58 = vld [vmem:[#allocation7 + $0x44] sm:$0xf] }
 0x3ac   : > { %v8456_v21 = vadd.f32 %v3460_v54, %v3412_v33  ;;  %v3366_v34 = vadd.f32 %v3365_v49, %v3317_v12  ;;  %3511 = vmatmul.bf16.gmra.mxu0 %v10640_v30  ;;  %v6796_v12 = vld [vmem:[#allocation7 + $0x7f0] sm:$0xf]  ;;  %v7232_v49 = vld [vmem:[#allocation7 + $0x804] sm:$0xf0] }
 0x3ad   : > { %3560 = vmatmul.bf16.gmra.mxu1 %v10641_v44  ;;  %3689 = vmatpush.bf16.msrb.mxu0 %v6605_v62  ;;  %v6797_v45 = vor.u32 %v7232_v49, %v6796_v12 }
 0x3ae   : > { %10639 = vst [vmem:[#allocation24_spill] sm:$0xff] %v8456_v21  ;;  %3609 = vmatmul.bf16.gmra.mxu2 %v7843_v14  ;;  %3836 = vmatpush.bf16.msrb.mxu3 %v6033_v17  ;;  %v7178_v17 = vld [vmem:[#allocation7 + $0x654] sm:$0xf0] }
 0x3af   : > { %3658 = vmatmul.bf16.gmra.mxu3 %v7845_v15  ;;  %3738 = vmatpush.bf16.msrb.mxu1 %v6797_v45 }
 0x3b1   : > { %v3414_v16 = vpop.f32.mrf.mxu2  ;;  %v3318_v33 = vpop.f32.mrf.mxu0 }
 0x3b2   : > { %v3415_v57 = vadd.f32 %v3414_v16, %v3366_v34  ;;  %v3463_v54 = vpop.f32.mrf.mxu3  ;;  %v3319_v53 = vadd.f32 %v3318_v33, %v8369_v1  ;;  %v3367_v24 = vpop.f32.mrf.mxu1 }
 0x3b4   : > { %v8463_v18 = vadd.f32 %v3463_v54, %v3415_v57  ;;  %v3368_v2 = vadd.f32 %v3367_v24, %v3319_v53  ;;  %v5814_v57 = vld [vmem:[#allocation7 + $0x58] sm:$0xf0]  ;;  %v6580_v54 = vld [vmem:[#allocation7 + $0x640] sm:$0xf] }
 0x3b5   : > { %v5817_v62 = vor.u32 %v6983_v58, %v5814_v57  ;;  %v6006_v53 = vld [vmem:[#allocation7 + $0x1d8] sm:$0xf0] }
 0x3b6   : > { %10642 = vst [vmem:[#allocation25_spill] sm:$0xff] %v8463_v18 }
 0x3b7   : > { %3788 = vmatpush.bf16.msrb.mxu2 %v5817_v62  ;;  %v10648_v62 = vld [vmem:[#allocation29_spill] sm:$0xff] }
 0x3b9   : > { %v3416_v48 = vpop.f32.mrf.mxu2  ;;  %v3321_v34 = vpop.f32.mrf.mxu0 }
 0x3ba   : > { %v3417_v21 = vadd.f32 %v3416_v48, %v3368_v2  ;;  %v3465_v59 = vpop.f32.mrf.mxu3  ;;  %v3322_v16 = vadd.f32 %v3321_v34, %v8378_v13  ;;  %v3370_v19 = vpop.f32.mrf.mxu1  ;;  %v7031_v13 = vld [vmem:[#allocation7 + $0x1c4] sm:$0xf]  ;;  %v6581_v2 = vor.u32 %v7178_v17, %v6580_v54 }
 0x3bb   : > { %v6009_v12 = vor.u32 %v7031_v13, %v6006_v53  ;;  %v10649_v13 = vld [vmem:[#allocation30_spill] sm:$0xff]  ;;  %v6977_v53 = vld [vmem:[#allocation7 + $0x14] sm:$0xf] }
 0x3bc   : > { %v8466_v50 = vadd.f32 %v3465_v59, %v3417_v21  ;;  %v3371_v1 = vadd.f32 %v3370_v19, %v3322_v16  ;;  %3516 = vmatmul.bf16.gmra.mxu0 %v10644_v39  ;;  %v6772_v16 = vld [vmem:[#allocation7 + $0x7c0] sm:$0xf]  ;;  %v7226_v19 = vld [vmem:[#allocation7 + $0x7d4] sm:$0xf0] }
 0x3bd   : > { %3565 = vmatmul.bf16.gmra.mxu1 %v10645_v36  ;;  %3690 = vmatpush.bf16.msrb.mxu0 %v6581_v2  ;;  %v6773_v57 = vor.u32 %v7226_v19, %v6772_v16 }
 0x3be   : > { %10643 = vst [vmem:[#allocation26_spill] sm:$0xff] %v8466_v50  ;;  %3614 = vmatmul.bf16.gmra.mxu2 %v7863_v42  ;;  %3837 = vmatpush.bf16.msrb.mxu3 %v6009_v12  ;;  %v7172_v12 = vld [vmem:[#allocation7 + $0x624] sm:$0xf0] }
 0x3bf   : > { %3663 = vmatmul.bf16.gmra.mxu3 %v7865_v43  ;;  %3739 = vmatpush.bf16.msrb.mxu1 %v6773_v57 }
 0x3c1   : > { %v3419_v33 = vpop.f32.mrf.mxu2  ;;  %v3323_v21 = vpop.f32.mrf.mxu0 }
 0x3c2   : > { %v3420_v24 = vadd.f32 %v3419_v33, %v3371_v1  ;;  %v3468_v59 = vpop.f32.mrf.mxu3  ;;  %v3324_v49 = vadd.f32 %v3323_v21, %v8383_v55  ;;  %v3372_v48 = vpop.f32.mrf.mxu1 }
 0x3c4   : > { %v8473_v45 = vadd.f32 %v3468_v59, %v3420_v24  ;;  %v3373_v34 = vadd.f32 %v3372_v48, %v3324_v49  ;;  %v5790_v24 = vld [vmem:[#allocation7 + $0x28] sm:$0xf0]  ;;  %v6556_v59 = vld [vmem:[#allocation7 + $0x610] sm:$0xf] }
 0x3c5   : > { %v5793_v2 = vor.u32 %v6977_v53, %v5790_v24  ;;  %v5982_v49 = vld [vmem:[#allocation7 + $0x1a8] sm:$0xf0] }
 0x3c6   : > { %10646 = vst [vmem:[#allocation27_spill] sm:$0xff] %v8473_v45 }
 0x3c7   : > { %3789 = vmatpush.bf16.msrb.mxu2 %v5793_v2  ;;  %v10651_v2 = vld [vmem:[#allocation31_spill] sm:$0xff] }
 0x3c9   : > { %v3421_v58 = vpop.f32.mrf.mxu2  ;;  %v3326_v1 = vpop.f32.mrf.mxu0 }
 0x3ca   : > { %v3422_v50 = vadd.f32 %v3421_v58, %v3373_v34  ;;  %v3470_v18 = vpop.f32.mrf.mxu3  ;;  %v3327_v33 = vadd.f32 %v3326_v1, %v8392_v20  ;;  %v3375_v54 = vpop.f32.mrf.mxu1  ;;  %v7025_v20 = vld [vmem:[#allocation7 + $0x194] sm:$0xf]  ;;  %v6557_v34 = vor.u32 %v7172_v12, %v6556_v59 }
 0x3cb   : > { %v5985_v16 = vor.u32 %v7025_v20, %v5982_v49  ;;  %v10652_v20 = vld [vmem:[#allocation32_spill] sm:$0xff]  ;;  %v7211_v49 = vld [vmem:[#allocation7 + $0x764] sm:$0xf] }
 0x3cc   : > { %v8476_v17 = vadd.f32 %v3470_v18, %v3422_v50  ;;  %v3376_v55 = vadd.f32 %v3375_v54, %v3327_v33  ;;  %3521 = vmatmul.bf16.gmra.mxu0 %v10648_v62  ;;  %v6748_v33 = vld [vmem:[#allocation7 + $0x790] sm:$0xf]  ;;  %v7220_v54 = vld [vmem:[#allocation7 + $0x7a4] sm:$0xf0] }
 0x3cd   : > { %3570 = vmatmul.bf16.gmra.mxu1 %v10649_v13  ;;  %3691 = vmatpush.bf16.msrb.mxu0 %v6557_v34  ;;  %v6749_v24 = vor.u32 %v7220_v54, %v6748_v33 }
 0x3ce   : > { %10647 = vst [vmem:[#allocation28_spill] sm:$0xff] %v8476_v17  ;;  %3619 = vmatmul.bf16.gmra.mxu2 %v7883_v10  ;;  %3838 = vmatpush.bf16.msrb.mxu3 %v5985_v16  ;;  %v6342_v16 = vld [vmem:[#allocation7 + $0x478] sm:$0xf0] }
 0x3cf   : > { %3668 = vmatmul.bf16.gmra.mxu3 %v7885_v11  ;;  %3740 = vmatpush.bf16.msrb.mxu1 %v6749_v24 }
 0x3d1   : > { %v3424_v21 = vpop.f32.mrf.mxu2  ;;  %v3328_v50 = vpop.f32.mrf.mxu0 }
 0x3d2   : > { %v3425_v48 = vadd.f32 %v3424_v21, %v3376_v55  ;;  %v3473_v18 = vpop.f32.mrf.mxu3  ;;  %v3329_v19 = vadd.f32 %v3328_v50, %v8397_v9  ;;  %v3377_v58 = vpop.f32.mrf.mxu1 }
 0x3d4   : > { %v8483_v57 = vadd.f32 %v3473_v18, %v3425_v48  ;;  %v3378_v1 = vadd.f32 %v3377_v58, %v3329_v19  ;;  %v6726_v48 = vld [vmem:[#allocation7 + $0x778] sm:$0xf0]  ;;  %v7115_v18 = vld [vmem:[#allocation7 + $0x464] sm:$0xf] }
 0x3d5   : > { %v6729_v34 = vor.u32 %v7211_v49, %v6726_v48  ;;  %v6918_v19 = vld [vmem:[#allocation7 + $0x8f8] sm:$0xf0] }
 0x3d7   : > { %3978 = vmatpush.bf16.msra.mxu2 %v6729_v34  ;;  %v10655_v34 = vld [vmem:[#allocation33_spill] sm:$0xff] }
 0x3d9   : > { %v3426_v53 = vpop.f32.mrf.mxu2  ;;  %v3331_v55 = vpop.f32.mrf.mxu0 }
 0x3da   : > { %v3427_v17 = vadd.f32 %v3426_v53, %v3378_v1  ;;  %v3475_v45 = vpop.f32.mrf.mxu3  ;;  %v3332_v21 = vadd.f32 %v3331_v55, %v8406_v35  ;;  %v3380_v59 = vpop.f32.mrf.mxu1  ;;  %v7259_v35 = vld [vmem:[#allocation7 + $0x8e4] sm:$0xf]  ;;  %v6345_v1 = vor.u32 %v7115_v18, %v6342_v16 }
 0x3db   : > { %v6921_v33 = vor.u32 %v7259_v35, %v6918_v19  ;;  %v7163_v55 = vld [vmem:[#allocation7 + $0x5e4] sm:$0xf] }
 0x3dc   : > { %v8486_v12 = vadd.f32 %v3475_v45, %v3427_v17  ;;  %v3381_v9 = vadd.f32 %v3380_v59, %v3332_v21  ;;  %3526 = vmatmul.bf16.gmra.mxu0 %v10651_v2  ;;  %v6534_v21 = vld [vmem:[#allocation7 + $0x5f8] sm:$0xf0]  ;;  %v10656_v19 = vld [vmem:[#allocation34_spill] sm:$0xff] }
 0x3dd   : > { %3575 = vmatmul.bf16.gmra.mxu1 %v10652_v20  ;;  %3880 = vmatpush.bf16.msra.mxu0 %v6345_v1  ;;  %v6537_v49 = vor.u32 %v7163_v55, %v6534_v21 }
 0x3de   : > { %10650 = vst [vmem:[#allocation29_spill] sm:$0xff] %v8486_v12  ;;  %3624 = vmatmul.bf16.gmra.mxu2 %v7903_v46  ;;  %4027 = vmatpush.bf16.msra.mxu3 %v6921_v33  ;;  %v6318_v33 = vld [vmem:[#allocation7 + $0x448] sm:$0xf0] }
 0x3df   : > { %3673 = vmatmul.bf16.gmra.mxu3 %v7905_v47  ;;  %3929 = vmatpush.bf16.msra.mxu1 %v6537_v49 }
 0x3e1   : > { %v3429_v50 = vpop.f32.mrf.mxu2  ;;  %v3333_v17 = vpop.f32.mrf.mxu0 }
 0x3e2   : > { %v3430_v58 = vadd.f32 %v3429_v50, %v3381_v9  ;;  %v3478_v45 = vpop.f32.mrf.mxu3  ;;  %v3334_v54 = vadd.f32 %v3333_v17, %v8411_v8  ;;  %v3382_v53 = vpop.f32.mrf.mxu1  ;;  %v7109_v17 = vld [vmem:[#allocation7 + $0x434] sm:$0xf] }
 0x3e3   : > { %v6321_v55 = vor.u32 %v7109_v17, %v6318_v33 }
 0x3e4   : > { %v8493_v24 = vadd.f32 %v3478_v45, %v3430_v58  ;;  %v3383_v59 = vadd.f32 %v3382_v53, %v3334_v54  ;;  %v7205_v58 = vld [vmem:[#allocation7 + $0x734] sm:$0xf]  ;;  %v6702_v45 = vld [vmem:[#allocation7 + $0x748] sm:$0xf0] }
 0x3e5   : > { %v6705_v1 = vor.u32 %v7205_v58, %v6702_v45  ;;  %v7253_v54 = vld [vmem:[#allocation7 + $0x8b4] sm:$0xf]  ;;  %v6894_v53 = vld [vmem:[#allocation7 + $0x8c8] sm:$0xf0]  ;;  %3881 = vmatpush.bf16.msra.mxu0 %v6321_v55  ;;  %v7103_v55 = vld [vmem:[#allocation7 + $0x404] sm:$0xf] }
 0x3e6   : > { %10653 = vst [vmem:[#allocation30_spill] sm:$0xff] %v8493_v24 }
 0x3e7   : > { %3979 = vmatpush.bf16.msra.mxu2 %v6705_v1 }
 0x3e9   : > { %v3431_v48 = vpop.f32.mrf.mxu2  ;;  %v3336_v50 = vpop.f32.mrf.mxu0 }
 0x3ea   : > { %v3432_v12 = vadd.f32 %v3431_v48, %v3383_v59  ;;  %v3480_v9 = vpop.f32.mrf.mxu3  ;;  %v3337_v18 = vadd.f32 %v3336_v50, %v8420_v7  ;;  %v3385_v16 = vpop.f32.mrf.mxu1 }
 0x3ec   : > { %v8496_v35 = vadd.f32 %v3480_v9, %v3432_v12  ;;  %v3386_v8 = vadd.f32 %v3385_v16, %v3337_v18  ;;  %3531 = vmatmul.bf16.gmra.mxu0 %v10655_v34  ;;  %v6897_v12 = vor.u32 %v7253_v54, %v6894_v53  ;;  %v7157_v18 = vld [vmem:[#allocation7 + $0x5b4] sm:$0xf]  ;;  %v6510_v16 = vld [vmem:[#allocation7 + $0x5c8] sm:$0xf0]  ;;  %v7199_v53 = vld [vmem:[#allocation7 + $0x704] sm:$0xf] }
 0x3ed   : > { %3580 = vmatmul.bf16.gmra.mxu1 %v10656_v19  ;;  %v6513_v45 = vor.u32 %v7157_v18, %v6510_v16 }
 0x3ee   : > { %10654 = vst [vmem:[#allocation31_spill] sm:$0xff] %v8496_v35  ;;  %3629 = vmatmul.bf16.gmra.mxu2 %v10566_v41  ;;  %4028 = vmatpush.bf16.msra.mxu3 %v6897_v12 }
 0x3ef   : > { %3678 = vmatmul.bf16.gmra.mxu3 %v10624_v25  ;;  %3930 = vmatpush.bf16.msra.mxu1 %v6513_v45  ;;  %v7151_v45 = vld [vmem:[#allocation7 + $0x584] sm:$0xf] }
 0x3f1   : > { %v3434_v7 = vpop.f32.mrf.mxu2  ;;  %v3338_v49 = vpop.f32.mrf.mxu0 }
 0x3f2   : > { %v3435_v21 = vadd.f32 %v3434_v7, %v3386_v8  ;;  %v3483_v59 = vpop.f32.mrf.mxu3  ;;  %v3339_v48 = vadd.f32 %v3338_v49, %v8425_v37  ;;  %v3387_v9 = vpop.f32.mrf.mxu1  ;;  %v10658_v37 = vld [vmem:[#allocation37_spill] sm:$0xff] }
 0x3f3   : > { %v6678_v7 = vld [vmem:[#allocation7 + $0x718] sm:$0xf0] }
 0x3f4   : > { %v8503_v50 = vadd.f32 %v3483_v59, %v3435_v21  ;;  %v3388_v58 = vadd.f32 %v3387_v9, %v3339_v48  ;;  %v6681_v12 = vor.u32 %v7199_v53, %v6678_v7  ;;  %v6294_v21 = vld [vmem:[#allocation7 + $0x418] sm:$0xf0] }
 0x3f5   : > { %v6870_v59 = vld [vmem:[#allocation7 + $0x898] sm:$0xf0]  ;;  %v6297_v48 = vor.u32 %v7103_v55, %v6294_v21 }
 0x3f6   : > { %3980 = vmatpush.bf16.msra.mxu2 %v6681_v12  ;;  %v7193_v12 = vld [vmem:[#allocation7 + $0x6d4] sm:$0xf] }
 0x3f7   : > { %3882 = vmatpush.bf16.msra.mxu0 %v6297_v48  ;;  %v6270_v48 = vld [vmem:[#allocation7 + $0x3e8] sm:$0xf0] }
 0x3f9   : > { %v3436_v35 = vpop.f32.mrf.mxu2  ;;  %v3497_v33 = vpop.f32.mrf.mxu0 }
 0x3fa   : > { %v3437_v24 = vadd.f32 %v3436_v35, %v3388_v58  ;;  %v3485_v17 = vpop.f32.mrf.mxu3  ;;  %v3546_v8 = vpop.f32.mrf.mxu1  ;;  %v7247_v35 = vld [vmem:[#allocation7 + $0x884] sm:$0xf] }
 0x3fb   : > { %v3547_v1 = vadd.f32 %v3546_v8, %v3497_v33 }
 0x3fc   : > { %v8505_v54 = vadd.f32 %v3485_v17, %v3437_v24  ;;  %3692 = vmatmul.bf16.vlgmr.msrb.gmra.mxu0 %v7935_v60  ;;  %v6873_v24 = vor.u32 %v7247_v35, %v6870_v59  ;;  %v6486_v17 = vld [vmem:[#allocation7 + $0x598] sm:$0xf0]  ;;  %v6654_v35 = vld [vmem:[#allocation7 + $0x6e8] sm:$0xf0]  ;;  %v7097_v59 = vld [vmem:[#allocation7 + $0x3d4] sm:$0xf] }
 0x3fd   : > { %3741 = vmatmul.bf16.vlgmr.msrb.gmra.mxu1 %v10658_v37  ;;  %v6489_v33 = vor.u32 %v7151_v45, %v6486_v17 }
 0x3fe   : > { %10657 = vst [vmem:[#allocation32_spill] sm:$0xff] %v8505_v54  ;;  %3790 = vmatmul.bf16.vlgmr.msrb.gmra.mxu2 %v10628_v22  ;;  %4029 = vmatpush.bf16.msra.mxu3 %v6873_v24  ;;  %v7241_v24 = vld [vmem:[#allocation7 + $0x854] sm:$0xf] }
 0x3ff   : > { %3839 = vmatmul.bf16.vlgmr.msrb.gmra.mxu3 %v10629_v31  ;;  %3931 = vmatpush.bf16.msra.mxu1 %v6489_v33  ;;  %v7145_v33 = vld [vmem:[#allocation7 + $0x554] sm:$0xf] }
 0x401   : > { %v3595_v49 = vpop.f32.mrf.mxu2  ;;  %v3499_v16 = vpop.f32.mrf.mxu0 }
 0x402   : > { %v3596_v9 = vadd.f32 %v3595_v49, %v3547_v1  ;;  %v3644_v18 = vpop.f32.mrf.mxu3  ;;  %v3548_v58 = vpop.f32.mrf.mxu1  ;;  %v6657_v49 = vor.u32 %v7193_v12, %v6654_v35 }
 0x403   : > { %v3549_v31 = vadd.f32 %v3548_v58, %v3499_v16  ;;  %v6273_v16 = vor.u32 %v7097_v59, %v6270_v48 }
 0x404   : > { %v8511_v22 = vadd.f32 %v3644_v18, %v3596_v9  ;;  %v6846_v9 = vld [vmem:[#allocation7 + $0x868] sm:$0xf0]  ;;  %3981 = vmatpush.bf16.msra.mxu2 %v6657_v49  ;;  %v7187_v49 = vld [vmem:[#allocation7 + $0x6a4] sm:$0xf] }
 0x405   : > { %v6849_v58 = vor.u32 %v7241_v24, %v6846_v9  ;;  %3883 = vmatpush.bf16.msra.mxu0 %v6273_v16  ;;  %v6630_v24 = vld [vmem:[#allocation7 + $0x6b8] sm:$0xf0]  ;;  %v7091_v9 = vld [vmem:[#allocation7 + $0x3a4] sm:$0xf] }
 0x406   : > { %v6246_v16 = vld [vmem:[#allocation7 + $0x3b8] sm:$0xf0] }
 0x407   : > { %4030 = vmatpush.bf16.msra.mxu3 %v6849_v58  ;;  %v7235_v58 = vld [vmem:[#allocation7 + $0x824] sm:$0xf] }
 0x409   : > { %v3597_v8 = vpop.f32.mrf.mxu2  ;;  %v3502_v54 = vpop.f32.mrf.mxu0 }
 0x40a   : > { %v3598_v53 = vadd.f32 %v3597_v8, %v3549_v31  ;;  %v3646_v7 = vpop.f32.mrf.mxu3  ;;  %v3551_v55 = vpop.f32.mrf.mxu1  ;;  %v6462_v8 = vld [vmem:[#allocation7 + $0x568] sm:$0xf0] }
 0x40b   : > { %v3552_v1 = vadd.f32 %v3551_v55, %v3502_v54 }
 0x40c   : > { %v8513_v21 = vadd.f32 %v3646_v7, %v3598_v53  ;;  %3697 = vmatmul.bf16.gmra.mxu0 %v7949_v56  ;;  %v6465_v53 = vor.u32 %v7145_v33, %v6462_v8 }
 0x40d   : > { %3746 = vmatmul.bf16.gmra.mxu1 %v7951_v63 }
 0x40e   : > { %3795 = vmatmul.bf16.gmra.mxu2 %v10632_v40  ;;  %3932 = vmatpush.bf16.msra.mxu1 %v6465_v53 }
 0x40f   : > { %3844 = vmatmul.bf16.gmra.mxu3 %v10633_v38 }
 0x411   : > { %v3600_v18 = vpop.f32.mrf.mxu2  ;;  %v3504_v45 = vpop.f32.mrf.mxu0 }
 0x412   : > { %v3601_v31 = vadd.f32 %v3600_v18, %v3552_v1  ;;  %v3649_v54 = vpop.f32.mrf.mxu3  ;;  %v3553_v17 = vpop.f32.mrf.mxu1  ;;  %v6633_v18 = vor.u32 %v7187_v49, %v6630_v24 }
 0x413   : > { %v3554_v38 = vadd.f32 %v3553_v17, %v3504_v45  ;;  %v6249_v45 = vor.u32 %v7091_v9, %v6246_v16 }
 0x414   : > { %v8519_v40 = vadd.f32 %v3649_v54, %v3601_v31  ;;  %v6822_v31 = vld [vmem:[#allocation7 + $0x838] sm:$0xf0]  ;;  %3982 = vmatpush.bf16.msra.mxu2 %v6633_v18  ;;  %v7181_v18 = vld [vmem:[#allocation7 + $0x674] sm:$0xf] }
 0x415   : > { %v6825_v17 = vor.u32 %v7235_v58, %v6822_v31  ;;  %3884 = vmatpush.bf16.msra.mxu0 %v6249_v45  ;;  %v6606_v58 = vld [vmem:[#allocation7 + $0x688] sm:$0xf0]  ;;  %v7085_v31 = vld [vmem:[#allocation7 + $0x374] sm:$0xf] }
 0x416   : > { %v6222_v45 = vld [vmem:[#allocation7 + $0x388] sm:$0xf0] }
 0x417   : > { %4031 = vmatpush.bf16.msra.mxu3 %v6825_v17  ;;  %v7229_v17 = vld [vmem:[#allocation7 + $0x7f4] sm:$0xf] }
 0x419   : > { %v3602_v7 = vpop.f32.mrf.mxu2  ;;  %v3507_v35 = vpop.f32.mrf.mxu0 }
 0x41a   : > { %v3603_v55 = vadd.f32 %v3602_v7, %v3554_v38  ;;  %v3651_v12 = vpop.f32.mrf.mxu3  ;;  %v3556_v59 = vpop.f32.mrf.mxu1  ;;  %v7139_v7 = vld [vmem:[#allocation7 + $0x524] sm:$0xf] }
 0x41b   : > { %v3557_v1 = vadd.f32 %v3556_v59, %v3507_v35 }
 0x41c   : > { %v8521_v48 = vadd.f32 %v3651_v12, %v3603_v55  ;;  %3702 = vmatmul.bf16.gmra.mxu0 %v7965_v0  ;;  %v6438_v55 = vld [vmem:[#allocation7 + $0x538] sm:$0xf0] }
 0x41d   : > { %3751 = vmatmul.bf16.gmra.mxu1 %v7967_v5  ;;  %v6441_v12 = vor.u32 %v7139_v7, %v6438_v55 }
 0x41e   : > { %3800 = vmatmul.bf16.gmra.mxu2 %v10636_v6 }
 0x41f   : > { %3849 = vmatmul.bf16.gmra.mxu3 %v10637_v23  ;;  %3933 = vmatpush.bf16.msra.mxu1 %v6441_v12 }
 0x421   : > { %v3605_v54 = vpop.f32.mrf.mxu2  ;;  %v3509_v8 = vpop.f32.mrf.mxu0 }
 0x422   : > { %v3606_v38 = vadd.f32 %v3605_v54, %v3557_v1  ;;  %v3654_v33 = vpop.f32.mrf.mxu3  ;;  %v3558_v53 = vpop.f32.mrf.mxu1  ;;  %v6609_v54 = vor.u32 %v7181_v18, %v6606_v58 }
 0x423   : > { %v3559_v23 = vadd.f32 %v3558_v53, %v3509_v8  ;;  %v6225_v8 = vor.u32 %v7085_v31, %v6222_v45 }
 0x424   : > { %v8527_v6 = vadd.f32 %v3654_v33, %v3606_v38  ;;  %v6798_v38 = vld [vmem:[#allocation7 + $0x808] sm:$0xf0]  ;;  %3983 = vmatpush.bf16.msra.mxu2 %v6609_v54  ;;  %v7175_v54 = vld [vmem:[#allocation7 + $0x644] sm:$0xf] }
 0x425   : > { %v6801_v53 = vor.u32 %v7229_v17, %v6798_v38  ;;  %3885 = vmatpush.bf16.msra.mxu0 %v6225_v8  ;;  %v6582_v17 = vld [vmem:[#allocation7 + $0x658] sm:$0xf0]  ;;  %v7079_v38 = vld [vmem:[#allocation7 + $0x344] sm:$0xf] }
 0x426   : > { %v6198_v8 = vld [vmem:[#allocation7 + $0x358] sm:$0xf0] }
 0x427   : > { %4032 = vmatpush.bf16.msra.mxu3 %v6801_v53  ;;  %v7223_v53 = vld [vmem:[#allocation7 + $0x7c4] sm:$0xf] }
 0x429   : > { %v3607_v35 = vpop.f32.mrf.mxu2  ;;  %v3512_v24 = vpop.f32.mrf.mxu0 }
 0x42a   : > { %v3608_v59 = vadd.f32 %v3607_v35, %v3559_v23  ;;  %v3656_v49 = vpop.f32.mrf.mxu3  ;;  %v3561_v9 = vpop.f32.mrf.mxu1  ;;  %v7133_v35 = vld [vmem:[#allocation7 + $0x4f4] sm:$0xf] }
 0x42b   : > { %v3562_v1 = vadd.f32 %v3561_v9, %v3512_v24 }
 0x42c   : > { %v8529_v16 = vadd.f32 %v3656_v49, %v3608_v59  ;;  %3707 = vmatmul.bf16.gmra.mxu0 %v7981_v29  ;;  %v6414_v59 = vld [vmem:[#allocation7 + $0x508] sm:$0xf0] }
 0x42d   : > { %3756 = vmatmul.bf16.gmra.mxu1 %v7983_v32  ;;  %v6417_v49 = vor.u32 %v7133_v35, %v6414_v59 }
 0x42e   : > { %3805 = vmatmul.bf16.gmra.mxu2 %v10640_v30 }
 0x42f   : > { %3854 = vmatmul.bf16.gmra.mxu3 %v10641_v44  ;;  %3934 = vmatpush.bf16.msra.mxu1 %v6417_v49 }
 0x431   : > { %v3610_v33 = vpop.f32.mrf.mxu2  ;;  %v3514_v55 = vpop.f32.mrf.mxu0 }
 0x432   : > { %v3611_v23 = vadd.f32 %v3610_v33, %v3562_v1  ;;  %v3659_v7 = vpop.f32.mrf.mxu3  ;;  %v3563_v12 = vpop.f32.mrf.mxu1  ;;  %v6585_v33 = vor.u32 %v7175_v54, %v6582_v17 }
 0x433   : > { %v3564_v44 = vadd.f32 %v3563_v12, %v3514_v55  ;;  %v6201_v55 = vor.u32 %v7079_v38, %v6198_v8 }
 0x434   : > { %v8535_v30 = vadd.f32 %v3659_v7, %v3611_v23  ;;  %v6774_v23 = vld [vmem:[#allocation7 + $0x7d8] sm:$0xf0]  ;;  %3984 = vmatpush.bf16.msra.mxu2 %v6585_v33  ;;  %v7169_v33 = vld [vmem:[#allocation7 + $0x614] sm:$0xf] }
 0x435   : > { %v6777_v12 = vor.u32 %v7223_v53, %v6774_v23  ;;  %3886 = vmatpush.bf16.msra.mxu0 %v6201_v55  ;;  %v6558_v53 = vld [vmem:[#allocation7 + $0x628] sm:$0xf0]  ;;  %v7073_v23 = vld [vmem:[#allocation7 + $0x314] sm:$0xf] }
 0x436   : > { %v6174_v55 = vld [vmem:[#allocation7 + $0x328] sm:$0xf0] }
 0x437   : > { %4033 = vmatpush.bf16.msra.mxu3 %v6777_v12  ;;  %v7217_v12 = vld [vmem:[#allocation7 + $0x794] sm:$0xf] }
 0x439   : > { %v3612_v24 = vpop.f32.mrf.mxu2  ;;  %v3517_v58 = vpop.f32.mrf.mxu0 }
 0x43a   : > { %v3613_v9 = vadd.f32 %v3612_v24, %v3564_v44  ;;  %v3661_v18 = vpop.f32.mrf.mxu3  ;;  %v3566_v31 = vpop.f32.mrf.mxu1  ;;  %v7127_v24 = vld [vmem:[#allocation7 + $0x4c4] sm:$0xf] }
 0x43b   : > { %v3567_v1 = vadd.f32 %v3566_v31, %v3517_v58 }
 0x43c   : > { %v8537_v45 = vadd.f32 %v3661_v18, %v3613_v9  ;;  %3712 = vmatmul.bf16.gmra.mxu0 %v7997_v61  ;;  %v6390_v9 = vld [vmem:[#allocation7 + $0x4d8] sm:$0xf0] }
 0x43d   : > { %3761 = vmatmul.bf16.gmra.mxu1 %v7999_v3  ;;  %v6393_v18 = vor.u32 %v7127_v24, %v6390_v9 }
 0x43e   : > { %3810 = vmatmul.bf16.gmra.mxu2 %v10644_v39 }
 0x43f   : > { %3859 = vmatmul.bf16.gmra.mxu3 %v10645_v36  ;;  %3935 = vmatpush.bf16.msra.mxu1 %v6393_v18 }
 0x441   : > { %v3615_v7 = vpop.f32.mrf.mxu2  ;;  %v3519_v59 = vpop.f32.mrf.mxu0 }
 0x442   : > { %v3616_v44 = vadd.f32 %v3615_v7, %v3567_v1  ;;  %v3664_v35 = vpop.f32.mrf.mxu3  ;;  %v3568_v49 = vpop.f32.mrf.mxu1  ;;  %v6561_v7 = vor.u32 %v7169_v33, %v6558_v53 }
 0x443   : > { %v3569_v36 = vadd.f32 %v3568_v49, %v3519_v59  ;;  %v6177_v59 = vor.u32 %v7073_v23, %v6174_v55 }
 0x444   : > { %v8543_v39 = vadd.f32 %v3664_v35, %v3616_v44  ;;  %v6750_v44 = vld [vmem:[#allocation7 + $0x7a8] sm:$0xf0]  ;;  %3985 = vmatpush.bf16.msra.mxu2 %v6561_v7  ;;  %v10660_v7 = vld [vmem:[#allocation40_spill] sm:$0xff] }
 0x445   : > { %v6753_v49 = vor.u32 %v7217_v12, %v6750_v44  ;;  %3887 = vmatpush.bf16.msra.mxu0 %v6177_v59  ;;  %v10659_v12 = vld [vmem:[#allocation39_spill] sm:$0xff] }
 0x447   : > { %4034 = vmatpush.bf16.msra.mxu3 %v6753_v49 }
 0x449   : > { %v3617_v58 = vpop.f32.mrf.mxu2  ;;  %v3522_v17 = vpop.f32.mrf.mxu0 }
 0x44a   : > { %v3618_v31 = vadd.f32 %v3617_v58, %v3569_v36  ;;  %v3666_v54 = vpop.f32.mrf.mxu3  ;;  %v3571_v38 = vpop.f32.mrf.mxu1  ;;  %v7121_v58 = vld [vmem:[#allocation7 + $0x494] sm:$0xf] }
 0x44b   : > { %v3572_v1 = vadd.f32 %v3571_v38, %v3522_v17 }
 0x44c   : > { %v8545_v8 = vadd.f32 %v3666_v54, %v3618_v31  ;;  %3717 = vmatmul.bf16.gmra.mxu0 %v8013_v28  ;;  %v6366_v31 = vld [vmem:[#allocation7 + $0x4a8] sm:$0xf0] }
 0x44d   : > { %3766 = vmatmul.bf16.gmra.mxu1 %v10602_v4  ;;  %v6369_v54 = vor.u32 %v7121_v58, %v6366_v31 }
 0x44e   : > { %3815 = vmatmul.bf16.gmra.mxu2 %v10648_v62 }
 0x44f   : > { %3864 = vmatmul.bf16.gmra.mxu3 %v10649_v13  ;;  %3936 = vmatpush.bf16.msra.mxu1 %v6369_v54 }
 0x451   : > { %v3620_v35 = vpop.f32.mrf.mxu2  ;;  %v3524_v9 = vpop.f32.mrf.mxu0 }
 0x452   : > { %v3621_v36 = vadd.f32 %v3620_v35, %v3572_v1  ;;  %v3669_v24 = vpop.f32.mrf.mxu3  ;;  %v3573_v18 = vpop.f32.mrf.mxu1 }
 0x453   : > { %v3574_v13 = vadd.f32 %v3573_v18, %v3524_v9 }
 0x454   : > { %v8551_v62 = vadd.f32 %v3669_v24, %v3621_v36 }
 0x459   : > { %v3622_v17 = vpop.f32.mrf.mxu2  ;;  %v3527_v53 = vpop.f32.mrf.mxu0 }
 0x45a   : > { %v3623_v38 = vadd.f32 %v3622_v17, %v3574_v13  ;;  %v3671_v33 = vpop.f32.mrf.mxu3  ;;  %v3576_v23 = vpop.f32.mrf.mxu1 }
 0x45b   : > { %v3577_v1 = vadd.f32 %v3576_v23, %v3527_v53 }
 0x45c   : > { %v8553_v55 = vadd.f32 %v3671_v33, %v3623_v38  ;;  %3722 = vmatmul.bf16.gmra.mxu0 %v10659_v12  ;;  %v10661_v33 = vld [vmem:[#allocation41_spill] sm:$0xff] }
 0x45d   : > { %3771 = vmatmul.bf16.gmra.mxu1 %v10660_v7 }
 0x45e   : > { %3820 = vmatmul.bf16.gmra.mxu2 %v10651_v2  ;;  %v10662_v2 = vld [vmem:[#allocation42_spill] sm:$0xff] }
 0x45f   : > { %3869 = vmatmul.bf16.gmra.mxu3 %v10652_v20 }
 0x461   : > { %v3625_v44 = vpop.f32.mrf.mxu2  ;;  %v3529_v49 = vpop.f32.mrf.mxu0 }
 0x462   : > { %v3626_v35 = vadd.f32 %v3625_v44, %v3577_v1  ;;  %v3674_v59 = vpop.f32.mrf.mxu3  ;;  %v3578_v36 = vpop.f32.mrf.mxu1 }
 0x463   : > { %v3579_v9 = vadd.f32 %v3578_v36, %v3529_v49 }
 0x464   : > { %v8559_v24 = vadd.f32 %v3674_v59, %v3626_v35 }
 0x469   : > { %v3627_v18 = vpop.f32.mrf.mxu2  ;;  %v3532_v31 = vpop.f32.mrf.mxu0 }
 0x46a   : > { %v3628_v13 = vadd.f32 %v3627_v18, %v3579_v9  ;;  %v3676_v58 = vpop.f32.mrf.mxu3  ;;  %v3581_v54 = vpop.f32.mrf.mxu1 }
 0x46b   : > { %v3582_v38 = vadd.f32 %v3581_v54, %v3532_v31  ;;  %v10664_v54 = vld [vmem:[#allocation20_spill] sm:$0xff] }
 0x46c   : > { %v8561_v17 = vadd.f32 %v3676_v58, %v3628_v13  ;;  %3727 = vmatmul.bf16.gmra.mxu0 %v10661_v33 }
 0x46d   : > { %3776 = vmatmul.bf16.gmra.mxu1 %v10662_v2 }
 0x46e   : > { %3825 = vmatmul.bf16.gmra.mxu2 %v10655_v34 }
 0x46f   : > { %3874 = vmatmul.bf16.gmra.mxu3 %v10656_v19  ;;  %v10663_v19 = vld [vmem:[#allocation19_spill] sm:$0xff] }
 0x471   : > { %v3630_v20 = vpop.f32.mrf.mxu2  ;;  %v3534_v1 = vpop.f32.mrf.mxu0 }
 0x472   : > { %v3631_v53 = vadd.f32 %v3630_v20, %v3582_v38  ;;  %v3679_v23 = vpop.f32.mrf.mxu3  ;;  %v3583_v44 = vpop.f32.mrf.mxu1 }
 0x473   : > { %v3584_v59 = vadd.f32 %v3583_v44, %v3534_v1 }
 0x474   : > { %v8567_v35 = vadd.f32 %v3679_v23, %v3631_v53 }
 0x479   : > { %v3632_v49 = vpop.f32.mrf.mxu2  ;;  %v3693_v18 = vpop.f32.mrf.mxu0 }
 0x47a   : > { %v3633_v36 = vadd.f32 %v3632_v49, %v3584_v59  ;;  %v3681_v9 = vpop.f32.mrf.mxu3  ;;  %v3694_v13 = vadd.f32 %v3693_v18, %v8511_v22  ;;  %v3742_v58 = vpop.f32.mrf.mxu1 }
 0x47c   : > { %v8570_v31 = vadd.f32 %v3681_v9, %v3633_v36  ;;  %v8572_v34 = vadd.f32 %v3742_v58, %v3694_v13  ;;  %3888 = vmatmul.bf16.vlgmr.msra.gmra.mxu0 %v10663_v19 }
 0x47d   : > { %3937 = vmatmul.bf16.vlgmr.msra.gmra.mxu1 %v10664_v54 }
 0x47e   : > { %3986 = vmatmul.bf16.vlgmr.msra.gmra.mxu2 %v7935_v60 }
 0x47f   : > { %4035 = vmatmul.bf16.vlgmr.msra.gmra.mxu3 %v10658_v37 }
 0x481   : > { %v3791_v38 = vpop.f32.mrf.mxu2  ;;  %v3695_v53 = vpop.f32.mrf.mxu0 }
 0x482   : > { %v3840_v20 = vpop.f32.mrf.mxu3  ;;  %v3696_v22 = vadd.f32 %v3695_v53, %v8513_v21  ;;  %v3744_v1 = vpop.f32.mrf.mxu1 }
 0x483   : > { %v8578_v23 = vadd.f32 %v3840_v20, %v3791_v38 }
 0x484   : > { %v8581_v44 = vadd.f32 %v3744_v1, %v3696_v22 }
 0x489   : > { %v3793_v59 = vpop.f32.mrf.mxu2  ;;  %v3698_v36 = vpop.f32.mrf.mxu0 }
 0x48a   : > { %v3842_v49 = vpop.f32.mrf.mxu3  ;;  %v3699_v18 = vadd.f32 %v3698_v36, %v8519_v40  ;;  %v3747_v60 = vpop.f32.mrf.mxu1 }
 0x48b   : > { %v8583_v9 = vadd.f32 %v3842_v49, %v3793_v59 }
 0x48c   : > { %v8586_v13 = vadd.f32 %v3747_v60, %v3699_v18  ;;  %3893 = vmatmul.bf16.gmra.mxu0 %v7803_v26 }
 0x48d   : > { %3942 = vmatmul.bf16.gmra.mxu1 %v7805_v27 }
 0x48e   : > { %3991 = vmatmul.bf16.gmra.mxu2 %v7949_v56 }
 0x48f   : > { %4040 = vmatmul.bf16.gmra.mxu3 %v7951_v63 }
 0x491   : > { %v3796_v37 = vpop.f32.mrf.mxu2  ;;  %v3700_v58 = vpop.f32.mrf.mxu0 }
 0x492   : > { %v3845_v21 = vpop.f32.mrf.mxu3  ;;  %v3701_v54 = vadd.f32 %v3700_v58, %v8521_v48  ;;  %v3749_v38 = vpop.f32.mrf.mxu1 }
 0x493   : > { %v8592_v19 = vadd.f32 %v3845_v21, %v3796_v37 }
 0x494   : > { %v8595_v40 = vadd.f32 %v3749_v38, %v3701_v54 }
 0x499   : > { %v3798_v20 = vpop.f32.mrf.mxu2  ;;  %v3703_v22 = vpop.f32.mrf.mxu0 }
 0x49a   : > { %v3847_v53 = vpop.f32.mrf.mxu3  ;;  %v3704_v27 = vadd.f32 %v3703_v22, %v8527_v6  ;;  %v3752_v56 = vpop.f32.mrf.mxu1 }
 0x49b   : > { %v8597_v26 = vadd.f32 %v3847_v53, %v3798_v20 }
 0x49c   : > { %v8600_v1 = vadd.f32 %v3752_v56, %v3704_v27  ;;  %3898 = vmatmul.bf16.gmra.mxu0 %v7823_v51 }
 0x49d   : > { %3947 = vmatmul.bf16.gmra.mxu1 %v7825_v52 }
 0x49e   : > { %3996 = vmatmul.bf16.gmra.mxu2 %v7965_v0 }
 0x49f   : > { %4045 = vmatmul.bf16.gmra.mxu3 %v7967_v5 }
 0x4a1   : > { %v3801_v63 = vpop.f32.mrf.mxu2  ;;  %v3705_v59 = vpop.f32.mrf.mxu0 }
 0x4a2   : > { %v3850_v48 = vpop.f32.mrf.mxu3  ;;  %v3706_v36 = vadd.f32 %v3705_v59, %v8529_v16  ;;  %v3754_v18 = vpop.f32.mrf.mxu1 }
 0x4a3   : > { %v8606_v49 = vadd.f32 %v3850_v48, %v3801_v63 }
 0x4a4   : > { %v8609_v6 = vadd.f32 %v3754_v18, %v3706_v36 }
 0x4a9   : > { %v3803_v60 = vpop.f32.mrf.mxu2  ;;  %v3708_v21 = vpop.f32.mrf.mxu0 }
 0x4aa   : > { %v3852_v37 = vpop.f32.mrf.mxu3  ;;  %v3709_v52 = vadd.f32 %v3708_v21, %v8535_v30  ;;  %v3757_v0 = vpop.f32.mrf.mxu1 }
 0x4ab   : > { %v8611_v51 = vadd.f32 %v3852_v37, %v3803_v60 }
 0x4ac   : > { %v8614_v58 = vadd.f32 %v3757_v0, %v3709_v52  ;;  %3903 = vmatmul.bf16.gmra.mxu0 %v7843_v14 }
 0x4ad   : > { %3952 = vmatmul.bf16.gmra.mxu1 %v7845_v15 }
 0x4ae   : > { %4001 = vmatmul.bf16.gmra.mxu2 %v7981_v29 }
 0x4af   : > { %4050 = vmatmul.bf16.gmra.mxu3 %v7983_v32 }
 0x4b1   : > { %v3806_v5 = vpop.f32.mrf.mxu2  ;;  %v3710_v54 = vpop.f32.mrf.mxu0 }
 0x4b2   : > { %v3855_v16 = vpop.f32.mrf.mxu3  ;;  %v3711_v20 = vadd.f32 %v3710_v54, %v8537_v45  ;;  %v3759_v53 = vpop.f32.mrf.mxu1 }
 0x4b3   : > { %v8620_v38 = vadd.f32 %v3855_v16, %v3806_v5 }
 0x4b4   : > { %v8623_v30 = vadd.f32 %v3759_v53, %v3711_v20 }
 0x4b9   : > { %v3808_v22 = vpop.f32.mrf.mxu2  ;;  %v3713_v56 = vpop.f32.mrf.mxu0 }
 0x4ba   : > { %v3857_v27 = vpop.f32.mrf.mxu3  ;;  %v3714_v15 = vadd.f32 %v3713_v56, %v8543_v39  ;;  %v3762_v29 = vpop.f32.mrf.mxu1 }
 0x4bb   : > { %v8625_v14 = vadd.f32 %v3857_v27, %v3808_v22 }
 0x4bc   : > { %v8628_v63 = vadd.f32 %v3762_v29, %v3714_v15  ;;  %3908 = vmatmul.bf16.gmra.mxu0 %v7863_v42 }
 0x4bd   : > { %3957 = vmatmul.bf16.gmra.mxu1 %v7865_v43 }
 0x4be   : > { %4006 = vmatmul.bf16.gmra.mxu2 %v7997_v61 }
 0x4bf   : > { %4055 = vmatmul.bf16.gmra.mxu3 %v7999_v3 }
 0x4c1   : > { %v3811_v32 = vpop.f32.mrf.mxu2  ;;  %v3715_v48 = vpop.f32.mrf.mxu0 }
 0x4c2   : > { %v3860_v45 = vpop.f32.mrf.mxu3  ;;  %v3716_v36 = vadd.f32 %v3715_v48, %v8545_v8  ;;  %v3764_v18 = vpop.f32.mrf.mxu1 }
 0x4c3   : > { %v8634_v59 = vadd.f32 %v3860_v45, %v3811_v32 }
 0x4c4   : > { %v8637_v39 = vadd.f32 %v3764_v18, %v3716_v36 }
 0x4c9   : > { %v3813_v60 = vpop.f32.mrf.mxu2  ;;  %v3718_v21 = vpop.f32.mrf.mxu0 }
 0x4ca   : > { %v3862_v37 = vpop.f32.mrf.mxu3  ;;  %v3719_v43 = vadd.f32 %v3718_v21, %v8551_v62  ;;  %v3767_v61 = vpop.f32.mrf.mxu1 }
 0x4cb   : > { %v8639_v42 = vadd.f32 %v3862_v37, %v3813_v60  ;;  %v4076_v37 = vld [vmem:[#allocation8] sm:$0x77] }
 0x4cc   : > { %v8642_v52 = vadd.f32 %v3767_v61, %v3719_v43  ;;  %3913 = vmatmul.bf16.gmra.mxu0 %v7883_v10  ;;  %v4077_v61 = vld [vmem:[#allocation8 + $0x8] sm:$0x77] }
 0x4cd   : > { %3962 = vmatmul.bf16.gmra.mxu1 %v7885_v11 }
 0x4ce   : > { %4011 = vmatmul.bf16.gmra.mxu2 %v8013_v28 }
 0x4cf   : > { %4060 = vmatmul.bf16.gmra.mxu3 %v10602_v4 }
 0x4d1   : > { %v3816_v3 = vpop.f32.mrf.mxu2  ;;  %v3720_v0 = vpop.f32.mrf.mxu0 }
 0x4d2   : > { %v3865_v8 = vpop.f32.mrf.mxu3  ;;  %v3721_v16 = vadd.f32 %v3720_v0, %v8553_v55  ;;  %v3769_v54 = vpop.f32.mrf.mxu1  ;;  %v4079_v0 = vld [vmem:[%s7757_s5] sm:$0xff] }
 0x4d3   : > { %v8648_v5 = vadd.f32 %v3865_v8, %v3816_v3  ;;  %v4275_v3 = vperm.slane %v4076_v37, 4  ;;  %v4080_v8 = vld [vmem:[%s7757_s5 + $0x8] sm:$0xff] }
 0x4d4   : > { %v8651_v62 = vadd.f32 %v3769_v54, %v3721_v16  ;;  %v4081_v16 = vld [vmem:[%s7757_s5 + $0x10] sm:$0xff] }
 0x4d9   : > { %v3818_v20 = vpop.f32.mrf.mxu2  ;;  %v3723_v22 = vpop.f32.mrf.mxu0 }
 0x4da   : > { %v3867_v53 = vpop.f32.mrf.mxu3  ;;  %v3724_v11 = vadd.f32 %v3723_v22, %v8559_v24  ;;  %v3772_v28 = vpop.f32.mrf.mxu1 }
 0x4db   : > { %v8653_v10 = vadd.f32 %v3867_v53, %v3818_v20  ;;  %v8685_v20 = vperm.slane %v4275_v3, 0  ;;  %v4078_v53 = vld [vmem:[#allocation8 + $0x10] sm:$0x77]  ;;  %v4086_v3 = vld [vmem:[%s7757_s5 + $0x38] sm:$0xff] }
 0x4dc   : > { %v8656_v27 = vadd.f32 %v3772_v28, %v3724_v11  ;;  %3918 = vmatmul.bf16.gmra.mxu0 %v7903_v46 }
 0x4dd   : > { %3967 = vmatmul.bf16.gmra.mxu1 %v7905_v47 }
 0x4de   : > { %4016 = vmatmul.bf16.gmra.mxu2 %v10659_v12 }
 0x4df   : > { %4065 = vmatmul.bf16.gmra.mxu3 %v10660_v7 }
 0x4e1   : > { %v3821_v4 = vpop.f32.mrf.mxu2  ;;  %v3725_v56 = vpop.f32.mrf.mxu0 }
 0x4e2   : > { %v3870_v55 = vpop.f32.mrf.mxu3  ;;  %v3726_v29 = vadd.f32 %v3725_v56, %v8561_v17  ;;  %v3774_v32 = vpop.f32.mrf.mxu1 }
 0x4e3   : > { %v8662_v15 = vadd.f32 %v3870_v55, %v3821_v4  ;;  %v10666_v55 = vld [vmem:[#allocation43_spill] sm:$0xff] }
 0x4e4   : > { %v8665_v24 = vadd.f32 %v3774_v32, %v3726_v29  ;;  %v4175_v56 = vadd.f32 %v4079_v0, %v10666_v55  ;;  %v10667_v29 = vld [vmem:[#allocation38_spill] sm:$0xff] }
 0x4e5   : > { %v4177_v32 = vadd.f32 %v4081_v16, %v10667_v29 }
 0x4e9   : > { %v3823_v45 = vpop.f32.mrf.mxu2  ;;  %v3728_v36 = vpop.f32.mrf.mxu0 }
 0x4ea   : > { %v3872_v48 = vpop.f32.mrf.mxu3  ;;  %v3729_v47 = vadd.f32 %v3728_v36, %v8567_v35  ;;  %v3777_v12 = vpop.f32.mrf.mxu1 }
 0x4eb   : > { %v8667_v46 = vadd.f32 %v3872_v48, %v3823_v45  ;;  %v4082_v48 = vld [vmem:[%s7757_s5 + $0x18] sm:$0xff] }
 0x4ec   : > { %v8670_v18 = vadd.f32 %v3777_v12, %v3729_v47  ;;  %3923 = vmatmul.bf16.gmra.mxu0 %v10566_v41  ;;  %v4278_v12 = vperm.slane %v4078_v53, 0 }
 0x4ed   : > { %3972 = vmatmul.bf16.gmra.mxu1 %v10624_v25  ;;  %v4274_v25 = vperm.slane %v4076_v37, 0  ;;  %v10669_v37 = vld [vmem:[#allocation17_spill] sm:$0xff] }
 0x4ee   : > { %4021 = vmatmul.bf16.gmra.mxu2 %v10661_v33  ;;  %v4276_v33 = vperm.slane %v4077_v61, 0  ;;  %v8714_v0 = vperm.slane %v4278_v12, 0 }
 0x4ef   : > { %4070 = vmatmul.bf16.gmra.mxu3 %v10662_v2  ;;  %v10665_v2 = vld [vmem:[#allocation58_spill] sm:$0xff]  ;;  %v8687_v11 = vperm.slane %v4274_v25, 0 }
 0x4f0   : > { %v4176_v54 = vadd.f32 %v4080_v8, %v10665_v2  ;;  %v8691_v45 = vperm.slane %v4276_v33, 0  ;;  %v4085_v8 = vld [vmem:[%s7757_s5 + $0x30] sm:$0xff]  ;;  %v4087_v33 = vld [vmem:[%s7757_s5 + $0x40] sm:$0xff]  ;;  %v4279_v2 = vperm.slane %v4078_v53, 4  ;;  %v4084_v53 = vld [vmem:[%s7757_s5 + $0x28] sm:$0xff] }
 0x4f1   : > { %v3826_v7 = vpop.f32.mrf.mxu2  ;;  %v3730_v60 = vpop.f32.mrf.mxu0 }
 0x4f2   : > { %v3875_v17 = vpop.f32.mrf.mxu3  ;;  %v3731_v35 = vadd.f32 %v3730_v60, %v8570_v31  ;;  %v3779_v43 = vpop.f32.mrf.mxu1  ;;  %v4277_v31 = vperm.slane %v4077_v61, 4  ;;  %v4083_v60 = vld [vmem:[%s7757_s5 + $0x20] sm:$0xff]  ;;  %v8705_v61 = vadd.f32 %v8687_v11, %v4175_v56  ;;  %v8709_v25 = vadd.f32 %v8691_v45, %v4177_v32  ;;  %v10672_v32 = vld [vmem:[#allocation44_spill] sm:$0xff] }
 0x4f3   : > { %v8676_v21 = vadd.f32 %v3875_v17, %v3826_v7  ;;  %v8698_v17 = vadd.f32 %v8685_v20, %v4176_v54 }
 0x4f4   : > { %v8679_v41 = vadd.f32 %v3779_v43, %v3731_v35  ;;  %v4178_v35 = vadd.f32 %v4082_v48, %v10669_v37  ;;  %v8702_v43 = vperm.slane %v4277_v31, 0  ;;  %v10670_v31 = vld [vmem:[#allocation59_spill] sm:$0xff]  ;;  %v10673_v48 = vld [vmem:[#allocation74_spill] sm:$0xff] }
 0x4f5   : > { %10668 = vst [vmem:[#allocation33_spill] sm:$0xff] %v8698_v17  ;;  %v4388_v54 = vadd.f32 %v8698_v17, %v8705_v61  ;;  %v4183_v12 = vadd.f32 %v4087_v33, %v10673_v48  ;;  %v4092_v33 = vld [vmem:[%s7757_s5 + $0x68] sm:$0xff] }
 0x4f9   : > { %v3828_v22 = vpop.f32.mrf.mxu2  ;;  %v3889_v4 = vpop.f32.mrf.mxu0 }
 0x4fa   : > { %v3877_v28 = vpop.f32.mrf.mxu3  ;;  %v3938_v47 = vpop.f32.mrf.mxu1  ;;  %v3890_v7 = vadd.f32 %v3889_v4, %v8578_v23  ;;  %v4179_v23 = vadd.f32 %v4083_v60, %v8572_v34  ;;  %v8720_v4 = vadd.f32 %v8702_v43, %v4178_v35  ;;  %v4181_v34 = vadd.f32 %v4085_v8, %v10672_v32 }
 0x4fb   : > { %v8694_v36 = vadd.f32 %v3877_v28, %v3828_v22  ;;  %v4182_v28 = vadd.f32 %v4086_v3, %v10670_v31  ;;  %v4389_v60 = vadd.f32 %v4388_v54, %v8709_v25  ;;  %v8728_v35 = vperm.slane %v4279_v2, 0  ;;  %v10675_v31 = vld [vmem:[#allocation18_spill] sm:$0xff] }
 0x4fc   : > { %v3939_v16 = vadd.f32 %v3938_v47, %v3890_v7  ;;  %10671 = vst [vmem:[#allocation34_spill] sm:$0xff] %v8720_v4  ;;  %v4088_v47 = vld [vmem:[%s7757_s5 + $0x48] sm:$0xff]  ;;  %v8741_v54 = vadd.f32 %v8687_v11, %v4181_v34  ;;  %v4091_v2 = vld [vmem:[%s7757_s5 + $0x60] sm:$0xff] }
 0x4fd   : > { %v8735_v8 = vadd.f32 %v8685_v20, %v4182_v28  ;;  %v4184_v32 = vadd.f32 %v4088_v47, %v10675_v31  ;;  %v4390_v17 = vadd.f32 %v4389_v60, %v8720_v4  ;;  %v10678_v47 = vld [vmem:[#allocation60_spill] sm:$0xff] }
 0x4fe   : > { %10676 = vst [vmem:[#allocation39_spill] sm:$0xff] %v8741_v54 }
 0x4ff   : > { %10674 = vst [vmem:[#allocation37_spill] sm:$0xff] %v8735_v8  ;;  %v4395_v34 = vadd.f32 %v8735_v8, %v8741_v54 }
 0x501   : > { %v3987_v22 = vpop.f32.mrf.mxu2  ;;  %v3891_v29 = vpop.f32.mrf.mxu0 }
 0x502   : > { %v3988_v55 = vadd.f32 %v3987_v22, %v3939_v16  ;;  %v4036_v56 = vpop.f32.mrf.mxu3  ;;  %v3940_v7 = vpop.f32.mrf.mxu1  ;;  %v3892_v3 = vadd.f32 %v3891_v29, %v8583_v9  ;;  %v8731_v16 = vadd.f32 %v8714_v0, %v4179_v23  ;;  %v4089_v22 = vld [vmem:[%s7757_s5 + $0x50] sm:$0xff]  ;;  %v8744_v9 = vadd.f32 %v8691_v45, %v4183_v12 }
 0x503   : > { %v4093_v23 = vld [vmem:[%s7757_s5 + $0x70] sm:$0xff]  ;;  %v8757_v12 = vadd.f32 %v8702_v43, %v4184_v32 }
 0x504   : > { %v4037_v37 = vadd.f32 %v4036_v56, %v3988_v55  ;;  %v4185_v55 = vadd.f32 %v4089_v22, %v8581_v44  ;;  %v3941_v28 = vadd.f32 %v3940_v7, %v3892_v3  ;;  %v4391_v29 = vadd.f32 %v4390_v17, %v8731_v16  ;;  %v10679_v7 = vld [vmem:[#allocation45_spill] sm:$0xff]  ;;  %v10680_v22 = vld [vmem:[#allocation75_spill] sm:$0xff] }
 0x505   : > { %v4187_v3 = vadd.f32 %v4091_v2, %v10679_v7  ;;  %v4189_v17 = vadd.f32 %v4093_v23, %v10680_v22  ;;  %v4095_v2 = vld [vmem:[%s7757_s5 + $0x80] sm:$0xff]  ;;  %v10683_v7 = vld [vmem:[#allocation21_spill] sm:$0xff] }
 0x506   : > { %v4180_v48 = vadd.f32 %v4084_v53, %v4037_v37  ;;  %v4188_v53 = vadd.f32 %v4092_v33, %v10678_v47  ;;  %v4090_v33 = vld [vmem:[%s7757_s5 + $0x58] sm:$0xff] }
 0x508   : > { %v8750_v56 = vadd.f32 %v8728_v35, %v4180_v48  ;;  %v4094_v48 = vld [vmem:[%s7757_s5 + $0x78] sm:$0xff] }
 0x509   : > { %v3989_v60 = vpop.f32.mrf.mxu2  ;;  %v3894_v4 = vpop.f32.mrf.mxu0  ;;  %v4190_v23 = vadd.f32 %v4094_v48, %v10683_v7  ;;  %v10686_v48 = vld [vmem:[#allocation61_spill] sm:$0xff] }
 0x50a   : > { %10677 = vst [vmem:[#allocation40_spill] sm:$0xff] %v8750_v56  ;;  %v3990_v37 = vadd.f32 %v3989_v60, %v3941_v28  ;;  %v4038_v31 = vpop.f32.mrf.mxu3  ;;  %v4392_v44 = vadd.f32 %v4391_v29, %v8750_v56  ;;  %v3943_v47 = vpop.f32.mrf.mxu1  ;;  %v3895_v32 = vadd.f32 %v3894_v4, %v8592_v19  ;;  %v8766_v28 = vadd.f32 %v8714_v0, %v4185_v55  ;;  %v4097_v4 = vld [vmem:[%s7757_s5 + $0x90] sm:$0xff]  ;;  %v4099_v55 = vld [vmem:[%s7757_s5 + $0xa0] sm:$0xff] }
 0x50b   : > { %v4396_v60 = vadd.f32 %v4395_v34, %v8744_v9  ;;  %v8770_v29 = vadd.f32 %v8685_v20, %v4188_v53  ;;  %v8776_v56 = vadd.f32 %v8687_v11, %v4187_v3  ;;  %v8780_v19 = vadd.f32 %v8691_v45, %v4189_v17 }
 0x50c   : > { %v4039_v8 = vadd.f32 %v4038_v31, %v3990_v37  ;;  %4393 = vadd.xlane.f32.xlu0 %v4392_v44  ;;  %10681 = vst [vmem:[#allocation41_spill] sm:$0xff] %v8766_v28  ;;  %v4098_v37 = vld [vmem:[%s7757_s5 + $0x98] sm:$0xff]  ;;  %v4191_v53 = vadd.f32 %v4095_v2, %v8586_v13  ;;  %v3944_v34 = vadd.f32 %v3943_v47, %v3895_v32  ;;  %v10688_v32 = vld [vmem:[#allocation46_spill] sm:$0xff] }
 0x50d   : > { %10682 = vst [vmem:[#allocation42_spill] sm:$0xff] %v8770_v29  ;;  %v4397_v54 = vadd.f32 %v4396_v60, %v8757_v12  ;;  %v4402_v44 = vadd.f32 %v8770_v29, %v8776_v56  ;;  %v8793_v17 = vadd.f32 %v8702_v43, %v4190_v23  ;;  %v4193_v2 = vadd.f32 %v4097_v4, %v10688_v32  ;;  %v4096_v29 = vld [vmem:[%s7757_s5 + $0x88] sm:$0xff] }
 0x50e   : > { %v4186_v22 = vadd.f32 %v4090_v33, %v4039_v8  ;;  %10684 = vst [vmem:[#allocation19_spill] sm:$0xff] %v8776_v56  ;;  %v4194_v33 = vadd.f32 %v4098_v37, %v10686_v48  ;;  %v8802_v23 = vadd.f32 %v8714_v0, %v4191_v53  ;;  %v4104_v4 = vld [vmem:[%s7757_s5 + $0xc8] sm:$0xff]  ;;  %v4103_v53 = vld [vmem:[%s7757_s5 + $0xc0] sm:$0xff] }
 0x50f   : > { %v4398_v8 = vadd.f32 %v4397_v54, %v8766_v28  ;;  %10687 = vst [vmem:[#allocation58_spill] sm:$0xff] %v8793_v17  ;;  %v4100_v28 = vld [vmem:[%s7757_s5 + $0xa8] sm:$0xff] }
 0x510   : > { %v8786_v31 = vadd.f32 %v8728_v35, %v4186_v22  ;;  %v10689_v22 = vld [vmem:[#allocation76_spill] sm:$0xff] }
 0x511   : > { %v3992_v3 = vpop.f32.mrf.mxu2  ;;  %v3896_v13 = vpop.f32.mrf.mxu0  ;;  %v4195_v54 = vadd.f32 %v4099_v55, %v10689_v22  ;;  %v10691_v55 = vld [vmem:[#allocation22_spill] sm:$0xff] }
 0x512   : > { %10685 = vst [vmem:[#allocation20_spill] sm:$0xff] %v8786_v31  ;;  %v3993_v60 = vadd.f32 %v3992_v3, %v3944_v34  ;;  %v4041_v7 = vpop.f32.mrf.mxu3  ;;  %v4399_v47 = vadd.f32 %v4398_v8, %v8786_v31  ;;  %v3945_v56 = vpop.f32.mrf.mxu1  ;;  %v3897_v48 = vadd.f32 %v3896_v13, %v8597_v26  ;;  %v4403_v34 = vadd.f32 %v4402_v44, %v8780_v19  ;;  %v4101_v3 = vld [vmem:[%s7757_s5 + $0xb0] sm:$0xff] }
 0x513   : > { %v8807_v8 = vadd.f32 %v8685_v20, %v4194_v33  ;;  %v4196_v32 = vadd.f32 %v4100_v28, %v10691_v55  ;;  %v8816_v26 = vadd.f32 %v8691_v45, %v4195_v54  ;;  %v4197_v44 = vadd.f32 %v4101_v3, %v8595_v40  ;;  %v10696_v3 = vld [vmem:[#allocation77_spill] sm:$0xff] }
 0x514   : > { %v4042_v37 = vadd.f32 %v4041_v7, %v3993_v60  ;;  %4400 = vadd.xlane.f32.xlu0 %v4399_v47  ;;  %v4404_v31 = vadd.f32 %v4403_v34, %v8793_v17  ;;  %v8813_v60 = vadd.f32 %v8687_v11, %v4193_v2  ;;  %v4105_v7 = vld [vmem:[%s7757_s5 + $0xd0] sm:$0xff]  ;;  %v3946_v33 = vadd.f32 %v3945_v56, %v3897_v48  ;;  %v10695_v56 = vld [vmem:[#allocation47_spill] sm:$0xff] }
 0x515   : > { %10690 = vst [vmem:[#allocation43_spill] sm:$0xff] %v8807_v8  ;;  %v8829_v54 = vadd.f32 %v8702_v43, %v4196_v32  ;;  %v4199_v48 = vadd.f32 %v4103_v53, %v10695_v56  ;;  %v4107_v53 = vld [vmem:[%s7757_s5 + $0xe0] sm:$0xff]  ;;  %v10699_v56 = vld [vmem:[#allocation23_spill] sm:$0xff] }
 0x516   : > { %v4192_v22 = vadd.f32 %v4096_v29, %v4042_v37  ;;  %10692 = vst [vmem:[#allocation38_spill] sm:$0xff] %v8813_v60  ;;  %v4405_v28 = vadd.f32 %v4404_v31, %v8802_v23  ;;  %v10694_v29 = vld [vmem:[#allocation62_spill] sm:$0xff]  ;;  %v4409_v2 = vadd.f32 %v8807_v8, %v8813_v60  ;;  %v4201_v31 = vadd.f32 %v4105_v7, %v10696_v3 }
 0x517   : > { %v4200_v47 = vadd.f32 %v4104_v4, %v10694_v29  ;;  %v4102_v4 = vld [vmem:[%s7757_s5 + $0xb8] sm:$0xff] }
 0x518   : > { %v8822_v13 = vadd.f32 %v8728_v35, %v4192_v22  ;;  %v4106_v22 = vld [vmem:[%s7757_s5 + $0xd8] sm:$0xff] }
 0x519   : > { %v3994_v37 = vpop.f32.mrf.mxu2  ;;  %v3899_v17 = vpop.f32.mrf.mxu0  ;;  %v4202_v7 = vadd.f32 %v4106_v22, %v10699_v56  ;;  %v10702_v22 = vld [vmem:[#allocation63_spill] sm:$0xff] }
 0x51a   : > { %10693 = vst [vmem:[#allocation17_spill] sm:$0xff] %v8822_v13  ;;  %v3995_v34 = vadd.f32 %v3994_v37, %v3946_v33  ;;  %v4043_v55 = vpop.f32.mrf.mxu3  ;;  %v4406_v40 = vadd.f32 %v4405_v28, %v8822_v13  ;;  %v3948_v29 = vpop.f32.mrf.mxu1  ;;  %v3900_v32 = vadd.f32 %v3899_v17, %v8606_v49  ;;  %v8838_v33 = vadd.f32 %v8714_v0, %v4197_v44  ;;  %v4109_v17 = vld [vmem:[%s7757_s5 + $0xf0] sm:$0xff]  ;;  %v4111_v44 = vld [vmem:[%s7757_s5 + $0x100] sm:$0xff] }
 0x51b   : > { %v4410_v37 = vadd.f32 %v4409_v2, %v8816_v26  ;;  %v8842_v28 = vadd.f32 %v8685_v20, %v4200_v47  ;;  %v8848_v13 = vadd.f32 %v8687_v11, %v4199_v48  ;;  %v8852_v49 = vadd.f32 %v8691_v45, %v4201_v31 }
 0x51c   : > { %v4044_v8 = vadd.f32 %v4043_v55, %v3995_v34  ;;  %4407 = vadd.xlane.f32.xlu1 %v4406_v40  ;;  %10697 = vst [vmem:[#allocation59_spill] sm:$0xff] %v8838_v33  ;;  %v4110_v34 = vld [vmem:[%s7757_s5 + $0xf8] sm:$0xff]  ;;  %v4203_v47 = vadd.f32 %v4107_v53, %v8600_v1  ;;  %v3949_v2 = vadd.f32 %v3948_v29, %v3900_v32  ;;  %v10704_v32 = vld [vmem:[#allocation48_spill] sm:$0xff] }
 0x51d   : > { %10698 = vst [vmem:[#allocation44_spill] sm:$0xff] %v8842_v28  ;;  %v4411_v60 = vadd.f32 %v4410_v37, %v8829_v54  ;;  %v4416_v40 = vadd.f32 %v8842_v28, %v8848_v13  ;;  %v8865_v31 = vadd.f32 %v8702_v43, %v4202_v7  ;;  %v4205_v53 = vadd.f32 %v4109_v17, %v10704_v32  ;;  %v4108_v28 = vld [vmem:[%s7757_s5 + $0xe8] sm:$0xff] }
 0x51e   : > { %v4198_v3 = vadd.f32 %v4102_v4, %v4044_v8  ;;  %10700 = vst [vmem:[#allocation74_spill] sm:$0xff] %v8848_v13  ;;  %v4206_v4 = vadd.f32 %v4110_v34, %v10702_v22  ;;  %v8874_v7 = vadd.f32 %v8714_v0, %v4203_v47  ;;  %v4116_v17 = vld [vmem:[%s7757_s5 + $0x128] sm:$0xff]  ;;  %v4115_v47 = vld [vmem:[%s7757_s5 + $0x120] sm:$0xff] }
 0x51f   : > { %v4412_v8 = vadd.f32 %v4411_v60, %v8838_v33  ;;  %10703 = vst [vmem:[#allocation60_spill] sm:$0xff] %v8865_v31  ;;  %v4112_v33 = vld [vmem:[%s7757_s5 + $0x108] sm:$0xff] }
 0x520   : > { %v8858_v55 = vadd.f32 %v8728_v35, %v4198_v3  ;;  %v10705_v3 = vld [vmem:[#allocation78_spill] sm:$0xff] }
 0x521   : > { %v3997_v48 = vpop.f32.mrf.mxu2  ;;  %v3901_v1 = vpop.f32.mrf.mxu0  ;;  %v4207_v60 = vadd.f32 %v4111_v44, %v10705_v3  ;;  %v10707_v44 = vld [vmem:[#allocation24_spill] sm:$0xff] }
 0x522   : > { %10701 = vst [vmem:[#allocation18_spill] sm:$0xff] %v8858_v55  ;;  %v3998_v37 = vadd.f32 %v3997_v48, %v3949_v2  ;;  %v4046_v56 = vpop.f32.mrf.mxu3  ;;  %v4413_v29 = vadd.f32 %v4412_v8, %v8858_v55  ;;  %v3950_v13 = vpop.f32.mrf.mxu1  ;;  %v3902_v22 = vadd.f32 %v3901_v1, %v8611_v51  ;;  %v4417_v2 = vadd.f32 %v4416_v40, %v8852_v49  ;;  %v4113_v48 = vld [vmem:[%s7757_s5 + $0x110] sm:$0xff] }
 0x523   : > { %v8879_v8 = vadd.f32 %v8685_v20, %v4206_v4  ;;  %v4208_v32 = vadd.f32 %v4112_v33, %v10707_v44  ;;  %v8888_v51 = vadd.f32 %v8691_v45, %v4207_v60  ;;  %v4209_v40 = vadd.f32 %v4113_v48, %v8609_v6  ;;  %v10713_v48 = vld [vmem:[#allocation79_spill] sm:$0xff] }
 0x524   : > { %v4047_v34 = vadd.f32 %v4046_v56, %v3998_v37  ;;  %4414 = vadd.xlane.f32.xlu1 %v4413_v29  ;;  %v4418_v55 = vadd.f32 %v4417_v2, %v8865_v31  ;;  %v8885_v37 = vadd.f32 %v8687_v11, %v4205_v53  ;;  %v4117_v56 = vld [vmem:[%s7757_s5 + $0x130] sm:$0xff]  ;;  %v3951_v4 = vadd.f32 %v3950_v13, %v3902_v22  ;;  %v10712_v13 = vld [vmem:[#allocation49_spill] sm:$0xff] }
 0x525   : > { %10706 = vst [vmem:[#allocation45_spill] sm:$0xff] %v8879_v8  ;;  %v8901_v60 = vadd.f32 %v8702_v43, %v4208_v32  ;;  %v4211_v22 = vadd.f32 %v4115_v47, %v10712_v13  ;;  %v4119_v47 = vld [vmem:[%s7757_s5 + $0x140] sm:$0xff]  ;;  %v10716_v13 = vld [vmem:[#allocation25_spill] sm:$0xff] }
 0x526   : > { %v4204_v3 = vadd.f32 %v4108_v28, %v4047_v34  ;;  %10708 = vst [vmem:[#allocation75_spill] sm:$0xff] %v8885_v37  ;;  %v4419_v33 = vadd.f32 %v4418_v55, %v8874_v7  ;;  %v10710_v28 = vld [vmem:[#allocation64_spill] sm:$0xff]  ;;  %v4423_v53 = vadd.f32 %v8879_v8, %v8885_v37  ;;  %v4213_v55 = vadd.f32 %v4117_v56, %v10713_v48 }
 0x527   : > { %v4212_v29 = vadd.f32 %v4116_v17, %v10710_v28  ;;  %10711 = vst [vmem:[#allocation61_spill] sm:$0xff] %v8901_v60  ;;  %v4114_v17 = vld [vmem:[%s7757_s5 + $0x118] sm:$0xff] }
 0x528   : > { %v8894_v1 = vadd.f32 %v8728_v35, %v4204_v3  ;;  %v4118_v3 = vld [vmem:[%s7757_s5 + $0x138] sm:$0xff] }
 0x529   : > { %v3999_v34 = vpop.f32.mrf.mxu2  ;;  %v3904_v31 = vpop.f32.mrf.mxu0  ;;  %v4214_v56 = vadd.f32 %v4118_v3, %v10716_v13  ;;  %v10719_v3 = vld [vmem:[#allocation65_spill] sm:$0xff] }
 0x52a   : > { %10709 = vst [vmem:[#allocation21_spill] sm:$0xff] %v8894_v1  ;;  %v4000_v2 = vadd.f32 %v3999_v34, %v3951_v4  ;;  %v4048_v44 = vpop.f32.mrf.mxu3  ;;  %v4420_v6 = vadd.f32 %v4419_v33, %v8894_v1  ;;  %v3953_v28 = vpop.f32.mrf.mxu1  ;;  %v3905_v32 = vadd.f32 %v3904_v31, %v8620_v38  ;;  %v8910_v4 = vadd.f32 %v8714_v0, %v4209_v40  ;;  %v4121_v31 = vld [vmem:[%s7757_s5 + $0x150] sm:$0xff]  ;;  %v4123_v40 = vld [vmem:[%s7757_s5 + $0x160] sm:$0xff] }
 0x52b   : > { %v4424_v34 = vadd.f32 %v4423_v53, %v8888_v51  ;;  %v8914_v33 = vadd.f32 %v8685_v20, %v4212_v29  ;;  %v8920_v1 = vadd.f32 %v8687_v11, %v4211_v22  ;;  %v8924_v38 = vadd.f32 %v8691_v45, %v4213_v55 }
 0x52c   : > { %v4049_v8 = vadd.f32 %v4048_v44, %v4000_v2  ;;  %4421 = vadd.xlane.f32.xlu2 %v4420_v6  ;;  %10714 = vst [vmem:[#allocation46_spill] sm:$0xff] %v8910_v4  ;;  %v4122_v2 = vld [vmem:[%s7757_s5 + $0x158] sm:$0xff]  ;;  %v4215_v29 = vadd.f32 %v4119_v47, %v8614_v58  ;;  %v3954_v53 = vadd.f32 %v3953_v28, %v3905_v32  ;;  %v10720_v32 = vld [vmem:[#allocation50_spill] sm:$0xff] }
 0x52d   : > { %10715 = vst [vmem:[#allocation76_spill] sm:$0xff] %v8914_v33  ;;  %v4425_v37 = vadd.f32 %v4424_v34, %v8901_v60  ;;  %v4430_v6 = vadd.f32 %v8914_v33, %v8920_v1  ;;  %v8937_v55 = vadd.f32 %v8702_v43, %v4214_v56  ;;  %v4217_v47 = vadd.f32 %v4121_v31, %v10720_v32  ;;  %v4120_v33 = vld [vmem:[%s7757_s5 + $0x148] sm:$0xff] }
 0x52e   : > { %v4210_v48 = vadd.f32 %v4114_v17, %v4049_v8  ;;  %10717 = vst [vmem:[#allocation22_spill] sm:$0xff] %v8920_v1  ;;  %v4218_v17 = vadd.f32 %v4122_v2, %v10719_v3  ;;  %v8946_v56 = vadd.f32 %v8714_v0, %v4215_v29  ;;  %v4125_v3 = vld [vmem:[%s7757_s5 + $0x170] sm:$0xff]  ;;  %v4128_v31 = vld [vmem:[%s7757_s5 + $0x188] sm:$0xff] }
 0x52f   : > { %v4426_v8 = vadd.f32 %v4425_v37, %v8910_v4  ;;  %v4124_v4 = vld [vmem:[%s7757_s5 + $0x168] sm:$0xff]  ;;  %v4431_v2 = vadd.f32 %v4430_v6, %v8924_v38  ;;  %v8957_v60 = vadd.f32 %v8687_v11, %v4217_v47  ;;  %v4127_v6 = vld [vmem:[%s7757_s5 + $0x180] sm:$0xff] }
 0x530   : > { %v8930_v44 = vadd.f32 %v8728_v35, %v4210_v48  ;;  %v10721_v48 = vld [vmem:[#allocation80_spill] sm:$0xff] }
 0x531   : > { %v4002_v22 = vpop.f32.mrf.mxu2  ;;  %v3906_v58 = vpop.f32.mrf.mxu0  ;;  %v4219_v37 = vadd.f32 %v4123_v40, %v10721_v48  ;;  %v10723_v40 = vld [vmem:[#allocation26_spill] sm:$0xff]  ;;  %10724 = vst [vmem:[#allocation77_spill] sm:$0xff] %v8957_v60 }
 0x532   : > { %10718 = vst [vmem:[#allocation62_spill] sm:$0xff] %v8930_v44  ;;  %v4003_v34 = vadd.f32 %v4002_v22, %v3954_v53  ;;  %v4051_v13 = vpop.f32.mrf.mxu3  ;;  %v4427_v28 = vadd.f32 %v4426_v8, %v8930_v44  ;;  %v3955_v1 = vpop.f32.mrf.mxu1  ;;  %v3907_v22 = vadd.f32 %v3906_v58, %v8625_v14  ;;  %v8951_v8 = vadd.f32 %v8685_v20, %v4218_v17  ;;  %v4129_v14 = vld [vmem:[%s7757_s5 + $0x190] sm:$0xff] }
 0x533   : > { %v4220_v32 = vadd.f32 %v4124_v4, %v10723_v40  ;;  %v4432_v44 = vadd.f32 %v4431_v2, %v8937_v55  ;;  %v8960_v29 = vadd.f32 %v8691_v45, %v4219_v37 }
 0x534   : > { %v4052_v53 = vadd.f32 %v4051_v13, %v4003_v34  ;;  %4428 = vadd.xlane.f32.xlu2 %v4427_v28  ;;  %10722 = vst [vmem:[#allocation47_spill] sm:$0xff] %v8951_v8  ;;  %v4221_v34 = vadd.f32 %v4125_v3, %v8623_v30  ;;  %v3956_v17 = vadd.f32 %v3955_v1, %v3907_v22  ;;  %v10728_v1 = vld [vmem:[#allocation51_spill] sm:$0xff]  ;;  %v10729_v3 = vld [vmem:[#allocation81_spill] sm:$0xff] }
 0x535   : > { %v4433_v4 = vadd.f32 %v4432_v44, %v8946_v56  ;;  %v4437_v47 = vadd.f32 %v8951_v8, %v8957_v60  ;;  %v8973_v37 = vadd.f32 %v8702_v43, %v4220_v32  ;;  %v4223_v22 = vadd.f32 %v4127_v6, %v10728_v1  ;;  %v4131_v6 = vld [vmem:[%s7757_s5 + $0x1a0] sm:$0xff]  ;;  %v10732_v1 = vld [vmem:[#allocation27_spill] sm:$0xff] }
 0x536   : > { %v4216_v48 = vadd.f32 %v4120_v33, %v4052_v53  ;;  %v10726_v33 = vld [vmem:[#allocation66_spill] sm:$0xff]  ;;  %v4225_v44 = vadd.f32 %v4129_v14, %v10729_v3 }
 0x537   : > { %v4224_v58 = vadd.f32 %v4128_v31, %v10726_v33  ;;  %10727 = vst [vmem:[#allocation63_spill] sm:$0xff] %v8973_v37  ;;  %v4126_v31 = vld [vmem:[%s7757_s5 + $0x178] sm:$0xff] }
 0x538   : > { %v8966_v13 = vadd.f32 %v8728_v35, %v4216_v48  ;;  %v4130_v48 = vld [vmem:[%s7757_s5 + $0x198] sm:$0xff] }
 0x539   : > { %v4004_v28 = vpop.f32.mrf.mxu2  ;;  %v3909_v40 = vpop.f32.mrf.mxu0  ;;  %v4226_v14 = vadd.f32 %v4130_v48, %v10732_v1  ;;  %v10735_v48 = vld [vmem:[#allocation67_spill] sm:$0xff] }
 0x53a   : > { %10725 = vst [vmem:[#allocation23_spill] sm:$0xff] %v8966_v13  ;;  %v4005_v2 = vadd.f32 %v4004_v28, %v3956_v17  ;;  %v4053_v53 = vpop.f32.mrf.mxu3  ;;  %v4434_v30 = vadd.f32 %v4433_v4, %v8966_v13  ;;  %v3958_v33 = vpop.f32.mrf.mxu1  ;;  %v3910_v32 = vadd.f32 %v3909_v40, %v8634_v59  ;;  %v8982_v17 = vadd.f32 %v8714_v0, %v4221_v34  ;;  %v4133_v34 = vld [vmem:[%s7757_s5 + $0x1b0] sm:$0xff] }
 0x53b   : > { %v4438_v28 = vadd.f32 %v4437_v47, %v8960_v29  ;;  %v8986_v4 = vadd.f32 %v8685_v20, %v4224_v58  ;;  %v8992_v13 = vadd.f32 %v8687_v11, %v4223_v22  ;;  %v8996_v59 = vadd.f32 %v8691_v45, %v4225_v44 }
 0x53c   : > { %v4054_v8 = vadd.f32 %v4053_v53, %v4005_v2  ;;  %4435 = vadd.xlane.f32.xlu0 %v4434_v30  ;;  %10730 = vst [vmem:[#allocation48_spill] sm:$0xff] %v8982_v17  ;;  %v4134_v2 = vld [vmem:[%s7757_s5 + $0x1b8] sm:$0xff]  ;;  %v4135_v53 = vld [vmem:[%s7757_s5 + $0x1c0] sm:$0xff]  ;;  %v4227_v58 = vadd.f32 %v4131_v6, %v8628_v63  ;;  %v3959_v47 = vadd.f32 %v3958_v33, %v3910_v32  ;;  %v10736_v32 = vld [vmem:[#allocation52_spill] sm:$0xff] }
 0x53d   : > { %10731 = vst [vmem:[#allocation78_spill] sm:$0xff] %v8986_v4  ;;  %v4439_v60 = vadd.f32 %v4438_v28, %v8973_v37  ;;  %v4444_v30 = vadd.f32 %v8986_v4, %v8992_v13  ;;  %v9009_v44 = vadd.f32 %v8702_v43, %v4226_v14  ;;  %v4229_v6 = vadd.f32 %v4133_v34, %v10736_v32  ;;  %v4132_v4 = vld [vmem:[%s7757_s5 + $0x1a8] sm:$0xff] }
 0x53e   : > { %v4222_v3 = vadd.f32 %v4126_v31, %v4054_v8  ;;  %10733 = vst [vmem:[#allocation24_spill] sm:$0xff] %v8992_v13  ;;  %v4230_v31 = vadd.f32 %v4134_v2, %v10735_v48  ;;  %v9018_v14 = vadd.f32 %v8714_v0, %v4227_v58  ;;  %v4137_v48 = vld [vmem:[%s7757_s5 + $0x1d0] sm:$0xff]  ;;  %v4140_v34 = vld [vmem:[%s7757_s5 + $0x1e8] sm:$0xff] }
 0x53f   : > { %v4440_v8 = vadd.f32 %v4439_v60, %v8982_v17  ;;  %v4136_v17 = vld [vmem:[%s7757_s5 + $0x1c8] sm:$0xff]  ;;  %v4445_v2 = vadd.f32 %v4444_v30, %v8996_v59  ;;  %v9029_v37 = vadd.f32 %v8687_v11, %v4229_v6  ;;  %v4139_v30 = vld [vmem:[%s7757_s5 + $0x1e0] sm:$0xff] }
 0x540   : > { %v9002_v40 = vadd.f32 %v8728_v35, %v4222_v3  ;;  %v10737_v3 = vld [vmem:[#allocation82_spill] sm:$0xff] }
 0x541   : > { %v4007_v22 = vpop.f32.mrf.mxu2  ;;  %v3911_v63 = vpop.f32.mrf.mxu0  ;;  %v4231_v60 = vadd.f32 %v4135_v53, %v10737_v3  ;;  %v10739_v53 = vld [vmem:[#allocation28_spill] sm:$0xff]  ;;  %10740 = vst [vmem:[#allocation79_spill] sm:$0xff] %v9029_v37 }
 0x542   : > { %10734 = vst [vmem:[#allocation64_spill] sm:$0xff] %v9002_v40  ;;  %v4008_v28 = vadd.f32 %v4007_v22, %v3959_v47  ;;  %v4056_v1 = vpop.f32.mrf.mxu3  ;;  %v4441_v33 = vadd.f32 %v4440_v8, %v9002_v40  ;;  %v3960_v13 = vpop.f32.mrf.mxu1  ;;  %v3912_v22 = vadd.f32 %v3911_v63, %v8639_v42  ;;  %v9023_v8 = vadd.f32 %v8685_v20, %v4230_v31  ;;  %v4141_v42 = vld [vmem:[%s7757_s5 + $0x1f0] sm:$0xff] }
 0x543   : > { %v4232_v32 = vadd.f32 %v4136_v17, %v10739_v53  ;;  %v4446_v40 = vadd.f32 %v4445_v2, %v9009_v44  ;;  %v9032_v58 = vadd.f32 %v8691_v45, %v4231_v60 }
 0x544   : > { %v4057_v47 = vadd.f32 %v4056_v1, %v4008_v28  ;;  %4442 = vadd.xlane.f32.xlu1 %v4441_v33  ;;  %10738 = vst [vmem:[#allocation49_spill] sm:$0xff] %v9023_v8  ;;  %v4233_v28 = vadd.f32 %v4137_v48, %v8637_v39  ;;  %v3961_v31 = vadd.f32 %v3960_v13, %v3912_v22  ;;  %v10743_v13 = vld [vmem:[#allocation53_spill] sm:$0xff]  ;;  %v10744_v48 = vld [vmem:[#allocation83_spill] sm:$0xff] }
 0x545   : > { %v4447_v17 = vadd.f32 %v4446_v40, %v9018_v14  ;;  %v4451_v6 = vadd.f32 %v9023_v8, %v9029_v37  ;;  %v9045_v60 = vadd.f32 %v8702_v43, %v4232_v32  ;;  %v4235_v22 = vadd.f32 %v4139_v30, %v10743_v13  ;;  %v4143_v30 = vld [vmem:[%s7757_s5 + $0x200] sm:$0xff] }
 0x546   : > { %v4228_v3 = vadd.f32 %v4132_v4, %v4057_v47  ;;  %v10741_v4 = vld [vmem:[#allocation68_spill] sm:$0xff]  ;;  %v4237_v40 = vadd.f32 %v4141_v42, %v10744_v48  ;;  %v9053_v8 = vadd.f32 %v8714_v0, %v4233_v28  ;;  %v4146_v28 = vld [vmem:[%s7757_s5 + $0x218] sm:$0xff] }
 0x547   : > { %v4236_v63 = vadd.f32 %v4140_v34, %v10741_v4  ;;  %10742 = vst [vmem:[#allocation25_spill] sm:$0xff] %v9045_v60  ;;  %v4138_v34 = vld [vmem:[%s7757_s5 + $0x1d8] sm:$0xff]  ;;  %v9064_v37 = vadd.f32 %v8687_v11, %v4235_v22 }
 0x548   : > { %v9038_v1 = vadd.f32 %v8728_v35, %v4228_v3  ;;  %v4142_v3 = vld [vmem:[%s7757_s5 + $0x1f8] sm:$0xff]  ;;  %10745 = vst [vmem:[#allocation65_spill] sm:$0xff] %v9053_v8 }
 0x549   : > { %v4009_v33 = vpop.f32.mrf.mxu2  ;;  %v3914_v53 = vpop.f32.mrf.mxu0  ;;  %v4238_v42 = vadd.f32 %v4142_v3, %v8483_v57  ;;  %10747 = vst [vmem:[#allocation80_spill] sm:$0xff] %v9064_v37  ;;  %v10749_v3 = vld [vmem:[#allocation69_spill] sm:$0xff] }
 0x54a   : > { %v4010_v2 = vadd.f32 %v4009_v33, %v3961_v31  ;;  %v4058_v47 = vpop.f32.mrf.mxu3  ;;  %v4448_v39 = vadd.f32 %v4447_v17, %v9038_v1  ;;  %v3963_v4 = vpop.f32.mrf.mxu1  ;;  %v3915_v31 = vadd.f32 %v3914_v53, %v8648_v5  ;;  %v4452_v33 = vadd.f32 %v4451_v6, %v9032_v58  ;;  %v4145_v5 = vld [vmem:[%s7757_s5 + $0x210] sm:$0xff] }
 0x54b   : > { %v9058_v17 = vadd.f32 %v8685_v20, %v4236_v63  ;;  %v4239_v63 = vadd.f32 %v4143_v30, %v8642_v52 }
 0x54c   : > { %v4059_v32 = vadd.f32 %v4058_v47, %v4010_v2  ;;  %4449 = vadd.xlane.f32.xlu2 %v4448_v39  ;;  %v4453_v48 = vadd.f32 %v4452_v33, %v9045_v60  ;;  %v9068_v2 = vadd.f32 %v8691_v45, %v4237_v40  ;;  %v4147_v47 = vld [vmem:[%s7757_s5 + $0x220] sm:$0xff]  ;;  %v3964_v6 = vadd.f32 %v3963_v4, %v3915_v31 }
 0x54d   : > { %10746 = vst [vmem:[#allocation50_spill] sm:$0xff] %v9058_v17  ;;  %v4458_v39 = vadd.f32 %v9058_v17, %v9064_v37  ;;  %v9081_v40 = vadd.f32 %v8702_v43, %v4238_v42  ;;  %v10750_v31 = vld [vmem:[#allocation54_spill] sm:$0xff]  ;;  %v4144_v17 = vld [vmem:[%s7757_s5 + $0x208] sm:$0xff]  ;;  %v9090_v42 = vadd.f32 %v8714_v0, %v4239_v63 }
 0x54e   : > { %v4234_v13 = vadd.f32 %v4138_v34, %v4059_v32  ;;  %v4454_v57 = vadd.f32 %v4453_v48, %v9053_v8  ;;  %v4242_v34 = vadd.f32 %v4146_v28, %v10749_v3  ;;  %v4241_v30 = vadd.f32 %v4145_v5, %v10750_v31  ;;  %v4148_v8 = vld [vmem:[%s7757_s5 + $0x228] sm:$0xff]  ;;  %v4149_v3 = vld [vmem:[%s7757_s5 + $0x230] sm:$0xff] }
 0x54f   : > { %v4459_v28 = vadd.f32 %v4458_v39, %v9068_v2  ;;  %v4152_v5 = vld [vmem:[%s7757_s5 + $0x248] sm:$0xff]  ;;  %v4151_v39 = vld [vmem:[%s7757_s5 + $0x240] sm:$0xff] }
 0x550   : > { %v9074_v53 = vadd.f32 %v8728_v35, %v4234_v13  ;;  %v10751_v13 = vld [vmem:[#allocation84_spill] sm:$0xff]  ;;  %v9101_v60 = vadd.f32 %v8687_v11, %v4241_v30 }
 0x551   : > { %v4012_v22 = vpop.f32.mrf.mxu2  ;;  %v3916_v52 = vpop.f32.mrf.mxu0  ;;  %v4243_v48 = vadd.f32 %v4147_v47, %v10751_v13  ;;  %v10753_v47 = vld [vmem:[#allocation29_spill] sm:$0xff] }
 0x552   : > { %10748 = vst [vmem:[#allocation26_spill] sm:$0xff] %v9074_v53  ;;  %v4013_v32 = vadd.f32 %v4012_v22, %v3964_v6  ;;  %v4061_v33 = vpop.f32.mrf.mxu3  ;;  %v4455_v4 = vadd.f32 %v4454_v57, %v9074_v53  ;;  %v3965_v37 = vpop.f32.mrf.mxu1  ;;  %v3917_v22 = vadd.f32 %v3916_v52, %v8653_v10  ;;  %v9095_v57 = vadd.f32 %v8685_v20, %v4242_v34  ;;  %v4153_v10 = vld [vmem:[%s7757_s5 + $0x250] sm:$0xff] }
 0x553   : > { %v4244_v31 = vadd.f32 %v4148_v8, %v10753_v47  ;;  %v4460_v53 = vadd.f32 %v4459_v28, %v9081_v40  ;;  %10754 = vst [vmem:[#allocation51_spill] sm:$0xff] %v9101_v60  ;;  %v9104_v63 = vadd.f32 %v8691_v45, %v4243_v48 }
 0x554   : > { %v4062_v6 = vadd.f32 %v4061_v33, %v4013_v32  ;;  %4456 = vadd.xlane.f32.xlu0 %v4455_v4  ;;  %10752 = vst [vmem:[#allocation66_spill] sm:$0xff] %v9095_v57  ;;  %v4245_v32 = vadd.f32 %v4149_v3, %v8651_v62  ;;  %v3966_v34 = vadd.f32 %v3965_v37, %v3917_v22  ;;  %v10758_v37 = vld [vmem:[#allocation55_spill] sm:$0xff]  ;;  %v10759_v3 = vld [vmem:[#allocation85_spill] sm:$0xff] }
 0x555   : > { %v4461_v8 = vadd.f32 %v4460_v53, %v9090_v42  ;;  %v4465_v30 = vadd.f32 %v9095_v57, %v9101_v60  ;;  %v9117_v48 = vadd.f32 %v8702_v43, %v4244_v31  ;;  %v4247_v22 = vadd.f32 %v4151_v39, %v10758_v37  ;;  %v4155_v39 = vld [vmem:[%s7757_s5 + $0x260] sm:$0xff] }
 0x556   : > { %v4240_v13 = vadd.f32 %v4144_v17, %v4062_v6  ;;  %v10756_v17 = vld [vmem:[#allocation70_spill] sm:$0xff]  ;;  %v4249_v53 = vadd.f32 %v4153_v10, %v10759_v3  ;;  %v9125_v57 = vadd.f32 %v8714_v0, %v4245_v32  ;;  %v4158_v32 = vld [vmem:[%s7757_s5 + $0x278] sm:$0xff] }
 0x557   : > { %v4248_v52 = vadd.f32 %v4152_v5, %v10756_v17  ;;  %10757 = vst [vmem:[#allocation27_spill] sm:$0xff] %v9117_v48  ;;  %v4150_v5 = vld [vmem:[%s7757_s5 + $0x238] sm:$0xff]  ;;  %v10762_v37 = vld [vmem:[#allocation30_spill] sm:$0xff] }
 0x558   : > { %v9110_v33 = vadd.f32 %v8728_v35, %v4240_v13  ;;  %v4154_v13 = vld [vmem:[%s7757_s5 + $0x258] sm:$0xff]  ;;  %10760 = vst [vmem:[#allocation67_spill] sm:$0xff] %v9125_v57 }
 0x559   : > { %v4014_v4 = vpop.f32.mrf.mxu2  ;;  %v3919_v47 = vpop.f32.mrf.mxu0  ;;  %v4250_v10 = vadd.f32 %v4154_v13, %v10762_v37 }
 0x55a   : > { %10755 = vst [vmem:[#allocation81_spill] sm:$0xff] %v9110_v33  ;;  %v4015_v28 = vadd.f32 %v4014_v4, %v3966_v34  ;;  %v4063_v6 = vpop.f32.mrf.mxu3  ;;  %v4462_v62 = vadd.f32 %v4461_v8, %v9110_v33  ;;  %v3968_v17 = vpop.f32.mrf.mxu1  ;;  %v3920_v34 = vadd.f32 %v3919_v47, %v8662_v15  ;;  %v4466_v4 = vadd.f32 %v4465_v30, %v9104_v63  ;;  %v4157_v15 = vld [vmem:[%s7757_s5 + $0x270] sm:$0xff] }
 0x55b   : > { %v9130_v8 = vadd.f32 %v8685_v20, %v4248_v52  ;;  %v9136_v33 = vadd.f32 %v8687_v11, %v4247_v22  ;;  %v4251_v52 = vadd.f32 %v4155_v39, %v8656_v27 }
 0x55c   : > { %v4064_v31 = vadd.f32 %v4063_v6, %v4015_v28  ;;  %4463 = vadd.xlane.f32.xlu1 %v4462_v62  ;;  %v4467_v60 = vadd.f32 %v4466_v4, %v9117_v48  ;;  %v9140_v28 = vadd.f32 %v8691_v45, %v4249_v53  ;;  %v4159_v6 = vld [vmem:[%s7757_s5 + $0x280] sm:$0xff]  ;;  %v3969_v30 = vadd.f32 %v3968_v17, %v3920_v34  ;;  %v10766_v34 = vld [vmem:[#allocation56_spill] sm:$0xff] }
 0x55d   : > { %10761 = vst [vmem:[#allocation52_spill] sm:$0xff] %v9130_v8  ;;  %v4472_v22 = vadd.f32 %v9130_v8, %v9136_v33  ;;  %v9153_v53 = vadd.f32 %v8702_v43, %v4250_v10  ;;  %v4253_v39 = vadd.f32 %v4157_v15, %v10766_v34  ;;  %v4156_v8 = vld [vmem:[%s7757_s5 + $0x268] sm:$0xff]  ;;  %v9162_v10 = vadd.f32 %v8714_v0, %v4251_v52 }
 0x55e   : > { %v4246_v3 = vadd.f32 %v4150_v5, %v4064_v31  ;;  %10763 = vst [vmem:[#allocation82_spill] sm:$0xff] %v9136_v33  ;;  %v4468_v62 = vadd.f32 %v4467_v60, %v9125_v57  ;;  %v10765_v5 = vld [vmem:[#allocation71_spill] sm:$0xff] }
 0x55f   : > { %v4254_v31 = vadd.f32 %v4158_v32, %v10765_v5  ;;  %v4160_v57 = vld [vmem:[%s7757_s5 + $0x288] sm:$0xff]  ;;  %v4473_v32 = vadd.f32 %v4472_v22, %v9140_v28  ;;  %v4161_v5 = vld [vmem:[%s7757_s5 + $0x290] sm:$0xff]  ;;  %v9173_v48 = vadd.f32 %v8687_v11, %v4253_v39  ;;  %v4163_v22 = vld [vmem:[%s7757_s5 + $0x2a0] sm:$0xff] }
 0x560   : > { %v9146_v47 = vadd.f32 %v8728_v35, %v4246_v3  ;;  %v10767_v3 = vld [vmem:[#allocation86_spill] sm:$0xff]  ;;  %v4164_v15 = vld [vmem:[%s7757_s5 + $0x2a8] sm:$0xff] }
 0x561   : > { %v4017_v13 = vpop.f32.mrf.mxu2  ;;  %v3921_v27 = vpop.f32.mrf.mxu0  ;;  %v4255_v60 = vadd.f32 %v4159_v6, %v10767_v3  ;;  %v10769_v6 = vld [vmem:[#allocation31_spill] sm:$0xff]  ;;  %10770 = vst [vmem:[#allocation53_spill] sm:$0xff] %v9173_v48 }
 0x562   : > { %10764 = vst [vmem:[#allocation28_spill] sm:$0xff] %v9146_v47  ;;  %v4018_v4 = vadd.f32 %v4017_v13, %v3969_v30  ;;  %v4066_v37 = vpop.f32.mrf.mxu3  ;;  %v4469_v17 = vadd.f32 %v4468_v62, %v9146_v47  ;;  %v3970_v33 = vpop.f32.mrf.mxu1  ;;  %v3922_v13 = vadd.f32 %v3921_v27, %v8667_v46  ;;  %v9167_v62 = vadd.f32 %v8685_v20, %v4254_v31  ;;  %v4165_v46 = vld [vmem:[%s7757_s5 + $0x2b0] sm:$0xff] }
 0x563   : > { %v4256_v34 = vadd.f32 %v4160_v57, %v10769_v6  ;;  %v4474_v47 = vadd.f32 %v4473_v32, %v9153_v53  ;;  %v9176_v52 = vadd.f32 %v8691_v45, %v4255_v60 }
 0x564   : > { %v4067_v30 = vadd.f32 %v4066_v37, %v4018_v4  ;;  %4470 = vadd.xlane.f32.xlu2 %v4469_v17  ;;  %10768 = vst [vmem:[#allocation68_spill] sm:$0xff] %v9167_v62  ;;  %v4257_v4 = vadd.f32 %v4161_v5, %v8665_v24  ;;  %v3971_v31 = vadd.f32 %v3970_v33, %v3922_v13  ;;  %v10773_v33 = vld [vmem:[#allocation57_spill] sm:$0xff]  ;;  %v10774_v5 = vld [vmem:[#allocation87_spill] sm:$0xff] }
 0x565   : > { %v4475_v57 = vadd.f32 %v4474_v47, %v9162_v10  ;;  %v4479_v39 = vadd.f32 %v9167_v62, %v9173_v48  ;;  %v9189_v60 = vadd.f32 %v8702_v43, %v4256_v34  ;;  %v4259_v13 = vadd.f32 %v4163_v22, %v10773_v33  ;;  %v4167_v22 = vld [vmem:[%s7757_s5 + $0x2c0] sm:$0xff] }
 0x566   : > { %v4252_v3 = vadd.f32 %v4156_v8, %v4067_v30  ;;  %v10771_v8 = vld [vmem:[#allocation72_spill] sm:$0xff]  ;;  %v4261_v47 = vadd.f32 %v4165_v46, %v10774_v5 }
 0x567   : > { %v4260_v27 = vadd.f32 %v4164_v15, %v10771_v8  ;;  %10772 = vst [vmem:[#allocation83_spill] sm:$0xff] %v9189_v60  ;;  %v4162_v15 = vld [vmem:[%s7757_s5 + $0x298] sm:$0xff]  ;;  %v9197_v8 = vadd.f32 %v8714_v0, %v4257_v4  ;;  %v9208_v48 = vadd.f32 %v8687_v11, %v4259_v13 }
 0x568   : > { %v9182_v37 = vadd.f32 %v8728_v35, %v4252_v3  ;;  %v4166_v3 = vld [vmem:[%s7757_s5 + $0x2b8] sm:$0xff] }
 0x569   : > { %v4019_v17 = vpop.f32.mrf.mxu2  ;;  %v3924_v6 = vpop.f32.mrf.mxu0  ;;  %10775 = vst [vmem:[#allocation69_spill] sm:$0xff] %v9197_v8  ;;  %v4262_v46 = vadd.f32 %v4166_v3, %v8503_v50  ;;  %v4170_v4 = vld [vmem:[%s7757_s5 + $0x2d8] sm:$0xff] }
 0x56a   : > { %v4020_v32 = vadd.f32 %v4019_v17, %v3971_v31  ;;  %v4068_v30 = vpop.f32.mrf.mxu3  ;;  %v4476_v24 = vadd.f32 %v4475_v57, %v9182_v37  ;;  %v3925_v34 = vadd.f32 %v3924_v6, %v8676_v21  ;;  %v4480_v31 = vadd.f32 %v4479_v39, %v9176_v52  ;;  %v3973_v17 = vpop.f32.mrf.mxu1  ;;  %10777 = vst [vmem:[#allocation84_spill] sm:$0xff] %v9208_v48  ;;  %v4169_v21 = vld [vmem:[%s7757_s5 + $0x2d0] sm:$0xff]  ;;  %v4171_v39 = vld [vmem:[%s7757_s5 + $0x2e0] sm:$0xff]  ;;  %v10778_v13 = vld [vmem:[#allocation73_spill] sm:$0xff] }
 0x56b   : > { %v9202_v57 = vadd.f32 %v8685_v20, %v4260_v27  ;;  %v4263_v27 = vadd.f32 %v4167_v22, %v8670_v18  ;;  %v9225_v3 = vadd.f32 %v8702_v43, %v4262_v46 }
 0x56c   : > { %v4069_v62 = vadd.f32 %v4068_v30, %v4020_v32  ;;  %4477 = vadd.xlane.f32.xlu0 %v4476_v24  ;;  %v4481_v5 = vadd.f32 %v4480_v31, %v9189_v60  ;;  %v9212_v32 = vadd.f32 %v8691_v45, %v4261_v47  ;;  %v3974_v30 = vadd.f32 %v3973_v17, %v3925_v34  ;;  %v10779_v34 = vld [vmem:[#allocation35_spill] sm:$0xff]  ;;  %v10780_v17 = vld [vmem:[#allocation36_spill] sm:$0xff] }
 0x56d   : > { %10776 = vst [vmem:[#allocation54_spill] sm:$0xff] %v9202_v57  ;;  %v4266_v47 = vadd.f32 %v4170_v4, %v10778_v13  ;;  %v4265_v22 = vadd.f32 %v4169_v21, %v10779_v34 }
 0x56e   : > { %v4258_v33 = vadd.f32 %v4162_v15, %v4069_v62  ;;  %v4482_v50 = vadd.f32 %v4481_v5, %v9197_v8  ;;  %v4486_v62 = vadd.f32 %v9202_v57, %v9208_v48  ;;  %v4172_v5 = vld [vmem:[%s7757_s5 + $0x2e8] sm:$0xff]  ;;  %v9234_v48 = vadd.f32 %v8714_v0, %v4263_v27 }
 0x56f   : > { %v4168_v8 = vld [vmem:[%s7757_s5 + $0x2c8] sm:$0xff]  ;;  %v9244_v34 = vadd.f32 %v8687_v11, %v4265_v22 }
 0x570   : > { %v9218_v6 = vadd.f32 %v8728_v35, %v4258_v33  ;;  %v4267_v33 = vadd.f32 %v4171_v39, %v10780_v17  ;;  %v4487_v57 = vadd.f32 %v4486_v62, %v9212_v32 }
 0x571   : > { %v4022_v24 = vpop.f32.mrf.mxu2  ;;  %v3926_v60 = vpop.f32.mrf.mxu0 }
 0x572   : > { %v4023_v15 = vadd.f32 %v4022_v24, %v3974_v30  ;;  %v4071_v31 = vpop.f32.mrf.mxu3  ;;  %v4483_v18 = vadd.f32 %v4482_v50, %v9218_v6  ;;  %v3927_v46 = vadd.f32 %v3926_v60, %v8694_v36  ;;  %v4173_v30 = vld [vmem:[%s7757_s5 + $0x2f0] sm:$0xff]  ;;  %v9239_v24 = vadd.f32 %v8685_v20, %v4266_v47  ;;  %v3975_v62 = vpop.f32.mrf.mxu1 }
 0x573   : > { %v10781_v50 = vld [vmem:[#allocation32_spill] sm:$0xff]  ;;  %v4488_v39 = vadd.f32 %v4487_v57, %v9225_v3  ;;  %v9247_v27 = vadd.f32 %v8691_v45, %v4267_v33  ;;  %v4269_v36 = vadd.f32 %v4173_v30, %v8679_v41 }
 0x574   : > { %v4072_v4 = vadd.f32 %v4071_v31, %v4023_v15  ;;  %4484 = vadd.xlane.f32.xlu1 %v4483_v18  ;;  %v4268_v13 = vadd.f32 %v4172_v5, %v10781_v50  ;;  %v3976_v60 = vadd.f32 %v3975_v62, %v3927_v46  ;;  %v4174_v18 = vld [vmem:[%s7757_s5 + $0x2f8] sm:$0xff]  ;;  %v10783_v62 = vld [vmem:[#allocation34_spill] sm:$0xff] }
 0x575   : > { %v4489_v20 = vadd.f32 %v4488_v39, %v9234_v48  ;;  %v9262_v41 = vadd.f32 %v8714_v0, %v4269_v36  ;;  %v10782_v0 = vld [vmem:[#allocation33_spill] sm:$0xff] }
 0x576   : > { %v4264_v21 = vadd.f32 %v4168_v8, %v4072_v4  ;;  %v4493_v8 = vadd.f32 %v9239_v24, %v9244_v34  ;;  %v9257_v57 = vadd.f32 %v8702_v43, %v4268_v13 }
 0x578   : > { %v9251_v15 = vadd.f32 %v8728_v35, %v4264_v21  ;;  %v4494_v17 = vadd.f32 %v4493_v8, %v9247_v27 }
 0x579   : > { %v4024_v47 = vpop.f32.mrf.mxu2 }
 0x57a   : > { %v4025_v11 = vadd.f32 %v4024_v47, %v3976_v60  ;;  %v4490_v45 = vadd.f32 %v4489_v20, %v9251_v15  ;;  %v4073_v31 = vpop.f32.mrf.mxu3  ;;  %v4495_v5 = vadd.f32 %v4494_v17, %v9257_v57 }
 0x57c   : > { %v4074_v22 = vadd.f32 %v4073_v31, %v4025_v11  ;;  %4491 = vadd.xlane.f32.xlu2 %v4490_v45  ;;  %v4496_v30 = vadd.f32 %v4495_v5, %v9262_v41  ;;  %v10786_v5 = vld [vmem:[#allocation37_spill] sm:$0xff] }
 0x57e   : > { %v4270_v33 = vadd.f32 %v4174_v18, %v4074_v22 }
 0x57f   : > { %v4394_v4 = vpop.xlane.xlu0 %4393 }
 0x580   : > { %v4500_v46 = vmul.f32 0.0013020834, %v4394_v4  ;;  %v9267_v43 = vadd.f32 %v8728_v35, %v4270_v33  ;;  %v10785_v33 = vld [vmem:[#allocation39_spill] sm:$0xff] }
 0x582   : > { %v4497_v50 = vadd.f32 %v4496_v30, %v9267_v43  ;;  %v9272_v13 = vsub.f32 %v8705_v61, %v4500_v46  ;;  %v9275_v21 = vsub.f32 %v10782_v0, %v4500_v46  ;;  %v9278_v39 = vsub.f32 %v8709_v25, %v4500_v46  ;;  %v10784_v25 = vld [vmem:[#allocation40_spill] sm:$0xff] }
 0x583   : > { %v9281_v36 = vsub.f32 %v10783_v62, %v4500_v46  ;;  %v9288_v20 = vsub.f32 %v8731_v16, %v4500_v46  ;;  %v9293_v11 = vsub.f32 %v10784_v25, %v4500_v46 }
 0x584   : > { %4498 = vadd.xlane.f32.xlu0 %v4497_v50  ;;  %v4612_v35 = vmul.f32 %v9272_v13, %v9272_v13  ;;  %v4613_v60 = vmul.f32 %v9275_v21, %v9275_v21  ;;  %v4614_v61 = vmul.f32 %v9278_v39, %v9278_v39 }
 0x585   : > { %v4615_v31 = vmul.f32 %v9281_v36, %v9281_v36  ;;  %v4616_v22 = vmul.f32 %v9288_v20, %v9288_v20  ;;  %v4617_v46 = vmul.f32 %v9293_v11, %v9293_v11 }
 0x586   : > { %v4708_v47 = vadd.f32 %v4613_v60, %v4612_v35  ;;  %v10788_v60 = vld [vmem:[#allocation41_spill] sm:$0xff] }
 0x587   : > { %v4401_v8 = vpop.xlane.xlu0 %4400 }
 0x588   : > { %v4501_v45 = vmul.f32 0.0013020834, %v4401_v8  ;;  %v4709_v18 = vadd.f32 %v4708_v47, %v4614_v61 }
 0x58a   : > { %v4710_v17 = vadd.f32 %v4709_v18, %v4615_v31  ;;  %v9300_v16 = vsub.f32 %v10785_v33, %v4501_v45  ;;  %v9303_v4 = vsub.f32 %v10786_v5, %v4501_v45  ;;  %v9306_v30 = vsub.f32 %v8744_v9, %v4501_v45  ;;  %v10789_v31 = vld [vmem:[#allocation20_spill] sm:$0xff] }
 0x58b   : > { %v9311_v0 = vsub.f32 %v8757_v12, %v4501_v45  ;;  %v9318_v61 = vsub.f32 %v10788_v60, %v4501_v45  ;;  %v9323_v18 = vsub.f32 %v10789_v31, %v4501_v45  ;;  %v10791_v60 = vld [vmem:[#allocation19_spill] sm:$0xff] }
 0x58c   : > { %10787 = vst [vmem:[#allocation29_spill] sm:$0xff] %v9306_v30  ;;  %v4711_v50 = vadd.f32 %v4710_v17, %v4616_v22  ;;  %v4618_v62 = vmul.f32 %v9300_v16, %v9300_v16  ;;  %v4619_v35 = vmul.f32 %v9303_v4, %v9303_v4  ;;  %v4620_v9 = vmul.f32 %v9306_v30, %v9306_v30 }
 0x58d   : > { %10790 = vst [vmem:[#allocation70_spill] sm:$0xff] %v9323_v18  ;;  %v4621_v22 = vmul.f32 %v9311_v0, %v9311_v0  ;;  %v4622_v33 = vmul.f32 %v9318_v61, %v9318_v61  ;;  %v4623_v45 = vmul.f32 %v9323_v18, %v9323_v18  ;;  %v10799_v18 = vld [vmem:[#allocation38_spill] sm:$0xff] }
 0x58e   : > { %v4712_v47 = vadd.f32 %v4711_v50, %v4617_v46  ;;  %v4715_v8 = vadd.f32 %v4619_v35, %v4618_v62  ;;  %v10793_v50 = vld [vmem:[#allocation42_spill] sm:$0xff] }
 0x58f   : > { %v4408_v25 = vpop.xlane.xlu1 %4407 }
 0x590   : > { %v4502_v12 = vmul.f32 0.0013020834, %v4408_v25  ;;  %4713 = vadd.xlane.f32.xlu1 %v4712_v47  ;;  %v4716_v17 = vadd.f32 %v4715_v8, %v4620_v9  ;;  %v10796_v47 = vld [vmem:[#allocation58_spill] sm:$0xff] }
 0x592   : > { %v4717_v5 = vadd.f32 %v4716_v17, %v4621_v22  ;;  %v9330_v46 = vsub.f32 %v10791_v60, %v4502_v12  ;;  %v9333_v30 = vsub.f32 %v10793_v50, %v4502_v12  ;;  %v9336_v62 = vsub.f32 %v8780_v19, %v4502_v12  ;;  %v10797_v50 = vld [vmem:[#allocation17_spill] sm:$0xff] }
 0x593   : > { %v9341_v25 = vsub.f32 %v10796_v47, %v4502_v12  ;;  %v9348_v31 = vsub.f32 %v8802_v23, %v4502_v12 }
 0x594   : > { %10792 = vst [vmem:[#allocation55_spill] sm:$0xff] %v9330_v46  ;;  %v4718_v35 = vadd.f32 %v4717_v5, %v4622_v33  ;;  %v4624_v9 = vmul.f32 %v9330_v46, %v9330_v46  ;;  %v4625_v8 = vmul.f32 %v9333_v30, %v9333_v30  ;;  %v4626_v19 = vmul.f32 %v9336_v62, %v9336_v62 }
 0x595   : > { %10794 = vst [vmem:[#allocation85_spill] sm:$0xff] %v9333_v30  ;;  %v9353_v33 = vsub.f32 %v10797_v50, %v4502_v12  ;;  %v4627_v47 = vmul.f32 %v9341_v25, %v9341_v25  ;;  %v4628_v30 = vmul.f32 %v9348_v31, %v9348_v31 }
 0x596   : > { %10795 = vst [vmem:[#allocation30_spill] sm:$0xff] %v9336_v62  ;;  %v4719_v22 = vadd.f32 %v4718_v35, %v4623_v45  ;;  %v4722_v17 = vadd.f32 %v4625_v8, %v4624_v9  ;;  %v10801_v35 = vld [vmem:[#allocation43_spill] sm:$0xff] }
 0x597   : > { %v4415_v60 = vpop.xlane.xlu1 %4414  ;;  %10798 = vst [vmem:[#allocation71_spill] sm:$0xff] %v9353_v33  ;;  %v4629_v12 = vmul.f32 %v9353_v33, %v9353_v33  ;;  %v10807_v33 = vld [vmem:[#allocation74_spill] sm:$0xff] }
 0x598   : > { %v4503_v5 = vmul.f32 0.0013020834, %v4415_v60  ;;  %4720 = vadd.xlane.f32.xlu2 %v4719_v22  ;;  %v4723_v46 = vadd.f32 %v4722_v17, %v4626_v19 }
 0x59a   : > { %v4724_v23 = vadd.f32 %v4723_v46, %v4627_v47  ;;  %v9360_v45 = vsub.f32 %v10799_v18, %v4503_v5  ;;  %v9363_v62 = vsub.f32 %v10801_v35, %v4503_v5  ;;  %v9366_v9 = vsub.f32 %v8816_v26, %v4503_v5  ;;  %v10804_v46 = vld [vmem:[#allocation59_spill] sm:$0xff]  ;;  %v10805_v35 = vld [vmem:[#allocation18_spill] sm:$0xff] }
 0x59b   : > { %v9371_v22 = vsub.f32 %v8829_v54, %v4503_v5  ;;  %v9378_v17 = vsub.f32 %v10804_v46, %v4503_v5 }
 0x59c   : > { %10800 = vst [vmem:[#allocation56_spill] sm:$0xff] %v9360_v45  ;;  %v4725_v8 = vadd.f32 %v4724_v23, %v4628_v30  ;;  %v4630_v19 = vmul.f32 %v9360_v45, %v9360_v45  ;;  %v4631_v18 = vmul.f32 %v9363_v62, %v9363_v62  ;;  %v4632_v26 = vmul.f32 %v9366_v9, %v9366_v9 }
 0x59d   : > { %10802 = vst [vmem:[#allocation86_spill] sm:$0xff] %v9363_v62  ;;  %v9383_v30 = vsub.f32 %v10805_v35, %v4503_v5  ;;  %v4633_v23 = vmul.f32 %v9371_v22, %v9371_v22  ;;  %v4634_v62 = vmul.f32 %v9378_v17, %v9378_v17 }
 0x59e   : > { %10803 = vst [vmem:[#allocation31_spill] sm:$0xff] %v9366_v9  ;;  %v4726_v60 = vadd.f32 %v4725_v8, %v4629_v12  ;;  %v4729_v50 = vadd.f32 %v4631_v18, %v4630_v19  ;;  %v10809_v8 = vld [vmem:[#allocation44_spill] sm:$0xff] }
 0x59f   : > { %v4422_v47 = vpop.xlane.xlu2 %4421  ;;  %10806 = vst [vmem:[#allocation72_spill] sm:$0xff] %v9383_v30  ;;  %v4635_v5 = vmul.f32 %v9383_v30, %v9383_v30  ;;  %v10816_v30 = vld [vmem:[#allocation75_spill] sm:$0xff] }
 0x5a0   : > { %v4504_v54 = vmul.f32 0.0013020834, %v4422_v47  ;;  %4727 = vadd.xlane.f32.xlu0 %v4726_v60  ;;  %v4730_v45 = vadd.f32 %v4729_v50, %v4632_v26  ;;  %v10812_v60 = vld [vmem:[#allocation60_spill] sm:$0xff] }
 0x5a2   : > { %v4731_v46 = vadd.f32 %v4730_v45, %v4633_v23  ;;  %v9390_v12 = vsub.f32 %v10807_v33, %v4504_v54  ;;  %v9393_v9 = vsub.f32 %v10809_v8, %v4504_v54  ;;  %v9396_v19 = vsub.f32 %v8852_v49, %v4504_v54  ;;  %v10814_v8 = vld [vmem:[#allocation21_spill] sm:$0xff] }
 0x5a3   : > { %v9401_v47 = vsub.f32 %v10812_v60, %v4504_v54  ;;  %v9408_v45 = vsub.f32 %v8874_v7, %v4504_v54 }
 0x5a4   : > { %10808 = vst [vmem:[#allocation57_spill] sm:$0xff] %v9390_v12  ;;  %v4732_v18 = vadd.f32 %v4731_v46, %v4634_v62  ;;  %v4636_v26 = vmul.f32 %v9390_v12, %v9390_v12  ;;  %v4637_v33 = vmul.f32 %v9393_v9, %v9393_v9  ;;  %v4638_v49 = vmul.f32 %v9396_v19, %v9396_v19 }
 0x5a5   : > { %10810 = vst [vmem:[#allocation87_spill] sm:$0xff] %v9393_v9  ;;  %v9413_v62 = vsub.f32 %v10814_v8, %v4504_v54  ;;  %v4639_v60 = vmul.f32 %v9401_v47, %v9401_v47  ;;  %v4640_v9 = vmul.f32 %v9408_v45, %v9408_v45 }
 0x5a6   : > { %10811 = vst [vmem:[#allocation73_spill] sm:$0xff] %v9396_v19  ;;  %v4733_v50 = vadd.f32 %v4732_v18, %v4635_v5  ;;  %v4736_v35 = vadd.f32 %v4637_v33, %v4636_v26  ;;  %v10818_v18 = vld [vmem:[#allocation45_spill] sm:$0xff] }
 0x5a7   : > { %10813 = vst [vmem:[#allocation35_spill] sm:$0xff] %v9408_v45  ;;  %v4429_v23 = vpop.xlane.xlu2 %4428  ;;  %v4641_v54 = vmul.f32 %v9413_v62, %v9413_v62  ;;  %v10824_v45 = vld [vmem:[#allocation22_spill] sm:$0xff] }
 0x5a8   : > { %10815 = vst [vmem:[#allocation36_spill] sm:$0xff] %v9413_v62  ;;  %v4505_v46 = vmul.f32 0.0013020834, %v4429_v23  ;;  %4734 = vadd.xlane.f32.xlu1 %v4733_v50  ;;  %v4737_v12 = vadd.f32 %v4736_v35, %v4638_v49  ;;  %v10821_v50 = vld [vmem:[#allocation61_spill] sm:$0xff]  ;;  %v10823_v62 = vld [vmem:[#allocation62_spill] sm:$0xff] }
 0x5aa   : > { %v4738_v7 = vadd.f32 %v4737_v12, %v4639_v60  ;;  %v9420_v5 = vsub.f32 %v10816_v30, %v4505_v46  ;;  %v9423_v19 = vsub.f32 %v10818_v18, %v4505_v46  ;;  %v9426_v26 = vsub.f32 %v8888_v51, %v4505_v46  ;;  %v10822_v12 = vld [vmem:[#allocation46_spill] sm:$0xff] }
 0x5ab   : > { %v9431_v23 = vsub.f32 %v10821_v50, %v4505_v46  ;;  %v9438_v35 = vsub.f32 %v10822_v12, %v4505_v46 }
 0x5ac   : > { %10817 = vst [vmem:[#allocation32_spill] sm:$0xff] %v9420_v5  ;;  %v4739_v33 = vadd.f32 %v4738_v7, %v4640_v9  ;;  %v4642_v49 = vmul.f32 %v9420_v5, %v9420_v5  ;;  %v4643_v30 = vmul.f32 %v9423_v19, %v9423_v19  ;;  %v4644_v51 = vmul.f32 %v9426_v26, %v9426_v26 }
 0x5ad   : > { %10819 = vst [vmem:[#allocation33_spill] sm:$0xff] %v9423_v19  ;;  %v9443_v9 = vsub.f32 %v10823_v62, %v4505_v46  ;;  %v4645_v50 = vmul.f32 %v9431_v23, %v9431_v23  ;;  %v4646_v19 = vmul.f32 %v9438_v35, %v9438_v35 }
 0x5ae   : > { %10820 = vst [vmem:[#allocation34_spill] sm:$0xff] %v9426_v26  ;;  %v4740_v8 = vadd.f32 %v4739_v33, %v4641_v54  ;;  %v4743_v60 = vadd.f32 %v4643_v30, %v4642_v49  ;;  %v10826_v33 = vld [vmem:[#allocation76_spill] sm:$0xff] }
 0x5af   : > { %v4436_v18 = vpop.xlane.xlu0 %4435  ;;  %v4647_v62 = vmul.f32 %v9443_v9, %v9443_v9 }
 0x5b0   : > { %v4506_v7 = vmul.f32 0.0013020834, %v4436_v18  ;;  %4741 = vadd.xlane.f32.xlu2 %v4740_v8  ;;  %v4744_v5 = vadd.f32 %v4743_v60, %v4644_v51 }
 0x5b2   : > { %v4745_v12 = vadd.f32 %v4744_v5, %v4645_v50  ;;  %v9450_v54 = vsub.f32 %v10824_v45, %v4506_v7  ;;  %v9453_v26 = vsub.f32 %v10826_v33, %v4506_v7  ;;  %v9456_v49 = vsub.f32 %v8924_v38, %v4506_v7  ;;  %v10830_v50 = vld [vmem:[#allocation23_spill] sm:$0xff] }
 0x5b3   : > { %v9461_v30 = vsub.f32 %v8937_v55, %v4506_v7  ;;  %v9468_v5 = vsub.f32 %v8946_v56, %v4506_v7 }
 0x5b4   : > { %10825 = vst [vmem:[#allocation40_spill] sm:$0xff] %v9450_v54  ;;  %v4746_v46 = vadd.f32 %v4745_v12, %v4646_v19  ;;  %v4648_v8 = vmul.f32 %v9450_v54, %v9450_v54  ;;  %v4649_v45 = vmul.f32 %v9453_v26, %v9453_v26  ;;  %v4650_v38 = vmul.f32 %v9456_v49, %v9456_v49  ;;  %v10832_v54 = vld [vmem:[#allocation77_spill] sm:$0xff] }
 0x5b5   : > { %10827 = vst [vmem:[#allocation39_spill] sm:$0xff] %v9453_v26  ;;  %v9473_v19 = vsub.f32 %v10830_v50, %v4506_v7  ;;  %v4651_v12 = vmul.f32 %v9461_v30, %v9461_v30  ;;  %v4652_v26 = vmul.f32 %v9468_v5, %v9468_v5 }
 0x5b6   : > { %10828 = vst [vmem:[#allocation37_spill] sm:$0xff] %v9456_v49  ;;  %v4747_v51 = vadd.f32 %v4746_v46, %v4647_v62  ;;  %v4750_v60 = vadd.f32 %v4649_v45, %v4648_v8  ;;  %v10834_v46 = vld [vmem:[#allocation47_spill] sm:$0xff] }
 0x5b7   : > { %10829 = vst [vmem:[#allocation41_spill] sm:$0xff] %v9468_v5  ;;  %v4443_v18 = vpop.xlane.xlu1 %4442  ;;  %v4653_v7 = vmul.f32 %v9473_v19, %v9473_v19  ;;  %v10840_v5 = vld [vmem:[#allocation24_spill] sm:$0xff] }
 0x5b8   : > { %10831 = vst [vmem:[#allocation20_spill] sm:$0xff] %v9473_v19  ;;  %v4507_v55 = vmul.f32 0.0013020834, %v4443_v18  ;;  %4748 = vadd.xlane.f32.xlu0 %v4747_v51  ;;  %v4751_v33 = vadd.f32 %v4750_v60, %v4650_v38  ;;  %v10837_v51 = vld [vmem:[#allocation63_spill] sm:$0xff]  ;;  %v10838_v60 = vld [vmem:[#allocation48_spill] sm:$0xff] }
 0x5b9   : > { %v10839_v19 = vld [vmem:[#allocation64_spill] sm:$0xff] }
 0x5ba   : > { %v4752_v56 = vadd.f32 %v4751_v33, %v4651_v12  ;;  %v9480_v62 = vsub.f32 %v10832_v54, %v4507_v55  ;;  %v9483_v49 = vsub.f32 %v10834_v46, %v4507_v55  ;;  %v9486_v8 = vsub.f32 %v8960_v29, %v4507_v55 }
 0x5bb   : > { %v9491_v18 = vsub.f32 %v10837_v51, %v4507_v55  ;;  %v9498_v50 = vsub.f32 %v10838_v60, %v4507_v55 }
 0x5bc   : > { %10833 = vst [vmem:[#allocation19_spill] sm:$0xff] %v9480_v62  ;;  %v4753_v45 = vadd.f32 %v4752_v56, %v4652_v26  ;;  %v4654_v38 = vmul.f32 %v9480_v62, %v9480_v62  ;;  %v4655_v54 = vmul.f32 %v9483_v49, %v9483_v49  ;;  %v4656_v29 = vmul.f32 %v9486_v8, %v9486_v8 }
 0x5bd   : > { %10835 = vst [vmem:[#allocation42_spill] sm:$0xff] %v9483_v49  ;;  %v9503_v26 = vsub.f32 %v10839_v19, %v4507_v55  ;;  %v4657_v51 = vmul.f32 %v9491_v18, %v9491_v18  ;;  %v4658_v49 = vmul.f32 %v9498_v50, %v9498_v50 }
 0x5be   : > { %10836 = vst [vmem:[#allocation58_spill] sm:$0xff] %v9486_v8  ;;  %v4754_v12 = vadd.f32 %v4753_v45, %v4653_v7  ;;  %v4757_v33 = vadd.f32 %v4655_v54, %v4654_v38  ;;  %v10841_v45 = vld [vmem:[#allocation78_spill] sm:$0xff] }
 0x5bf   : > { %v4450_v46 = vpop.xlane.xlu2 %4449  ;;  %v4659_v19 = vmul.f32 %v9503_v26, %v9503_v26 }
 0x5c0   : > { %v4508_v56 = vmul.f32 0.0013020834, %v4450_v46  ;;  %4755 = vadd.xlane.f32.xlu1 %v4754_v12  ;;  %v4758_v62 = vadd.f32 %v4757_v33, %v4656_v29 }
 0x5c2   : > { %v4759_v60 = vadd.f32 %v4758_v62, %v4657_v51  ;;  %v9510_v7 = vsub.f32 %v10840_v5, %v4508_v56  ;;  %v9513_v8 = vsub.f32 %v10841_v45, %v4508_v56  ;;  %v9516_v38 = vsub.f32 %v8996_v59, %v4508_v56 }
 0x5c3   : > { %v9521_v54 = vsub.f32 %v9009_v44, %v4508_v56  ;;  %v9528_v62 = vsub.f32 %v9018_v14, %v4508_v56 }
 0x5c4   : > { %10842 = vst [vmem:[#allocation17_spill] sm:$0xff] %v9513_v8  ;;  %v4760_v55 = vadd.f32 %v4759_v60, %v4658_v49  ;;  %v4660_v12 = vmul.f32 %v9510_v7, %v9510_v7  ;;  %v4661_v5 = vmul.f32 %v9513_v8, %v9513_v8  ;;  %v4662_v59 = vmul.f32 %v9516_v38, %v9516_v38  ;;  %v10846_v8 = vld [vmem:[#allocation79_spill] sm:$0xff] }
 0x5c5   : > { %10843 = vst [vmem:[#allocation38_spill] sm:$0xff] %v9516_v38  ;;  %v9533_v49 = vsub.f32 %v9038_v1, %v4508_v56  ;;  %v4663_v51 = vmul.f32 %v9521_v54, %v9521_v54  ;;  %v4664_v45 = vmul.f32 %v9528_v62, %v9528_v62 }
 0x5c6   : > { %10844 = vst [vmem:[#allocation43_spill] sm:$0xff] %v9528_v62  ;;  %v4761_v29 = vadd.f32 %v4760_v55, %v4659_v19  ;;  %v4764_v33 = vadd.f32 %v4661_v5, %v4660_v12  ;;  %v10848_v55 = vld [vmem:[#allocation49_spill] sm:$0xff]  ;;  %v10854_v62 = vld [vmem:[#allocation80_spill] sm:$0xff] }
 0x5c7   : > { %v4457_v46 = vpop.xlane.xlu0 %4456  ;;  %10845 = vst [vmem:[#allocation59_spill] sm:$0xff] %v9533_v49  ;;  %v4665_v1 = vmul.f32 %v9533_v49, %v9533_v49  ;;  %v10851_v5 = vld [vmem:[#allocation25_spill] sm:$0xff]  ;;  %v10853_v49 = vld [vmem:[#allocation26_spill] sm:$0xff] }
 0x5c8   : > { %v4509_v44 = vmul.f32 0.0013020834, %v4457_v46  ;;  %4762 = vadd.xlane.f32.xlu2 %v4761_v29  ;;  %v4765_v60 = vadd.f32 %v4764_v33, %v4662_v59  ;;  %v10852_v33 = vld [vmem:[#allocation65_spill] sm:$0xff] }
 0x5ca   : > { %v4766_v14 = vadd.f32 %v4765_v60, %v4663_v51  ;;  %v9540_v19 = vsub.f32 %v10846_v8, %v4509_v44  ;;  %v9543_v38 = vsub.f32 %v10848_v55, %v4509_v44  ;;  %v9546_v12 = vsub.f32 %v9032_v58, %v4509_v44 }
 0x5cb   : > { %v9551_v29 = vsub.f32 %v10851_v5, %v4509_v44  ;;  %v9558_v46 = vsub.f32 %v10852_v33, %v4509_v44 }
 0x5cc   : > { %10847 = vst [vmem:[#allocation18_spill] sm:$0xff] %v9540_v19  ;;  %v4767_v56 = vadd.f32 %v4766_v14, %v4664_v45  ;;  %v4666_v59 = vmul.f32 %v9540_v19, %v9540_v19  ;;  %v4667_v8 = vmul.f32 %v9543_v38, %v9543_v38  ;;  %v4668_v58 = vmul.f32 %v9546_v12, %v9546_v12 }
 0x5cd   : > { %10849 = vst [vmem:[#allocation74_spill] sm:$0xff] %v9543_v38  ;;  %v9563_v45 = vsub.f32 %v10853_v49, %v4509_v44  ;;  %v4669_v5 = vmul.f32 %v9551_v29, %v9551_v29  ;;  %v4670_v38 = vmul.f32 %v9558_v46, %v9558_v46 }
 0x5ce   : > { %10850 = vst [vmem:[#allocation44_spill] sm:$0xff] %v9546_v12  ;;  %v4768_v51 = vadd.f32 %v4767_v56, %v4665_v1  ;;  %v4771_v60 = vadd.f32 %v4667_v8, %v4666_v59  ;;  %v10856_v56 = vld [vmem:[#allocation50_spill] sm:$0xff] }
 0x5cf   : > { %v4464_v55 = vpop.xlane.xlu1 %4463  ;;  %v4671_v49 = vmul.f32 %v9563_v45, %v9563_v45 }
 0x5d0   : > { %v4510_v14 = vmul.f32 0.0013020834, %v4464_v55  ;;  %4769 = vadd.xlane.f32.xlu0 %v4768_v51  ;;  %v4772_v19 = vadd.f32 %v4771_v60, %v4668_v58 }
 0x5d2   : > { %v4773_v33 = vadd.f32 %v4772_v19, %v4669_v5  ;;  %v9570_v1 = vsub.f32 %v10854_v62, %v4510_v14  ;;  %v9573_v12 = vsub.f32 %v10856_v56, %v4510_v14  ;;  %v9576_v59 = vsub.f32 %v9068_v2, %v4510_v14  ;;  %v10860_v5 = vld [vmem:[#allocation81_spill] sm:$0xff] }
 0x5d3   : > { %v9581_v8 = vsub.f32 %v9081_v40, %v4510_v14  ;;  %v9588_v19 = vsub.f32 %v9090_v42, %v4510_v14 }
 0x5d4   : > { %10855 = vst [vmem:[#allocation60_spill] sm:$0xff] %v9570_v1  ;;  %v4774_v44 = vadd.f32 %v4773_v33, %v4670_v38  ;;  %v4672_v51 = vmul.f32 %v9570_v1, %v9570_v1  ;;  %v4673_v62 = vmul.f32 %v9573_v12, %v9573_v12  ;;  %v4674_v2 = vmul.f32 %v9576_v59, %v9576_v59  ;;  %v10862_v1 = vld [vmem:[#allocation51_spill] sm:$0xff] }
 0x5d5   : > { %10857 = vst [vmem:[#allocation21_spill] sm:$0xff] %v9573_v12  ;;  %v9593_v38 = vsub.f32 %v10860_v5, %v4510_v14  ;;  %v4675_v33 = vmul.f32 %v9581_v8, %v9581_v8  ;;  %v4676_v12 = vmul.f32 %v9588_v19, %v9588_v19 }
 0x5d6   : > { %10858 = vst [vmem:[#allocation75_spill] sm:$0xff] %v9576_v59  ;;  %v4775_v58 = vadd.f32 %v4774_v44, %v4671_v49  ;;  %v4778_v60 = vadd.f32 %v4673_v62, %v4672_v51  ;;  %v10864_v44 = vld [vmem:[#allocation66_spill] sm:$0xff] }
 0x5d7   : > { %10859 = vst [vmem:[#allocation45_spill] sm:$0xff] %v9588_v19  ;;  %v4471_v55 = vpop.xlane.xlu2 %4470  ;;  %v4677_v14 = vmul.f32 %v9593_v38, %v9593_v38  ;;  %v10870_v19 = vld [vmem:[#allocation82_spill] sm:$0xff] }
 0x5d8   : > { %10861 = vst [vmem:[#allocation61_spill] sm:$0xff] %v9593_v38  ;;  %v4511_v40 = vmul.f32 0.0013020834, %v4471_v55  ;;  %4776 = vadd.xlane.f32.xlu1 %v4775_v58  ;;  %v4779_v56 = vadd.f32 %v4778_v60, %v4674_v2  ;;  %v10867_v58 = vld [vmem:[#allocation27_spill] sm:$0xff]  ;;  %v10869_v38 = vld [vmem:[#allocation28_spill] sm:$0xff] }
 0x5d9   : > { %v10868_v60 = vld [vmem:[#allocation67_spill] sm:$0xff] }
 0x5da   : > { %v4780_v42 = vadd.f32 %v4779_v56, %v4675_v33  ;;  %v9600_v49 = vsub.f32 %v10862_v1, %v4511_v40  ;;  %v9603_v59 = vsub.f32 %v10864_v44, %v4511_v40  ;;  %v9606_v51 = vsub.f32 %v9104_v63, %v4511_v40 }
 0x5db   : > { %v9611_v55 = vsub.f32 %v10867_v58, %v4511_v40  ;;  %v9618_v5 = vsub.f32 %v10868_v60, %v4511_v40 }
 0x5dc   : > { %10863 = vst [vmem:[#allocation46_spill] sm:$0xff] %v9600_v49  ;;  %v4781_v62 = vadd.f32 %v4780_v42, %v4676_v12  ;;  %v4678_v2 = vmul.f32 %v9600_v49, %v9600_v49  ;;  %v4679_v1 = vmul.f32 %v9603_v59, %v9603_v59  ;;  %v4680_v63 = vmul.f32 %v9606_v51, %v9606_v51 }
 0x5dd   : > { %10865 = vst [vmem:[#allocation62_spill] sm:$0xff] %v9603_v59  ;;  %v9623_v12 = vsub.f32 %v10869_v38, %v4511_v40  ;;  %v4681_v58 = vmul.f32 %v9611_v55, %v9611_v55  ;;  %v4682_v59 = vmul.f32 %v9618_v5, %v9618_v5 }
 0x5de   : > { %10866 = vst [vmem:[#allocation22_spill] sm:$0xff] %v9606_v51  ;;  %v4782_v33 = vadd.f32 %v4781_v62, %v4677_v14  ;;  %v4785_v56 = vadd.f32 %v4679_v1, %v4678_v2  ;;  %v10871_v62 = vld [vmem:[#allocation52_spill] sm:$0xff] }
 0x5df   : > { %v4478_v44 = vpop.xlane.xlu0 %4477  ;;  %v4683_v38 = vmul.f32 %v9623_v12, %v9623_v12 }
 0x5e0   : > { %v4512_v42 = vmul.f32 0.0013020834, %v4478_v44  ;;  %4783 = vadd.xlane.f32.xlu2 %v4782_v33  ;;  %v4786_v49 = vadd.f32 %v4785_v56, %v4680_v63 }
 0x5e2   : > { %v4787_v60 = vadd.f32 %v4786_v49, %v4681_v58  ;;  %v9630_v14 = vsub.f32 %v10870_v19, %v4512_v42  ;;  %v9633_v51 = vsub.f32 %v10871_v62, %v4512_v42  ;;  %v9636_v2 = vsub.f32 %v9140_v28, %v4512_v42 }
 0x5e3   : > { %v9641_v1 = vsub.f32 %v9153_v53, %v4512_v42  ;;  %v9648_v49 = vsub.f32 %v9162_v10, %v4512_v42 }
 0x5e4   : > { %10872 = vst [vmem:[#allocation76_spill] sm:$0xff] %v9633_v51  ;;  %v4788_v40 = vadd.f32 %v4787_v60, %v4682_v59  ;;  %v4684_v33 = vmul.f32 %v9630_v14, %v9630_v14  ;;  %v4685_v19 = vmul.f32 %v9633_v51, %v9633_v51  ;;  %v4686_v28 = vmul.f32 %v9636_v2, %v9636_v2  ;;  %v10875_v51 = vld [vmem:[#allocation53_spill] sm:$0xff] }
 0x5e5   : > { %10873 = vst [vmem:[#allocation23_spill] sm:$0xff] %v9636_v2  ;;  %v9653_v59 = vsub.f32 %v9182_v37, %v4512_v42  ;;  %v4687_v58 = vmul.f32 %v9641_v1, %v9641_v1  ;;  %v4688_v62 = vmul.f32 %v9648_v49, %v9648_v49 }
 0x5e6   : > { %v4789_v63 = vadd.f32 %v4788_v40, %v4683_v38  ;;  %v4792_v56 = vadd.f32 %v4685_v19, %v4684_v33  ;;  %v10877_v40 = vld [vmem:[#allocation68_spill] sm:$0xff]  ;;  %v10880_v19 = vld [vmem:[#allocation83_spill] sm:$0xff] }
 0x5e7   : > { %v4485_v44 = vpop.xlane.xlu1 %4484  ;;  %10874 = vst [vmem:[#allocation77_spill] sm:$0xff] %v9653_v59  ;;  %v4689_v37 = vmul.f32 %v9653_v59, %v9653_v59  ;;  %v10884_v59 = vld [vmem:[#allocation84_spill] sm:$0xff] }
 0x5e8   : > { %v4513_v53 = vmul.f32 0.0013020834, %v4485_v44  ;;  %4790 = vadd.xlane.f32.xlu0 %v4789_v63  ;;  %v4793_v60 = vadd.f32 %v4792_v56, %v4686_v28  ;;  %v10881_v56 = vld [vmem:[#allocation69_spill] sm:$0xff] }
 0x5ea   : > { %v4794_v10 = vadd.f32 %v4793_v60, %v4687_v58  ;;  %v9660_v38 = vsub.f32 %v10875_v51, %v4513_v53  ;;  %v9663_v2 = vsub.f32 %v10877_v40, %v4513_v53  ;;  %v9666_v33 = vsub.f32 %v9176_v52, %v4513_v53 }
 0x5eb   : > { %v9671_v63 = vsub.f32 %v10880_v19, %v4513_v53  ;;  %v9678_v44 = vsub.f32 %v10881_v56, %v4513_v53 }
 0x5ec   : > { %10876 = vst [vmem:[#allocation47_spill] sm:$0xff] %v9660_v38  ;;  %v4795_v42 = vadd.f32 %v4794_v10, %v4688_v62  ;;  %v4690_v28 = vmul.f32 %v9660_v38, %v9660_v38  ;;  %v4691_v51 = vmul.f32 %v9663_v2, %v9663_v2  ;;  %v4692_v52 = vmul.f32 %v9666_v33, %v9666_v33 }
 0x5ed   : > { %10878 = vst [vmem:[#allocation63_spill] sm:$0xff] %v9663_v2  ;;  %v9683_v62 = vsub.f32 %v9218_v6, %v4513_v53  ;;  %v4693_v19 = vmul.f32 %v9671_v63, %v9671_v63  ;;  %v4694_v2 = vmul.f32 %v9678_v44, %v9678_v44 }
 0x5ee   : > { %10879 = vst [vmem:[#allocation48_spill] sm:$0xff] %v9666_v33  ;;  %v4796_v58 = vadd.f32 %v4795_v42, %v4689_v37  ;;  %v4799_v60 = vadd.f32 %v4691_v51, %v4690_v28  ;;  %v10886_v42 = vld [vmem:[#allocation54_spill] sm:$0xff] }
 0x5ef   : > { %10882 = vst [vmem:[#allocation64_spill] sm:$0xff] %v9678_v44  ;;  %v4492_v40 = vpop.xlane.xlu2 %4491  ;;  %v4695_v6 = vmul.f32 %v9683_v62, %v9683_v62 }
 0x5f0   : > { %10883 = vst [vmem:[#allocation24_spill] sm:$0xff] %v9683_v62  ;;  %v4514_v10 = vmul.f32 0.0013020834, %v4492_v40  ;;  %4797 = vadd.xlane.f32.xlu1 %v4796_v58  ;;  %v4800_v38 = vadd.f32 %v4799_v60, %v4692_v52 }
 0x5f2   : > { %v4801_v56 = vadd.f32 %v4800_v38, %v4693_v19  ;;  %v9690_v37 = vsub.f32 %v10884_v59, %v4514_v10  ;;  %v9693_v33 = vsub.f32 %v10886_v42, %v4514_v10  ;;  %v9696_v28 = vsub.f32 %v9212_v32, %v4514_v10 }
 0x5f3   : > { %v9701_v51 = vsub.f32 %v9225_v3, %v4514_v10  ;;  %v9708_v38 = vsub.f32 %v9234_v48, %v4514_v10 }
 0x5f4   : > { %10885 = vst [vmem:[#allocation78_spill] sm:$0xff] %v9690_v37  ;;  %v4802_v53 = vadd.f32 %v4801_v56, %v4694_v2  ;;  %v4696_v58 = vmul.f32 %v9690_v37, %v9690_v37  ;;  %v4697_v59 = vmul.f32 %v9693_v33, %v9693_v33  ;;  %v4698_v32 = vmul.f32 %v9696_v28, %v9696_v28 }
 0x5f5   : > { %10887 = vst [vmem:[#allocation79_spill] sm:$0xff] %v9693_v33  ;;  %v9713_v2 = vsub.f32 %v9251_v15, %v4514_v10  ;;  %v4699_v19 = vmul.f32 %v9701_v51, %v9701_v51  ;;  %v4700_v42 = vmul.f32 %v9708_v38, %v9708_v38 }
 0x5f6   : > { %10888 = vst [vmem:[#allocation49_spill] sm:$0xff] %v9696_v28  ;;  %v4803_v52 = vadd.f32 %v4802_v53, %v4695_v6  ;;  %v4806_v60 = vadd.f32 %v4697_v59, %v4696_v58 }
 0x5f7   : > { %10889 = vst [vmem:[#allocation25_spill] sm:$0xff] %v9701_v51  ;;  %v4499_v40 = vpop.xlane.xlu0 %4498  ;;  %v4701_v15 = vmul.f32 %v9713_v2, %v9713_v2 }
 0x5f8   : > { %10890 = vst [vmem:[#allocation65_spill] sm:$0xff] %v9708_v38  ;;  %v4515_v3 = vmul.f32 0.0013020834, %v4499_v40  ;;  %4804 = vadd.xlane.f32.xlu2 %v4803_v52  ;;  %v4807_v56 = vadd.f32 %v4806_v60, %v4698_v32 }
 0x5f9   : > { %10891 = vst [vmem:[#allocation26_spill] sm:$0xff] %v9713_v2 }
 0x5fa   : > { %v4808_v48 = vadd.f32 %v4807_v56, %v4699_v19  ;;  %v9720_v6 = vsub.f32 %v9244_v34, %v4515_v3  ;;  %v9723_v53 = vsub.f32 %v9239_v24, %v4515_v3  ;;  %v9726_v58 = vsub.f32 %v9247_v27, %v4515_v3 }
 0x5fb   : > { %v9731_v59 = vsub.f32 %v9257_v57, %v4515_v3  ;;  %v9738_v24 = vsub.f32 %v9262_v41, %v4515_v3  ;;  %v9743_v40 = vsub.f32 %v9267_v43, %v4515_v3 }
 0x5fc   : > { %10892 = vst [vmem:[#allocation80_spill] sm:$0xff] %v9720_v6  ;;  %v4809_v10 = vadd.f32 %v4808_v48, %v4700_v42  ;;  %v4702_v52 = vmul.f32 %v9720_v6, %v9720_v6  ;;  %v4703_v34 = vmul.f32 %v9723_v53, %v9723_v53  ;;  %v4704_v27 = vmul.f32 %v9726_v58, %v9726_v58 }
 0x5fd   : > { %10893 = vst [vmem:[#allocation50_spill] sm:$0xff] %v9723_v53  ;;  %v4705_v57 = vmul.f32 %v9731_v59, %v9731_v59  ;;  %v4706_v56 = vmul.f32 %v9738_v24, %v9738_v24  ;;  %v4707_v41 = vmul.f32 %v9743_v40, %v9743_v40 }
 0x5fe   : > { %10894 = vst [vmem:[#allocation81_spill] sm:$0xff] %v9726_v58  ;;  %v4810_v32 = vadd.f32 %v4809_v10, %v4701_v15  ;;  %v4813_v60 = vadd.f32 %v4703_v34, %v4702_v52 }
 0x5ff   : > { %10895 = vst [vmem:[#allocation51_spill] sm:$0xff] %v9731_v59 }
 0x600   : > { %10896 = vst [vmem:[#allocation66_spill] sm:$0xff] %v9738_v24  ;;  %4811 = vadd.xlane.f32.xlu0 %v4810_v32  ;;  %v4814_v19 = vadd.f32 %v4813_v60, %v4704_v27  ;;  %v7380_v32 = vld [vmem:[#allocation8] sm:$0x77]  ;;  %v7381_v24 = vld [vmem:[#allocation8 + $0x8] sm:$0x77] }
 0x601   : > { %10897 = vst [vmem:[#allocation27_spill] sm:$0xff] %v9743_v40  ;;  %v5108_v59 = vperm.slane %v7380_v32, 1  ;;  %v5109_v60 = vperm.slane %v7380_v32, 5  ;;  %v5111_v40 = vperm.slane %v7381_v24, 5  ;;  %v5223_v6 = vperm.slane %v7380_v32, 6 }
 0x602   : > { %v4815_v42 = vadd.f32 %v4814_v19, %v4705_v57  ;;  %v5110_v57 = vperm.slane %v7381_v24, 1  ;;  %v5224_v2 = vperm.slane %v7381_v24, 2  ;;  %v5225_v38 = vperm.slane %v7381_v24, 6 }
 0x603   : > { %v4714_v48 = vpop.xlane.xlu1 %4713  ;;  %v9760_v62 = vperm.slane %v5111_v40, 1 }
 0x604   : > { %v4820_v15 = vmul.f32 0.0013020834, %v4714_v48  ;;  %v4816_v10 = vadd.f32 %v4815_v42, %v4706_v56  ;;  %v7382_v56 = vld [vmem:[#allocation8 + $0x10] sm:$0x77] }
 0x605   : > { %v5112_v42 = vperm.slane %v7382_v56, 1  ;;  %v5226_v28 = vperm.slane %v7382_v56, 2  ;;  %v5227_v33 = vperm.slane %v7382_v56, 6 }
 0x606   : > { %v4836_v58 = vadd.f32 1e-12, %v4820_v15  ;;  %v4817_v52 = vadd.f32 %v4816_v10, %v4707_v41  ;;  %v5113_v15 = vperm.slane %v7382_v56, 5  ;;  %v9754_v41 = vperm.slane %v5108_v59, 1 }
 0x607   : > { %v9756_v10 = vperm.slane %v5109_v60, 1  ;;  %v9762_v59 = vperm.slane %v5112_v42, 1  ;;  %v9775_v56 = vperm.slane %v5225_v38, 2  ;;  %v9778_v40 = vperm.slane %v5226_v28, 2 }
 0x608   : > { %7348 = vrsqrt.f32 %v4836_v58  ;;  %4818 = vadd.xlane.f32.xlu1 %v4817_v52  ;;  %v9758_v52 = vperm.slane %v5110_v57, 1  ;;  %v9764_v60 = vperm.slane %v5113_v15, 1  ;;  %vm4858_vm1 = vweird.f32 %v4836_v58 }
 0x609   : > { %v9780_v42 = vperm.slane %v5227_v33, 2 }
 0x60b   : > { %v4721_v43 = vpop.xlane.xlu2 %4720 }
 0x60c   : > { %v4821_v3 = vmul.f32 0.0013020834, %v4721_v43  ;;  %v5222_v43 = vperm.slane %v7380_v32, 2  ;;  %v9773_v32 = vperm.slane %v5224_v2, 2 }
 0x60e   : > { %v7349_v34 = vpop.eup %7348  ;;  %v9751_v27 = vadd.f32 1e-12, %v4821_v3  ;;  %v9768_v44 = vperm.slane %v5222_v43, 2 }
 0x60f   : > { %v4853_v19 = vmul.f32 %v7349_v34, %v4836_v58  ;;  %vm4859_vm0 = vweird.f32 %v7349_v34 }
 0x610   : > { %7350 = vrsqrt.f32 %v9751_v27  ;;  %vm4860_vm2 = vmor %vm4858_vm1, %vm4859_vm0  ;;  %vm4868_vm4 = vweird.f32 %v9751_v27 }
 0x611   : > { %v4854_v48 = vmul.f32 %v7349_v34, %v4853_v19 }
 0x613   : > { %v4855_v3 = vmul.f32 0.5, %v4854_v48  ;;  %v4728_v53 = vpop.xlane.xlu0 %4727 }
 0x614   : > { %v4822_v51 = vmul.f32 0.0013020834, %v4728_v53  ;;  %v9771_v53 = vperm.slane %v5223_v6, 2 }
 0x615   : > { %v4856_v19 = vsub.f32 1.5, %v4855_v3 }
 0x616   : > { %v7351_v37 = vpop.eup %7350  ;;  %v9766_v57 = vadd.f32 1e-12, %v4822_v51 }
 0x617   : > { %v4857_v48 = vmul.f32 %v7349_v34, %v4856_v19  ;;  %v4863_v24 = vmul.f32 %v7351_v37, %v9751_v27  ;;  %vm4869_vm3 = vweird.f32 %v7351_v37 }
 0x618   : > { %7352 = vrsqrt.f32 %v9766_v57  ;;  %vm4870_vm5 = vmor %vm4868_vm4, %vm4869_vm3  ;;  %vm4878_vm7 = vweird.f32 %v9766_v57 }
 0x619   : > { %v4861_v51 = vsel %vm4860_vm2, %v7349_v34, %v4857_v48  ;;  %v4864_v15 = vmul.f32 %v7351_v37, %v4863_v24 }
 0x61a   : > { %v5012_v43 = vmul.f32 %v4861_v51, %v9272_v13  ;;  %v5013_v58 = vmul.f32 %v4861_v51, %v9275_v21  ;;  %v5014_v6 = vmul.f32 %v4861_v51, %v9278_v39  ;;  %v5015_v2 = vmul.f32 %v4861_v51, %v9281_v36 }
 0x61b   : > { %v5016_v38 = vmul.f32 %v4861_v51, %v9288_v20  ;;  %v5017_v3 = vmul.f32 %v4861_v51, %v9293_v11  ;;  %v4865_v19 = vmul.f32 0.5, %v4864_v15  ;;  %v4735_v28 = vpop.xlane.xlu1 %4734 }
 0x61c   : > { %v5126_v33 = vmul.f32 %v9754_v41, %v5012_v43  ;;  %v5127_v34 = vmul.f32 %v9756_v10, %v5013_v58  ;;  %v5128_v13 = vmul.f32 %v9758_v52, %v5014_v6  ;;  %v5129_v21 = vmul.f32 %v9760_v62, %v5015_v2 }
 0x61d   : > { %v5130_v39 = vmul.f32 %v9762_v59, %v5016_v38  ;;  %v5131_v36 = vmul.f32 %v9764_v60, %v5017_v3  ;;  %v4866_v48 = vsub.f32 1.5, %v4865_v19  ;;  %v4823_v20 = vmul.f32 0.0013020834, %v4735_v28 }
 0x61e   : > { %v7353_v24 = vpop.eup %7352  ;;  %v5240_v11 = vadd.f32 %v9768_v44, %v5126_v33  ;;  %v5241_v51 = vadd.f32 %v9771_v53, %v5127_v34  ;;  %v5242_v15 = vadd.f32 %v9773_v32, %v5128_v13  ;;  %v5243_v43 = vadd.f32 %v9775_v56, %v5129_v21  ;;  %v10898_v34 = vld [vmem:[#allocation29_spill] sm:$0xff] }
 0x61f   : > { %v4867_v58 = vmul.f32 %v7351_v37, %v4866_v48  ;;  %v4873_v6 = vmul.f32 %v7353_v24, %v9766_v57  ;;  %v5244_v2 = vadd.f32 %v9778_v40, %v5130_v39  ;;  %v9807_v38 = vadd.f32 1e-12, %v4823_v20  ;;  %v10899_v48 = vld [vmem:[#allocation70_spill] sm:$0xff] }
 0x620   : > { %5336 = vst [vmem:[%s9803_s21] sm:$0xff] %v5240_v11  ;;  %v5245_v3 = vadd.f32 %v9780_v42, %v5131_v36  ;;  %vm4879_vm6 = vweird.f32 %v7353_v24  ;;  %v10902_v57 = vld [vmem:[#allocation30_spill] sm:$0xff] }
 0x621   : > { %5337 = vst [vmem:[%s9803_s21 + $0x8] sm:$0xff] %v5241_v51  ;;  %v4871_v27 = vsel %vm4870_vm5, %v7351_v37, %v4867_v58  ;;  %v4874_v19 = vmul.f32 %v7353_v24, %v4873_v6  ;;  %7354 = vrsqrt.f32 %v9807_v38  ;;  %vm4880_vm8 = vmor %vm4878_vm7, %vm4879_vm6  ;;  %vm4888_vm10 = vweird.f32 %v9807_v38 }
 0x622   : > { %5338 = vst [vmem:[%s9803_s21 + $0x10] sm:$0xff] %v5242_v15  ;;  %v5018_v28 = vmul.f32 %v4871_v27, %v9300_v16  ;;  %v5019_v33 = vmul.f32 %v4871_v27, %v9303_v4  ;;  %v5020_v13 = vmul.f32 %v4871_v27, %v10898_v34  ;;  %v5021_v21 = vmul.f32 %v4871_v27, %v9311_v0 }
 0x623   : > { %5339 = vst [vmem:[%s9803_s21 + $0x18] sm:$0xff] %v5243_v43  ;;  %v5022_v39 = vmul.f32 %v4871_v27, %v9318_v61  ;;  %v5023_v20 = vmul.f32 %v4871_v27, %v10899_v48  ;;  %v4875_v11 = vmul.f32 0.5, %v4874_v19  ;;  %v4742_v51 = vpop.xlane.xlu2 %4741  ;;  %v10901_v48 = vld [vmem:[#allocation85_spill] sm:$0xff] }
 0x624   : > { %5340 = vst [vmem:[%s9803_s21 + $0x20] sm:$0xff] %v5244_v2  ;;  %v5132_v37 = vmul.f32 %v9754_v41, %v5018_v28  ;;  %v5133_v36 = vmul.f32 %v9756_v10, %v5019_v33  ;;  %v5134_v16 = vmul.f32 %v9758_v52, %v5020_v13  ;;  %v5135_v4 = vmul.f32 %v9760_v62, %v5021_v21  ;;  %v10900_v21 = vld [vmem:[#allocation55_spill] sm:$0xff] }
 0x625   : > { %5341 = vst [vmem:[%s9803_s21 + $0x28] sm:$0xff] %v5245_v3  ;;  %v5136_v0 = vmul.f32 %v9762_v59, %v5022_v39  ;;  %v5137_v61 = vmul.f32 %v9764_v60, %v5023_v20  ;;  %v4876_v15 = vsub.f32 1.5, %v4875_v11  ;;  %v4824_v3 = vmul.f32 0.0013020834, %v4742_v51 }
 0x626   : > { %v5246_v43 = vadd.f32 %v9768_v44, %v5132_v37  ;;  %v5247_v58 = vadd.f32 %v9771_v53, %v5133_v36  ;;  %v5248_v6 = vadd.f32 %v9773_v32, %v5134_v16  ;;  %v5249_v2 = vadd.f32 %v9775_v56, %v5135_v4  ;;  %v10903_v16 = vld [vmem:[#allocation71_spill] sm:$0xff] }
 0x627   : > { %v4877_v27 = vmul.f32 %v7353_v24, %v4876_v15  ;;  %v5250_v19 = vadd.f32 %v9778_v40, %v5136_v0  ;;  %v7355_v28 = vpop.eup %7354  ;;  %v5251_v33 = vadd.f32 %v9780_v42, %v5137_v61  ;;  %v9837_v13 = vadd.f32 1e-12, %v4824_v3 }
 0x628   : > { %5342 = vst [vmem:[%s9803_s21 + $0x30] sm:$0xff] %v5246_v43  ;;  %v4883_v51 = vmul.f32 %v7355_v28, %v9807_v38  ;;  %vm4889_vm9 = vweird.f32 %v7355_v28 }
 0x629   : > { %5343 = vst [vmem:[%s9803_s21 + $0x38] sm:$0xff] %v5247_v58  ;;  %v4881_v34 = vsel %vm4880_vm8, %v7353_v24, %v4877_v27  ;;  %7356 = vrsqrt.f32 %v9837_v13  ;;  %vm4890_vm11 = vmor %vm4888_vm10, %vm4889_vm9  ;;  %vm4898_vm13 = vweird.f32 %v9837_v13 }
 0x62a   : > { %5344 = vst [vmem:[%s9803_s21 + $0x40] sm:$0xff] %v5248_v6  ;;  %v5024_v39 = vmul.f32 %v4881_v34, %v10900_v21  ;;  %v5025_v20 = vmul.f32 %v4881_v34, %v10901_v48  ;;  %v5026_v11 = vmul.f32 %v4881_v34, %v10902_v57  ;;  %v5027_v37 = vmul.f32 %v4881_v34, %v9341_v25 }
 0x62b   : > { %5345 = vst [vmem:[%s9803_s21 + $0x48] sm:$0xff] %v5249_v2  ;;  %v5028_v36 = vmul.f32 %v4881_v34, %v9348_v31  ;;  %v5029_v4 = vmul.f32 %v4881_v34, %v10903_v16  ;;  %v4884_v43 = vmul.f32 %v7355_v28, %v4883_v51  ;;  %v4749_v58 = vpop.xlane.xlu0 %4748 }
 0x62c   : > { %5346 = vst [vmem:[%s9803_s21 + $0x50] sm:$0xff] %v5250_v19  ;;  %v5138_v24 = vmul.f32 %v9754_v41, %v5024_v39  ;;  %v5139_v0 = vmul.f32 %v9756_v10, %v5025_v20  ;;  %v5140_v61 = vmul.f32 %v9758_v52, %v5026_v11  ;;  %v5141_v15 = vmul.f32 %v9760_v62, %v5027_v37 }
 0x62d   : > { %5347 = vst [vmem:[%s9803_s21 + $0x58] sm:$0xff] %v5251_v33  ;;  %v5142_v25 = vmul.f32 %v9762_v59, %v5028_v36  ;;  %v5143_v31 = vmul.f32 %v9764_v60, %v5029_v4  ;;  %v4885_v19 = vmul.f32 0.5, %v4884_v43  ;;  %v4825_v34 = vmul.f32 0.0013020834, %v4749_v58  ;;  %v10904_v4 = vld [vmem:[#allocation56_spill] sm:$0xff] }
 0x62e   : > { %v5252_v6 = vadd.f32 %v9768_v44, %v5138_v24  ;;  %v5253_v2 = vadd.f32 %v9771_v53, %v5139_v0  ;;  %v5254_v27 = vadd.f32 %v9773_v32, %v5140_v61  ;;  %v5255_v3 = vadd.f32 %v9775_v56, %v5141_v15  ;;  %v10905_v24 = vld [vmem:[#allocation86_spill] sm:$0xff]  ;;  %v10906_v61 = vld [vmem:[#allocation31_spill] sm:$0xff] }
 0x62f   : > { %v5256_v33 = vadd.f32 %v9778_v40, %v5142_v25  ;;  %v5257_v21 = vadd.f32 %v9780_v42, %v5143_v31  ;;  %v4886_v39 = vsub.f32 1.5, %v4885_v19  ;;  %v9866_v48 = vadd.f32 1e-12, %v4825_v34  ;;  %v7357_v20 = vpop.eup %7356  ;;  %v10907_v31 = vld [vmem:[#allocation72_spill] sm:$0xff] }
 0x630   : > { %5348 = vst [vmem:[%s9803_s21 + $0x60] sm:$0xff] %v5252_v6  ;;  %v4893_v37 = vmul.f32 %v7357_v20, %v9837_v13  ;;  %vm4899_vm12 = vweird.f32 %v7357_v20  ;;  %v10910_v13 = vld [vmem:[#allocation73_spill] sm:$0xff] }
 0x631   : > { %5349 = vst [vmem:[%s9803_s21 + $0x68] sm:$0xff] %v5253_v2  ;;  %v4887_v57 = vmul.f32 %v7355_v28, %v4886_v39  ;;  %7358 = vrsqrt.f32 %v9866_v48  ;;  %vm4900_vm14 = vmor %vm4898_vm13, %vm4899_vm12  ;;  %vm4908_vm15 = vweird.f32 %v9866_v48 }
 0x632   : > { %5350 = vst [vmem:[%s9803_s21 + $0x70] sm:$0xff] %v5254_v27  ;;  %v4894_v58 = vmul.f32 %v7357_v20, %v4893_v37 }
 0x633   : > { %5351 = vst [vmem:[%s9803_s21 + $0x78] sm:$0xff] %v5255_v3  ;;  %v4756_v11 = vpop.xlane.xlu1 %4755  ;;  %v4891_v36 = vsel %vm4890_vm11, %v7355_v28, %v4887_v57 }
 0x634   : > { %5352 = vst [vmem:[%s9803_s21 + $0x80] sm:$0xff] %v5256_v33  ;;  %v4826_v16 = vmul.f32 0.0013020834, %v4756_v11  ;;  %v5030_v51 = vmul.f32 %v4891_v36, %v10904_v4  ;;  %v5031_v0 = vmul.f32 %v4891_v36, %v10905_v24  ;;  %v5032_v15 = vmul.f32 %v4891_v36, %v10906_v61 }
 0x635   : > { %5353 = vst [vmem:[%s9803_s21 + $0x88] sm:$0xff] %v5257_v21  ;;  %v5033_v25 = vmul.f32 %v4891_v36, %v9371_v22  ;;  %v5034_v38 = vmul.f32 %v4891_v36, %v9378_v17  ;;  %v5035_v43 = vmul.f32 %v4891_v36, %v10907_v31  ;;  %v4895_v17 = vmul.f32 0.5, %v4894_v58  ;;  %v10908_v31 = vld [vmem:[#allocation57_spill] sm:$0xff]  ;;  %v10909_v58 = vld [vmem:[#allocation87_spill] sm:$0xff] }
 0x636   : > { %v9880_v6 = vadd.f32 1e-12, %v4826_v16  ;;  %v5144_v2 = vmul.f32 %v9754_v41, %v5030_v51  ;;  %v5145_v28 = vmul.f32 %v9756_v10, %v5031_v0  ;;  %v5146_v27 = vmul.f32 %v9758_v52, %v5032_v15 }
 0x637   : > { %v5147_v3 = vmul.f32 %v9760_v62, %v5033_v25  ;;  %v5148_v19 = vmul.f32 %v9762_v59, %v5034_v38  ;;  %v5149_v22 = vmul.f32 %v9764_v60, %v5035_v43  ;;  %v7359_v33 = vpop.eup %7358  ;;  %v4896_v11 = vsub.f32 1.5, %v4895_v17 }
 0x638   : > { %7360 = vrsqrt.f32 %v9880_v6  ;;  %v5258_v34 = vadd.f32 %v9768_v44, %v5144_v2  ;;  %v5259_v21 = vadd.f32 %v9771_v53, %v5145_v28  ;;  %v5260_v39 = vadd.f32 %v9773_v32, %v5146_v27 }
 0x639   : > { %v5261_v57 = vadd.f32 %v9775_v56, %v5147_v3  ;;  %v4903_v37 = vmul.f32 %v7359_v33, %v9866_v48  ;;  %v5262_v16 = vadd.f32 %v9778_v40, %v5148_v19  ;;  %v5263_v51 = vadd.f32 %v9780_v42, %v5149_v22  ;;  %v10911_v3 = vld [vmem:[#allocation35_spill] sm:$0xff]  ;;  %v10912_v22 = vld [vmem:[#allocation36_spill] sm:$0xff] }
 0x63a   : > { %5354 = vst [vmem:[%s9803_s21 + $0x90] sm:$0xff] %v5258_v34  ;;  %v4897_v24 = vmul.f32 %v7357_v20, %v4896_v11  ;;  %vm4909_vm0 = vweird.f32 %v7359_v33  ;;  %vm4918_vm1 = vweird.f32 %v9880_v6 }
 0x63b   : > { %v4763_v36 = vpop.xlane.xlu2 %4762  ;;  %5355 = vst [vmem:[%s9803_s21 + $0x98] sm:$0xff] %v5259_v21  ;;  %v4904_v0 = vmul.f32 %v7359_v33, %v4903_v37  ;;  %vm4910_vm2 = vmor %vm4908_vm15, %vm4909_vm0 }
 0x63c   : > { %v4827_v4 = vmul.f32 0.0013020834, %v4763_v36  ;;  %5356 = vst [vmem:[%s9803_s21 + $0xa0] sm:$0xff] %v5260_v39  ;;  %v4901_v15 = vsel %vm4900_vm14, %v7357_v20, %v4897_v24 }
 0x63d   : > { %5357 = vst [vmem:[%s9803_s21 + $0xa8] sm:$0xff] %v5261_v57  ;;  %v4905_v25 = vmul.f32 0.5, %v4904_v0  ;;  %v5036_v43 = vmul.f32 %v4901_v15, %v10908_v31  ;;  %v5037_v2 = vmul.f32 %v4901_v15, %v10909_v58  ;;  %v5038_v28 = vmul.f32 %v4901_v15, %v10910_v13  ;;  %v10913_v58 = vld [vmem:[#allocation32_spill] sm:$0xff]  ;;  %v10914_v13 = vld [vmem:[#allocation33_spill] sm:$0xff] }
 0x63e   : > { %v9901_v61 = vpop.eup %7360  ;;  %v9904_v38 = vadd.f32 1e-12, %v4827_v4  ;;  %5358 = vst [vmem:[%s9803_s21 + $0xb0] sm:$0xff] %v5262_v16  ;;  %v5039_v27 = vmul.f32 %v4901_v15, %v9401_v47  ;;  %v5040_v19 = vmul.f32 %v4901_v15, %v10911_v3  ;;  %v5041_v17 = vmul.f32 %v4901_v15, %v10912_v22 }
 0x63f   : > { %5359 = vst [vmem:[%s9803_s21 + $0xb8] sm:$0xff] %v5263_v51  ;;  %v4906_v34 = vsub.f32 1.5, %v4905_v25  ;;  %v4913_v20 = vmul.f32 %v9901_v61, %v9880_v6  ;;  %v5150_v21 = vmul.f32 %v9754_v41, %v5036_v43  ;;  %v5151_v39 = vmul.f32 %v9756_v10, %v5037_v2  ;;  %v10918_v6 = vld [vmem:[#allocation37_spill] sm:$0xff] }
 0x640   : > { %v5152_v57 = vmul.f32 %v9758_v52, %v5038_v28  ;;  %v5153_v47 = vmul.f32 %v9760_v62, %v5039_v27  ;;  %v5154_v11 = vmul.f32 %v9762_v59, %v5040_v19  ;;  %v5155_v37 = vmul.f32 %v9764_v60, %v5041_v17  ;;  %v10915_v27 = vld [vmem:[#allocation34_spill] sm:$0xff] }
 0x641   : > { %v4907_v36 = vmul.f32 %v7359_v33, %v4906_v34  ;;  %v4914_v16 = vmul.f32 %v9901_v61, %v4913_v20  ;;  %v5264_v4 = vadd.f32 %v9768_v44, %v5150_v21  ;;  %v5265_v51 = vadd.f32 %v9771_v53, %v5151_v39 }
 0x642   : > { %v5266_v24 = vadd.f32 %v9773_v32, %v5152_v57  ;;  %v5267_v0 = vadd.f32 %v9775_v56, %v5153_v47  ;;  %v5268_v15 = vadd.f32 %v9778_v40, %v5154_v11  ;;  %v5269_v25 = vadd.f32 %v9780_v42, %v5155_v37 }
 0x643   : > { %v4911_v31 = vsel %vm4910_vm2, %v7359_v33, %v4907_v36  ;;  %v4915_v43 = vmul.f32 0.5, %v4914_v16  ;;  %5360 = vst [vmem:[%s9803_s21 + $0xc0] sm:$0xff] %v5264_v4  ;;  %vm4919_vm3 = vweird.f32 %v9901_v61  ;;  %7362 = vrsqrt.f32 %v9904_v38  ;;  %v4770_v11 = vpop.xlane.xlu0 %4769 }
 0x644   : > { %v5042_v2 = vmul.f32 %v4911_v31, %v10913_v58  ;;  %v5043_v28 = vmul.f32 %v4911_v31, %v10914_v13  ;;  %v5044_v3 = vmul.f32 %v4911_v31, %v10915_v27  ;;  %v5045_v19 = vmul.f32 %v4911_v31, %v9431_v23  ;;  %5361 = vst [vmem:[%s9803_s21 + $0xc8] sm:$0xff] %v5265_v51  ;;  %vm4920_vm4 = vmor %vm4918_vm1, %vm4919_vm3  ;;  %v10919_v58 = vld [vmem:[#allocation41_spill] sm:$0xff]  ;;  %v10920_v13 = vld [vmem:[#allocation20_spill] sm:$0xff] }
 0x645   : > { %v5046_v48 = vmul.f32 %v4911_v31, %v9438_v35  ;;  %v5047_v22 = vmul.f32 %v4911_v31, %v9443_v9  ;;  %v4916_v17 = vsub.f32 1.5, %v4915_v43  ;;  %5362 = vst [vmem:[%s9803_s21 + $0xd0] sm:$0xff] %v5266_v24  ;;  %v10916_v24 = vld [vmem:[#allocation40_spill] sm:$0xff]  ;;  %v4828_v27 = vmul.f32 0.0013020834, %v4770_v11 }
 0x646   : > { %v5156_v33 = vmul.f32 %v9754_v41, %v5042_v2  ;;  %v5157_v34 = vmul.f32 %v9756_v10, %v5043_v28  ;;  %v5158_v20 = vmul.f32 %v9758_v52, %v5044_v3  ;;  %v5159_v21 = vmul.f32 %v9760_v62, %v5045_v19  ;;  %5363 = vst [vmem:[%s9803_s21 + $0xd8] sm:$0xff] %v5267_v0 }
 0x647   : > { %v5160_v23 = vmul.f32 %v9762_v59, %v5046_v48  ;;  %v5161_v35 = vmul.f32 %v9764_v60, %v5047_v22  ;;  %v4917_v9 = vmul.f32 %v9901_v61, %v4916_v17  ;;  %5364 = vst [vmem:[%s9803_s21 + $0xe0] sm:$0xff] %v5268_v15  ;;  %v10917_v15 = vld [vmem:[#allocation39_spill] sm:$0xff]  ;;  %vm4928_vm6 = vweird.f32 %v9904_v38 }
 0x648   : > { %v5270_v39 = vadd.f32 %v9768_v44, %v5156_v33  ;;  %v5271_v57 = vadd.f32 %v9771_v53, %v5157_v34  ;;  %v5272_v47 = vadd.f32 %v9773_v32, %v5158_v20  ;;  %5365 = vst [vmem:[%s9803_s21 + $0xe8] sm:$0xff] %v5269_v25  ;;  %v5273_v37 = vadd.f32 %v9775_v56, %v5159_v21 }
 0x649   : > { %v5274_v36 = vadd.f32 %v9778_v40, %v5160_v23  ;;  %v5275_v16 = vadd.f32 %v9780_v42, %v5161_v35  ;;  %v4921_v4 = vsel %vm4920_vm4, %v9901_v61, %v4917_v9  ;;  %v9981_v34 = vadd.f32 1e-12, %v4828_v27  ;;  %v10923_v27 = vld [vmem:[#allocation58_spill] sm:$0xff] }
 0x64a   : > { %5366 = vst [vmem:[%s9803_s21 + $0xf0] sm:$0xff] %v5270_v39  ;;  %v5048_v0 = vmul.f32 %v4921_v4, %v10916_v24  ;;  %v5049_v31 = vmul.f32 %v4921_v4, %v10917_v15  ;;  %v5050_v43 = vmul.f32 %v4921_v4, %v10918_v6  ;;  %v5051_v25 = vmul.f32 %v4921_v4, %v9461_v30  ;;  %v7363_v30 = vpop.eup %7362 }
 0x64b   : > { %v4777_v51 = vpop.xlane.xlu1 %4776  ;;  %5367 = vst [vmem:[%s9803_s21 + $0xf8] sm:$0xff] %v5271_v57  ;;  %v5052_v2 = vmul.f32 %v4921_v4, %v10919_v58  ;;  %v5053_v28 = vmul.f32 %v4921_v4, %v10920_v13  ;;  %v4923_v39 = vmul.f32 %v7363_v30, %v9904_v38  ;;  %7364 = vrsqrt.f32 %v9981_v34  ;;  %v10921_v58 = vld [vmem:[#allocation19_spill] sm:$0xff]  ;;  %v10922_v13 = vld [vmem:[#allocation42_spill] sm:$0xff] }
 0x64c   : > { %v4829_v3 = vmul.f32 0.0013020834, %v4777_v51  ;;  %5368 = vst [vmem:[%s9803_s21 + $0x100] sm:$0xff] %v5272_v47  ;;  %v5162_v61 = vmul.f32 %v9754_v41, %v5048_v0  ;;  %v5163_v19 = vmul.f32 %v9756_v10, %v5049_v31  ;;  %v5164_v48 = vmul.f32 %v9758_v52, %v5050_v43 }
 0x64d   : > { %v5165_v22 = vmul.f32 %v9760_v62, %v5051_v25  ;;  %5369 = vst [vmem:[%s9803_s21 + $0x108] sm:$0xff] %v5273_v37  ;;  %v5166_v17 = vmul.f32 %v9762_v59, %v5052_v2  ;;  %v5167_v33 = vmul.f32 %v9764_v60, %v5053_v28  ;;  %v4924_v11 = vmul.f32 %v7363_v30, %v4923_v39 }
 0x64e   : > { %v9983_v20 = vadd.f32 1e-12, %v4829_v3  ;;  %5370 = vst [vmem:[%s9803_s21 + $0x110] sm:$0xff] %v5274_v36  ;;  %v5276_v21 = vadd.f32 %v9768_v44, %v5162_v61  ;;  %v5277_v23 = vadd.f32 %v9771_v53, %v5163_v19  ;;  %v5278_v35 = vadd.f32 %v9773_v32, %v5164_v48 }
 0x64f   : > { %5371 = vst [vmem:[%s9803_s21 + $0x118] sm:$0xff] %v5275_v16  ;;  %v5279_v9 = vadd.f32 %v9775_v56, %v5165_v22  ;;  %v5280_v57 = vadd.f32 %v9778_v40, %v5166_v17  ;;  %v5281_v47 = vadd.f32 %v9780_v42, %v5167_v33  ;;  %v4925_v16 = vmul.f32 0.5, %v4924_v11 }
 0x650   : > { %5372 = vst [vmem:[%s9803_s21 + $0x120] sm:$0xff] %v5276_v21  ;;  %7366 = vrsqrt.f32 %v9983_v20  ;;  %vm4929_vm5 = vweird.f32 %v7363_v30  ;;  %vm4938_vm9 = vweird.f32 %v9981_v34  ;;  %vm4948_vm12 = vweird.f32 %v9983_v20 }
 0x651   : > { %5373 = vst [vmem:[%s9803_s21 + $0x128] sm:$0xff] %v5277_v23  ;;  %v4926_v51 = vsub.f32 1.5, %v4925_v16  ;;  %v7365_v24 = vpop.eup %7364  ;;  %vm4930_vm7 = vmor %vm4928_vm6, %vm4929_vm5 }
 0x652   : > { %5374 = vst [vmem:[%s9803_s21 + $0x130] sm:$0xff] %v5278_v35  ;;  %v4933_v31 = vmul.f32 %v7365_v24, %v9981_v34  ;;  %vm4939_vm8 = vweird.f32 %v7365_v24 }
 0x653   : > { %v4784_v37 = vpop.xlane.xlu2 %4783  ;;  %5375 = vst [vmem:[%s9803_s21 + $0x138] sm:$0xff] %v5279_v9  ;;  %v4927_v15 = vmul.f32 %v7363_v30, %v4926_v51  ;;  %vm4940_vm11 = vmor %vm4938_vm9, %vm4939_vm8 }
 0x654   : > { %v4830_v36 = vmul.f32 0.0013020834, %v4784_v37  ;;  %5376 = vst [vmem:[%s9803_s21 + $0x140] sm:$0xff] %v5280_v57  ;;  %v4934_v25 = vmul.f32 %v7365_v24, %v4933_v31 }
 0x655   : > { %5377 = vst [vmem:[%s9803_s21 + $0x148] sm:$0xff] %v5281_v47  ;;  %v4931_v43 = vsel %vm4930_vm7, %v7363_v30, %v4927_v15 }
 0x656   : > { %v10001_v4 = vadd.f32 1e-12, %v4830_v36  ;;  %v7367_v0 = vpop.eup %7366  ;;  %v5054_v2 = vmul.f32 %v4931_v43, %v10921_v58  ;;  %v5055_v28 = vmul.f32 %v4931_v43, %v10922_v13  ;;  %v5056_v3 = vmul.f32 %v4931_v43, %v10923_v27 }
 0x657   : > { %v4943_v6 = vmul.f32 %v7367_v0, %v9983_v20  ;;  %v5057_v61 = vmul.f32 %v4931_v43, %v9491_v18  ;;  %v5058_v38 = vmul.f32 %v4931_v43, %v9498_v50  ;;  %v5059_v19 = vmul.f32 %v4931_v43, %v9503_v26 }
 0x658   : > { %7368 = vrsqrt.f32 %v10001_v4  ;;  %v4935_v48 = vmul.f32 0.5, %v4934_v25  ;;  %v5168_v17 = vmul.f32 %v9754_v41, %v5054_v2  ;;  %v5169_v30 = vmul.f32 %v9756_v10, %v5055_v28  ;;  %v10924_v25 = vld [vmem:[#allocation17_spill] sm:$0xff]  ;;  %v10925_v2 = vld [vmem:[#allocation38_spill] sm:$0xff]  ;;  %v10926_v28 = vld [vmem:[#allocation43_spill] sm:$0xff] }
 0x659   : > { %v4944_v22 = vmul.f32 %v7367_v0, %v4943_v6  ;;  %v5170_v33 = vmul.f32 %v9758_v52, %v5056_v3  ;;  %v5171_v21 = vmul.f32 %v9760_v62, %v5057_v61  ;;  %v5172_v35 = vmul.f32 %v9762_v59, %v5058_v38  ;;  %v10927_v3 = vld [vmem:[#allocation59_spill] sm:$0xff] }
 0x65a   : > { %v5173_v18 = vmul.f32 %v9764_v60, %v5059_v19  ;;  %v4936_v50 = vsub.f32 1.5, %v4935_v48  ;;  %v5282_v26 = vadd.f32 %v9768_v44, %v5168_v17  ;;  %v5283_v39 = vadd.f32 %v9771_v53, %v5169_v30  ;;  %v10928_v30 = vld [vmem:[#allocation18_spill] sm:$0xff] }
 0x65b   : > { %v4945_v9 = vmul.f32 0.5, %v4944_v22  ;;  %v5284_v57 = vadd.f32 %v9773_v32, %v5170_v33  ;;  %v4791_v47 = vpop.xlane.xlu0 %4790  ;;  %v5285_v11 = vadd.f32 %v9775_v56, %v5171_v21  ;;  %vm4949_vm10 = vweird.f32 %v7367_v0  ;;  %v10929_v33 = vld [vmem:[#allocation74_spill] sm:$0xff] }
 0x65c   : > { %v4937_v37 = vmul.f32 %v7365_v24, %v4936_v50  ;;  %v5286_v16 = vadd.f32 %v9778_v40, %v5172_v35  ;;  %5378 = vst [vmem:[%s9803_s21 + $0x150] sm:$0xff] %v5282_v26  ;;  %v5287_v34 = vadd.f32 %v9780_v42, %v5173_v18  ;;  %v4831_v6 = vmul.f32 0.0013020834, %v4791_v47  ;;  %vm4950_vm13 = vmor %vm4948_vm12, %vm4949_vm10 }
 0x65d   : > { %v4946_v36 = vsub.f32 1.5, %v4945_v9  ;;  %5379 = vst [vmem:[%s9803_s21 + $0x158] sm:$0xff] %v5283_v39  ;;  %vm4958_vm15 = vweird.f32 %v10001_v4 }
 0x65e   : > { %v10018_v23 = vpop.eup %7368  ;;  %v4941_v15 = vsel %vm4940_vm11, %v7365_v24, %v4937_v37  ;;  %5380 = vst [vmem:[%s9803_s21 + $0x160] sm:$0xff] %v5284_v57  ;;  %v10930_v57 = vld [vmem:[#allocation44_spill] sm:$0xff] }
 0x65f   : > { %v4953_v51 = vmul.f32 %v10018_v23, %v10001_v4  ;;  %v4947_v31 = vmul.f32 %v7367_v0, %v4946_v36  ;;  %v5060_v43 = vmul.f32 %v4941_v15, %v9510_v7  ;;  %v5061_v58 = vmul.f32 %v4941_v15, %v10924_v25  ;;  %5381 = vst [vmem:[%s9803_s21 + $0x168] sm:$0xff] %v5285_v11  ;;  %v10932_v4 = vld [vmem:[#allocation21_spill] sm:$0xff] }
 0x660   : > { %v5062_v13 = vmul.f32 %v4941_v15, %v10925_v2  ;;  %v5063_v20 = vmul.f32 %v4941_v15, %v9521_v54  ;;  %v5064_v27 = vmul.f32 %v4941_v15, %v10926_v28  ;;  %v5065_v61 = vmul.f32 %v4941_v15, %v10927_v3  ;;  %5382 = vst [vmem:[%s9803_s21 + $0x170] sm:$0xff] %v5286_v16 }
 0x661   : > { %v4951_v24 = vsel %vm4950_vm13, %v7367_v0, %v4947_v31  ;;  %v4954_v38 = vmul.f32 %v10018_v23, %v4953_v51  ;;  %v5174_v19 = vmul.f32 %v9754_v41, %v5060_v43  ;;  %v5175_v7 = vmul.f32 %v9756_v10, %v5061_v58  ;;  %5383 = vst [vmem:[%s9803_s21 + $0x178] sm:$0xff] %v5287_v34 }
 0x662   : > { %v5176_v48 = vmul.f32 %v9758_v52, %v5062_v13  ;;  %v5177_v54 = vmul.f32 %v9760_v62, %v5063_v20  ;;  %v5178_v22 = vmul.f32 %v9762_v59, %v5064_v27  ;;  %v5179_v17 = vmul.f32 %v9764_v60, %v5065_v61 }
 0x663   : > { %v5066_v0 = vmul.f32 %v4951_v24, %v10928_v30  ;;  %v5067_v21 = vmul.f32 %v4951_v24, %v10929_v33  ;;  %v5288_v35 = vadd.f32 %v9768_v44, %v5174_v19  ;;  %v5289_v18 = vadd.f32 %v9771_v53, %v5175_v7  ;;  %v10931_v7 = vld [vmem:[#allocation60_spill] sm:$0xff]  ;;  %v10934_v33 = vld [vmem:[#allocation45_spill] sm:$0xff] }
 0x664   : > { %v5290_v50 = vadd.f32 %v9773_v32, %v5176_v48  ;;  %v5291_v9 = vadd.f32 %v9775_v56, %v5177_v54  ;;  %v5292_v26 = vadd.f32 %v9778_v40, %v5178_v22  ;;  %v5293_v39 = vadd.f32 %v9780_v42, %v5179_v17  ;;  %v10933_v22 = vld [vmem:[#allocation75_spill] sm:$0xff] }
 0x665   : > { %v5068_v47 = vmul.f32 %v4951_v24, %v10930_v57  ;;  %v5069_v11 = vmul.f32 %v4951_v24, %v9551_v29  ;;  %5384 = vst [vmem:[%s9803_s21 + $0x180] sm:$0xff] %v5288_v35  ;;  %v5070_v37 = vmul.f32 %v4951_v24, %v9558_v46  ;;  %v5071_v36 = vmul.f32 %v4951_v24, %v9563_v45  ;;  %v4798_v29 = vpop.xlane.xlu1 %4797  ;;  %v10935_v35 = vld [vmem:[#allocation61_spill] sm:$0xff] }
 0x666   : > { %v5180_v16 = vmul.f32 %v9754_v41, %v5066_v0  ;;  %v5181_v51 = vmul.f32 %v9756_v10, %v5067_v21  ;;  %5385 = vst [vmem:[%s9803_s21 + $0x188] sm:$0xff] %v5289_v18  ;;  %v4955_v31 = vmul.f32 0.5, %v4954_v38  ;;  %v10071_v43 = vadd.f32 1e-12, %v4831_v6 }
 0x667   : > { %v5182_v34 = vmul.f32 %v9758_v52, %v5068_v47  ;;  %v5183_v15 = vmul.f32 %v9760_v62, %v5069_v11  ;;  %5386 = vst [vmem:[%s9803_s21 + $0x190] sm:$0xff] %v5290_v50  ;;  %v5184_v46 = vmul.f32 %v9762_v59, %v5070_v37  ;;  %vm4959_vm14 = vweird.f32 %v10018_v23 }
 0x668   : > { %v5294_v45 = vadd.f32 %v9768_v44, %v5180_v16  ;;  %5387 = vst [vmem:[%s9803_s21 + $0x198] sm:$0xff] %v5291_v9  ;;  %v5185_v58 = vmul.f32 %v9764_v60, %v5071_v36  ;;  %v5295_v2 = vadd.f32 %v9771_v53, %v5181_v51  ;;  %v4956_v13 = vsub.f32 1.5, %v4955_v31  ;;  %vm4960_vm0 = vmor %vm4958_vm15, %vm4959_vm14 }
 0x669   : > { %7370 = vrsqrt.f32 %v10071_v43  ;;  %5388 = vst [vmem:[%s9803_s21 + $0x1a0] sm:$0xff] %v5292_v26  ;;  %v5296_v6 = vadd.f32 %v9773_v32, %v5182_v34  ;;  %v4832_v20 = vmul.f32 0.0013020834, %v4798_v29  ;;  %v5297_v28 = vadd.f32 %v9775_v56, %v5183_v15 }
 0x66a   : > { %5389 = vst [vmem:[%s9803_s21 + $0x1a8] sm:$0xff] %v5293_v39  ;;  %v4957_v27 = vmul.f32 %v10018_v23, %v4956_v13  ;;  %v5298_v61 = vadd.f32 %v9778_v40, %v5184_v46  ;;  %v5299_v38 = vadd.f32 %v9780_v42, %v5185_v58  ;;  %vm4968_vm2 = vweird.f32 %v10071_v43 }
 0x66b   : > { %v4805_v25 = vpop.xlane.xlu2 %4804  ;;  %5390 = vst [vmem:[%s9803_s21 + $0x1b0] sm:$0xff] %v5294_v45  ;;  %v10091_v24 = vadd.f32 1e-12, %v4832_v20 }
 0x66c   : > { %v4833_v3 = vmul.f32 0.0013020834, %v4805_v25  ;;  %5391 = vst [vmem:[%s9803_s21 + $0x1b8] sm:$0xff] %v5295_v2  ;;  %v4961_v19 = vsel %vm4960_vm0, %v10018_v23, %v4957_v27 }
 0x66d   : > { %5392 = vst [vmem:[%s9803_s21 + $0x1c0] sm:$0xff] %v5296_v6  ;;  %v5072_v48 = vmul.f32 %v4961_v19, %v10931_v7  ;;  %v5073_v54 = vmul.f32 %v4961_v19, %v10932_v4  ;;  %v5074_v17 = vmul.f32 %v4961_v19, %v10933_v22  ;;  %v5075_v30 = vmul.f32 %v4961_v19, %v9581_v8  ;;  %v10936_v7 = vld [vmem:[#allocation46_spill] sm:$0xff] }
 0x66e   : > { %5393 = vst [vmem:[%s9803_s21 + $0x1c8] sm:$0xff] %v5297_v28  ;;  %v5076_v21 = vmul.f32 %v4961_v19, %v10934_v33  ;;  %v5077_v18 = vmul.f32 %v4961_v19, %v10935_v35  ;;  %7372 = vrsqrt.f32 %v10091_v24  ;;  %v10105_v50 = vadd.f32 1e-12, %v4833_v3  ;;  %v10937_v4 = vld [vmem:[#allocation62_spill] sm:$0xff] }
 0x66f   : > { %v7371_v0 = vpop.eup %7370  ;;  %5394 = vst [vmem:[%s9803_s21 + $0x1d0] sm:$0xff] %v5298_v61  ;;  %v5186_v23 = vmul.f32 %v9754_v41, %v5072_v48  ;;  %v5187_v9 = vmul.f32 %v9756_v10, %v5073_v54  ;;  %v5188_v26 = vmul.f32 %v9758_v52, %v5074_v17  ;;  %v5189_v8 = vmul.f32 %v9760_v62, %v5075_v30 }
 0x670   : > { %5395 = vst [vmem:[%s9803_s21 + $0x1d8] sm:$0xff] %v5299_v38  ;;  %v5190_v39 = vmul.f32 %v9762_v59, %v5076_v21  ;;  %v5191_v57 = vmul.f32 %v9764_v60, %v5077_v18  ;;  %v4963_v47 = vmul.f32 %v7371_v0, %v10071_v43  ;;  %7374 = vrsqrt.f32 %v10105_v50  ;;  %v10938_v43 = vld [vmem:[#allocation22_spill] sm:$0xff] }
 0x671   : > { %v5300_v37 = vadd.f32 %v9768_v44, %v5186_v23  ;;  %v5301_v36 = vadd.f32 %v9771_v53, %v5187_v9  ;;  %v5302_v16 = vadd.f32 %v9773_v32, %v5188_v26  ;;  %v5303_v51 = vadd.f32 %v9775_v56, %v5189_v8 }
 0x672   : > { %v4964_v34 = vmul.f32 %v7371_v0, %v4963_v47  ;;  %v5304_v15 = vadd.f32 %v9778_v40, %v5190_v39  ;;  %v5305_v46 = vadd.f32 %v9780_v42, %v5191_v57  ;;  %vm4969_vm1 = vweird.f32 %v7371_v0 }
 0x673   : > { %v4812_v11 = vpop.xlane.xlu0 %4811  ;;  %5396 = vst [vmem:[%s9803_s21 + $0x1e0] sm:$0xff] %v5300_v37  ;;  %vm4970_vm3 = vmor %vm4968_vm2, %vm4969_vm1  ;;  %vm4978_vm4 = vweird.f32 %v10091_v24  ;;  %vm4988_vm6 = vweird.f32 %v10105_v50 }
 0x674   : > { %v4834_v31 = vmul.f32 0.0013020834, %v4812_v11  ;;  %v7373_v29 = vpop.eup %7372  ;;  %5397 = vst [vmem:[%s9803_s21 + $0x1e8] sm:$0xff] %v5301_v36  ;;  %v4965_v45 = vmul.f32 0.5, %v4964_v34 }
 0x675   : > { %5398 = vst [vmem:[%s9803_s21 + $0x1f0] sm:$0xff] %v5302_v16  ;;  %v4973_v25 = vmul.f32 %v7373_v29, %v10091_v24  ;;  %vm4979_vm5 = vweird.f32 %v7373_v29 }
 0x676   : > { %v10127_v58 = vadd.f32 1e-12, %v4834_v31  ;;  %5399 = vst [vmem:[%s9803_s21 + $0x1f8] sm:$0xff] %v5303_v51  ;;  %v4966_v2 = vsub.f32 1.5, %v4965_v45  ;;  %v7375_v28 = vpop.eup %7374  ;;  %vm4980_vm8 = vmor %vm4978_vm4, %vm4979_vm5 }
 0x677   : > { %5400 = vst [vmem:[%s9803_s21 + $0x200] sm:$0xff] %v5304_v15  ;;  %v4974_v6 = vmul.f32 %v7373_v29, %v4973_v25  ;;  %v4983_v61 = vmul.f32 %v7375_v28, %v10105_v50  ;;  %vm4989_vm7 = vweird.f32 %v7375_v28  ;;  %v10939_v15 = vld [vmem:[#allocation76_spill] sm:$0xff] }
 0x678   : > { %5401 = vst [vmem:[%s9803_s21 + $0x208] sm:$0xff] %v5305_v46  ;;  %v4967_v27 = vmul.f32 %v7371_v0, %v4966_v2  ;;  %7376 = vrsqrt.f32 %v10127_v58  ;;  %v10940_v46 = vld [vmem:[#allocation23_spill] sm:$0xff]  ;;  %v10941_v2 = vld [vmem:[#allocation77_spill] sm:$0xff]  ;;  %vm4990_vm9 = vmor %vm4988_vm6, %vm4989_vm7  ;;  %vm4998_vm11 = vweird.f32 %v10127_v58 }
 0x679   : > { %v4975_v3 = vmul.f32 0.5, %v4974_v6 }
 0x67a   : > { %v4971_v38 = vsel %vm4970_vm3, %v7371_v0, %v4967_v27  ;;  %v4984_v0 = vmul.f32 %v7375_v28, %v4983_v61 }
 0x67b   : > { %v4819_v13 = vpop.xlane.xlu1 %4818  ;;  %v5078_v48 = vmul.f32 %v4971_v38, %v10936_v7  ;;  %v5079_v54 = vmul.f32 %v4971_v38, %v10937_v4  ;;  %v5080_v22 = vmul.f32 %v4971_v38, %v10938_v43  ;;  %v5081_v17 = vmul.f32 %v4971_v38, %v9611_v55 }
 0x67c   : > { %v4835_v20 = vmul.f32 0.0013020834, %v4819_v13  ;;  %v5082_v30 = vmul.f32 %v4971_v38, %v9618_v5  ;;  %v5083_v33 = vmul.f32 %v4971_v38, %v9623_v12  ;;  %v4976_v21 = vsub.f32 1.5, %v4975_v3 }
 0x67d   : > { %v5192_v35 = vmul.f32 %v9754_v41, %v5078_v48  ;;  %v5193_v18 = vmul.f32 %v9756_v10, %v5079_v54  ;;  %v5194_v23 = vmul.f32 %v9758_v52, %v5080_v22  ;;  %v5195_v9 = vmul.f32 %v9760_v62, %v5081_v17  ;;  %v10942_v22 = vld [vmem:[#allocation47_spill] sm:$0xff] }
 0x67e   : > { %v10137_v19 = vadd.f32 1e-12, %v4835_v20  ;;  %v5196_v26 = vmul.f32 %v9762_v59, %v5082_v30  ;;  %v5197_v8 = vmul.f32 %v9764_v60, %v5083_v33  ;;  %v4977_v55 = vmul.f32 %v7373_v29, %v4976_v21  ;;  %v10151_v5 = vpop.eup %7376  ;;  %v10943_v17 = vld [vmem:[#allocation63_spill] sm:$0xff]  ;;  %v10944_v33 = vld [vmem:[#allocation48_spill] sm:$0xff] }
 0x67f   : > { %v4985_v39 = vmul.f32 0.5, %v4984_v0  ;;  %v5306_v12 = vadd.f32 %v9768_v44, %v5192_v35  ;;  %v5307_v57 = vadd.f32 %v9771_v53, %v5193_v18  ;;  %v5308_v47 = vadd.f32 %v9773_v32, %v5194_v23  ;;  %v10945_v35 = vld [vmem:[#allocation64_spill] sm:$0xff] }
 0x680   : > { %v5309_v11 = vadd.f32 %v9775_v56, %v5195_v9  ;;  %v5310_v37 = vadd.f32 %v9778_v40, %v5196_v26  ;;  %v5311_v36 = vadd.f32 %v9780_v42, %v5197_v8  ;;  %v4981_v16 = vsel %vm4980_vm8, %v7373_v29, %v4977_v55  ;;  %v10946_v23 = vld [vmem:[#allocation24_spill] sm:$0xff] }
 0x681   : > { %v4986_v51 = vsub.f32 1.5, %v4985_v39  ;;  %5402 = vst [vmem:[%s9803_s21 + $0x210] sm:$0xff] %v5306_v12  ;;  %v5084_v34 = vmul.f32 %v4981_v16, %v9630_v14  ;;  %v5085_v31 = vmul.f32 %v4981_v16, %v10939_v15  ;;  %v5086_v45 = vmul.f32 %v4981_v16, %v10940_v46  ;;  %v10947_v46 = vld [vmem:[#allocation78_spill] sm:$0xff] }
 0x682   : > { %v5087_v25 = vmul.f32 %v4981_v16, %v9641_v1  ;;  %5403 = vst [vmem:[%s9803_s21 + $0x218] sm:$0xff] %v5307_v57  ;;  %v5088_v24 = vmul.f32 %v4981_v16, %v9648_v49  ;;  %v5089_v13 = vmul.f32 %v4981_v16, %v10941_v2  ;;  %v4993_v29 = vmul.f32 %v10151_v5, %v10127_v58  ;;  %v10949_v2 = vld [vmem:[#allocation49_spill] sm:$0xff] }
 0x683   : > { %v4987_v6 = vmul.f32 %v7375_v28, %v4986_v51  ;;  %5404 = vst [vmem:[%s9803_s21 + $0x220] sm:$0xff] %v5308_v47  ;;  %v5198_v14 = vmul.f32 %v9754_v41, %v5084_v34  ;;  %v5199_v20 = vmul.f32 %v9756_v10, %v5085_v31  ;;  %v5200_v27 = vmul.f32 %v9758_v52, %v5086_v45 }
 0x684   : > { %v5201_v1 = vmul.f32 %v9760_v62, %v5087_v25  ;;  %5405 = vst [vmem:[%s9803_s21 + $0x228] sm:$0xff] %v5309_v11  ;;  %v5202_v49 = vmul.f32 %v9762_v59, %v5088_v24  ;;  %v5203_v3 = vmul.f32 %v9764_v60, %v5089_v13  ;;  %v4994_v38 = vmul.f32 %v10151_v5, %v4993_v29  ;;  %v10948_v25 = vld [vmem:[#allocation79_spill] sm:$0xff]  ;;  %v10950_v13 = vld [vmem:[#allocation25_spill] sm:$0xff] }
 0x685   : > { %v4991_v61 = vsel %vm4990_vm9, %v7375_v28, %v4987_v6  ;;  %5406 = vst [vmem:[%s9803_s21 + $0x230] sm:$0xff] %v5310_v37  ;;  %v5312_v7 = vadd.f32 %v9768_v44, %v5198_v14  ;;  %v5313_v48 = vadd.f32 %v9771_v53, %v5199_v20  ;;  %v5314_v4 = vadd.f32 %v9773_v32, %v5200_v27  ;;  %v10951_v14 = vld [vmem:[#allocation65_spill] sm:$0xff]  ;;  %v10952_v27 = vld [vmem:[#allocation26_spill] sm:$0xff] }
 0x686   : > { %v5315_v50 = vadd.f32 %v9775_v56, %v5201_v1  ;;  %5407 = vst [vmem:[%s9803_s21 + $0x238] sm:$0xff] %v5311_v36  ;;  %v5316_v54 = vadd.f32 %v9778_v40, %v5202_v49  ;;  %v5317_v43 = vadd.f32 %v9780_v42, %v5203_v3  ;;  %v5090_v28 = vmul.f32 %v4991_v61, %v10942_v22 }
 0x687   : > { %v5091_v30 = vmul.f32 %v4991_v61, %v10943_v17  ;;  %5408 = vst [vmem:[%s9803_s21 + $0x240] sm:$0xff] %v5312_v7  ;;  %v5092_v21 = vmul.f32 %v4991_v61, %v10944_v33  ;;  %v5093_v0 = vmul.f32 %v4991_v61, %v9671_v63  ;;  %v5094_v18 = vmul.f32 %v4991_v61, %v10945_v35  ;;  %v10953_v35 = vld [vmem:[#allocation80_spill] sm:$0xff] }
 0x688   : > { %v5095_v9 = vmul.f32 %v4991_v61, %v10946_v23  ;;  %5409 = vst [vmem:[%s9803_s21 + $0x248] sm:$0xff] %v5313_v48  ;;  %v5204_v26 = vmul.f32 %v9754_v41, %v5090_v28  ;;  %v4995_v55 = vmul.f32 0.5, %v4994_v38  ;;  %vm4999_vm10 = vweird.f32 %v10151_v5  ;;  %v10954_v23 = vld [vmem:[#allocation50_spill] sm:$0xff] }
 0x689   : > { %v5205_v8 = vmul.f32 %v9756_v10, %v5091_v30  ;;  %5410 = vst [vmem:[%s9803_s21 + $0x250] sm:$0xff] %v5314_v4  ;;  %v5206_v39 = vmul.f32 %v9758_v52, %v5092_v21  ;;  %v5207_v63 = vmul.f32 %v9760_v62, %v5093_v0  ;;  %v5208_v12 = vmul.f32 %v9762_v59, %v5094_v18  ;;  %vm5000_vm12 = vmor %vm4998_vm11, %vm4999_vm10 }
 0x68a   : > { %v5209_v57 = vmul.f32 %v9764_v60, %v5095_v9  ;;  %5411 = vst [vmem:[%s9803_s21 + $0x258] sm:$0xff] %v5315_v50  ;;  %v5318_v47 = vadd.f32 %v9768_v44, %v5204_v26  ;;  %v4996_v37 = vsub.f32 1.5, %v4995_v55  ;;  %7378 = vrsqrt.f32 %v10137_v19  ;;  %v10955_v26 = vld [vmem:[#allocation81_spill] sm:$0xff]  ;;  %v10956_v55 = vld [vmem:[#allocation51_spill] sm:$0xff] }
 0x68b   : > { %v5319_v11 = vadd.f32 %v9771_v53, %v5205_v8  ;;  %5412 = vst [vmem:[%s9803_s21 + $0x260] sm:$0xff] %v5316_v54  ;;  %v5320_v36 = vadd.f32 %v9773_v32, %v5206_v39  ;;  %v5321_v16 = vadd.f32 %v9775_v56, %v5207_v63  ;;  %v5322_v34 = vadd.f32 %v9778_v40, %v5208_v12  ;;  %v10957_v63 = vld [vmem:[#allocation66_spill] sm:$0xff] }
 0x68c   : > { %5413 = vst [vmem:[%s9803_s21 + $0x268] sm:$0xff] %v5317_v43  ;;  %v4997_v51 = vmul.f32 %v10151_v5, %v4996_v37  ;;  %v5323_v15 = vadd.f32 %v9780_v42, %v5209_v57  ;;  %vm5008_vm14 = vweird.f32 %v10137_v19  ;;  %v10958_v57 = vld [vmem:[#allocation27_spill] sm:$0xff] }
 0x68d   : > { %5414 = vst [vmem:[%s9803_s21 + $0x270] sm:$0xff] %v5318_v47 }
 0x68e   : > { %5415 = vst [vmem:[%s9803_s21 + $0x278] sm:$0xff] %v5319_v11  ;;  %v5001_v31 = vsel %vm5000_vm12, %v10151_v5, %v4997_v51 }
 0x68f   : > { %5416 = vst [vmem:[%s9803_s21 + $0x280] sm:$0xff] %v5320_v36  ;;  %v5096_v45 = vmul.f32 %v5001_v31, %v10947_v46  ;;  %v5097_v24 = vmul.f32 %v5001_v31, %v10948_v25  ;;  %v5098_v58 = vmul.f32 %v5001_v31, %v10949_v2  ;;  %v5099_v6 = vmul.f32 %v5001_v31, %v10950_v13 }
 0x690   : > { %v7379_v29 = vpop.eup %7378  ;;  %5417 = vst [vmem:[%s9803_s21 + $0x288] sm:$0xff] %v5321_v16  ;;  %v5100_v20 = vmul.f32 %v5001_v31, %v10951_v14  ;;  %v5101_v1 = vmul.f32 %v5001_v31, %v10952_v27 }
 0x691   : > { %5418 = vst [vmem:[%s9803_s21 + $0x290] sm:$0xff] %v5322_v34  ;;  %v5210_v49 = vmul.f32 %v9754_v41, %v5096_v45  ;;  %v5211_v5 = vmul.f32 %v9756_v10, %v5097_v24  ;;  %v5212_v3 = vmul.f32 %v9758_v52, %v5098_v58  ;;  %v5213_v61 = vmul.f32 %v9760_v62, %v5099_v6 }
 0x692   : > { %5419 = vst [vmem:[%s9803_s21 + $0x298] sm:$0xff] %v5323_v15  ;;  %v5214_v38 = vmul.f32 %v9762_v59, %v5100_v20  ;;  %v5215_v7 = vmul.f32 %v9764_v60, %v5101_v1  ;;  %v5003_v48 = vmul.f32 %v7379_v29, %v10137_v19  ;;  %vm5009_vm13 = vweird.f32 %v7379_v29 }
 0x693   : > { %v5324_v4 = vadd.f32 %v9768_v44, %v5210_v49  ;;  %v5325_v50 = vadd.f32 %v9771_v53, %v5211_v5  ;;  %v5326_v54 = vadd.f32 %v9773_v32, %v5212_v3  ;;  %v5327_v43 = vadd.f32 %v9775_v56, %v5213_v61  ;;  %vm5010_vm15 = vmor %vm5008_vm14, %vm5009_vm13 }
 0x694   : > { %v5004_v22 = vmul.f32 %v7379_v29, %v5003_v48  ;;  %v5328_v28 = vadd.f32 %v9778_v40, %v5214_v38  ;;  %v5329_v17 = vadd.f32 %v9780_v42, %v5215_v7 }
 0x695   : > { %5420 = vst [vmem:[%s9803_s21 + $0x2a0] sm:$0xff] %v5324_v4 }
 0x696   : > { %5421 = vst [vmem:[%s9803_s21 + $0x2a8] sm:$0xff] %v5325_v50  ;;  %v5005_v30 = vmul.f32 0.5, %v5004_v22 }
 0x697   : > { %5422 = vst [vmem:[%s9803_s21 + $0x2b0] sm:$0xff] %v5326_v54 }
 0x698   : > { %5423 = vst [vmem:[%s9803_s21 + $0x2b8] sm:$0xff] %v5327_v43  ;;  %v5006_v33 = vsub.f32 1.5, %v5005_v30 }
 0x699   : > { %5424 = vst [vmem:[%s9803_s21 + $0x2c0] sm:$0xff] %v5328_v28 }
 0x69a   : > { %5425 = vst [vmem:[%s9803_s21 + $0x2c8] sm:$0xff] %v5329_v17  ;;  %v5007_v21 = vmul.f32 %v7379_v29, %v5006_v33 }
 0x69c   : > { %v5011_v0 = vsel %vm5010_vm15, %v7379_v29, %v5007_v21 }
 0x69d   : > { %v5102_v18 = vmul.f32 %v5011_v0, %v10953_v35  ;;  %v5103_v9 = vmul.f32 %v5011_v0, %v10954_v23  ;;  %v5104_v8 = vmul.f32 %v5011_v0, %v10955_v26  ;;  %v5105_v39 = vmul.f32 %v5011_v0, %v10956_v55 }
 0x69e   : > { %v5106_v12 = vmul.f32 %v5011_v0, %v10957_v63  ;;  %v5107_v47 = vmul.f32 %v5011_v0, %v10958_v57 }
 0x69f   : > { %v5216_v11 = vmul.f32 %v9754_v41, %v5102_v18  ;;  %v5217_v19 = vmul.f32 %v9756_v10, %v5103_v9  ;;  %v5218_v37 = vmul.f32 %v9758_v52, %v5104_v8  ;;  %v5219_v36 = vmul.f32 %v9760_v62, %v5105_v39 }
 0x6a0   : > { %v5220_v16 = vmul.f32 %v9762_v59, %v5106_v12  ;;  %v5221_v51 = vmul.f32 %v9764_v60, %v5107_v47 }
 0x6a1   : > { %v5330_v41 = vadd.f32 %v9768_v44, %v5216_v11  ;;  %v5331_v10 = vadd.f32 %v9771_v53, %v5217_v19  ;;  %v5332_v52 = vadd.f32 %v9773_v32, %v5218_v37  ;;  %v5333_v62 = vadd.f32 %v9775_v56, %v5219_v36 }
 0x6a2   : > { %v5334_v34 = vadd.f32 %v9778_v40, %v5220_v16  ;;  %v5335_v59 = vadd.f32 %v9780_v42, %v5221_v51 }
 0x6a3   : > { %5426 = vst [vmem:[%s9803_s21 + $0x2d0] sm:$0xff] %v5330_v41 }
 0x6a4   : > { %5427 = vst [vmem:[%s9803_s21 + $0x2d8] sm:$0xff] %v5331_v10 }
 0x6a5   : > { %5428 = vst [vmem:[%s9803_s21 + $0x2e0] sm:$0xff] %v5332_v52 }
 0x6a6   : > { %5429 = vst [vmem:[%s9803_s21 + $0x2e8] sm:$0xff] %v5333_v62 }
 0x6a7   : > { %5430 = vst [vmem:[%s9803_s21 + $0x2f0] sm:$0xff] %v5334_v34 }
 0x6a8   : > { %5431 = vst [vmem:[%s9803_s21 + $0x2f8] sm:$0xff] %v5335_v59 }
 0x6a9   : > { %7530 = shalt.err (!%p7527_p10)
}
 0x6aa   : > { %s7589_s7 = smov 768   ;;  %s7590_s3 = smov 48  }
 0x6ab   : > { %7282 = dma.vmem_to_hbm [thread:$0]  (%p7684_p0), %s5447_s23, 12288, %s5449_s28, %s5433_s20, %s7589_s7, %s7589_s7, %s7590_s3  }
 0x6ac PF: > { %p7307_p11 = scmp.ge.s32.totalorder %s7581_s18, 2  ;;  %s5463_s14 = sand.u32 1, %s7569_s15  }
 0x6ad   : > { %s5464_s0 = scalar_lea.sflag [#allocation4], %s5463_s14 }
 0x6ae   : > { %p7299_p12 = pnand %p7307_p11, %p7651_p6 }
 0x6b0   : > { %p7300_p13 = pneg %p7299_p12 }
 0x6b2   : > { %7564 = dma.done.wait (%p7300_p13), %s5464_s0, 12288  }
 0x6b3   : > { %7566 = vsyncadd (%p7300_p13), %s5464_s0, 4294955008  ;;  %s10959_s26 = sld [smem:[#allocation16_spill]]  ;;  %p21_p3 = scmp.ge.s32.totalorder %s7674_s10, 5  }
 0x6b4   : > { %s10960_s15 = smov %s7573_s16  ;;  %s10961_s16 = smov %s7577_s17 }
 0x6b5   : > { %s10963_s18 = smov %s7674_s10  ;;  %23 = sbr.rel (!%p21_p3) target bundleno = 12 (0xc), region = 102 }
 0x6b9   : > { %s10962_s17 = smov %s10959_s26 }
 0x6ba   :  { %5470 = vsyncpa [#allocation3], 1 }
 0x6bb   :  { %5472 = vsyncpa [#allocation3 + $0x1], 1 }
 0x6bc   :  { %5473 = vsyncpa [#allocation6], 1 }
 0x6bd   :  { %5475 = vsyncpa [#allocation6 + $0x1], 1 }
 0x6be   :  { %5476 = vsyncpa [#allocation9], 1 }
 0x6bf   :  { %5477 = vsyncpa [#allocation4], 1 }
 0x6c0   :  { %5479 = vsyncpa [#allocation4 + $0x1], 1 }

</bundles_post_ra>
